<compile_context>
chip_gen: v7x
topology: tpu7x:2x2x1
jax: 0.10.0
libtpu: 0.0.40
codegen_flags: <defaults>
</compile_context>

<pallas_src>
import math

import numpy as np

import jax
import jax.numpy as jnp
from jax.experimental import pallas as pl
from jax.experimental.pallas import tpu as pltpu

_EPS = 1e-5  # nn.GroupNorm default eps


# --------------------------------------------------------------------------
# pltpu.roll calibration: verify the rotate convention once with a tiny probe
# so the in-kernel im2col shifts are robust; if the rotate primitive is not
# usable for any reason, fall back to wrapper-side patch building everywhere.
# --------------------------------------------------------------------------
_ROLL_OK = None      # True once the rotate primitive has been validated
_ROLL_NUMPY = True   # True -> pltpu.roll follows np.roll: out[i] = x[i - shift]


def _calibrate_roll_direction():
    global _ROLL_OK, _ROLL_NUMPY
    if _ROLL_OK is not None:
        return
    try:
        def probe(x_ref, o_ref):
            o_ref[...] = pltpu.roll(x_ref[...], shift=1, axis=1)

        x = jnp.broadcast_to(jnp.arange(128, dtype=jnp.float32), (8, 128))
        y = pl.pallas_call(
            probe, out_shape=jax.ShapeDtypeStruct((8, 128), jnp.float32))(x)
        y = np.asarray(jax.device_get(y))
        if y[0, 1] == 0.0:        # np.roll convention: [127, 0, 1, ...]
            _ROLL_OK, _ROLL_NUMPY = True, True
        elif y[0, 0] == 1.0:      # opposite convention: [1, 2, ..., 0]
            _ROLL_OK, _ROLL_NUMPY = True, False
        else:                     # unexpected -> don't trust it
            _ROLL_OK = False
    except Exception:
        _ROLL_OK = False


# --------------------------------------------------------------------------
# Pallas kernel: conv3x3(same) -> GroupNorm(1, Cout) -> ReLU [-> fused heads]
# --------------------------------------------------------------------------
def _make_conv_kernel(num_inputs, H, W, in_kernel_im2col, with_head, roll_numpy):
    """Builds the per-sample kernel.  Activation layout is channels-major
    (C, H*W): the lane axis is the flattened spatial axis."""
    HW = H * W

    def kernel(*refs):
        xs = [refs[i][...] for i in range(num_inputs)]
        pos = num_inputs
        w_ref, b_ref, g_ref, bt_ref = refs[pos:pos + 4]
        pos += 4
        if with_head:
            hw_ref, hb_ref = refs[pos:pos + 2]
            pos += 2
        o_ref = refs[pos]

        if in_kernel_im2col:
            # Build the (9*Cin, HW) im2col matrix in VMEM: every 3x3 tap is a
            # lane rotation of the flattened spatial axis plus a boundary mask
            # (no 9x HBM patch blow-up).
            lane = jax.lax.broadcasted_iota(jnp.int32, (1, HW), 1)
            row_i = lane // W            # spatial row of each lane
            col_j = lane - row_i * W     # spatial column of each lane
            pieces = []
            for kh in range(3):
                for kw in range(3):
                    # want: shifted[r] = x[r + offs]
                    offs = (kh - 1) * W + (kw - 1)
                    shift = ((-offs) if roll_numpy else offs) % HW
                    mask = None
                    if kh == 0:
                        mask = row_i >= 1
                    elif kh == 2:
                        mask = row_i <= H - 2
                    if kw == 0:
                        m = col_j >= 1
                        mask = m if mask is None else jnp.logical_and(mask, m)
                    elif kw == 2:
                        m = col_j <= W - 2
                        mask = m if mask is None else jnp.logical_and(mask, m)
                    for xv in xs:   # channel order: [x1 channels, x2 channels]
                        xsft = xv if shift == 0 else pltpu.roll(
                            xv, shift=shift, axis=1)
                        if mask is not None:
                            xsft = jnp.where(mask, xsft, 0.0)
                        pieces.append(xsft)
            xcat = jnp.concatenate(pieces, axis=0)
        else:
            # Wrapper already provided the (9*Cin, HW) patch matrix.
            xcat = xs[0] if len(xs) == 1 else jnp.concatenate(xs, axis=0)

        # Conv as a single MXU matmul: (Cout, 9*Cin) @ (9*Cin, HW).
        y = jnp.dot(w_ref[...], xcat, preferred_element_type=jnp.float32)
        y = y + b_ref[...]

        # GroupNorm(num_groups=1): per-sample stats over all of (C, H, W),
        # single pass (sum / sum-of-squares), biased variance (PyTorch).
        inv_n = 1.0 / float(y.shape[0] * y.shape[1])
        s = jnp.sum(y)
        ss = jnp.sum(y * y)
        mu = s * inv_n
        var = jnp.maximum(ss * inv_n - mu * mu, 0.0)
        y = (y - mu) * jax.lax.rsqrt(var + _EPS)
        y = jnp.maximum(y * g_ref[...] + bt_ref[...], 0.0)   # affine + ReLU

        if with_head:
            # Fused mean/logvar 1x1 heads: one (2*Din, Cout) @ (Cout, HW) matmul,
            # lane-dense (HW = 256) output.
            y = jnp.dot(hw_ref[...], y, preferred_element_type=jnp.float32)
            y = y + hb_ref[...]
        o_ref[...] = y

    return kernel


# --------------------------------------------------------------------------
# Wrappers / glue
# --------------------------------------------------------------------------
def _im2col_nchw(x):
    """(N, C, H, W) -> (N, 9*C, H*W), tap-major (kh, kw) then channel.
    Only used for the tiny deep layers (HW <= 64)."""
    N, C, H, W = x.shape
    xp = jnp.pad(x, ((0, 0), (0, 0), (1, 1), (1, 1)))
    taps = [xp[:, :, kh:kh + H, kw:kw + W] for kh in range(3) for kw in range(3)]
    return jnp.concatenate(taps, axis=1).reshape(N, 9 * C, H * W)


def conv_block(inputs, p, head=None):
    """3x3 'same' conv -> GroupNorm(1) -> ReLU [-> fused 1x1 mean/logvar heads].

    inputs : list of NCHW activations, concatenated along channels in order
             (matches torch.cat([...], dim=1)).
    p      : dict(w=(Cout, 9*Cin), b/gamma/beta=(Cout, 1)) kernel-ready params.
    head   : optional dict(w=(2*Din, Cout), b=(2*Din, 1)).
    """
    N, _, H, W = inputs[0].shape
    HW = H * W
    out_rows = p["w"].shape[0] if head is None else head["w"].shape[0]

    # In-kernel im2col uses lane rotations of the flattened spatial axis;
    # use it when HW is native-lane tiled (multiple of 128).
    use_in_kernel = (HW % 128 == 0) and (_ROLL_OK is True)
    if use_in_kernel:
        kins = [t.reshape(N, t.shape[1], HW) for t in inputs]
    else:
        cat = inputs[0] if len(inputs) == 1 else jnp.concatenate(inputs, axis=1)
        kins = [_im2col_nchw(cat)]

    kernel = _make_conv_kernel(
        num_inputs=len(kins), H=H, W=W, in_kernel_im2col=use_in_kernel,
        with_head=head is not None, roll_numpy=_ROLL_NUMPY)

    in_specs = [pl.BlockSpec((pl.Squeezed(), t.shape[1], HW), lambda n: (n, 0, 0))
                for t in kins]
    args = list(kins)
    const_arrays = [p["w"], p["b"], p["gamma"], p["beta"]]
    if head is not None:
        const_arrays += [head["w"], head["b"]]
    for arr in const_arrays:
        in_specs.append(pl.BlockSpec(arr.shape, lambda n: (0, 0)))
        args.append(arr)

    out = pl.pallas_call(
        kernel,
        grid=(N,),
        out_shape=jax.ShapeDtypeStruct((N, out_rows, HW), jnp.float32),
        in_specs=in_specs,
        out_specs=pl.BlockSpec((pl.Squeezed(), out_rows, HW), lambda n: (n, 0, 0)),
        compiler_params=pltpu.CompilerParams(dimension_semantics=("parallel",)),
    )(*args)
    return out.reshape(N, out_rows, H, W)


def maxpool2(x):
    """nn.MaxPool2d(2) in NCHW (XLA glue: reshape + max, fuses cleanly)."""
    N, C, H, W = x.shape
    return x.reshape(N, C, H // 2, 2, W // 2, 2).max(axis=(3, 5))


def _interp_matrix_ac(in_size, out_size):
    """Dense 1-D interpolation matrix for bilinear, align_corners=True."""
    A = np.zeros((out_size, in_size), np.float32)
    if in_size == 1:
        A[:, 0] = 1.0
        return jnp.asarray(A)
    scale = (in_size - 1) / (out_size - 1) if out_size > 1 else 0.0
    for o in range(out_size):
        src = o * scale
        i0 = min(int(np.floor(src)), in_size - 1)
        i1 = min(i0 + 1, in_size - 1)
        f = src - i0
        A[o, i0] += 1.0 - f
        A[o, i1] += f
    return jnp.asarray(A)


def upsample_bilinear_ac(x, out_h, out_w):
    """nn.Upsample(mode='bilinear', align_corners=True) as two small matmuls
    (no gathers, XLA-fusable)."""
    _, _, H, W = x.shape
    Ah = _interp_matrix_ac(H, out_h)
    Aw = _interp_matrix_ac(W, out_w)
    y = jnp.einsum("oh,nchw->ncow", Ah, x, precision=jax.lax.Precision.HIGHEST)
    y = jnp.einsum("pw,ncow->ncop", Aw, y, precision=jax.lax.Precision.HIGHEST)
    return y


# --------------------------------------------------------------------------
# Parameters (PyTorch layout: conv weights OIHW) + conversion to kernel layout
# --------------------------------------------------------------------------
def init_params(key, input_dim, hidden_dim):
    Hd = hidden_dim
    specs = [
        ("enc1", input_dim, Hd), ("enc2", Hd, Hd), ("enc3", Hd, Hd),
        ("enc4", Hd, 2 * Hd), ("bottleneck", 2 * Hd, 2 * Hd),
        ("dec4", 4 * Hd, Hd), ("dec3", 2 * Hd, Hd), ("dec2", 2 * Hd, Hd),
        ("dec1", 2 * Hd, Hd),
    ]
    keys = iter(jax.random.split(key, 4 * len(specs) + 4))
    params = {}
    for name, ci, co in specs:
        params[name] = dict(
            w=jax.random.normal(next(keys), (co, ci, 3, 3), jnp.float32)
            / math.sqrt(9 * ci),
            b=0.1 * jax.random.normal(next(keys), (co,), jnp.float32),
            gamma=1.0 + 0.1 * jax.random.normal(next(keys), (co,), jnp.float32),
            beta=0.1 * jax.random.normal(next(keys), (co,), jnp.float32),
        )
    params["mean_head"] = dict(
        w=jax.random.normal(next(keys), (input_dim, Hd, 1, 1), jnp.float32)
        / math.sqrt(Hd),
        b=0.1 * jax.random.normal(next(keys), (input_dim,), jnp.float32),
    )
    params["logvar_head"] = dict(
        w=jax.random.normal(next(keys), (input_dim, Hd, 1, 1), jnp.float32)
        / math.sqrt(Hd),
        b=0.1 * jax.random.normal(next(keys), (input_dim,), jnp.float32),
    )
    return params


def prepare_params(params):
    """PyTorch-layout (OIHW) params -> kernel-ready layout:
       conv w -> (Cout, 9*Cin) ordered (kh, kw, cin); vectors -> (C, 1);
       the two 1x1 heads are fused into one (2*Din, Cout) matrix."""
    kp = {}
    for name in ("enc1", "enc2", "enc3", "enc4", "bottleneck",
                 "dec4", "dec3", "dec2", "dec1"):
        p = params[name]
        co, ci, kh, kw = p["w"].shape
        kp[name] = dict(
            w=jnp.transpose(p["w"], (0, 2, 3, 1)).reshape(co, kh * kw * ci),
            b=p["b"].reshape(co, 1),
            gamma=p["gamma"].reshape(co, 1),
            beta=p["beta"].reshape(co, 1),
        )
    wm = params["mean_head"]["w"][:, :, 0, 0]
    wl = params["logvar_head"]["w"][:, :, 0, 0]
    kp["heads"] = dict(
        w=jnp.concatenate([wm, wl], axis=0),
        b=jnp.concatenate(
            [params["mean_head"]["b"], params["logvar_head"]["b"]],
            axis=0).reshape(-1, 1),
    )
    return kp


# --------------------------------------------------------------------------
# Forward pass (mirrors PosteriorUNet.forward for max_depth == 4)
# --------------------------------------------------------------------------
def posterior_unet_forward(kparams, x):
    """x: (N, input_dim, H, W) NCHW float32 -> (mean, logvar), both NCHW."""
    enc = []
    h = conv_block([x], kparams["enc1"]); enc.append(h); h = maxpool2(h)
    h = conv_block([h], kparams["enc2"]); enc.append(h); h = maxpool2(h)
    h = conv_block([h], kparams["enc3"]); enc.append(h); h = maxpool2(h)
    h = conv_block([h], kparams["enc4"]); enc.append(h); h = maxpool2(h)
    h = conv_block([h], kparams["bottleneck"])

    for name in ("dec4", "dec3", "dec2"):
        skip = enc.pop()
        up = upsample_bilinear_ac(h, 2 * h.shape[2], 2 * h.shape[3])
        if up.shape[2:] != skip.shape[2:]:      # F.interpolate fallback
            up = upsample_bilinear_ac(up, skip.shape[2], skip.shape[3])
        h = conv_block([up, skip], kparams[name])   # cat([x, skip], dim=1) order

    skip = enc.pop()
    up = upsample_bilinear_ac(h, 2 * h.shape[2], 2 * h.shape[3])
    if up.shape[2:] != skip.shape[2:]:
        up = upsample_bilinear_ac(up, skip.shape[2], skip.shape[3])
    out = conv_block([up, skip], kparams["dec1"], head=kparams["heads"])

    d = out.shape[1] // 2
    return out[:, :d], out[:, d:]


# --------------------------------------------------------------------------
# Pure-XLA reference (independent implementation for cross-checking)
# --------------------------------------------------------------------------
def _conv_gn_relu_ref(x, p):
    y = jax.lax.conv_general_dilated(
        x, p["w"], window_strides=(1, 1), padding="SAME",
        dimension_numbers=("NCHW", "OIHW", "NCHW"),
        precision=jax.lax.Precision.HIGHEST)
    y = y + p["b"][None, :, None, None]
    mu = jnp.mean(y, axis=(1, 2, 3), keepdims=True)
    var = jnp.mean((y - mu) ** 2, axis=(1, 2, 3), keepdims=True)
    y = (y - mu) * jax.lax.rsqrt(var + _EPS)
    y = y * p["gamma"][None, :, None, None] + p["beta"][None, :, None, None]
    return jnp.maximum(y, 0.0)


def _upsample_ref(x, oh, ow):
    N, C, H, W = x.shape
    if H == 1 or oh == 1:
        sh = jnp.zeros((oh,), jnp.float32)
    else:
        sh = jnp.arange(oh, dtype=jnp.float32) * ((H - 1) / (oh - 1))
    if W == 1 or ow == 1:
        sw = jnp.zeros((ow,), jnp.float32)
    else:
        sw = jnp.arange(ow, dtype=jnp.float32) * ((W - 1) / (ow - 1))
    h0 = jnp.floor(sh).astype(jnp.int32)
    h1 = jnp.minimum(h0 + 1, H - 1)
    fh = (sh - h0.astype(jnp.float32))[None, None, :, None]
    w0 = jnp.floor(sw).astype(jnp.int32)
    w1 = jnp.minimum(w0 + 1, W - 1)
    fw = (sw - w0.astype(jnp.float32))[None, None, None, :]
    rows = x[:, :, h0, :] * (1.0 - fh) + x[:, :, h1, :] * fh
    return rows[:, :, :, w0] * (1.0 - fw) + rows[:, :, :, w1] * fw


def reference_forward(params, x):
    enc = []
    h = _conv_gn_relu_ref(x, params["enc1"]); enc.append(h); h = maxpool2(h)
    h = _conv_gn_relu_ref(h, params["enc2"]); enc.append(h); h = maxpool2(h)
    h = _conv_gn_relu_ref(h, params["enc3"]); enc.append(h); h = maxpool2(h)
    h = _conv_gn_relu_ref(h, params["enc4"]); enc.append(h); h = maxpool2(h)
    h = _conv_gn_relu_ref(h, params["bottleneck"])
    for name in ("dec4", "dec3", "dec2", "dec1"):
        skip = enc.pop()
        up = _upsample_ref(h, skip.shape[2], skip.shape[3])
        h = _conv_gn_relu_ref(jnp.concatenate([up, skip], axis=1), params[name])
    wm = params["mean_head"]["w"][:, :, 0, 0]
    wl = params["logvar_head"]["w"][:, :, 0, 0]
    mean = jnp.einsum("oc,nchw->nohw", wm, h,
                      precision=jax.lax.Precision.HIGHEST) \
        + params["mean_head"]["b"][None, :, None, None]
    logvar = jnp.einsum("oc,nchw->nohw", wl, h,
                        precision=jax.lax.Precision.HIGHEST) \
        + params["logvar_head"]["b"][None, :, None, None]
    return mean, logvar


# --------------------------------------------------------------------------
if __name__ == "__main__":
    input_dim, hidden_dim, image_size, batch = 4, 32, 16, 2

    key = jax.random.PRNGKey(0)
    pkey, xkey = jax.random.split(key)
    params = init_params(pkey, input_dim, hidden_dim)
    x = jax.random.normal(xkey, (batch, input_dim, image_size, image_size),
                          jnp.float32)

    _calibrate_roll_direction()          # resolve pltpu.roll convention once

    kparams = prepare_params(params)
    fwd = jax.jit(posterior_unet_forward)
    mean, logvar = fwd(kparams, x)
    jax.block_until_ready((mean, logvar))

    assert mean.shape == (batch, input_dim, image_size, image_size)
    assert logvar.shape == (batch, input_dim, image_size, image_size)
    assert bool(jnp.all(jnp.isfinite(mean))) and bool(jnp.all(jnp.isfinite(logvar)))

    # Cross-check the Pallas path against the pure-XLA reference.
    ref_mean, ref_logvar = jax.jit(reference_forward)(params, x)
    err = max(float(jnp.max(jnp.abs(mean - ref_mean))),
              float(jnp.max(jnp.abs(logvar - ref_logvar))))
    scale = max(float(jnp.max(jnp.abs(ref_mean))),
                float(jnp.max(jnp.abs(ref_logvar))), 1.0)
    assert err <= 2e-2 * scale, f"Pallas/XLA mismatch: max |diff| = {err:.3e}"

    print("KERNEL_OK")
</pallas_src>

<mosaic_0001>
module attributes {stable_mosaic.version = 11 : i64} {
  func.func @probe(%arg0: memref<8x128xf32, #tpu.memory_space<vmem>>, %arg1: memref<8x128xf32, #tpu.memory_space<vmem>>) attributes {dimension_semantics = [], scalar_prefetch = 0 : i64, scratch_operands = 0 : i64, tpu.core_type = #tpu.core_type<tc>} {
    %c0 = arith.constant 0 : index
    %c0_0 = arith.constant 0 : index
    %0 = vector.load %arg0[%c0, %c0_0] : memref<8x128xf32, #tpu.memory_space<vmem>>, vector<8x128xf32>
    %c1_i32 = arith.constant 1 : i32
    %1 = tpu.dynamic_rotate %0 by %c1_i32 dim 1 : vector<8x128xf32>, i32 -> vector<8x128xf32>
    %c0_1 = arith.constant 0 : index
    %c0_2 = arith.constant 0 : index
    %2 = vector.load %arg1[%c0_1, %c0_2] : memref<8x128xf32, #tpu.memory_space<vmem>>, vector<8x128xf32>
    tpu.vector_store %arg1[%c0_1, %c0_2], %1 {strides = array<i32>} : memref<8x128xf32, #tpu.memory_space<vmem>>, vector<8x128xf32>,
    return
  }
}

module attributes {stable_mosaic.version = 11 : i64} {
  func.func @kernel(%arg0: i32, %arg1: memref<1x36x256xf32, #tpu.memory_space<vmem>>, %arg2: memref<32x36xf32, #tpu.memory_space<vmem>>, %arg3: memref<32x1xf32, #tpu.memory_space<vmem>>, %arg4: memref<32x1xf32, #tpu.memory_space<vmem>>, %arg5: memref<32x1xf32, #tpu.memory_space<vmem>>, %arg6: memref<1x32x256xf32, #tpu.memory_space<vmem>>) attributes {dimension_semantics = [#tpu.dimension_semantics<parallel>], iteration_bounds = array<i64: 2>, scalar_prefetch = 0 : i64, scratch_operands = 0 : i64, tpu.core_type = #tpu.core_type<tc>, window_params = [{transform_indices = @transform_0, window_bounds = array<i64: 1, 36, 256>}, {pipeline_mode = #tpu.pipeline_mode<synchronous>, transform_indices = @transform_1, window_bounds = array<i64: 32, 36>}, {pipeline_mode = #tpu.pipeline_mode<synchronous>, transform_indices = @transform_2, window_bounds = array<i64: 32, 1>}, {pipeline_mode = #tpu.pipeline_mode<synchronous>, transform_indices = @transform_3, window_bounds = array<i64: 32, 1>}, {pipeline_mode = #tpu.pipeline_mode<synchronous>, transform_indices = @transform_4, window_bounds = array<i64: 32, 1>}, {transform_indices = @transform_5, window_bounds = array<i64: 1, 32, 256>}]} {
    %c0 = arith.constant 0 : index
    %c0_0 = arith.constant 0 : index
    %c0_1 = arith.constant 0 : index
    %0 = vector.load %arg1[%c0, %c0_0, %c0_1] : memref<1x36x256xf32, #tpu.memory_space<vmem>>, vector<1x36x256xf32>
    %1 = vector.shape_cast %0 : vector<1x36x256xf32> to vector<36x256xf32>
    %c0_2 = arith.constant 0 : index
    %c0_3 = arith.constant 0 : index
    %2 = vector.load %arg2[%c0_2, %c0_3] : memref<32x36xf32, #tpu.memory_space<vmem>>, vector<32x36xf32>
    %cst = arith.constant dense<0.000000e+00> : vector<32x256xf32>
    %3 = tpu.matmul %2, %1, %cst {dimension_numbers = #tpu.dot_dimension_numbers<[1], [0], [0], [1], [0, 0, 1, 1], [], []>} : vector<32x36xf32>, vector<36x256xf32>, vector<32x256xf32> -> vector<32x256xf32>
    %c0_4 = arith.constant 0 : index
    %c0_5 = arith.constant 0 : index
    %4 = vector.load %arg3[%c0_4, %c0_5] : memref<32x1xf32, #tpu.memory_space<vmem>>, vector<32x1xf32>
    %5 = vector.broadcast %4 : vector<32x1xf32> to vector<32x256xf32>
    %6 = arith.addf %3, %5 : vector<32x256xf32>
    %7 = vector.shape_cast %6 : vector<32x256xf32> to vector<1x32x256xf32>
    %cst_6 = arith.constant dense<0.000000e+00> : vector<1xf32>
    %8 = vector.multi_reduction <add>, %7, %cst_6 [1, 2] : vector<1x32x256xf32> to vector<1xf32>
    %9 = vector.shape_cast %8 : vector<1xf32> to vector<1x1x1xf32>
    %10 = vector.extract %9[0, 0, 0] : f32 from vector<1x1x1xf32>
    %11 = arith.mulf %6, %6 : vector<32x256xf32>
    %12 = vector.shape_cast %11 : vector<32x256xf32> to vector<1x32x256xf32>
    %cst_7 = arith.constant dense<0.000000e+00> : vector<1xf32>
    %13 = vector.multi_reduction <add>, %12, %cst_7 [1, 2] : vector<1x32x256xf32> to vector<1xf32>
    %14 = vector.shape_cast %13 : vector<1xf32> to vector<1x1x1xf32>
    %15 = vector.extract %14[0, 0, 0] : f32 from vector<1x1x1xf32>
    %cst_8 = arith.constant 1.22070313E-4 : f32
    %16 = arith.mulf %10, %cst_8 : f32
    %cst_9 = arith.constant 1.22070313E-4 : f32
    %17 = arith.mulf %15, %cst_9 : f32
    %18 = arith.mulf %16, %16 : f32
    %19 = arith.subf %17, %18 : f32
    %cst_10 = arith.constant 0.000000e+00 : f32
    %20 = arith.maximumf %19, %cst_10 : f32
    %21 = vector.broadcast %16 : f32 to vector<32x256xf32>
    %22 = arith.subf %6, %21 : vector<32x256xf32>
    %cst_11 = arith.constant 9.99999974E-6 : f32
    %23 = arith.addf %20, %cst_11 : f32
    %24 = math.rsqrt %23 : f32
    %25 = vector.broadcast %24 : f32 to vector<32x256xf32>
    %26 = arith.mulf %22, %25 : vector<32x256xf32>
    %c0_12 = arith.constant 0 : index
    %c0_13 = arith.constant 0 : index
    %27 = vector.load %arg4[%c0_12, %c0_13] : memref<32x1xf32, #tpu.memory_space<vmem>>, vector<32x1xf32>
    %28 = vector.broadcast %27 : vector<32x1xf32> to vector<32x256xf32>
    %29 = arith.mulf %26, %28 : vector<32x256xf32>
    %c0_14 = arith.constant 0 : index
    %c0_15 = arith.constant 0 : index
    %30 = vector.load %arg5[%c0_14, %c0_15] : memref<32x1xf32, #tpu.memory_space<vmem>>, vector<32x1xf32>
    %31 = vector.broadcast %30 : vector<32x1xf32> to vector<32x256xf32>
    %32 = arith.addf %29, %31 : vector<32x256xf32>
    %cst_16 = arith.constant 0.000000e+00 : f32
    %33 = vector.broadcast %cst_16 : f32 to vector<32x256xf32>
    %34 = arith.maximumf %32, %33 : vector<32x256xf32>
    %c0_17 = arith.constant 0 : index
    %c0_18 = arith.constant 0 : index
    %c0_19 = arith.constant 0 : index
    %35 = vector.load %arg6[%c0_17, %c0_18, %c0_19] : memref<1x32x256xf32, #tpu.memory_space<vmem>>, vector<1x32x256xf32>
    %36 = vector.shape_cast %35 : vector<1x32x256xf32> to vector<32x256xf32>
    %37 = vector.shape_cast %34 : vector<32x256xf32> to vector<1x32x256xf32>
    tpu.vector_store %arg6[%c0_17, %c0_18, %c0_19], %37 {strides = array<i32>} : memref<1x32x256xf32, #tpu.memory_space<vmem>>, vector<1x32x256xf32>,
    return
  }
  func.func @transform_0(%arg0: i32) -> (i32, i32, i32) {
    %c0_i32 = arith.constant 0 : i32
    %c0_i32_0 = arith.constant 0 : i32
    %c0_i32_1 = arith.constant 0 : i32
    return %arg0, %c0_i32, %c0_i32_0 : i32, i32, i32
  }
  func.func @transform_1(%arg0: i32) -> (i32, i32) {
    %c0_i32 = arith.constant 0 : i32
    %c0_i32_0 = arith.constant 0 : i32
    %c0_i32_1 = arith.constant 0 : i32
    return %c0_i32, %c0_i32_0 : i32, i32
  }
  func.func @transform_2(%arg0: i32) -> (i32, i32) {
    %c0_i32 = arith.constant 0 : i32
    %c0_i32_0 = arith.constant 0 : i32
    %c0_i32_1 = arith.constant 0 : i32
    return %c0_i32, %c0_i32_0 : i32, i32
  }
  func.func @transform_3(%arg0: i32) -> (i32, i32) {
    %c0_i32 = arith.constant 0 : i32
    %c0_i32_0 = arith.constant 0 : i32
    %c0_i32_1 = arith.constant 0 : i32
    return %c0_i32, %c0_i32_0 : i32, i32
  }
  func.func @transform_4(%arg0: i32) -> (i32, i32) {
    %c0_i32 = arith.constant 0 : i32
    %c0_i32_0 = arith.constant 0 : i32
    %c0_i32_1 = arith.constant 0 : i32
    return %c0_i32, %c0_i32_0 : i32, i32
  }
  func.func @transform_5(%arg0: i32) -> (i32, i32, i32) {
    %c0_i32 = arith.constant 0 : i32
    %c0_i32_0 = arith.constant 0 : i32
    %c0_i32_1 = arith.constant 0 : i32
    return %arg0, %c0_i32, %c0_i32_0 : i32, i32, i32
  }
}

module attributes {stable_mosaic.version = 11 : i64} {
  func.func @kernel(%arg0: i32, %arg1: memref<1x288x64xf32, #tpu.memory_space<vmem>>, %arg2: memref<32x288xf32, #tpu.memory_space<vmem>>, %arg3: memref<32x1xf32, #tpu.memory_space<vmem>>, %arg4: memref<32x1xf32, #tpu.memory_space<vmem>>, %arg5: memref<32x1xf32, #tpu.memory_space<vmem>>, %arg6: memref<1x32x64xf32, #tpu.memory_space<vmem>>) attributes {dimension_semantics = [#tpu.dimension_semantics<parallel>], iteration_bounds = array<i64: 2>, scalar_prefetch = 0 : i64, scratch_operands = 0 : i64, tpu.core_type = #tpu.core_type<tc>, window_params = [{transform_indices = @transform_0, window_bounds = array<i64: 1, 288, 64>}, {pipeline_mode = #tpu.pipeline_mode<synchronous>, transform_indices = @transform_1, window_bounds = array<i64: 32, 288>}, {pipeline_mode = #tpu.pipeline_mode<synchronous>, transform_indices = @transform_2, window_bounds = array<i64: 32, 1>}, {pipeline_mode = #tpu.pipeline_mode<synchronous>, transform_indices = @transform_3, window_bounds = array<i64: 32, 1>}, {pipeline_mode = #tpu.pipeline_mode<synchronous>, transform_indices = @transform_4, window_bounds = array<i64: 32, 1>}, {transform_indices = @transform_5, window_bounds = array<i64: 1, 32, 64>}]} {
    %c0 = arith.constant 0 : index
    %c0_0 = arith.constant 0 : index
    %c0_1 = arith.constant 0 : index
    %0 = vector.load %arg1[%c0, %c0_0, %c0_1] : memref<1x288x64xf32, #tpu.memory_space<vmem>>, vector<1x288x64xf32>
    %1 = vector.shape_cast %0 : vector<1x288x64xf32> to vector<288x64xf32>
    %c0_2 = arith.constant 0 : index
    %c0_3 = arith.constant 0 : index
    %2 = vector.load %arg2[%c0_2, %c0_3] : memref<32x288xf32, #tpu.memory_space<vmem>>, vector<32x288xf32>
    %cst = arith.constant dense<0.000000e+00> : vector<32x64xf32>
    %3 = tpu.matmul %2, %1, %cst {dimension_numbers = #tpu.dot_dimension_numbers<[1], [0], [0], [1], [0, 0, 1, 1], [], []>} : vector<32x288xf32>, vector<288x64xf32>, vector<32x64xf32> -> vector<32x64xf32>
    %c0_4 = arith.constant 0 : index
    %c0_5 = arith.constant 0 : index
    %4 = vector.load %arg3[%c0_4, %c0_5] : memref<32x1xf32, #tpu.memory_space<vmem>>, vector<32x1xf32>
    %5 = vector.broadcast %4 : vector<32x1xf32> to vector<32x64xf32>
    %6 = arith.addf %3, %5 : vector<32x64xf32>
    %7 = vector.shape_cast %6 : vector<32x64xf32> to vector<1x32x64xf32>
    %cst_6 = arith.constant dense<0.000000e+00> : vector<1xf32>
    %8 = vector.multi_reduction <add>, %7, %cst_6 [1, 2] : vector<1x32x64xf32> to vector<1xf32>
    %9 = vector.shape_cast %8 : vector<1xf32> to vector<1x1x1xf32>
    %10 = vector.extract %9[0, 0, 0] : f32 from vector<1x1x1xf32>
    %11 = arith.mulf %6, %6 : vector<32x64xf32>
    %12 = vector.shape_cast %11 : vector<32x64xf32> to vector<1x32x64xf32>
    %cst_7 = arith.constant dense<0.000000e+00> : vector<1xf32>
    %13 = vector.multi_reduction <add>, %12, %cst_7 [1, 2] : vector<1x32x64xf32> to vector<1xf32>
    %14 = vector.shape_cast %13 : vector<1xf32> to vector<1x1x1xf32>
    %15 = vector.extract %14[0, 0, 0] : f32 from vector<1x1x1xf32>
    %cst_8 = arith.constant 4.8828125E-4 : f32
    %16 = arith.mulf %10, %cst_8 : f32
    %cst_9 = arith.constant 4.8828125E-4 : f32
    %17 = arith.mulf %15, %cst_9 : f32
    %18 = arith.mulf %16, %16 : f32
    %19 = arith.subf %17, %18 : f32
    %cst_10 = arith.constant 0.000000e+00 : f32
    %20 = arith.maximumf %19, %cst_10 : f32
    %21 = vector.broadcast %16 : f32 to vector<32x64xf32>
    %22 = arith.subf %6, %21 : vector<32x64xf32>
    %cst_11 = arith.constant 9.99999974E-6 : f32
    %23 = arith.addf %20, %cst_11 : f32
    %24 = math.rsqrt %23 : f32
    %25 = vector.broadcast %24 : f32 to vector<32x64xf32>
    %26 = arith.mulf %22, %25 : vector<32x64xf32>
    %c0_12 = arith.constant 0 : index
    %c0_13 = arith.constant 0 : index
    %27 = vector.load %arg4[%c0_12, %c0_13] : memref<32x1xf32, #tpu.memory_space<vmem>>, vector<32x1xf32>
    %28 = vector.broadcast %27 : vector<32x1xf32> to vector<32x64xf32>
    %29 = arith.mulf %26, %28 : vector<32x64xf32>
    %c0_14 = arith.constant 0 : index
    %c0_15 = arith.constant 0 : index
    %30 = vector.load %arg5[%c0_14, %c0_15] : memref<32x1xf32, #tpu.memory_space<vmem>>, vector<32x1xf32>
    %31 = vector.broadcast %30 : vector<32x1xf32> to vector<32x64xf32>
    %32 = arith.addf %29, %31 : vector<32x64xf32>
    %cst_16 = arith.constant 0.000000e+00 : f32
    %33 = vector.broadcast %cst_16 : f32 to vector<32x64xf32>
    %34 = arith.maximumf %32, %33 : vector<32x64xf32>
    %c0_17 = arith.constant 0 : index
    %c0_18 = arith.constant 0 : index
    %c0_19 = arith.constant 0 : index
    %35 = vector.load %arg6[%c0_17, %c0_18, %c0_19] : memref<1x32x64xf32, #tpu.memory_space<vmem>>, vector<1x32x64xf32>
    %36 = vector.shape_cast %35 : vector<1x32x64xf32> to vector<32x64xf32>
    %37 = vector.shape_cast %34 : vector<32x64xf32> to vector<1x32x64xf32>
    tpu.vector_store %arg6[%c0_17, %c0_18, %c0_19], %37 {strides = array<i32>} : memref<1x32x64xf32, #tpu.memory_space<vmem>>, vector<1x32x64xf32>,
    return
  }
  func.func @transform_0(%arg0: i32) -> (i32, i32, i32) {
    %c0_i32 = arith.constant 0 : i32
    %c0_i32_0 = arith.constant 0 : i32
    %c0_i32_1 = arith.constant 0 : i32
    return %arg0, %c0_i32, %c0_i32_0 : i32, i32, i32
  }
  func.func @transform_1(%arg0: i32) -> (i32, i32) {
    %c0_i32 = arith.constant 0 : i32
    %c0_i32_0 = arith.constant 0 : i32
    %c0_i32_1 = arith.constant 0 : i32
    return %c0_i32, %c0_i32_0 : i32, i32
  }
  func.func @transform_2(%arg0: i32) -> (i32, i32) {
    %c0_i32 = arith.constant 0 : i32
    %c0_i32_0 = arith.constant 0 : i32
    %c0_i32_1 = arith.constant 0 : i32
    return %c0_i32, %c0_i32_0 : i32, i32
  }
  func.func @transform_3(%arg0: i32) -> (i32, i32) {
    %c0_i32 = arith.constant 0 : i32
    %c0_i32_0 = arith.constant 0 : i32
    %c0_i32_1 = arith.constant 0 : i32
    return %c0_i32, %c0_i32_0 : i32, i32
  }
  func.func @transform_4(%arg0: i32) -> (i32, i32) {
    %c0_i32 = arith.constant 0 : i32
    %c0_i32_0 = arith.constant 0 : i32
    %c0_i32_1 = arith.constant 0 : i32
    return %c0_i32, %c0_i32_0 : i32, i32
  }
  func.func @transform_5(%arg0: i32) -> (i32, i32, i32) {
    %c0_i32 = arith.constant 0 : i32
    %c0_i32_0 = arith.constant 0 : i32
    %c0_i32_1 = arith.constant 0 : i32
    return %arg0, %c0_i32, %c0_i32_0 : i32, i32, i32
  }
}

module attributes {stable_mosaic.version = 11 : i64} {
  func.func @kernel(%arg0: i32, %arg1: memref<1x288x16xf32, #tpu.memory_space<vmem>>, %arg2: memref<32x288xf32, #tpu.memory_space<vmem>>, %arg3: memref<32x1xf32, #tpu.memory_space<vmem>>, %arg4: memref<32x1xf32, #tpu.memory_space<vmem>>, %arg5: memref<32x1xf32, #tpu.memory_space<vmem>>, %arg6: memref<1x32x16xf32, #tpu.memory_space<vmem>>) attributes {dimension_semantics = [#tpu.dimension_semantics<parallel>], iteration_bounds = array<i64: 2>, scalar_prefetch = 0 : i64, scratch_operands = 0 : i64, tpu.core_type = #tpu.core_type<tc>, window_params = [{transform_indices = @transform_0, window_bounds = array<i64: 1, 288, 16>}, {pipeline_mode = #tpu.pipeline_mode<synchronous>, transform_indices = @transform_1, window_bounds = array<i64: 32, 288>}, {pipeline_mode = #tpu.pipeline_mode<synchronous>, transform_indices = @transform_2, window_bounds = array<i64: 32, 1>}, {pipeline_mode = #tpu.pipeline_mode<synchronous>, transform_indices = @transform_3, window_bounds = array<i64: 32, 1>}, {pipeline_mode = #tpu.pipeline_mode<synchronous>, transform_indices = @transform_4, window_bounds = array<i64: 32, 1>}, {transform_indices = @transform_5, window_bounds = array<i64: 1, 32, 16>}]} {
    %c0 = arith.constant 0 : index
    %c0_0 = arith.constant 0 : index
    %c0_1 = arith.constant 0 : index
    %0 = vector.load %arg1[%c0, %c0_0, %c0_1] : memref<1x288x16xf32, #tpu.memory_space<vmem>>, vector<1x288x16xf32>
    %1 = vector.shape_cast %0 : vector<1x288x16xf32> to vector<288x16xf32>
    %c0_2 = arith.constant 0 : index
    %c0_3 = arith.constant 0 : index
    %2 = vector.load %arg2[%c0_2, %c0_3] : memref<32x288xf32, #tpu.memory_space<vmem>>, vector<32x288xf32>
    %cst = arith.constant dense<0.000000e+00> : vector<32x16xf32>
    %3 = tpu.matmul %2, %1, %cst {dimension_numbers = #tpu.dot_dimension_numbers<[1], [0], [0], [1], [0, 0, 1, 1], [], []>} : vector<32x288xf32>, vector<288x16xf32>, vector<32x16xf32> -> vector<32x16xf32>
    %c0_4 = arith.constant 0 : index
    %c0_5 = arith.constant 0 : index
    %4 = vector.load %arg3[%c0_4, %c0_5] : memref<32x1xf32, #tpu.memory_space<vmem>>, vector<32x1xf32>
    %5 = vector.broadcast %4 : vector<32x1xf32> to vector<32x16xf32>
    %6 = arith.addf %3, %5 : vector<32x16xf32>
    %7 = vector.shape_cast %6 : vector<32x16xf32> to vector<1x32x16xf32>
    %cst_6 = arith.constant dense<0.000000e+00> : vector<1xf32>
    %8 = vector.multi_reduction <add>, %7, %cst_6 [1, 2] : vector<1x32x16xf32> to vector<1xf32>
    %9 = vector.shape_cast %8 : vector<1xf32> to vector<1x1x1xf32>
    %10 = vector.extract %9[0, 0, 0] : f32 from vector<1x1x1xf32>
    %11 = arith.mulf %6, %6 : vector<32x16xf32>
    %12 = vector.shape_cast %11 : vector<32x16xf32> to vector<1x32x16xf32>
    %cst_7 = arith.constant dense<0.000000e+00> : vector<1xf32>
    %13 = vector.multi_reduction <add>, %12, %cst_7 [1, 2] : vector<1x32x16xf32> to vector<1xf32>
    %14 = vector.shape_cast %13 : vector<1xf32> to vector<1x1x1xf32>
    %15 = vector.extract %14[0, 0, 0] : f32 from vector<1x1x1xf32>
    %cst_8 = arith.constant 0.001953125 : f32
    %16 = arith.mulf %10, %cst_8 : f32
    %cst_9 = arith.constant 0.001953125 : f32
    %17 = arith.mulf %15, %cst_9 : f32
    %18 = arith.mulf %16, %16 : f32
    %19 = arith.subf %17, %18 : f32
    %cst_10 = arith.constant 0.000000e+00 : f32
    %20 = arith.maximumf %19, %cst_10 : f32
    %21 = vector.broadcast %16 : f32 to vector<32x16xf32>
    %22 = arith.subf %6, %21 : vector<32x16xf32>
    %cst_11 = arith.constant 9.99999974E-6 : f32
    %23 = arith.addf %20, %cst_11 : f32
    %24 = math.rsqrt %23 : f32
    %25 = vector.broadcast %24 : f32 to vector<32x16xf32>
    %26 = arith.mulf %22, %25 : vector<32x16xf32>
    %c0_12 = arith.constant 0 : index
    %c0_13 = arith.constant 0 : index
    %27 = vector.load %arg4[%c0_12, %c0_13] : memref<32x1xf32, #tpu.memory_space<vmem>>, vector<32x1xf32>
    %28 = vector.broadcast %27 : vector<32x1xf32> to vector<32x16xf32>
    %29 = arith.mulf %26, %28 : vector<32x16xf32>
    %c0_14 = arith.constant 0 : index
    %c0_15 = arith.constant 0 : index
    %30 = vector.load %arg5[%c0_14, %c0_15] : memref<32x1xf32, #tpu.memory_space<vmem>>, vector<32x1xf32>
    %31 = vector.broadcast %30 : vector<32x1xf32> to vector<32x16xf32>
    %32 = arith.addf %29, %31 : vector<32x16xf32>
    %cst_16 = arith.constant 0.000000e+00 : f32
    %33 = vector.broadcast %cst_16 : f32 to vector<32x16xf32>
    %34 = arith.maximumf %32, %33 : vector<32x16xf32>
    %c0_17 = arith.constant 0 : index
    %c0_18 = arith.constant 0 : index
    %c0_19 = arith.constant 0 : index
    %35 = vector.load %arg6[%c0_17, %c0_18, %c0_19] : memref<1x32x16xf32, #tpu.memory_space<vmem>>, vector<1x32x16xf32>
    %36 = vector.shape_cast %35 : vector<1x32x16xf32> to vector<32x16xf32>
    %37 = vector.shape_cast %34 : vector<32x16xf32> to vector<1x32x16xf32>
    tpu.vector_store %arg6[%c0_17, %c0_18, %c0_19], %37 {strides = array<i32>} : memref<1x32x16xf32, #tpu.memory_space<vmem>>, vector<1x32x16xf32>,
    return
  }
  func.func @transform_0(%arg0: i32) -> (i32, i32, i32) {
    %c0_i32 = arith.constant 0 : i32
    %c0_i32_0 = arith.constant 0 : i32
    %c0_i32_1 = arith.constant 0 : i32
    return %arg0, %c0_i32, %c0_i32_0 : i32, i32, i32
  }
  func.func @transform_1(%arg0: i32) -> (i32, i32) {
    %c0_i32 = arith.constant 0 : i32
    %c0_i32_0 = arith.constant 0 : i32
    %c0_i32_1 = arith.constant 0 : i32
    return %c0_i32, %c0_i32_0 : i32, i32
  }
  func.func @transform_2(%arg0: i32) -> (i32, i32) {
    %c0_i32 = arith.constant 0 : i32
    %c0_i32_0 = arith.constant 0 : i32
    %c0_i32_1 = arith.constant 0 : i32
    return %c0_i32, %c0_i32_0 : i32, i32
  }
  func.func @transform_3(%arg0: i32) -> (i32, i32) {
    %c0_i32 = arith.constant 0 : i32
    %c0_i32_0 = arith.constant 0 : i32
    %c0_i32_1 = arith.constant 0 : i32
    return %c0_i32, %c0_i32_0 : i32, i32
  }
  func.func @transform_4(%arg0: i32) -> (i32, i32) {
    %c0_i32 = arith.constant 0 : i32
    %c0_i32_0 = arith.constant 0 : i32
    %c0_i32_1 = arith.constant 0 : i32
    return %c0_i32, %c0_i32_0 : i32, i32
  }
  func.func @transform_5(%arg0: i32) -> (i32, i32, i32) {
    %c0_i32 = arith.constant 0 : i32
    %c0_i32_0 = arith.constant 0 : i32
    %c0_i32_1 = arith.constant 0 : i32
    return %arg0, %c0_i32, %c0_i32_0 : i32, i32, i32
  }
}

module attributes {stable_mosaic.version = 11 : i64} {
  func.func @kernel(%arg0: i32, %arg1: memref<1x288x4xf32, #tpu.memory_space<vmem>>, %arg2: memref<64x288xf32, #tpu.memory_space<vmem>>, %arg3: memref<64x1xf32, #tpu.memory_space<vmem>>, %arg4: memref<64x1xf32, #tpu.memory_space<vmem>>, %arg5: memref<64x1xf32, #tpu.memory_space<vmem>>, %arg6: memref<1x64x4xf32, #tpu.memory_space<vmem>>) attributes {dimension_semantics = [#tpu.dimension_semantics<parallel>], iteration_bounds = array<i64: 2>, scalar_prefetch = 0 : i64, scratch_operands = 0 : i64, tpu.core_type = #tpu.core_type<tc>, window_params = [{transform_indices = @transform_0, window_bounds = array<i64: 1, 288, 4>}, {pipeline_mode = #tpu.pipeline_mode<synchronous>, transform_indices = @transform_1, window_bounds = array<i64: 64, 288>}, {pipeline_mode = #tpu.pipeline_mode<synchronous>, transform_indices = @transform_2, window_bounds = array<i64: 64, 1>}, {pipeline_mode = #tpu.pipeline_mode<synchronous>, transform_indices = @transform_3, window_bounds = array<i64: 64, 1>}, {pipeline_mode = #tpu.pipeline_mode<synchronous>, transform_indices = @transform_4, window_bounds = array<i64: 64, 1>}, {transform_indices = @transform_5, window_bounds = array<i64: 1, 64, 4>}]} {
    %c0 = arith.constant 0 : index
    %c0_0 = arith.constant 0 : index
    %c0_1 = arith.constant 0 : index
    %0 = vector.load %arg1[%c0, %c0_0, %c0_1] : memref<1x288x4xf32, #tpu.memory_space<vmem>>, vector<1x288x4xf32>
    %1 = vector.shape_cast %0 : vector<1x288x4xf32> to vector<288x4xf32>
    %c0_2 = arith.constant 0 : index
    %c0_3 = arith.constant 0 : index
    %2 = vector.load %arg2[%c0_2, %c0_3] : memref<64x288xf32, #tpu.memory_space<vmem>>, vector<64x288xf32>
    %cst = arith.constant dense<0.000000e+00> : vector<64x4xf32>
    %3 = tpu.matmul %2, %1, %cst {dimension_numbers = #tpu.dot_dimension_numbers<[1], [0], [0], [1], [0, 0, 1, 1], [], []>} : vector<64x288xf32>, vector<288x4xf32>, vector<64x4xf32> -> vector<64x4xf32>
    %c0_4 = arith.constant 0 : index
    %c0_5 = arith.constant 0 : index
    %4 = vector.load %arg3[%c0_4, %c0_5] : memref<64x1xf32, #tpu.memory_space<vmem>>, vector<64x1xf32>
    %5 = vector.broadcast %4 : vector<64x1xf32> to vector<64x4xf32>
    %6 = arith.addf %3, %5 : vector<64x4xf32>
    %7 = vector.shape_cast %6 : vector<64x4xf32> to vector<1x64x4xf32>
    %cst_6 = arith.constant dense<0.000000e+00> : vector<1xf32>
    %8 = vector.multi_reduction <add>, %7, %cst_6 [1, 2] : vector<1x64x4xf32> to vector<1xf32>
    %9 = vector.shape_cast %8 : vector<1xf32> to vector<1x1x1xf32>
    %10 = vector.extract %9[0, 0, 0] : f32 from vector<1x1x1xf32>
    %11 = arith.mulf %6, %6 : vector<64x4xf32>
    %12 = vector.shape_cast %11 : vector<64x4xf32> to vector<1x64x4xf32>
    %cst_7 = arith.constant dense<0.000000e+00> : vector<1xf32>
    %13 = vector.multi_reduction <add>, %12, %cst_7 [1, 2] : vector<1x64x4xf32> to vector<1xf32>
    %14 = vector.shape_cast %13 : vector<1xf32> to vector<1x1x1xf32>
    %15 = vector.extract %14[0, 0, 0] : f32 from vector<1x1x1xf32>
    %cst_8 = arith.constant 3.906250e-03 : f32
    %16 = arith.mulf %10, %cst_8 : f32
    %cst_9 = arith.constant 3.906250e-03 : f32
    %17 = arith.mulf %15, %cst_9 : f32
    %18 = arith.mulf %16, %16 : f32
    %19 = arith.subf %17, %18 : f32
    %cst_10 = arith.constant 0.000000e+00 : f32
    %20 = arith.maximumf %19, %cst_10 : f32
    %21 = vector.broadcast %16 : f32 to vector<64x4xf32>
    %22 = arith.subf %6, %21 : vector<64x4xf32>
    %cst_11 = arith.constant 9.99999974E-6 : f32
    %23 = arith.addf %20, %cst_11 : f32
    %24 = math.rsqrt %23 : f32
    %25 = vector.broadcast %24 : f32 to vector<64x4xf32>
    %26 = arith.mulf %22, %25 : vector<64x4xf32>
    %c0_12 = arith.constant 0 : index
    %c0_13 = arith.constant 0 : index
    %27 = vector.load %arg4[%c0_12, %c0_13] : memref<64x1xf32, #tpu.memory_space<vmem>>, vector<64x1xf32>
    %28 = vector.broadcast %27 : vector<64x1xf32> to vector<64x4xf32>
    %29 = arith.mulf %26, %28 : vector<64x4xf32>
    %c0_14 = arith.constant 0 : index
    %c0_15 = arith.constant 0 : index
    %30 = vector.load %arg5[%c0_14, %c0_15] : memref<64x1xf32, #tpu.memory_space<vmem>>, vector<64x1xf32>
    %31 = vector.broadcast %30 : vector<64x1xf32> to vector<64x4xf32>
    %32 = arith.addf %29, %31 : vector<64x4xf32>
    %cst_16 = arith.constant 0.000000e+00 : f32
    %33 = vector.broadcast %cst_16 : f32 to vector<64x4xf32>
    %34 = arith.maximumf %32, %33 : vector<64x4xf32>
    %c0_17 = arith.constant 0 : index
    %c0_18 = arith.constant 0 : index
    %c0_19 = arith.constant 0 : index
    %35 = vector.load %arg6[%c0_17, %c0_18, %c0_19] : memref<1x64x4xf32, #tpu.memory_space<vmem>>, vector<1x64x4xf32>
    %36 = vector.shape_cast %35 : vector<1x64x4xf32> to vector<64x4xf32>
    %37 = vector.shape_cast %34 : vector<64x4xf32> to vector<1x64x4xf32>
    tpu.vector_store %arg6[%c0_17, %c0_18, %c0_19], %37 {strides = array<i32>} : memref<1x64x4xf32, #tpu.memory_space<vmem>>, vector<1x64x4xf32>,
    return
  }
  func.func @transform_0(%arg0: i32) -> (i32, i32, i32) {
    %c0_i32 = arith.constant 0 : i32
    %c0_i32_0 = arith.constant 0 : i32
    %c0_i32_1 = arith.constant 0 : i32
    return %arg0, %c0_i32, %c0_i32_0 : i32, i32, i32
  }
  func.func @transform_1(%arg0: i32) -> (i32, i32) {
    %c0_i32 = arith.constant 0 : i32
    %c0_i32_0 = arith.constant 0 : i32
    %c0_i32_1 = arith.constant 0 : i32
    return %c0_i32, %c0_i32_0 : i32, i32
  }
  func.func @transform_2(%arg0: i32) -> (i32, i32) {
    %c0_i32 = arith.constant 0 : i32
    %c0_i32_0 = arith.constant 0 : i32
    %c0_i32_1 = arith.constant 0 : i32
    return %c0_i32, %c0_i32_0 : i32, i32
  }
  func.func @transform_3(%arg0: i32) -> (i32, i32) {
    %c0_i32 = arith.constant 0 : i32
    %c0_i32_0 = arith.constant 0 : i32
    %c0_i32_1 = arith.constant 0 : i32
    return %c0_i32, %c0_i32_0 : i32, i32
  }
  func.func @transform_4(%arg0: i32) -> (i32, i32) {
    %c0_i32 = arith.constant 0 : i32
    %c0_i32_0 = arith.constant 0 : i32
    %c0_i32_1 = arith.constant 0 : i32
    return %c0_i32, %c0_i32_0 : i32, i32
  }
  func.func @transform_5(%arg0: i32) -> (i32, i32, i32) {
    %c0_i32 = arith.constant 0 : i32
    %c0_i32_0 = arith.constant 0 : i32
    %c0_i32_1 = arith.constant 0 : i32
    return %arg0, %c0_i32, %c0_i32_0 : i32, i32, i32
  }
}

module attributes {stable_mosaic.version = 11 : i64} {
  func.func @kernel(%arg0: i32, %arg1: memref<1x576x1xf32, #tpu.memory_space<vmem>>, %arg2: memref<64x576xf32, #tpu.memory_space<vmem>>, %arg3: memref<64x1xf32, #tpu.memory_space<vmem>>, %arg4: memref<64x1xf32, #tpu.memory_space<vmem>>, %arg5: memref<64x1xf32, #tpu.memory_space<vmem>>, %arg6: memref<1x64x1xf32, #tpu.memory_space<vmem>>) attributes {dimension_semantics = [#tpu.dimension_semantics<parallel>], iteration_bounds = array<i64: 2>, scalar_prefetch = 0 : i64, scratch_operands = 0 : i64, tpu.core_type = #tpu.core_type<tc>, window_params = [{transform_indices = @transform_0, window_bounds = array<i64: 1, 576, 1>}, {pipeline_mode = #tpu.pipeline_mode<synchronous>, transform_indices = @transform_1, window_bounds = array<i64: 64, 576>}, {pipeline_mode = #tpu.pipeline_mode<synchronous>, transform_indices = @transform_2, window_bounds = array<i64: 64, 1>}, {pipeline_mode = #tpu.pipeline_mode<synchronous>, transform_indices = @transform_3, window_bounds = array<i64: 64, 1>}, {pipeline_mode = #tpu.pipeline_mode<synchronous>, transform_indices = @transform_4, window_bounds = array<i64: 64, 1>}, {transform_indices = @transform_5, window_bounds = array<i64: 1, 64, 1>}]} {
    %c0 = arith.constant 0 : index
    %c0_0 = arith.constant 0 : index
    %c0_1 = arith.constant 0 : index
    %0 = vector.load %arg1[%c0, %c0_0, %c0_1] : memref<1x576x1xf32, #tpu.memory_space<vmem>>, vector<1x576x1xf32>
    %1 = vector.shape_cast %0 : vector<1x576x1xf32> to vector<576x1xf32>
    %c0_2 = arith.constant 0 : index
    %c0_3 = arith.constant 0 : index
    %2 = vector.load %arg2[%c0_2, %c0_3] : memref<64x576xf32, #tpu.memory_space<vmem>>, vector<64x576xf32>
    %cst = arith.constant dense<0.000000e+00> : vector<64x1xf32>
    %3 = tpu.matmul %2, %1, %cst {dimension_numbers = #tpu.dot_dimension_numbers<[1], [0], [0], [1], [0, 0, 1, 1], [], []>} : vector<64x576xf32>, vector<576x1xf32>, vector<64x1xf32> -> vector<64x1xf32>
    %c0_4 = arith.constant 0 : index
    %c0_5 = arith.constant 0 : index
    %4 = vector.load %arg3[%c0_4, %c0_5] : memref<64x1xf32, #tpu.memory_space<vmem>>, vector<64x1xf32>
    %5 = arith.addf %3, %4 : vector<64x1xf32>
    %6 = vector.shape_cast %5 : vector<64x1xf32> to vector<1x64x1xf32>
    %cst_6 = arith.constant dense<0.000000e+00> : vector<1xf32>
    %7 = vector.multi_reduction <add>, %6, %cst_6 [1, 2] : vector<1x64x1xf32> to vector<1xf32>
    %8 = vector.shape_cast %7 : vector<1xf32> to vector<1x1x1xf32>
    %9 = vector.extract %8[0, 0, 0] : f32 from vector<1x1x1xf32>
    %10 = arith.mulf %5, %5 : vector<64x1xf32>
    %11 = vector.shape_cast %10 : vector<64x1xf32> to vector<1x64x1xf32>
    %cst_7 = arith.constant dense<0.000000e+00> : vector<1xf32>
    %12 = vector.multi_reduction <add>, %11, %cst_7 [1, 2] : vector<1x64x1xf32> to vector<1xf32>
    %13 = vector.shape_cast %12 : vector<1xf32> to vector<1x1x1xf32>
    %14 = vector.extract %13[0, 0, 0] : f32 from vector<1x1x1xf32>
    %cst_8 = arith.constant 1.562500e-02 : f32
    %15 = arith.mulf %9, %cst_8 : f32
    %cst_9 = arith.constant 1.562500e-02 : f32
    %16 = arith.mulf %14, %cst_9 : f32
    %17 = arith.mulf %15, %15 : f32
    %18 = arith.subf %16, %17 : f32
    %cst_10 = arith.constant 0.000000e+00 : f32
    %19 = arith.maximumf %18, %cst_10 : f32
    %20 = vector.broadcast %15 : f32 to vector<64x1xf32>
    %21 = arith.subf %5, %20 : vector<64x1xf32>
    %cst_11 = arith.constant 9.99999974E-6 : f32
    %22 = arith.addf %19, %cst_11 : f32
    %23 = math.rsqrt %22 : f32
    %24 = vector.broadcast %23 : f32 to vector<64x1xf32>
    %25 = arith.mulf %21, %24 : vector<64x1xf32>
    %c0_12 = arith.constant 0 : index
    %c0_13 = arith.constant 0 : index
    %26 = vector.load %arg4[%c0_12, %c0_13] : memref<64x1xf32, #tpu.memory_space<vmem>>, vector<64x1xf32>
    %27 = arith.mulf %25, %26 : vector<64x1xf32>
    %c0_14 = arith.constant 0 : index
    %c0_15 = arith.constant 0 : index
    %28 = vector.load %arg5[%c0_14, %c0_15] : memref<64x1xf32, #tpu.memory_space<vmem>>, vector<64x1xf32>
    %29 = arith.addf %27, %28 : vector<64x1xf32>
    %cst_16 = arith.constant 0.000000e+00 : f32
    %30 = vector.broadcast %cst_16 : f32 to vector<64x1xf32>
    %31 = arith.maximumf %29, %30 : vector<64x1xf32>
    %c0_17 = arith.constant 0 : index
    %c0_18 = arith.constant 0 : index
    %c0_19 = arith.constant 0 : index
    %32 = vector.load %arg6[%c0_17, %c0_18, %c0_19] : memref<1x64x1xf32, #tpu.memory_space<vmem>>, vector<1x64x1xf32>
    %33 = vector.shape_cast %32 : vector<1x64x1xf32> to vector<64x1xf32>
    %34 = vector.shape_cast %31 : vector<64x1xf32> to vector<1x64x1xf32>
    tpu.vector_store %arg6[%c0_17, %c0_18, %c0_19], %34 {strides = array<i32>} : memref<1x64x1xf32, #tpu.memory_space<vmem>>, vector<1x64x1xf32>,
    return
  }
  func.func @transform_0(%arg0: i32) -> (i32, i32, i32) {
    %c0_i32 = arith.constant 0 : i32
    %c0_i32_0 = arith.constant 0 : i32
    %c0_i32_1 = arith.constant 0 : i32
    return %arg0, %c0_i32, %c0_i32_0 : i32, i32, i32
  }
  func.func @transform_1(%arg0: i32) -> (i32, i32) {
    %c0_i32 = arith.constant 0 : i32
    %c0_i32_0 = arith.constant 0 : i32
    %c0_i32_1 = arith.constant 0 : i32
    return %c0_i32, %c0_i32_0 : i32, i32
  }
  func.func @transform_2(%arg0: i32) -> (i32, i32) {
    %c0_i32 = arith.constant 0 : i32
    %c0_i32_0 = arith.constant 0 : i32
    %c0_i32_1 = arith.constant 0 : i32
    return %c0_i32, %c0_i32_0 : i32, i32
  }
  func.func @transform_3(%arg0: i32) -> (i32, i32) {
    %c0_i32 = arith.constant 0 : i32
    %c0_i32_0 = arith.constant 0 : i32
    %c0_i32_1 = arith.constant 0 : i32
    return %c0_i32, %c0_i32_0 : i32, i32
  }
  func.func @transform_4(%arg0: i32) -> (i32, i32) {
    %c0_i32 = arith.constant 0 : i32
    %c0_i32_0 = arith.constant 0 : i32
    %c0_i32_1 = arith.constant 0 : i32
    return %c0_i32, %c0_i32_0 : i32, i32
  }
  func.func @transform_5(%arg0: i32) -> (i32, i32, i32) {
    %c0_i32 = arith.constant 0 : i32
    %c0_i32_0 = arith.constant 0 : i32
    %c0_i32_1 = arith.constant 0 : i32
    return %arg0, %c0_i32, %c0_i32_0 : i32, i32, i32
  }
}

module attributes {stable_mosaic.version = 11 : i64} {
  func.func @kernel(%arg0: i32, %arg1: memref<1x1152x4xf32, #tpu.memory_space<vmem>>, %arg2: memref<32x1152xf32, #tpu.memory_space<vmem>>, %arg3: memref<32x1xf32, #tpu.memory_space<vmem>>, %arg4: memref<32x1xf32, #tpu.memory_space<vmem>>, %arg5: memref<32x1xf32, #tpu.memory_space<vmem>>, %arg6: memref<1x32x4xf32, #tpu.memory_space<vmem>>) attributes {dimension_semantics = [#tpu.dimension_semantics<parallel>], iteration_bounds = array<i64: 2>, scalar_prefetch = 0 : i64, scratch_operands = 0 : i64, tpu.core_type = #tpu.core_type<tc>, window_params = [{transform_indices = @transform_0, window_bounds = array<i64: 1, 1152, 4>}, {pipeline_mode = #tpu.pipeline_mode<synchronous>, transform_indices = @transform_1, window_bounds = array<i64: 32, 1152>}, {pipeline_mode = #tpu.pipeline_mode<synchronous>, transform_indices = @transform_2, window_bounds = array<i64: 32, 1>}, {pipeline_mode = #tpu.pipeline_mode<synchronous>, transform_indices = @transform_3, window_bounds = array<i64: 32, 1>}, {pipeline_mode = #tpu.pipeline_mode<synchronous>, transform_indices = @transform_4, window_bounds = array<i64: 32, 1>}, {transform_indices = @transform_5, window_bounds = array<i64: 1, 32, 4>}]} {
    %c0 = arith.constant 0 : index
    %c0_0 = arith.constant 0 : index
    %c0_1 = arith.constant 0 : index
    %0 = vector.load %arg1[%c0, %c0_0, %c0_1] : memref<1x1152x4xf32, #tpu.memory_space<vmem>>, vector<1x1152x4xf32>
    %1 = vector.shape_cast %0 : vector<1x1152x4xf32> to vector<1152x4xf32>
    %c0_2 = arith.constant 0 : index
    %c0_3 = arith.constant 0 : index
    %2 = vector.load %arg2[%c0_2, %c0_3] : memref<32x1152xf32, #tpu.memory_space<vmem>>, vector<32x1152xf32>
    %cst = arith.constant dense<0.000000e+00> : vector<32x4xf32>
    %3 = tpu.matmul %2, %1, %cst {dimension_numbers = #tpu.dot_dimension_numbers<[1], [0], [0], [1], [0, 0, 1, 1], [], []>} : vector<32x1152xf32>, vector<1152x4xf32>, vector<32x4xf32> -> vector<32x4xf32>
    %c0_4 = arith.constant 0 : index
    %c0_5 = arith.constant 0 : index
    %4 = vector.load %arg3[%c0_4, %c0_5] : memref<32x1xf32, #tpu.memory_space<vmem>>, vector<32x1xf32>
    %5 = vector.broadcast %4 : vector<32x1xf32> to vector<32x4xf32>
    %6 = arith.addf %3, %5 : vector<32x4xf32>
    %7 = vector.shape_cast %6 : vector<32x4xf32> to vector<1x32x4xf32>
    %cst_6 = arith.constant dense<0.000000e+00> : vector<1xf32>
    %8 = vector.multi_reduction <add>, %7, %cst_6 [1, 2] : vector<1x32x4xf32> to vector<1xf32>
    %9 = vector.shape_cast %8 : vector<1xf32> to vector<1x1x1xf32>
    %10 = vector.extract %9[0, 0, 0] : f32 from vector<1x1x1xf32>
    %11 = arith.mulf %6, %6 : vector<32x4xf32>
    %12 = vector.shape_cast %11 : vector<32x4xf32> to vector<1x32x4xf32>
    %cst_7 = arith.constant dense<0.000000e+00> : vector<1xf32>
    %13 = vector.multi_reduction <add>, %12, %cst_7 [1, 2] : vector<1x32x4xf32> to vector<1xf32>
    %14 = vector.shape_cast %13 : vector<1xf32> to vector<1x1x1xf32>
    %15 = vector.extract %14[0, 0, 0] : f32 from vector<1x1x1xf32>
    %cst_8 = arith.constant 7.812500e-03 : f32
    %16 = arith.mulf %10, %cst_8 : f32
    %cst_9 = arith.constant 7.812500e-03 : f32
    %17 = arith.mulf %15, %cst_9 : f32
    %18 = arith.mulf %16, %16 : f32
    %19 = arith.subf %17, %18 : f32
    %cst_10 = arith.constant 0.000000e+00 : f32
    %20 = arith.maximumf %19, %cst_10 : f32
    %21 = vector.broadcast %16 : f32 to vector<32x4xf32>
    %22 = arith.subf %6, %21 : vector<32x4xf32>
    %cst_11 = arith.constant 9.99999974E-6 : f32
    %23 = arith.addf %20, %cst_11 : f32
    %24 = math.rsqrt %23 : f32
    %25 = vector.broadcast %24 : f32 to vector<32x4xf32>
    %26 = arith.mulf %22, %25 : vector<32x4xf32>
    %c0_12 = arith.constant 0 : index
    %c0_13 = arith.constant 0 : index
    %27 = vector.load %arg4[%c0_12, %c0_13] : memref<32x1xf32, #tpu.memory_space<vmem>>, vector<32x1xf32>
    %28 = vector.broadcast %27 : vector<32x1xf32> to vector<32x4xf32>
    %29 = arith.mulf %26, %28 : vector<32x4xf32>
    %c0_14 = arith.constant 0 : index
    %c0_15 = arith.constant 0 : index
    %30 = vector.load %arg5[%c0_14, %c0_15] : memref<32x1xf32, #tpu.memory_space<vmem>>, vector<32x1xf32>
    %31 = vector.broadcast %30 : vector<32x1xf32> to vector<32x4xf32>
    %32 = arith.addf %29, %31 : vector<32x4xf32>
    %cst_16 = arith.constant 0.000000e+00 : f32
    %33 = vector.broadcast %cst_16 : f32 to vector<32x4xf32>
    %34 = arith.maximumf %32, %33 : vector<32x4xf32>
    %c0_17 = arith.constant 0 : index
    %c0_18 = arith.constant 0 : index
    %c0_19 = arith.constant 0 : index
    %35 = vector.load %arg6[%c0_17, %c0_18, %c0_19] : memref<1x32x4xf32, #tpu.memory_space<vmem>>, vector<1x32x4xf32>
    %36 = vector.shape_cast %35 : vector<1x32x4xf32> to vector<32x4xf32>
    %37 = vector.shape_cast %34 : vector<32x4xf32> to vector<1x32x4xf32>
    tpu.vector_store %arg6[%c0_17, %c0_18, %c0_19], %37 {strides = array<i32>} : memref<1x32x4xf32, #tpu.memory_space<vmem>>, vector<1x32x4xf32>,
    return
  }
  func.func @transform_0(%arg0: i32) -> (i32, i32, i32) {
    %c0_i32 = arith.constant 0 : i32
    %c0_i32_0 = arith.constant 0 : i32
    %c0_i32_1 = arith.constant 0 : i32
    return %arg0, %c0_i32, %c0_i32_0 : i32, i32, i32
  }
  func.func @transform_1(%arg0: i32) -> (i32, i32) {
    %c0_i32 = arith.constant 0 : i32
    %c0_i32_0 = arith.constant 0 : i32
    %c0_i32_1 = arith.constant 0 : i32
    return %c0_i32, %c0_i32_0 : i32, i32
  }
  func.func @transform_2(%arg0: i32) -> (i32, i32) {
    %c0_i32 = arith.constant 0 : i32
    %c0_i32_0 = arith.constant 0 : i32
    %c0_i32_1 = arith.constant 0 : i32
    return %c0_i32, %c0_i32_0 : i32, i32
  }
  func.func @transform_3(%arg0: i32) -> (i32, i32) {
    %c0_i32 = arith.constant 0 : i32
    %c0_i32_0 = arith.constant 0 : i32
    %c0_i32_1 = arith.constant 0 : i32
    return %c0_i32, %c0_i32_0 : i32, i32
  }
  func.func @transform_4(%arg0: i32) -> (i32, i32) {
    %c0_i32 = arith.constant 0 : i32
    %c0_i32_0 = arith.constant 0 : i32
    %c0_i32_1 = arith.constant 0 : i32
    return %c0_i32, %c0_i32_0 : i32, i32
  }
  func.func @transform_5(%arg0: i32) -> (i32, i32, i32) {
    %c0_i32 = arith.constant 0 : i32
    %c0_i32_0 = arith.constant 0 : i32
    %c0_i32_1 = arith.constant 0 : i32
    return %arg0, %c0_i32, %c0_i32_0 : i32, i32, i32
  }
}

module attributes {stable_mosaic.version = 11 : i64} {
  func.func @kernel(%arg0: i32, %arg1: memref<1x576x16xf32, #tpu.memory_space<vmem>>, %arg2: memref<32x576xf32, #tpu.memory_space<vmem>>, %arg3: memref<32x1xf32, #tpu.memory_space<vmem>>, %arg4: memref<32x1xf32, #tpu.memory_space<vmem>>, %arg5: memref<32x1xf32, #tpu.memory_space<vmem>>, %arg6: memref<1x32x16xf32, #tpu.memory_space<vmem>>) attributes {dimension_semantics = [#tpu.dimension_semantics<parallel>], iteration_bounds = array<i64: 2>, scalar_prefetch = 0 : i64, scratch_operands = 0 : i64, tpu.core_type = #tpu.core_type<tc>, window_params = [{transform_indices = @transform_0, window_bounds = array<i64: 1, 576, 16>}, {pipeline_mode = #tpu.pipeline_mode<synchronous>, transform_indices = @transform_1, window_bounds = array<i64: 32, 576>}, {pipeline_mode = #tpu.pipeline_mode<synchronous>, transform_indices = @transform_2, window_bounds = array<i64: 32, 1>}, {pipeline_mode = #tpu.pipeline_mode<synchronous>, transform_indices = @transform_3, window_bounds = array<i64: 32, 1>}, {pipeline_mode = #tpu.pipeline_mode<synchronous>, transform_indices = @transform_4, window_bounds = array<i64: 32, 1>}, {transform_indices = @transform_5, window_bounds = array<i64: 1, 32, 16>}]} {
    %c0 = arith.constant 0 : index
    %c0_0 = arith.constant 0 : index
    %c0_1 = arith.constant 0 : index
    %0 = vector.load %arg1[%c0, %c0_0, %c0_1] : memref<1x576x16xf32, #tpu.memory_space<vmem>>, vector<1x576x16xf32>
    %1 = vector.shape_cast %0 : vector<1x576x16xf32> to vector<576x16xf32>
    %c0_2 = arith.constant 0 : index
    %c0_3 = arith.constant 0 : index
    %2 = vector.load %arg2[%c0_2, %c0_3] : memref<32x576xf32, #tpu.memory_space<vmem>>, vector<32x576xf32>
    %cst = arith.constant dense<0.000000e+00> : vector<32x16xf32>
    %3 = tpu.matmul %2, %1, %cst {dimension_numbers = #tpu.dot_dimension_numbers<[1], [0], [0], [1], [0, 0, 1, 1], [], []>} : vector<32x576xf32>, vector<576x16xf32>, vector<32x16xf32> -> vector<32x16xf32>
    %c0_4 = arith.constant 0 : index
    %c0_5 = arith.constant 0 : index
    %4 = vector.load %arg3[%c0_4, %c0_5] : memref<32x1xf32, #tpu.memory_space<vmem>>, vector<32x1xf32>
    %5 = vector.broadcast %4 : vector<32x1xf32> to vector<32x16xf32>
    %6 = arith.addf %3, %5 : vector<32x16xf32>
    %7 = vector.shape_cast %6 : vector<32x16xf32> to vector<1x32x16xf32>
    %cst_6 = arith.constant dense<0.000000e+00> : vector<1xf32>
    %8 = vector.multi_reduction <add>, %7, %cst_6 [1, 2] : vector<1x32x16xf32> to vector<1xf32>
    %9 = vector.shape_cast %8 : vector<1xf32> to vector<1x1x1xf32>
    %10 = vector.extract %9[0, 0, 0] : f32 from vector<1x1x1xf32>
    %11 = arith.mulf %6, %6 : vector<32x16xf32>
    %12 = vector.shape_cast %11 : vector<32x16xf32> to vector<1x32x16xf32>
    %cst_7 = arith.constant dense<0.000000e+00> : vector<1xf32>
    %13 = vector.multi_reduction <add>, %12, %cst_7 [1, 2] : vector<1x32x16xf32> to vector<1xf32>
    %14 = vector.shape_cast %13 : vector<1xf32> to vector<1x1x1xf32>
    %15 = vector.extract %14[0, 0, 0] : f32 from vector<1x1x1xf32>
    %cst_8 = arith.constant 0.001953125 : f32
    %16 = arith.mulf %10, %cst_8 : f32
    %cst_9 = arith.constant 0.001953125 : f32
    %17 = arith.mulf %15, %cst_9 : f32
    %18 = arith.mulf %16, %16 : f32
    %19 = arith.subf %17, %18 : f32
    %cst_10 = arith.constant 0.000000e+00 : f32
    %20 = arith.maximumf %19, %cst_10 : f32
    %21 = vector.broadcast %16 : f32 to vector<32x16xf32>
    %22 = arith.subf %6, %21 : vector<32x16xf32>
    %cst_11 = arith.constant 9.99999974E-6 : f32
    %23 = arith.addf %20, %cst_11 : f32
    %24 = math.rsqrt %23 : f32
    %25 = vector.broadcast %24 : f32 to vector<32x16xf32>
    %26 = arith.mulf %22, %25 : vector<32x16xf32>
    %c0_12 = arith.constant 0 : index
    %c0_13 = arith.constant 0 : index
    %27 = vector.load %arg4[%c0_12, %c0_13] : memref<32x1xf32, #tpu.memory_space<vmem>>, vector<32x1xf32>
    %28 = vector.broadcast %27 : vector<32x1xf32> to vector<32x16xf32>
    %29 = arith.mulf %26, %28 : vector<32x16xf32>
    %c0_14 = arith.constant 0 : index
    %c0_15 = arith.constant 0 : index
    %30 = vector.load %arg5[%c0_14, %c0_15] : memref<32x1xf32, #tpu.memory_space<vmem>>, vector<32x1xf32>
    %31 = vector.broadcast %30 : vector<32x1xf32> to vector<32x16xf32>
    %32 = arith.addf %29, %31 : vector<32x16xf32>
    %cst_16 = arith.constant 0.000000e+00 : f32
    %33 = vector.broadcast %cst_16 : f32 to vector<32x16xf32>
    %34 = arith.maximumf %32, %33 : vector<32x16xf32>
    %c0_17 = arith.constant 0 : index
    %c0_18 = arith.constant 0 : index
    %c0_19 = arith.constant 0 : index
    %35 = vector.load %arg6[%c0_17, %c0_18, %c0_19] : memref<1x32x16xf32, #tpu.memory_space<vmem>>, vector<1x32x16xf32>
    %36 = vector.shape_cast %35 : vector<1x32x16xf32> to vector<32x16xf32>
    %37 = vector.shape_cast %34 : vector<32x16xf32> to vector<1x32x16xf32>
    tpu.vector_store %arg6[%c0_17, %c0_18, %c0_19], %37 {strides = array<i32>} : memref<1x32x16xf32, #tpu.memory_space<vmem>>, vector<1x32x16xf32>,
    return
  }
  func.func @transform_0(%arg0: i32) -> (i32, i32, i32) {
    %c0_i32 = arith.constant 0 : i32
    %c0_i32_0 = arith.constant 0 : i32
    %c0_i32_1 = arith.constant 0 : i32
    return %arg0, %c0_i32, %c0_i32_0 : i32, i32, i32
  }
  func.func @transform_1(%arg0: i32) -> (i32, i32) {
    %c0_i32 = arith.constant 0 : i32
    %c0_i32_0 = arith.constant 0 : i32
    %c0_i32_1 = arith.constant 0 : i32
    return %c0_i32, %c0_i32_0 : i32, i32
  }
  func.func @transform_2(%arg0: i32) -> (i32, i32) {
    %c0_i32 = arith.constant 0 : i32
    %c0_i32_0 = arith.constant 0 : i32
    %c0_i32_1 = arith.constant 0 : i32
    return %c0_i32, %c0_i32_0 : i32, i32
  }
  func.func @transform_3(%arg0: i32) -> (i32, i32) {
    %c0_i32 = arith.constant 0 : i32
    %c0_i32_0 = arith.constant 0 : i32
    %c0_i32_1 = arith.constant 0 : i32
    return %c0_i32, %c0_i32_0 : i32, i32
  }
  func.func @transform_4(%arg0: i32) -> (i32, i32) {
    %c0_i32 = arith.constant 0 : i32
    %c0_i32_0 = arith.constant 0 : i32
    %c0_i32_1 = arith.constant 0 : i32
    return %c0_i32, %c0_i32_0 : i32, i32
  }
  func.func @transform_5(%arg0: i32) -> (i32, i32, i32) {
    %c0_i32 = arith.constant 0 : i32
    %c0_i32_0 = arith.constant 0 : i32
    %c0_i32_1 = arith.constant 0 : i32
    return %arg0, %c0_i32, %c0_i32_0 : i32, i32, i32
  }
}

module attributes {stable_mosaic.version = 11 : i64} {
  func.func @kernel(%arg0: i32, %arg1: memref<1x576x64xf32, #tpu.memory_space<vmem>>, %arg2: memref<32x576xf32, #tpu.memory_space<vmem>>, %arg3: memref<32x1xf32, #tpu.memory_space<vmem>>, %arg4: memref<32x1xf32, #tpu.memory_space<vmem>>, %arg5: memref<32x1xf32, #tpu.memory_space<vmem>>, %arg6: memref<1x32x64xf32, #tpu.memory_space<vmem>>) attributes {dimension_semantics = [#tpu.dimension_semantics<parallel>], iteration_bounds = array<i64: 2>, scalar_prefetch = 0 : i64, scratch_operands = 0 : i64, tpu.core_type = #tpu.core_type<tc>, window_params = [{transform_indices = @transform_0, window_bounds = array<i64: 1, 576, 64>}, {pipeline_mode = #tpu.pipeline_mode<synchronous>, transform_indices = @transform_1, window_bounds = array<i64: 32, 576>}, {pipeline_mode = #tpu.pipeline_mode<synchronous>, transform_indices = @transform_2, window_bounds = array<i64: 32, 1>}, {pipeline_mode = #tpu.pipeline_mode<synchronous>, transform_indices = @transform_3, window_bounds = array<i64: 32, 1>}, {pipeline_mode = #tpu.pipeline_mode<synchronous>, transform_indices = @transform_4, window_bounds = array<i64: 32, 1>}, {transform_indices = @transform_5, window_bounds = array<i64: 1, 32, 64>}]} {
    %c0 = arith.constant 0 : index
    %c0_0 = arith.constant 0 : index
    %c0_1 = arith.constant 0 : index
    %0 = vector.load %arg1[%c0, %c0_0, %c0_1] : memref<1x576x64xf32, #tpu.memory_space<vmem>>, vector<1x576x64xf32>
    %1 = vector.shape_cast %0 : vector<1x576x64xf32> to vector<576x64xf32>
    %c0_2 = arith.constant 0 : index
    %c0_3 = arith.constant 0 : index
    %2 = vector.load %arg2[%c0_2, %c0_3] : memref<32x576xf32, #tpu.memory_space<vmem>>, vector<32x576xf32>
    %cst = arith.constant dense<0.000000e+00> : vector<32x64xf32>
    %3 = tpu.matmul %2, %1, %cst {dimension_numbers = #tpu.dot_dimension_numbers<[1], [0], [0], [1], [0, 0, 1, 1], [], []>} : vector<32x576xf32>, vector<576x64xf32>, vector<32x64xf32> -> vector<32x64xf32>
    %c0_4 = arith.constant 0 : index
    %c0_5 = arith.constant 0 : index
    %4 = vector.load %arg3[%c0_4, %c0_5] : memref<32x1xf32, #tpu.memory_space<vmem>>, vector<32x1xf32>
    %5 = vector.broadcast %4 : vector<32x1xf32> to vector<32x64xf32>
    %6 = arith.addf %3, %5 : vector<32x64xf32>
    %7 = vector.shape_cast %6 : vector<32x64xf32> to vector<1x32x64xf32>
    %cst_6 = arith.constant dense<0.000000e+00> : vector<1xf32>
    %8 = vector.multi_reduction <add>, %7, %cst_6 [1, 2] : vector<1x32x64xf32> to vector<1xf32>
    %9 = vector.shape_cast %8 : vector<1xf32> to vector<1x1x1xf32>
    %10 = vector.extract %9[0, 0, 0] : f32 from vector<1x1x1xf32>
    %11 = arith.mulf %6, %6 : vector<32x64xf32>
    %12 = vector.shape_cast %11 : vector<32x64xf32> to vector<1x32x64xf32>
    %cst_7 = arith.constant dense<0.000000e+00> : vector<1xf32>
    %13 = vector.multi_reduction <add>, %12, %cst_7 [1, 2] : vector<1x32x64xf32> to vector<1xf32>
    %14 = vector.shape_cast %13 : vector<1xf32> to vector<1x1x1xf32>
    %15 = vector.extract %14[0, 0, 0] : f32 from vector<1x1x1xf32>
    %cst_8 = arith.constant 4.8828125E-4 : f32
    %16 = arith.mulf %10, %cst_8 : f32
    %cst_9 = arith.constant 4.8828125E-4 : f32
    %17 = arith.mulf %15, %cst_9 : f32
    %18 = arith.mulf %16, %16 : f32
    %19 = arith.subf %17, %18 : f32
    %cst_10 = arith.constant 0.000000e+00 : f32
    %20 = arith.maximumf %19, %cst_10 : f32
    %21 = vector.broadcast %16 : f32 to vector<32x64xf32>
    %22 = arith.subf %6, %21 : vector<32x64xf32>
    %cst_11 = arith.constant 9.99999974E-6 : f32
    %23 = arith.addf %20, %cst_11 : f32
    %24 = math.rsqrt %23 : f32
    %25 = vector.broadcast %24 : f32 to vector<32x64xf32>
    %26 = arith.mulf %22, %25 : vector<32x64xf32>
    %c0_12 = arith.constant 0 : index
    %c0_13 = arith.constant 0 : index
    %27 = vector.load %arg4[%c0_12, %c0_13] : memref<32x1xf32, #tpu.memory_space<vmem>>, vector<32x1xf32>
    %28 = vector.broadcast %27 : vector<32x1xf32> to vector<32x64xf32>
    %29 = arith.mulf %26, %28 : vector<32x64xf32>
    %c0_14 = arith.constant 0 : index
    %c0_15 = arith.constant 0 : index
    %30 = vector.load %arg5[%c0_14, %c0_15] : memref<32x1xf32, #tpu.memory_space<vmem>>, vector<32x1xf32>
    %31 = vector.broadcast %30 : vector<32x1xf32> to vector<32x64xf32>
    %32 = arith.addf %29, %31 : vector<32x64xf32>
    %cst_16 = arith.constant 0.000000e+00 : f32
    %33 = vector.broadcast %cst_16 : f32 to vector<32x64xf32>
    %34 = arith.maximumf %32, %33 : vector<32x64xf32>
    %c0_17 = arith.constant 0 : index
    %c0_18 = arith.constant 0 : index
    %c0_19 = arith.constant 0 : index
    %35 = vector.load %arg6[%c0_17, %c0_18, %c0_19] : memref<1x32x64xf32, #tpu.memory_space<vmem>>, vector<1x32x64xf32>
    %36 = vector.shape_cast %35 : vector<1x32x64xf32> to vector<32x64xf32>
    %37 = vector.shape_cast %34 : vector<32x64xf32> to vector<1x32x64xf32>
    tpu.vector_store %arg6[%c0_17, %c0_18, %c0_19], %37 {strides = array<i32>} : memref<1x32x64xf32, #tpu.memory_space<vmem>>, vector<1x32x64xf32>,
    return
  }
  func.func @transform_0(%arg0: i32) -> (i32, i32, i32) {
    %c0_i32 = arith.constant 0 : i32
    %c0_i32_0 = arith.constant 0 : i32
    %c0_i32_1 = arith.constant 0 : i32
    return %arg0, %c0_i32, %c0_i32_0 : i32, i32, i32
  }
  func.func @transform_1(%arg0: i32) -> (i32, i32) {
    %c0_i32 = arith.constant 0 : i32
    %c0_i32_0 = arith.constant 0 : i32
    %c0_i32_1 = arith.constant 0 : i32
    return %c0_i32, %c0_i32_0 : i32, i32
  }
  func.func @transform_2(%arg0: i32) -> (i32, i32) {
    %c0_i32 = arith.constant 0 : i32
    %c0_i32_0 = arith.constant 0 : i32
    %c0_i32_1 = arith.constant 0 : i32
    return %c0_i32, %c0_i32_0 : i32, i32
  }
  func.func @transform_3(%arg0: i32) -> (i32, i32) {
    %c0_i32 = arith.constant 0 : i32
    %c0_i32_0 = arith.constant 0 : i32
    %c0_i32_1 = arith.constant 0 : i32
    return %c0_i32, %c0_i32_0 : i32, i32
  }
  func.func @transform_4(%arg0: i32) -> (i32, i32) {
    %c0_i32 = arith.constant 0 : i32
    %c0_i32_0 = arith.constant 0 : i32
    %c0_i32_1 = arith.constant 0 : i32
    return %c0_i32, %c0_i32_0 : i32, i32
  }
  func.func @transform_5(%arg0: i32) -> (i32, i32, i32) {
    %c0_i32 = arith.constant 0 : i32
    %c0_i32_0 = arith.constant 0 : i32
    %c0_i32_1 = arith.constant 0 : i32
    return %arg0, %c0_i32, %c0_i32_0 : i32, i32, i32
  }
}

module attributes {stable_mosaic.version = 11 : i64} {
  func.func @kernel(%arg0: i32, %arg1: memref<1x576x256xf32, #tpu.memory_space<vmem>>, %arg2: memref<32x576xf32, #tpu.memory_space<vmem>>, %arg3: memref<32x1xf32, #tpu.memory_space<vmem>>, %arg4: memref<32x1xf32, #tpu.memory_space<vmem>>, %arg5: memref<32x1xf32, #tpu.memory_space<vmem>>, %arg6: memref<8x32xf32, #tpu.memory_space<vmem>>, %arg7: memref<8x1xf32, #tpu.memory_space<vmem>>, %arg8: memref<1x8x256xf32, #tpu.memory_space<vmem>>) attributes {dimension_semantics = [#tpu.dimension_semantics<parallel>], iteration_bounds = array<i64: 2>, scalar_prefetch = 0 : i64, scratch_operands = 0 : i64, tpu.core_type = #tpu.core_type<tc>, window_params = [{transform_indices = @transform_0, window_bounds = array<i64: 1, 576, 256>}, {pipeline_mode = #tpu.pipeline_mode<synchronous>, transform_indices = @transform_1, window_bounds = array<i64: 32, 576>}, {pipeline_mode = #tpu.pipeline_mode<synchronous>, transform_indices = @transform_2, window_bounds = array<i64: 32, 1>}, {pipeline_mode = #tpu.pipeline_mode<synchronous>, transform_indices = @transform_3, window_bounds = array<i64: 32, 1>}, {pipeline_mode = #tpu.pipeline_mode<synchronous>, transform_indices = @transform_4, window_bounds = array<i64: 32, 1>}, {pipeline_mode = #tpu.pipeline_mode<synchronous>, transform_indices = @transform_5, window_bounds = array<i64: 8, 32>}, {pipeline_mode = #tpu.pipeline_mode<synchronous>, transform_indices = @transform_6, window_bounds = array<i64: 8, 1>}, {transform_indices = @transform_7, window_bounds = array<i64: 1, 8, 256>}]} {
    %c0 = arith.constant 0 : index
    %c0_0 = arith.constant 0 : index
    %c0_1 = arith.constant 0 : index
    %0 = vector.load %arg1[%c0, %c0_0, %c0_1] : memref<1x576x256xf32, #tpu.memory_space<vmem>>, vector<1x576x256xf32>
    %1 = vector.shape_cast %0 : vector<1x576x256xf32> to vector<576x256xf32>
    %c0_2 = arith.constant 0 : index
    %c0_3 = arith.constant 0 : index
    %2 = vector.load %arg2[%c0_2, %c0_3] : memref<32x576xf32, #tpu.memory_space<vmem>>, vector<32x576xf32>
    %cst = arith.constant dense<0.000000e+00> : vector<32x256xf32>
    %3 = tpu.matmul %2, %1, %cst {dimension_numbers = #tpu.dot_dimension_numbers<[1], [0], [0], [1], [0, 0, 1, 1], [], []>} : vector<32x576xf32>, vector<576x256xf32>, vector<32x256xf32> -> vector<32x256xf32>
    %c0_4 = arith.constant 0 : index
    %c0_5 = arith.constant 0 : index
    %4 = vector.load %arg3[%c0_4, %c0_5] : memref<32x1xf32, #tpu.memory_space<vmem>>, vector<32x1xf32>
    %5 = vector.broadcast %4 : vector<32x1xf32> to vector<32x256xf32>
    %6 = arith.addf %3, %5 : vector<32x256xf32>
    %7 = vector.shape_cast %6 : vector<32x256xf32> to vector<1x32x256xf32>
    %cst_6 = arith.constant dense<0.000000e+00> : vector<1xf32>
    %8 = vector.multi_reduction <add>, %7, %cst_6 [1, 2] : vector<1x32x256xf32> to vector<1xf32>
    %9 = vector.shape_cast %8 : vector<1xf32> to vector<1x1x1xf32>
    %10 = vector.extract %9[0, 0, 0] : f32 from vector<1x1x1xf32>
    %11 = arith.mulf %6, %6 : vector<32x256xf32>
    %12 = vector.shape_cast %11 : vector<32x256xf32> to vector<1x32x256xf32>
    %cst_7 = arith.constant dense<0.000000e+00> : vector<1xf32>
    %13 = vector.multi_reduction <add>, %12, %cst_7 [1, 2] : vector<1x32x256xf32> to vector<1xf32>
    %14 = vector.shape_cast %13 : vector<1xf32> to vector<1x1x1xf32>
    %15 = vector.extract %14[0, 0, 0] : f32 from vector<1x1x1xf32>
    %cst_8 = arith.constant 1.22070313E-4 : f32
    %16 = arith.mulf %10, %cst_8 : f32
    %cst_9 = arith.constant 1.22070313E-4 : f32
    %17 = arith.mulf %15, %cst_9 : f32
    %18 = arith.mulf %16, %16 : f32
    %19 = arith.subf %17, %18 : f32
    %cst_10 = arith.constant 0.000000e+00 : f32
    %20 = arith.maximumf %19, %cst_10 : f32
    %21 = vector.broadcast %16 : f32 to vector<32x256xf32>
    %22 = arith.subf %6, %21 : vector<32x256xf32>
    %cst_11 = arith.constant 9.99999974E-6 : f32
    %23 = arith.addf %20, %cst_11 : f32
    %24 = math.rsqrt %23 : f32
    %25 = vector.broadcast %24 : f32 to vector<32x256xf32>
    %26 = arith.mulf %22, %25 : vector<32x256xf32>
    %c0_12 = arith.constant 0 : index
    %c0_13 = arith.constant 0 : index
    %27 = vector.load %arg4[%c0_12, %c0_13] : memref<32x1xf32, #tpu.memory_space<vmem>>, vector<32x1xf32>
    %28 = vector.broadcast %27 : vector<32x1xf32> to vector<32x256xf32>
    %29 = arith.mulf %26, %28 : vector<32x256xf32>
    %c0_14 = arith.constant 0 : index
    %c0_15 = arith.constant 0 : index
    %30 = vector.load %arg5[%c0_14, %c0_15] : memref<32x1xf32, #tpu.memory_space<vmem>>, vector<32x1xf32>
    %31 = vector.broadcast %30 : vector<32x1xf32> to vector<32x256xf32>
    %32 = arith.addf %29, %31 : vector<32x256xf32>
    %cst_16 = arith.constant 0.000000e+00 : f32
    %33 = vector.broadcast %cst_16 : f32 to vector<32x256xf32>
    %34 = arith.maximumf %32, %33 : vector<32x256xf32>
    %c0_17 = arith.constant 0 : index
    %c0_18 = arith.constant 0 : index
    %35 = vector.load %arg6[%c0_17, %c0_18] : memref<8x32xf32, #tpu.memory_space<vmem>>, vector<8x32xf32>
    %cst_19 = arith.constant dense<0.000000e+00> : vector<8x256xf32>
    %36 = tpu.matmul %35, %34, %cst_19 {dimension_numbers = #tpu.dot_dimension_numbers<[1], [0], [0], [1], [0, 0, 1, 1], [], []>} : vector<8x32xf32>, vector<32x256xf32>, vector<8x256xf32> -> vector<8x256xf32>
    %c0_20 = arith.constant 0 : index
    %c0_21 = arith.constant 0 : index
    %37 = vector.load %arg7[%c0_20, %c0_21] : memref<8x1xf32, #tpu.memory_space<vmem>>, vector<8x1xf32>
    %38 = vector.broadcast %37 : vector<8x1xf32> to vector<8x256xf32>
    %39 = arith.addf %36, %38 : vector<8x256xf32>
    %c0_22 = arith.constant 0 : index
    %c0_23 = arith.constant 0 : index
    %c0_24 = arith.constant 0 : index
    %40 = vector.load %arg8[%c0_22, %c0_23, %c0_24] : memref<1x8x256xf32, #tpu.memory_space<vmem>>, vector<1x8x256xf32>
    %41 = vector.shape_cast %40 : vector<1x8x256xf32> to vector<8x256xf32>
    %42 = vector.shape_cast %39 : vector<8x256xf32> to vector<1x8x256xf32>
    tpu.vector_store %arg8[%c0_22, %c0_23, %c0_24], %42 {strides = array<i32>} : memref<1x8x256xf32, #tpu.memory_space<vmem>>, vector<1x8x256xf32>,
    return
  }
  func.func @transform_0(%arg0: i32) -> (i32, i32, i32) {
    %c0_i32 = arith.constant 0 : i32
    %c0_i32_0 = arith.constant 0 : i32
    %c0_i32_1 = arith.constant 0 : i32
    return %arg0, %c0_i32, %c0_i32_0 : i32, i32, i32
  }
  func.func @transform_1(%arg0: i32) -> (i32, i32) {
    %c0_i32 = arith.constant 0 : i32
    %c0_i32_0 = arith.constant 0 : i32
    %c0_i32_1 = arith.constant 0 : i32
    return %c0_i32, %c0_i32_0 : i32, i32
  }
  func.func @transform_2(%arg0: i32) -> (i32, i32) {
    %c0_i32 = arith.constant 0 : i32
    %c0_i32_0 = arith.constant 0 : i32
    %c0_i32_1 = arith.constant 0 : i32
    return %c0_i32, %c0_i32_0 : i32, i32
  }
  func.func @transform_3(%arg0: i32) -> (i32, i32) {
    %c0_i32 = arith.constant 0 : i32
    %c0_i32_0 = arith.constant 0 : i32
    %c0_i32_1 = arith.constant 0 : i32
    return %c0_i32, %c0_i32_0 : i32, i32
  }
  func.func @transform_4(%arg0: i32) -> (i32, i32) {
    %c0_i32 = arith.constant 0 : i32
    %c0_i32_0 = arith.constant 0 : i32
    %c0_i32_1 = arith.constant 0 : i32
    return %c0_i32, %c0_i32_0 : i32, i32
  }
  func.func @transform_5(%arg0: i32) -> (i32, i32) {
    %c0_i32 = arith.constant 0 : i32
    %c0_i32_0 = arith.constant 0 : i32
    %c0_i32_1 = arith.constant 0 : i32
    return %c0_i32, %c0_i32_0 : i32, i32
  }
  func.func @transform_6(%arg0: i32) -> (i32, i32) {
    %c0_i32 = arith.constant 0 : i32
    %c0_i32_0 = arith.constant 0 : i32
    %c0_i32_1 = arith.constant 0 : i32
    return %c0_i32, %c0_i32_0 : i32, i32
  }
  func.func @transform_7(%arg0: i32) -> (i32, i32, i32) {
    %c0_i32 = arith.constant 0 : i32
    %c0_i32_0 = arith.constant 0 : i32
    %c0_i32_1 = arith.constant 0 : i32
    return %arg0, %c0_i32, %c0_i32_0 : i32, i32, i32
  }
}

</mosaic_0001>

<bundles_post_ra>
// kernel: tpu_custom_call.1
= control target key start
LH: loop header
LB: loop body
LE: loop exit
PB: predicated region body
PF: predicated region fallthrough
CT: control target
= control target key end

     0   :  { %6 = vsyncpa [#allocation3], 0  ;;  %s128_s0 = inlined_call_operand.hbm [shape: f32[8,128], index: 0, kind: input, shape index: {}]   ;;  %s129_s1 = inlined_call_operand.hbm [shape: f32[8,128], index: 1, kind: output, shape index: {}]  }
   0x1   :  { %7 = vsyncpa [#allocation4], 0  ;;  %s91_s6 = smov [#allocation2]   ;;  %s43_s10 = scalar_lea.hbm %s128_s0, 128 }
   0x2   :  { %s14_s7 = sshll.u32 %s91_s6, 4  ;;  %p44_p0 = scmp.ne.s32.totalorder %s128_s0, %s43_s10  ;;  %s15_s7 = int_to_ptr.vmem [resolvable:$true] %s14_s7 }
   0x3   :  { %p47_p1 = scmp.lt.u32.totalorder %s43_s10, %s128_s0 }
   0x5   :  { %p49_p2 = pnand %p47_p1, %p44_p0 }
   0x7   :  { %52 = shalt.err (!%p49_p2)
}
   0x8   :  { %s53_s15 = scalar_lea.vmem %s15_s7, 128  ;;  %p58_p4 = scmp.lt.s32.totalorder %s15_s7, %s15_s7 }
   0x9   :  { %p54_p3 = scmp.ne.s32.totalorder %s15_s7, %s53_s15  ;;  %p59_p5 = scmp.lt.s32.totalorder %s53_s15, %s53_s15 }
   0xb   :  { %p60_p6 = por %p59_p5, %p58_p4 }
   0xd   :  { %p61_p7 = pnand %p60_p6, %p54_p3 }
   0xf   :  { %64 = shalt.err (!%p61_p7)
}
  0x10   :  { %17 = dma.hbm_to_vmem [thread:$0]  %s128_s0, 128, %s15_s7, [#allocation3]  }
  0x11   :  { %87 = dma.done.wait [#allocation3], 128  }
  0x12   :  { %88 = vsyncadd [#allocation3], 4294967168  ;;  %v21_v0 = vld [vmem:[#allocation2] sm:$0xff]  ;;  %s92_s18 = smov 1   ;;  %s93_s19 = smov [#allocation5]  }
  0x13   :  { %22 = vrot.lane.b32.xlu0 %v21_v0, %s92_s18  ;;  %s31_s20 = sshll.u32 %s93_s19, 4  ;;  %s32_s20 = int_to_ptr.vmem [resolvable:$true] %s31_s20 }
  0x14   :  { %s65_s21 = scalar_lea.vmem %s32_s20, 128  ;;  %p70_p9 = scmp.lt.s32.totalorder %s32_s20, %s32_s20 }
  0x15   :  { %p66_p8 = scmp.ne.s32.totalorder %s32_s20, %s65_s21  ;;  %p71_p10 = scmp.lt.s32.totalorder %s65_s21, %s65_s21 }
  0x17   :  { %p72_p11 = por %p71_p10, %p70_p9 }
  0x19   :  { %p73_p12 = pnand %p72_p11, %p66_p8 }
  0x85   :  { %v23_v1 = vpop.permute.xlu0 %22 }
  0x86   :  { %24 = vst [vmem:[#allocation5] sm:$0xff] %v23_v1 }
  0x87   :  { %76 = shalt.err (!%p73_p12)
}
  0x88   :  { %s77_s0 = scalar_lea.hbm %s129_s1, 128 }
  0x89   :  { %p78_p13 = scmp.ne.s32.totalorder %s129_s1, %s77_s0  ;;  %p81_p0 = scmp.lt.u32.totalorder %s77_s0, %s129_s1 }
  0x8b   :  { %p83_p1 = pnand %p81_p0, %p78_p13 }
  0x8d   :  { %86 = shalt.err (!%p83_p1)
}
  0x8e   :  { %34 = dma.vmem_to_hbm [thread:$0]  %s32_s20, 128, %s129_s1, [#allocation4]  }
  0x8f   :  { %89 = dma.done.wait [#allocation4], 128  }
  0x90   :  { %90 = vsyncadd [#allocation4], 4294967168 }
  0x91   :  { %38 = vsyncpa [#allocation3], 1 }
  0x92   :  { %39 = vsyncpa [#allocation4], 1 }

// kernel: posterior_unet_forward.9
= control target key start
LH: loop header
LB: loop body
LE: loop exit
PB: predicated region body
PF: predicated region fallthrough
CT: control target
= control target key end

     0   :  { %s668_s18 = smov 0   ;;  %s785_s0 = inlined_call_operand.vmem [shape: f32[2,36,256], index: 0, kind: input, shape index: {}]   ;;  %s786_s1 = inlined_call_operand.vmem [shape: f32[32,36], index: 1, kind: input, shape index: {}]   ;;  %s787_s2 = inlined_call_operand.vmem [shape: f32[32,1], index: 2, kind: input, shape index: {}]   ;;  %s788_s3 = inlined_call_operand.vmem [shape: f32[32,1], index: 3, kind: input, shape index: {}]   ;;  %s789_s4 = inlined_call_operand.vmem [shape: f32[32,1], index: 4, kind: input, shape index: {}]   ;;  %s790_s5 = inlined_call_operand.vmem [shape: f32[2,32,256], index: 5, kind: output, shape index: {}]  }
   0x1 LB: > { %s574_s19 = sadd.s32 4294967295, %s633_s18   ;;  %p578_p0 = scmp.ge.s32.totalorder %s633_s18, 1  ;;  %s633_s18 = sphi %s668_s18, %s15_s18  }
   0x2   : > { %p187_p1 = scmp.lt.s32.totalorder %s633_s18, 3 }
   0x4   : > { %p188_p2 = pnand %p578_p0, %p187_p1 }
   0x5   : > { %p215_p3 = scmp.lt.s32.totalorder (!%p188_p2), %s574_s19, 1  ;;  %v635_v0 = vmov (!%p188_p2), 0.0   ;;  %v239_v1 = vld [vmem:[%s787_s2] sm:$0xff] (!%p188_p2)  ;;  %v636_v2 = vmov (!%p188_p2), 0   ;;  %v241_v3 = vld [vmem:[%s787_s2 + $0x10] sm:$0xff] (!%p188_p2)  ;;  %v240_v4 = vld [vmem:[%s787_s2 + $0x8] sm:$0xff] (!%p188_p2) }
   0x6   : > { %191 = sbr.rel (%p188_p2) target bundleno = 549 (0x225), region = 40  ;;  %347 = vmatprep.mubr.f32.mxu0 (!%p188_p2), %v635_v0  ;;  %359 = vmatprep.mubr.f32.mxu1 (!%p188_p2), %v635_v0  ;;  %v242_v5 = vld [vmem:[%s787_s2 + $0x18] sm:$0xff] (!%p188_p2)  ;;  %vm276_vm0 = vcmask (!%p188_p2), 1043456   ;;  %v235_v20 = vld [vmem:[%s786_s1] sm:$0xff] (!%p188_p2)  ;;  %vm263_vm1 = vcmask (!%p188_p2), 293888   ;;  %v237_v21 = vld [vmem:[%s786_s1 + $0x10] sm:$0xff] (!%p188_p2) }
   0x7   : > { %623 = vset.pattern.permute.xlu0 (!%p188_p2), %v636_v2  ;;  %624 = vset.pattern.permute.xlu1 (!%p188_p2), %v636_v2  ;;  %v236_v22 = vld [vmem:[%s786_s1 + $0x8] sm:$0xff] (!%p188_p2)  ;;  %v238_v23 = vld [vmem:[%s786_s1 + $0x18] sm:$0xff] (!%p188_p2)  ;;  %s637_s14 = smov (!%p188_p2), 0.0  }
   0x8   : > { %245 = vperm.xlu0 (!%p188_p2), %623, %v239_v1   ;;  %255 = vperm.xlu1 (!%p188_p2), %624, %v241_v3   ;;  %v440_v2 = vld [vmem:[%s788_s3 + $0x8] sm:$0xff] (!%p188_p2)  ;;  %v439_v3 = vld [vmem:[%s788_s3] sm:$0xff] (!%p188_p2) }
   0xc   : > { %250 = vperm.xlu0 (!%p188_p2), %623, %v240_v4   ;;  %260 = vperm.xlu1 (!%p188_p2), %624, %v242_v5   ;;  %v442_v4 = vld [vmem:[%s788_s3 + $0x18] sm:$0xff] (!%p188_p2)  ;;  %v441_v5 = vld [vmem:[%s788_s3 + $0x10] sm:$0xff] (!%p188_p2) }
   0xd   : > { %s792_s19 = smov (!%p215_p3, %s574_s19), 1 }
   0xe   : > { %s605_s24 = smul.u32 80, %s792_s19  ;;  %s590_s20 = sshll.u32 %s792_s19, 6 }
   0xf   : > { %s224_s23 = scalar_lea.vmem %s790_s5, %s590_s20 }
  0x10   : > { %s219_s6 = scalar_lea.vmem %s785_s0, %s605_s24 }
  0x11   : > { %v226_v6 = vld [vmem:[%s219_s6 + $0x8] sm:$0xff]  ;;  %v228_v7 = vld [vmem:[%s219_s6 + $0x18] sm:$0xff]  ;;  %v225_v8 = vld [vmem:[%s219_s6] sm:$0xff] }
  0x12   : > { %v591_v9 = vpack.c.bf16 %v228_v7, %v226_v6  ;;  %v227_v10 = vld [vmem:[%s219_s6 + $0x10] sm:$0xff]  ;;  %v230_v11 = vld [vmem:[%s219_s6 + $0x28] sm:$0xff]  ;;  %v232_v12 = vld [vmem:[%s219_s6 + $0x38] sm:$0xff] }
  0x13   : > { %v593_v13 = vpack.c.bf16 %v227_v10, %v225_v8  ;;  %v595_v14 = vpack.c.bf16 %v232_v12, %v230_v11  ;;  %v229_v15 = vld [vmem:[%s219_s6 + $0x20] sm:$0xff]  ;;  %v231_v16 = vld [vmem:[%s219_s6 + $0x30] sm:$0xff]  ;;  %v234_v18 = vld [vmem:[%s219_s6 + $0x48] sm:$0xf] }
  0x14   : > { %592 = vmatprep.subr.bf16.mxu0 %v591_v9  ;;  %599 = vmatprep.subr.bf16.mxu1 %v591_v9  ;;  %v597_v17 = vpack.c.bf16 %v231_v16, %v229_v15  ;;  %v233_v19 = vld [vmem:[%s219_s6 + $0x40] sm:$0xf]  ;;  %v472_v6 = vld [vmem:[%s789_s4 + $0x8] sm:$0xff]  ;;  %v474_v8 = vld [vmem:[%s789_s4 + $0x18] sm:$0xff] }
  0x15   : > { %594 = vmatpush1.bf16.msra.mxu0 %v593_v13  ;;  %602 = vmatpush1.bf16.msra.mxu1 %v593_v13  ;;  %v471_v7 = vld [vmem:[%s789_s4] sm:$0xff]  ;;  %v473_v9 = vld [vmem:[%s789_s4 + $0x10] sm:$0xff] }
  0x16   : > { %596 = vmatprep.subr.bf16.mxu0 %v595_v14  ;;  %600 = vmatprep.subr.bf16.mxu1 %v595_v14 }
  0x19   : > { %598 = vmatpush1.bf16.msra.mxu0 %v597_v17  ;;  %603 = vmatpush1.bf16.msra.mxu1 %v597_v17 }
  0x1a   : > { %582 = vmatprep.subr.msk.mxu0 %vm276_vm0, %v234_v18  ;;  %601 = vmatprep.subr.msk.mxu1 %vm276_vm0, %v234_v18 }
  0x1d   : > { %583 = vmatpush1.msk.msra.mxu0 %vm276_vm0, %v233_v19  ;;  %604 = vmatpush1.msk.msra.mxu1 %vm276_vm0, %v233_v19 }
  0x1e   : > { %584 = vmatmul.mubr.msk.f32.vlgmr.msra.gmra.mrb[0].mxu0 %vm263_vm1, %v235_v20  ;;  %586 = vmatmul.mubr.msk.f32.vlgmr.msra.gmra.mrb[0].mxu1 %vm263_vm1, %v237_v21 }
  0x1f   : > { %353 = vmatprep.mubr.f32.mxu0 %v635_v0  ;;  %365 = vmatprep.mubr.f32.mxu1 %v635_v0 }
  0x22   : > { %585 = vmatmul.mubr.msk.f32.gmra.mrb[2].mxu0 %vm263_vm1, %v236_v22  ;;  %587 = vmatmul.mubr.msk.f32.gmra.mrb[2].mxu1 %vm263_vm1, %v238_v23 }
  0x87   : > { %v246_v24 = vpop.permute.xlu0 %245  ;;  %v256_v31 = vpop.permute.xlu1 %255 }
  0x8b   : > { %v251_v32 = vpop.permute.xlu0 %250  ;;  %v261_v47 = vpop.permute.xlu1 %260 }
  0xf1   : > { %v349_v25 = vpop.f32.mrb[0].mxu0  ;;  %v361_v26 = vpop.f32.mrb[0].mxu1 }
  0xf2   : > { %v706_v27 = vadd.f32 %v349_v25, %v246_v24  ;;  %v351_v28 = vpop.f32.mrb[1].mxu0  ;;  %v363_v29 = vpop.f32.mrb[1].mxu1  ;;  %v718_v40 = vadd.f32 %v361_v26, %v256_v31 }
  0xf3   : > { %v708_v30 = vadd.f32 %v351_v28, %v246_v24  ;;  %v730_v51 = vadd.f32 %v363_v29, %v256_v31 }
  0xf4   : > { %v388_v33 = vmul.f32 %v706_v27, %v706_v27  ;;  %v392_v50 = vmul.f32 %v718_v40, %v718_v40 }
  0xf5   : > { %v372_v34 = vadd.f32 %v708_v30, %v706_v27  ;;  %v389_v35 = vmul.f32 %v708_v30, %v708_v30  ;;  %v355_v36 = vpop.f32.mrb[2].mxu0  ;;  %v367_v37 = vpop.f32.mrb[2].mxu1  ;;  %v393_v57 = vmul.f32 %v730_v51, %v730_v51 }
  0xf6   : > { %v716_v38 = vadd.f32 %v355_v36, %v251_v32  ;;  %v357_v39 = vpop.f32.mrb[3].mxu0  ;;  %v369_v41 = vpop.f32.mrb[3].mxu1  ;;  %v733_v54 = vadd.f32 %v367_v37, %v261_v47 }
  0xf7   : > { %v396_v42 = vadd.f32 %v389_v35, %v388_v33  ;;  %v720_v43 = vadd.f32 %v357_v39, %v251_v32  ;;  %v738_v58 = vadd.f32 %v369_v41, %v261_v47 }
  0xf8   : > { %v373_v44 = vadd.f32 %v372_v34, %v716_v38  ;;  %v390_v45 = vmul.f32 %v716_v38, %v716_v38  ;;  %v394_v60 = vmul.f32 %v733_v54, %v733_v54 }
  0xf9   : > { %v391_v46 = vmul.f32 %v720_v43, %v720_v43  ;;  %v395_v63 = vmul.f32 %v738_v58, %v738_v58 }
  0xfa   : > { %v397_v48 = vadd.f32 %v396_v42, %v390_v45  ;;  %v374_v49 = vadd.f32 %v373_v44, %v720_v43 }
  0xfc   : > { %v398_v52 = vadd.f32 %v397_v48, %v391_v46  ;;  %v375_v53 = vadd.f32 %v374_v49, %v718_v40 }
  0xfe   : > { %v399_v55 = vadd.f32 %v398_v52, %v392_v50  ;;  %v376_v56 = vadd.f32 %v375_v53, %v730_v51 }
 0x100   : > { %v377_v59 = vadd.f32 %v376_v56, %v733_v54  ;;  %v400_v61 = vadd.f32 %v399_v55, %v393_v57 }
 0x102   : > { %v378_v62 = vadd.f32 %v377_v59, %v738_v58  ;;  %v401_v0 = vadd.f32 %v400_v61, %v394_v60 }
 0x104   : > { %379 = vadd.xlane.f32.xlu0 %v378_v62  ;;  %v402_v1 = vadd.f32 %v401_v0, %v395_v63 }
 0x106   : > { %403 = vadd.xlane.f32.xlu1 %v402_v1 }
 0x117   : > { %450 = vperm.xlu1 %624, %v440_v2  }
 0x11a   : > { %445 = vperm.xlu0 %623, %v439_v3  }
 0x11b   : > { %460 = vperm.xlu1 %624, %v442_v4  }
 0x11e   : > { %455 = vperm.xlu0 %623, %v441_v5  }
 0x11f   : > { %482 = vperm.xlu1 %624, %v472_v6  }
 0x122   : > { %477 = vperm.xlu0 %623, %v471_v7  }
 0x123   : > { %492 = vperm.xlu1 %624, %v474_v8  }
 0x126   : > { %487 = vperm.xlu0 %623, %v473_v9  }
 0x191   : > { %v380_v10 = vpop.xlane.xlu0 %379 }
 0x192   : > { %v381_v11 = vrot.slane %v380_v10, 4 }
 0x193   : > { %v404_v12 = vpop.xlane.xlu1 %403 }
 0x194   : > { %v382_v13 = vadd.f32 %v381_v11, %v380_v10  ;;  %v405_v14 = vrot.slane %v404_v12, 4 }
 0x196   : > { %v383_v15 = vrot.slane %v382_v13, 2  ;;  %v406_v16 = vadd.f32 %v405_v14, %v404_v12 }
 0x197   : > { %v451_v26 = vpop.permute.xlu1 %450 }
 0x198   : > { %v407_v17 = vrot.slane %v406_v16, 2  ;;  %v384_v18 = vadd.f32 %v383_v15, %v382_v13 }
 0x199   : > { %v446_v28 = vpop.permute.xlu0 %445 }
 0x19a   : > { %v385_v19 = vrot.slane %v384_v18, 1  ;;  %v408_v20 = vadd.f32 %v407_v17, %v406_v16 }
 0x19b   : > { %v461_v29 = vpop.permute.xlu1 %460 }
 0x19c   : > { %v386_v21 = vadd.f32 %v385_v19, %v384_v18  ;;  %v409_v22 = vrot.slane %v408_v20, 1 }
 0x19d   : > { %v456_v31 = vpop.permute.xlu0 %455 }
 0x19e   : > { %606 = vpush %v386_v21  ;;  %v410_v23 = vadd.f32 %v409_v22, %v408_v20 }
 0x19f   : > { %v483_v34 = vpop.permute.xlu1 %482 }
 0x1a0   : > { %608 = vpush %v410_v23 }
 0x1a1   : > { %v478_v35 = vpop.permute.xlu0 %477 }
 0x1a3   : > { %v493_v59 = vpop.permute.xlu1 %492 }
 0x1cf   : > { %s607_s8 = spop %606 }
 0x1d0   : > { %s412_s9 = smul.f32 0.00012207031, %s607_s8 }
 0x1d1   : > { %s609_s10 = spop %608 }
 0x1d2   : > { %s414_s11 = smul.f32 %s412_s9, %s412_s9  ;;  %v417_v32 = vstv %s412_s9 }
 0x1d3   : > { %s413_s12 = smul.f32 0.00012207031, %s609_s10  ;;  %v418_v33 = vsub.f32 %v706_v27, %v417_v32  ;;  %v419_v36 = vsub.f32 %v708_v30, %v417_v32  ;;  %v420_v37 = vsub.f32 %v716_v38, %v417_v32  ;;  %v421_v39 = vsub.f32 %v720_v43, %v417_v32 }
 0x1d4   : > { %v422_v41 = vsub.f32 %v718_v40, %v417_v32  ;;  %v423_v42 = vsub.f32 %v730_v51, %v417_v32  ;;  %v424_v44 = vsub.f32 %v733_v54, %v417_v32  ;;  %v425_v45 = vsub.f32 %v738_v58, %v417_v32  ;;  %v488_v58 = vpop.permute.xlu0 %487 }
 0x1d5   : > { %s415_s13 = ssub.f32 %s413_s12, %s414_s11 }
 0x1d7   : > { %s416_s15 = smax.f32 %s637_s14, %s415_s13 }
 0x1d8   : > { %s426_s16 = sadd.f32 1e-05, %s416_s15 }
 0x1da   : > { %v427_v24 = vstv %s426_s16 }
 0x1db   : > { %625 = vrsqrt.f32 %v427_v24 }
 0x1e5   : > { %v626_v25 = vpop.eup %625 }
 0x1e6   : > { %610 = vpush %v626_v25 }
 0x217   : > { %s611_s17 = spop %610 }
 0x218   : > { %v430_v46 = vstv %s611_s17 }
 0x219   : > { %v431_v27 = vmul.f32 %v430_v46, %v418_v33  ;;  %v432_v47 = vmul.f32 %v430_v46, %v419_v36  ;;  %v433_v48 = vmul.f32 %v430_v46, %v420_v37  ;;  %v434_v49 = vmul.f32 %v430_v46, %v421_v39 }
 0x21a   : > { %v435_v30 = vmul.f32 %v430_v46, %v422_v41  ;;  %v436_v50 = vmul.f32 %v430_v46, %v423_v42  ;;  %v437_v38 = vmul.f32 %v430_v46, %v424_v44  ;;  %v438_v52 = vmul.f32 %v430_v46, %v425_v45 }
 0x21b   : > { %v463_v43 = vmul.f32 %v446_v28, %v431_v27  ;;  %v464_v53 = vmul.f32 %v446_v28, %v432_v47  ;;  %v465_v40 = vmul.f32 %v451_v26, %v433_v48  ;;  %v466_v55 = vmul.f32 %v451_v26, %v434_v49 }
 0x21c   : > { %v467_v56 = vmul.f32 %v456_v31, %v435_v30  ;;  %v468_v51 = vmul.f32 %v456_v31, %v436_v50  ;;  %v469_v57 = vmul.f32 %v461_v29, %v437_v38  ;;  %v470_v54 = vmul.f32 %v461_v29, %v438_v52 }
 0x21d   : > { %v495_v60 = vadd.f32 %v478_v35, %v463_v43  ;;  %v496_v61 = vadd.f32 %v478_v35, %v464_v53  ;;  %v497_v62 = vadd.f32 %v483_v34, %v465_v40  ;;  %v498_v63 = vadd.f32 %v483_v34, %v466_v55 }
 0x21e   : > { %v499_v0 = vadd.f32 %v488_v58, %v467_v56  ;;  %v500_v1 = vadd.f32 %v488_v58, %v468_v51  ;;  %v501_v2 = vadd.f32 %v493_v59, %v469_v57  ;;  %v502_v3 = vadd.f32 %v493_v59, %v470_v54 }
 0x21f   : > { %v503_v4 = vmax.f32 %v495_v60, 0.0  ;;  %v504_v5 = vmax.f32 %v496_v61, 0.0  ;;  %v505_v6 = vmax.f32 %v497_v62, 0.0  ;;  %v506_v7 = vmax.f32 %v498_v63, 0.0 }
 0x220   : > { %v507_v8 = vmax.f32 %v499_v0, 0.0  ;;  %v508_v9 = vmax.f32 %v500_v1, 0.0  ;;  %v509_v10 = vmax.f32 %v501_v2, 0.0  ;;  %v510_v11 = vmax.f32 %v502_v3, 0.0 }
 0x221   : > { %511 = vst [vmem:[%s224_s23] sm:$0xff] %v503_v4  ;;  %512 = vst [vmem:[%s224_s23 + $0x8] sm:$0xff] %v504_v5 }
 0x222   : > { %513 = vst [vmem:[%s224_s23 + $0x10] sm:$0xff] %v505_v6  ;;  %514 = vst [vmem:[%s224_s23 + $0x18] sm:$0xff] %v506_v7 }
 0x223   : > { %515 = vst [vmem:[%s224_s23 + $0x20] sm:$0xff] %v507_v8  ;;  %516 = vst [vmem:[%s224_s23 + $0x28] sm:$0xff] %v508_v9 }
 0x224   : > { %517 = vst [vmem:[%s224_s23 + $0x30] sm:$0xff] %v509_v10  ;;  %518 = vst [vmem:[%s224_s23 + $0x38] sm:$0xff] %v510_v11 }
 0x225 PF: > { %s15_s18 = sadd.s32 1, %s633_s18  }
 0x226   : > { %p12_p4 = scmp.ge.s32.totalorder %s15_s18, 4  }
 0x228   :  { %14 = sbr.rel (!%p12_p4) target bundleno = 1 (0x1), region = 70 }

// kernel: posterior_unet_forward.10
= control target key start
LH: loop header
LB: loop body
LE: loop exit
PB: predicated region body
PF: predicated region fallthrough
CT: control target
= control target key end

     0   :  { %s837_s18 = smov 0   ;;  %s1008_s0 = inlined_call_operand.vmem [shape: f32[2,288,64], index: 0, kind: input, shape index: {}]   ;;  %s1009_s1 = inlined_call_operand.vmem [shape: f32[32,288], index: 1, kind: input, shape index: {}]   ;;  %s1010_s2 = inlined_call_operand.vmem [shape: f32[32,1], index: 2, kind: input, shape index: {}]   ;;  %s1011_s3 = inlined_call_operand.vmem [shape: f32[32,1], index: 3, kind: input, shape index: {}]   ;;  %s1012_s4 = inlined_call_operand.vmem [shape: f32[32,1], index: 4, kind: input, shape index: {}]   ;;  %s1013_s5 = inlined_call_operand.vmem [shape: f32[2,32,64], index: 5, kind: output, shape index: {}]  }
   0x1 LB: > { %s655_s19 = sadd.s32 4294967295, %s803_s18   ;;  %p659_p0 = scmp.ge.s32.totalorder %s803_s18, 1  ;;  %s803_s18 = sphi %s837_s18, %s15_s18  }
   0x2   : > { %p187_p1 = scmp.lt.s32.totalorder %s803_s18, 3 }
   0x4   : > { %p188_p2 = pnand %p659_p0, %p187_p1 }
   0x5   : > { %p215_p3 = scmp.lt.s32.totalorder (!%p188_p2), %s655_s19, 1  ;;  %v262_v0 = vld [vmem:[%s1009_s1 + $0x8] sm:$0xff] (!%p188_p2)  ;;  %vm297_vm0 = vcmask (!%p188_p2), 261120   ;;  %v263_v1 = vld [vmem:[%s1009_s1 + $0x10] sm:$0xff] (!%p188_p2)  ;;  %v805_v2 = vmov (!%p188_p2), 0   ;;  %v273_v3 = vld [vmem:[%s1010_s2] sm:$0xff] (!%p188_p2) }
   0x6   : > { %191 = sbr.rel (%p188_p2) target bundleno = 573 (0x23d), region = 40  ;;  %374 = vmatprep.mubr.f32.mxu0 (!%p188_p2), %v262_v0  ;;  %793 = vset.pattern.permute.xlu0 (!%p188_p2), %v805_v2  ;;  %v275_v4 = vld [vmem:[%s1010_s2 + $0x10] sm:$0xff] (!%p188_p2)  ;;  %v274_v5 = vld [vmem:[%s1010_s2 + $0x8] sm:$0xff] (!%p188_p2)  ;;  %v276_v6 = vld [vmem:[%s1010_s2 + $0x18] sm:$0xff] (!%p188_p2)  ;;  %vm480_vm1 = vcmask (!%p188_p2), 523264   ;;  %s806_s7 = smov (!%p188_p2), 0.0  }
   0x7   : > { %730 = vmatprep.mubr.msk.f32.mxu1 (!%p188_p2), %vm297_vm0, %v263_v1  ;;  %794 = vset.pattern.permute.xlu1 (!%p188_p2), %v805_v2  ;;  %v266_v50 = vld [vmem:[%s1009_s1 + $0x28] sm:$0xff] (!%p188_p2)  ;;  %v269_v51 = vld [vmem:[%s1009_s1 + $0x40] sm:$0xff] (!%p188_p2)  ;;  %v272_v58 = vld [vmem:[%s1009_s1 + $0x58] sm:$0xff] (!%p188_p2) }
   0x8   : > { %279 = vperm.xlu0 (!%p188_p2), %793, %v273_v3   ;;  %289 = vperm.xlu1 (!%p188_p2), %794, %v275_v4   ;;  %v261_v0 = vld [vmem:[%s1009_s1] sm:$0xff] (!%p188_p2)  ;;  %v264_v2 = vld [vmem:[%s1009_s1 + $0x18] sm:$0xff] (!%p188_p2)  ;;  %v267_v4 = vld [vmem:[%s1009_s1 + $0x30] sm:$0xff] (!%p188_p2) }
   0x9   : > { %v265_v1 = vld [vmem:[%s1009_s1 + $0x20] sm:$0xff] (!%p188_p2)  ;;  %v268_v3 = vld [vmem:[%s1009_s1 + $0x38] sm:$0xff] (!%p188_p2) }
   0xc   : > { %284 = vperm.xlu0 (!%p188_p2), %793, %v274_v5   ;;  %294 = vperm.xlu1 (!%p188_p2), %794, %v276_v6   ;;  %v271_v5 = vld [vmem:[%s1009_s1 + $0x50] sm:$0xff] (!%p188_p2)  ;;  %v270_v6 = vld [vmem:[%s1009_s1 + $0x48] sm:$0xff] (!%p188_p2) }
   0xd   : > { %s1015_s19 = smov (!%p215_p3, %s655_s19), 1 }
   0xe   : > { %s776_s24 = smul.u32 288, %s1015_s19  ;;  %s669_s11 = sshll.u32 %s1015_s19, 5 }
   0xf   : > { %s224_s14 = scalar_lea.vmem %s1013_s5, %s669_s11 }
  0x10   : > { %s864_s6 = scalar_lea.vmem %s1008_s0, %s776_s24 }
  0x11   : > { %v241_v7 = vld [vmem:[%s864_s6 + $0x80] sm:$0xff]  ;;  %v242_v8 = vld [vmem:[%s864_s6 + $0x88] sm:$0xff]  ;;  %v243_v12 = vld [vmem:[%s864_s6 + $0x90] sm:$0xff] }
  0x12   : > { %v225_v9 = vld [vmem:[%s864_s6] sm:$0xff]  ;;  %v736_v10 = vpack.c.bf16 %v242_v8, %v241_v7  ;;  %v226_v11 = vld [vmem:[%s864_s6 + $0x8] sm:$0xff]  ;;  %v244_v13 = vld [vmem:[%s864_s6 + $0x98] sm:$0xff] }
  0x13   : > { %v738_v14 = vpack.c.bf16 %v226_v11, %v225_v9  ;;  %v740_v15 = vpack.c.bf16 %v244_v13, %v243_v12  ;;  %v227_v16 = vld [vmem:[%s864_s6 + $0x10] sm:$0xff]  ;;  %v228_v17 = vld [vmem:[%s864_s6 + $0x18] sm:$0xff]  ;;  %v245_v18 = vld [vmem:[%s864_s6 + $0xa0] sm:$0xff] }
  0x14   : > { %737 = vmatprep.subr.bf16.mxu0 %v736_v10  ;;  %v246_v19 = vld [vmem:[%s864_s6 + $0xa8] sm:$0xff]  ;;  %v742_v20 = vpack.c.bf16 %v228_v17, %v227_v16  ;;  %v229_v22 = vld [vmem:[%s864_s6 + $0x20] sm:$0xff]  ;;  %v247_v24 = vld [vmem:[%s864_s6 + $0xb0] sm:$0xff] }
  0x15   : > { %739 = vmatpush3.bf16.msra.mxu0 %v738_v14  ;;  %v744_v21 = vpack.c.bf16 %v246_v19, %v245_v18  ;;  %v230_v23 = vld [vmem:[%s864_s6 + $0x28] sm:$0xff]  ;;  %v248_v25 = vld [vmem:[%s864_s6 + $0xb8] sm:$0xff]  ;;  %v231_v28 = vld [vmem:[%s864_s6 + $0x30] sm:$0xff] }
  0x16   : > { %741 = vmatprep.subr.bf16.mxu0 %v740_v15  ;;  %v746_v26 = vpack.c.bf16 %v230_v23, %v229_v22  ;;  %v748_v27 = vpack.c.bf16 %v248_v25, %v247_v24  ;;  %v232_v29 = vld [vmem:[%s864_s6 + $0x38] sm:$0xff]  ;;  %v249_v30 = vld [vmem:[%s864_s6 + $0xc0] sm:$0xff]  ;;  %v250_v31 = vld [vmem:[%s864_s6 + $0xc8] sm:$0xff] }
  0x17   : > { %v257_v32 = vld [vmem:[%s864_s6 + $0x100] sm:$0xff]  ;;  %v258_v33 = vld [vmem:[%s864_s6 + $0x108] sm:$0xff]  ;;  %v259_v35 = vld [vmem:[%s864_s6 + $0x110] sm:$0xff]  ;;  %v750_v37 = vpack.c.bf16 %v232_v29, %v231_v28  ;;  %v752_v39 = vpack.c.bf16 %v250_v31, %v249_v30 }
  0x18   : > { %v768_v34 = vpack.c.bf16 %v258_v33, %v257_v32  ;;  %v260_v36 = vld [vmem:[%s864_s6 + $0x118] sm:$0xff]  ;;  %v233_v40 = vld [vmem:[%s864_s6 + $0x40] sm:$0xff]  ;;  %v234_v41 = vld [vmem:[%s864_s6 + $0x48] sm:$0xff] }
  0x19   : > { %743 = vmatpush3.bf16.msra.mxu0 %v742_v20  ;;  %v772_v38 = vpack.c.bf16 %v260_v36, %v259_v35  ;;  %v251_v42 = vld [vmem:[%s864_s6 + $0xd0] sm:$0xff]  ;;  %v252_v43 = vld [vmem:[%s864_s6 + $0xd8] sm:$0xff]  ;;  %v754_v44 = vpack.c.bf16 %v234_v41, %v233_v40  ;;  %v253_v48 = vld [vmem:[%s864_s6 + $0xe0] sm:$0xff] }
  0x1a   : > { %745 = vmatprep.subr.bf16.mxu0 %v744_v21  ;;  %769 = vmatprep.subr.bf16.mxu1 %v768_v34  ;;  %v756_v45 = vpack.c.bf16 %v252_v43, %v251_v42  ;;  %v235_v46 = vld [vmem:[%s864_s6 + $0x50] sm:$0xff]  ;;  %v236_v47 = vld [vmem:[%s864_s6 + $0x58] sm:$0xff]  ;;  %v254_v49 = vld [vmem:[%s864_s6 + $0xe8] sm:$0xff] }
  0x1b   : > { %771 = vmatpush3.bf16.msra.mxu1 %v768_v34  ;;  %v758_v52 = vpack.c.bf16 %v236_v47, %v235_v46  ;;  %v760_v53 = vpack.c.bf16 %v254_v49, %v253_v48  ;;  %v237_v54 = vld [vmem:[%s864_s6 + $0x60] sm:$0xff]  ;;  %v238_v55 = vld [vmem:[%s864_s6 + $0x68] sm:$0xff]  ;;  %v255_v56 = vld [vmem:[%s864_s6 + $0xf0] sm:$0xff] }
  0x1c   : > { %773 = vmatprep.subr.bf16.mxu1 %v772_v38  ;;  %v256_v57 = vld [vmem:[%s864_s6 + $0xf8] sm:$0xff]  ;;  %v762_v59 = vpack.c.bf16 %v238_v55, %v237_v54  ;;  %v239_v61 = vld [vmem:[%s864_s6 + $0x70] sm:$0xff]  ;;  %v536_v54 = vld [vmem:[%s1011_s3] sm:$0xff] }
  0x1d   : > { %747 = vmatpush3.bf16.msra.mxu0 %v746_v26  ;;  %v764_v60 = vpack.c.bf16 %v256_v57, %v255_v56  ;;  %v240_v62 = vld [vmem:[%s864_s6 + $0x78] sm:$0xff]  ;;  %v538_v56 = vld [vmem:[%s1011_s3 + $0x10] sm:$0xff]  ;;  %v565_v57 = vld [vmem:[%s1012_s4 + $0x8] sm:$0xff] }
  0x1e   : > { %749 = vmatprep.subr.bf16.mxu0 %v748_v27  ;;  %v766_v63 = vpack.c.bf16 %v240_v62, %v239_v61  ;;  %v539_v55 = vld [vmem:[%s1011_s3 + $0x18] sm:$0xff] }
  0x1f   : > { %775 = vmatpush3.bf16.msra.mxu1 %v772_v38 }
  0x21   : > { %751 = vmatpush3.bf16.msra.mxu0 %v750_v37 }
  0x22   : > { %753 = vmatprep.subr.bf16.mxu0 %v752_v39  ;;  %731 = vmatmul.mubr.msk.f32.vlgmr.msra.gmra.mrb[0].mxu1 %vm297_vm0, %v266_v50 }
  0x23   : > { %733 = vmatprep.mubr.msk.f32.mxu1 %vm297_vm0, %v269_v51 }
  0x25   : > { %755 = vmatpush3.bf16.msra.mxu0 %v754_v44 }
  0x26   : > { %757 = vmatprep.subr.bf16.mxu0 %v756_v45  ;;  %734 = vmatmul.mubr.msk.f32.gmra.mrb[2].mxu1 %vm297_vm0, %v272_v58  ;;  %v564_v58 = vld [vmem:[%s1012_s4] sm:$0xff] }
  0x29   : > { %759 = vmatpush3.bf16.msra.mxu0 %v758_v52 }
  0x2a   : > { %761 = vmatprep.subr.bf16.mxu0 %v760_v53  ;;  %v537_v53 = vld [vmem:[%s1011_s3 + $0x8] sm:$0xff] }
  0x2d   : > { %763 = vmatpush3.bf16.msra.mxu0 %v762_v59  ;;  %v567_v59 = vld [vmem:[%s1012_s4 + $0x18] sm:$0xff] }
  0x2e   : > { %765 = vmatprep.subr.bf16.mxu0 %v764_v60  ;;  %v566_v60 = vld [vmem:[%s1012_s4 + $0x10] sm:$0xff] }
  0x31   : > { %767 = vmatpush3.bf16.msra.mxu0 %v766_v63 }
  0x34   : > { %375 = vmatmul.mubr.f32.vlgmr.msra.gmra.mrb[0].mxu0 %v261_v0 }
  0x35   : > { %379 = vmatprep.mubr.f32.mxu0 %v265_v1 }
  0x38   : > { %380 = vmatmul.mubr.f32.gmra.mrb[2].mxu0 %v264_v2 }
  0x39   : > { %384 = vmatprep.mubr.f32.mxu0 %v268_v3 }
  0x3c   : > { %385 = vmatmul.mubr.f32.gmra.mrb[4].mxu0 %v267_v4 }
  0x3d   : > { %389 = vmatprep.mubr.f32.mxu0 %v271_v5 }
  0x40   : > { %390 = vmatmul.mubr.f32.gmra.mrb[6].mxu0 %v270_v6 }
  0x87   : > { %v280_v11 = vpop.permute.xlu0 %279  ;;  %v290_v23 = vpop.permute.xlu1 %289 }
  0x8b   : > { %v285_v18 = vpop.permute.xlu0 %284  ;;  %v295_v36 = vpop.permute.xlu1 %294 }
  0xf5   : > { %v732_v7 = vpop.f32.mrb[0].mxu1 }
  0xf6   : > { %v461_v8 = vpop.f32.mrb[1].mxu1 }
  0xf9   : > { %v735_v9 = vpop.f32.mrb[2].mxu1 }
  0xfa   : > { %v471_v10 = vpop.f32.mrb[3].mxu1 }
 0x107   : > { %v702_v12 = vpop.f32.mrb[0].mxu0 }
 0x108   : > { %v703_v13 = vpop.f32.mrb[1].mxu0 }
 0x109   : > { %v704_v14 = vadd.f32 %v703_v13, %v702_v12 }
 0x10b   : > { %v377_v15 = vadd.f32 %v704_v14, %v280_v11  ;;  %v705_v16 = vpop.f32.mrb[2].mxu0 }
 0x10c   : > { %v706_v17 = vpop.f32.mrb[3].mxu0 }
 0x10d   : > { %v707_v19 = vadd.f32 %v706_v17, %v705_v16  ;;  %v941_v20 = vadd.f32 %v461_v8, %v377_v15 }
 0x10f   : > { %v382_v21 = vadd.f32 %v707_v19, %v285_v18  ;;  %v708_v22 = vpop.f32.mrb[4].mxu0  ;;  %v497_v31 = vmul.f32 %v941_v20, %v941_v20  ;;  %v481_v35 = vsel %vm480_vm1, %v941_v20, 0.0 }
 0x110   : > { %v709_v24 = vpop.f32.mrb[5].mxu0 }
 0x111   : > { %v943_v25 = vadd.f32 %v732_v7, %v382_v21  ;;  %v710_v26 = vadd.f32 %v709_v24, %v708_v22  ;;  %v501_v43 = vsel %vm480_vm1, %v497_v31, 0.0 }
 0x113   : > { %v498_v27 = vmul.f32 %v943_v25, %v943_v25  ;;  %v711_v28 = vpop.f32.mrb[6].mxu0  ;;  %v387_v29 = vadd.f32 %v710_v26, %v290_v23  ;;  %v482_v34 = vsel %vm480_vm1, %v943_v25, 0.0 }
 0x114   : > { %v712_v30 = vpop.f32.mrb[7].mxu0  ;;  %v483_v41 = vadd.f32 %v482_v34, %v481_v35 }
 0x115   : > { %v713_v32 = vadd.f32 %v712_v30, %v711_v28  ;;  %v949_v33 = vadd.f32 %v471_v10, %v387_v29  ;;  %v502_v40 = vsel %vm480_vm1, %v498_v27, 0.0 }
 0x116   : > { %v503_v46 = vadd.f32 %v502_v40, %v501_v43 }
 0x117   : > { %v392_v37 = vadd.f32 %v713_v32, %v295_v36  ;;  %v499_v38 = vmul.f32 %v949_v33, %v949_v33  ;;  %v484_v39 = vsel %vm480_vm1, %v949_v33, 0.0 }
 0x118   : > { %v485_v45 = vadd.f32 %v484_v39, %v483_v41 }
 0x119   : > { %v960_v42 = vadd.f32 %v735_v9, %v392_v37  ;;  %v504_v44 = vsel %vm480_vm1, %v499_v38, 0.0 }
 0x11a   : > { %v505_v50 = vadd.f32 %v504_v44, %v503_v46 }
 0x11b   : > { %v486_v47 = vsel %vm480_vm1, %v960_v42, 0.0  ;;  %v500_v48 = vmul.f32 %v960_v42, %v960_v42 }
 0x11c   : > { %v487_v49 = vadd.f32 %v486_v47, %v485_v45 }
 0x11d   : > { %v506_v51 = vsel %vm480_vm1, %v500_v48, 0.0 }
 0x11e   : > { %488 = vadd.xlane.f32.xlu0 %v487_v49  ;;  %v507_v52 = vadd.f32 %v506_v51, %v505_v50 }
 0x120   : > { %508 = vadd.xlane.f32.xlu1 %v507_v52 }
 0x131   : > { %547 = vperm.xlu1 %794, %v537_v53  }
 0x134   : > { %542 = vperm.xlu0 %793, %v536_v54  }
 0x135   : > { %557 = vperm.xlu1 %794, %v539_v55  }
 0x138   : > { %552 = vperm.xlu0 %793, %v538_v56  }
 0x139   : > { %575 = vperm.xlu1 %794, %v565_v57  }
 0x13c   : > { %570 = vperm.xlu0 %793, %v564_v58  }
 0x13d   : > { %585 = vperm.xlu1 %794, %v567_v59  }
 0x140   : > { %580 = vperm.xlu0 %793, %v566_v60  }
 0x1ab   : > { %v489_v61 = vpop.xlane.xlu0 %488 }
 0x1ac   : > { %v490_v62 = vrot.slane %v489_v61, 4 }
 0x1ad   : > { %v509_v63 = vpop.xlane.xlu1 %508 }
 0x1ae   : > { %v491_v0 = vadd.f32 %v490_v62, %v489_v61  ;;  %v510_v1 = vrot.slane %v509_v63, 4 }
 0x1b0   : > { %v492_v2 = vrot.slane %v491_v0, 2  ;;  %v511_v3 = vadd.f32 %v510_v1, %v509_v63 }
 0x1b1   : > { %v548_v13 = vpop.permute.xlu1 %547 }
 0x1b2   : > { %v512_v4 = vrot.slane %v511_v3, 2  ;;  %v493_v5 = vadd.f32 %v492_v2, %v491_v0 }
 0x1b3   : > { %v543_v14 = vpop.permute.xlu0 %542 }
 0x1b4   : > { %v494_v6 = vrot.slane %v493_v5, 1  ;;  %v513_v7 = vadd.f32 %v512_v4, %v511_v3 }
 0x1b5   : > { %v558_v15 = vpop.permute.xlu1 %557 }
 0x1b6   : > { %v495_v8 = vadd.f32 %v494_v6, %v493_v5  ;;  %v514_v9 = vrot.slane %v513_v7, 1 }
 0x1b7   : > { %v553_v16 = vpop.permute.xlu0 %552 }
 0x1b8   : > { %777 = vpush %v495_v8  ;;  %v515_v10 = vadd.f32 %v514_v9, %v513_v7 }
 0x1b9   : > { %v576_v18 = vpop.permute.xlu1 %575 }
 0x1ba   : > { %779 = vpush %v515_v10 }
 0x1bb   : > { %v571_v19 = vpop.permute.xlu0 %570 }
 0x1bd   : > { %v586_v36 = vpop.permute.xlu1 %585 }
 0x1bf   : > { %v581_v37 = vpop.permute.xlu0 %580 }
 0x1e9   : > { %s778_s26 = spop %777 }
 0x1ea   : > { %s517_s27 = smul.f32 0.00048828125, %s778_s26 }
 0x1eb   : > { %s780_s28 = spop %779 }
 0x1ec   : > { %s519_s29 = smul.f32 %s517_s27, %s517_s27  ;;  %v522_v17 = vstv %s517_s27 }
 0x1ed   : > { %s518_s30 = smul.f32 0.00048828125, %s780_s28  ;;  %v523_v21 = vsub.f32 %v941_v20, %v522_v17  ;;  %v524_v22 = vsub.f32 %v943_v25, %v522_v17  ;;  %v525_v23 = vsub.f32 %v949_v33, %v522_v17  ;;  %v526_v24 = vsub.f32 %v960_v42, %v522_v17 }
 0x1ef   : > { %s520_s6 = ssub.f32 %s518_s30, %s519_s29 }
 0x1f1   : > { %s521_s8 = smax.f32 %s806_s7, %s520_s6 }
 0x1f2   : > { %s527_s9 = sadd.f32 1e-05, %s521_s8 }
 0x1f4   : > { %v528_v11 = vstv %s527_s9 }
 0x1f5   : > { %795 = vrsqrt.f32 %v528_v11 }
 0x1ff   : > { %v796_v12 = vpop.eup %795 }
 0x200   : > { %781 = vpush %v796_v12 }
 0x231   : > { %s782_s10 = spop %781 }
 0x232   : > { %v531_v26 = vstv %s782_s10 }
 0x233   : > { %v532_v27 = vmul.f32 %v531_v26, %v523_v21  ;;  %v533_v28 = vmul.f32 %v531_v26, %v524_v22  ;;  %v534_v29 = vmul.f32 %v531_v26, %v525_v23  ;;  %v535_v30 = vmul.f32 %v531_v26, %v526_v24 }
 0x235   : > { %v560_v31 = vmul.f32 %v543_v14, %v532_v27  ;;  %v561_v32 = vmul.f32 %v548_v13, %v533_v28  ;;  %v562_v34 = vmul.f32 %v553_v16, %v534_v29  ;;  %v563_v35 = vmul.f32 %v558_v15, %v535_v30 }
 0x237   : > { %v588_v20 = vadd.f32 %v571_v19, %v560_v31  ;;  %v589_v38 = vadd.f32 %v576_v18, %v561_v32  ;;  %v590_v25 = vadd.f32 %v581_v37, %v562_v34  ;;  %v591_v39 = vadd.f32 %v586_v36, %v563_v35 }
 0x239   : > { %v592_v33 = vmax.f32 %v588_v20, 0.0  ;;  %v593_v40 = vmax.f32 %v589_v38, 0.0  ;;  %v594_v41 = vmax.f32 %v590_v25, 0.0  ;;  %v595_v42 = vmax.f32 %v591_v39, 0.0 }
 0x23b   : > { %596 = vst.msk [vmem:[%s224_s14] sm:$0xff] %vm480_vm1, %v592_v33  ;;  %597 = vst.msk [vmem:[%s224_s14 + $0x8] sm:$0xff] %vm480_vm1, %v593_v40 }
 0x23c   : > { %598 = vst.msk [vmem:[%s224_s14 + $0x10] sm:$0xff] %vm480_vm1, %v594_v41  ;;  %599 = vst.msk [vmem:[%s224_s14 + $0x18] sm:$0xff] %vm480_vm1, %v595_v42 }
 0x23d PF: > { %s15_s18 = sadd.s32 1, %s803_s18  }
 0x23e   : > { %p12_p4 = scmp.ge.s32.totalorder %s15_s18, 4  }
 0x240   :  { %14 = sbr.rel (!%p12_p4) target bundleno = 1 (0x1), region = 70 }

// kernel: posterior_unet_forward.11
= control target key start
LH: loop header
LB: loop body
LE: loop exit
PB: predicated region body
PF: predicated region fallthrough
CT: control target
= control target key end

     0   :  { %s837_s18 = smov 0   ;;  %s1008_s0 = inlined_call_operand.vmem [shape: f32[2,288,16], index: 0, kind: input, shape index: {}]   ;;  %s1009_s1 = inlined_call_operand.vmem [shape: f32[32,288], index: 1, kind: input, shape index: {}]   ;;  %s1010_s2 = inlined_call_operand.vmem [shape: f32[32,1], index: 2, kind: input, shape index: {}]   ;;  %s1011_s3 = inlined_call_operand.vmem [shape: f32[32,1], index: 3, kind: input, shape index: {}]   ;;  %s1012_s4 = inlined_call_operand.vmem [shape: f32[32,1], index: 4, kind: input, shape index: {}]   ;;  %s1013_s5 = inlined_call_operand.vmem [shape: f32[2,32,16], index: 5, kind: output, shape index: {}]  }
   0x1 LB: > { %s655_s19 = sadd.s32 4294967295, %s803_s18   ;;  %p659_p0 = scmp.ge.s32.totalorder %s803_s18, 1  ;;  %s803_s18 = sphi %s837_s18, %s15_s18  }
   0x2   : > { %p187_p1 = scmp.lt.s32.totalorder %s803_s18, 3 }
   0x4   : > { %p188_p2 = pnand %p659_p0, %p187_p1 }
   0x5   : > { %p215_p3 = scmp.lt.s32.totalorder (!%p188_p2), %s655_s19, 1  ;;  %v262_v0 = vld [vmem:[%s1009_s1 + $0x8] sm:$0xff] (!%p188_p2)  ;;  %vm297_vm0 = vcmask (!%p188_p2), 261120   ;;  %v263_v1 = vld [vmem:[%s1009_s1 + $0x10] sm:$0xff] (!%p188_p2)  ;;  %v805_v2 = vmov (!%p188_p2), 0   ;;  %v273_v3 = vld [vmem:[%s1010_s2] sm:$0xff] (!%p188_p2) }
   0x6   : > { %191 = sbr.rel (%p188_p2) target bundleno = 573 (0x23d), region = 40  ;;  %374 = vmatprep.mubr.f32.mxu0 (!%p188_p2), %v262_v0  ;;  %793 = vset.pattern.permute.xlu0 (!%p188_p2), %v805_v2  ;;  %v275_v4 = vld [vmem:[%s1010_s2 + $0x10] sm:$0xff] (!%p188_p2)  ;;  %v274_v5 = vld [vmem:[%s1010_s2 + $0x8] sm:$0xff] (!%p188_p2)  ;;  %v276_v6 = vld [vmem:[%s1010_s2 + $0x18] sm:$0xff] (!%p188_p2)  ;;  %vm480_vm1 = vcmask (!%p188_p2), 130048   ;;  %s806_s7 = smov (!%p188_p2), 0.0  }
   0x7   : > { %730 = vmatprep.mubr.msk.f32.mxu1 (!%p188_p2), %vm297_vm0, %v263_v1  ;;  %794 = vset.pattern.permute.xlu1 (!%p188_p2), %v805_v2  ;;  %v266_v50 = vld [vmem:[%s1009_s1 + $0x28] sm:$0xff] (!%p188_p2)  ;;  %v269_v51 = vld [vmem:[%s1009_s1 + $0x40] sm:$0xff] (!%p188_p2)  ;;  %v272_v58 = vld [vmem:[%s1009_s1 + $0x58] sm:$0xff] (!%p188_p2) }
   0x8   : > { %279 = vperm.xlu0 (!%p188_p2), %793, %v273_v3   ;;  %289 = vperm.xlu1 (!%p188_p2), %794, %v275_v4   ;;  %v261_v0 = vld [vmem:[%s1009_s1] sm:$0xff] (!%p188_p2)  ;;  %v264_v2 = vld [vmem:[%s1009_s1 + $0x18] sm:$0xff] (!%p188_p2)  ;;  %v267_v4 = vld [vmem:[%s1009_s1 + $0x30] sm:$0xff] (!%p188_p2) }
   0x9   : > { %v265_v1 = vld [vmem:[%s1009_s1 + $0x20] sm:$0xff] (!%p188_p2)  ;;  %v268_v3 = vld [vmem:[%s1009_s1 + $0x38] sm:$0xff] (!%p188_p2) }
   0xc   : > { %284 = vperm.xlu0 (!%p188_p2), %793, %v274_v5   ;;  %294 = vperm.xlu1 (!%p188_p2), %794, %v276_v6   ;;  %v271_v5 = vld [vmem:[%s1009_s1 + $0x50] sm:$0xff] (!%p188_p2)  ;;  %v270_v6 = vld [vmem:[%s1009_s1 + $0x48] sm:$0xff] (!%p188_p2) }
   0xd   : > { %s1015_s19 = smov (!%p215_p3, %s655_s19), 1 }
   0xe   : > { %s776_s24 = smul.u32 288, %s1015_s19  ;;  %s669_s11 = sshll.u32 %s1015_s19, 5 }
   0xf   : > { %s224_s14 = scalar_lea.vmem %s1013_s5, %s669_s11 }
  0x10   : > { %s864_s6 = scalar_lea.vmem %s1008_s0, %s776_s24 }
  0x11   : > { %v241_v7 = vld [vmem:[%s864_s6 + $0x80] sm:$0xff]  ;;  %v242_v8 = vld [vmem:[%s864_s6 + $0x88] sm:$0xff]  ;;  %v243_v12 = vld [vmem:[%s864_s6 + $0x90] sm:$0xff] }
  0x12   : > { %v225_v9 = vld [vmem:[%s864_s6] sm:$0xff]  ;;  %v736_v10 = vpack.c.bf16 %v242_v8, %v241_v7  ;;  %v226_v11 = vld [vmem:[%s864_s6 + $0x8] sm:$0xff]  ;;  %v244_v13 = vld [vmem:[%s864_s6 + $0x98] sm:$0xff] }
  0x13   : > { %v738_v14 = vpack.c.bf16 %v226_v11, %v225_v9  ;;  %v740_v15 = vpack.c.bf16 %v244_v13, %v243_v12  ;;  %v227_v16 = vld [vmem:[%s864_s6 + $0x10] sm:$0xff]  ;;  %v228_v17 = vld [vmem:[%s864_s6 + $0x18] sm:$0xff]  ;;  %v245_v18 = vld [vmem:[%s864_s6 + $0xa0] sm:$0xff] }
  0x14   : > { %737 = vmatprep.subr.bf16.mxu0 %v736_v10  ;;  %v246_v19 = vld [vmem:[%s864_s6 + $0xa8] sm:$0xff]  ;;  %v742_v20 = vpack.c.bf16 %v228_v17, %v227_v16  ;;  %v229_v22 = vld [vmem:[%s864_s6 + $0x20] sm:$0xff]  ;;  %v247_v24 = vld [vmem:[%s864_s6 + $0xb0] sm:$0xff] }
  0x15   : > { %739 = vmatpush3.bf16.msra.mxu0 %v738_v14  ;;  %v744_v21 = vpack.c.bf16 %v246_v19, %v245_v18  ;;  %v230_v23 = vld [vmem:[%s864_s6 + $0x28] sm:$0xff]  ;;  %v248_v25 = vld [vmem:[%s864_s6 + $0xb8] sm:$0xff]  ;;  %v231_v28 = vld [vmem:[%s864_s6 + $0x30] sm:$0xff] }
  0x16   : > { %741 = vmatprep.subr.bf16.mxu0 %v740_v15  ;;  %v746_v26 = vpack.c.bf16 %v230_v23, %v229_v22  ;;  %v748_v27 = vpack.c.bf16 %v248_v25, %v247_v24  ;;  %v232_v29 = vld [vmem:[%s864_s6 + $0x38] sm:$0xff]  ;;  %v249_v30 = vld [vmem:[%s864_s6 + $0xc0] sm:$0xff]  ;;  %v250_v31 = vld [vmem:[%s864_s6 + $0xc8] sm:$0xff] }
  0x17   : > { %v257_v32 = vld [vmem:[%s864_s6 + $0x100] sm:$0xff]  ;;  %v258_v33 = vld [vmem:[%s864_s6 + $0x108] sm:$0xff]  ;;  %v259_v35 = vld [vmem:[%s864_s6 + $0x110] sm:$0xff]  ;;  %v750_v37 = vpack.c.bf16 %v232_v29, %v231_v28  ;;  %v752_v39 = vpack.c.bf16 %v250_v31, %v249_v30 }
  0x18   : > { %v768_v34 = vpack.c.bf16 %v258_v33, %v257_v32  ;;  %v260_v36 = vld [vmem:[%s864_s6 + $0x118] sm:$0xff]  ;;  %v233_v40 = vld [vmem:[%s864_s6 + $0x40] sm:$0xff]  ;;  %v234_v41 = vld [vmem:[%s864_s6 + $0x48] sm:$0xff] }
  0x19   : > { %743 = vmatpush3.bf16.msra.mxu0 %v742_v20  ;;  %v772_v38 = vpack.c.bf16 %v260_v36, %v259_v35  ;;  %v251_v42 = vld [vmem:[%s864_s6 + $0xd0] sm:$0xff]  ;;  %v252_v43 = vld [vmem:[%s864_s6 + $0xd8] sm:$0xff]  ;;  %v754_v44 = vpack.c.bf16 %v234_v41, %v233_v40  ;;  %v253_v48 = vld [vmem:[%s864_s6 + $0xe0] sm:$0xff] }
  0x1a   : > { %745 = vmatprep.subr.bf16.mxu0 %v744_v21  ;;  %769 = vmatprep.subr.bf16.mxu1 %v768_v34  ;;  %v756_v45 = vpack.c.bf16 %v252_v43, %v251_v42  ;;  %v235_v46 = vld [vmem:[%s864_s6 + $0x50] sm:$0xff]  ;;  %v236_v47 = vld [vmem:[%s864_s6 + $0x58] sm:$0xff]  ;;  %v254_v49 = vld [vmem:[%s864_s6 + $0xe8] sm:$0xff] }
  0x1b   : > { %771 = vmatpush3.bf16.msra.mxu1 %v768_v34  ;;  %v758_v52 = vpack.c.bf16 %v236_v47, %v235_v46  ;;  %v760_v53 = vpack.c.bf16 %v254_v49, %v253_v48  ;;  %v237_v54 = vld [vmem:[%s864_s6 + $0x60] sm:$0xff]  ;;  %v238_v55 = vld [vmem:[%s864_s6 + $0x68] sm:$0xff]  ;;  %v255_v56 = vld [vmem:[%s864_s6 + $0xf0] sm:$0xff] }
  0x1c   : > { %773 = vmatprep.subr.bf16.mxu1 %v772_v38  ;;  %v256_v57 = vld [vmem:[%s864_s6 + $0xf8] sm:$0xff]  ;;  %v762_v59 = vpack.c.bf16 %v238_v55, %v237_v54  ;;  %v239_v61 = vld [vmem:[%s864_s6 + $0x70] sm:$0xff]  ;;  %v536_v54 = vld [vmem:[%s1011_s3] sm:$0xff] }
  0x1d   : > { %747 = vmatpush3.bf16.msra.mxu0 %v746_v26  ;;  %v764_v60 = vpack.c.bf16 %v256_v57, %v255_v56  ;;  %v240_v62 = vld [vmem:[%s864_s6 + $0x78] sm:$0xff]  ;;  %v538_v56 = vld [vmem:[%s1011_s3 + $0x10] sm:$0xff]  ;;  %v565_v57 = vld [vmem:[%s1012_s4 + $0x8] sm:$0xff] }
  0x1e   : > { %749 = vmatprep.subr.bf16.mxu0 %v748_v27  ;;  %v766_v63 = vpack.c.bf16 %v240_v62, %v239_v61  ;;  %v539_v55 = vld [vmem:[%s1011_s3 + $0x18] sm:$0xff] }
  0x1f   : > { %775 = vmatpush3.bf16.msra.mxu1 %v772_v38 }
  0x21   : > { %751 = vmatpush3.bf16.msra.mxu0 %v750_v37 }
  0x22   : > { %753 = vmatprep.subr.bf16.mxu0 %v752_v39  ;;  %731 = vmatmul.mubr.msk.f32.vlgmr.msra.gmra.mrb[0].mxu1 %vm297_vm0, %v266_v50 }
  0x23   : > { %733 = vmatprep.mubr.msk.f32.mxu1 %vm297_vm0, %v269_v51 }
  0x25   : > { %755 = vmatpush3.bf16.msra.mxu0 %v754_v44 }
  0x26   : > { %757 = vmatprep.subr.bf16.mxu0 %v756_v45  ;;  %734 = vmatmul.mubr.msk.f32.gmra.mrb[2].mxu1 %vm297_vm0, %v272_v58  ;;  %v564_v58 = vld [vmem:[%s1012_s4] sm:$0xff] }
  0x29   : > { %759 = vmatpush3.bf16.msra.mxu0 %v758_v52 }
  0x2a   : > { %761 = vmatprep.subr.bf16.mxu0 %v760_v53  ;;  %v537_v53 = vld [vmem:[%s1011_s3 + $0x8] sm:$0xff] }
  0x2d   : > { %763 = vmatpush3.bf16.msra.mxu0 %v762_v59  ;;  %v567_v59 = vld [vmem:[%s1012_s4 + $0x18] sm:$0xff] }
  0x2e   : > { %765 = vmatprep.subr.bf16.mxu0 %v764_v60  ;;  %v566_v60 = vld [vmem:[%s1012_s4 + $0x10] sm:$0xff] }
  0x31   : > { %767 = vmatpush3.bf16.msra.mxu0 %v766_v63 }
  0x34   : > { %375 = vmatmul.mubr.f32.vlgmr.msra.gmra.mrb[0].mxu0 %v261_v0 }
  0x35   : > { %379 = vmatprep.mubr.f32.mxu0 %v265_v1 }
  0x38   : > { %380 = vmatmul.mubr.f32.gmra.mrb[2].mxu0 %v264_v2 }
  0x39   : > { %384 = vmatprep.mubr.f32.mxu0 %v268_v3 }
  0x3c   : > { %385 = vmatmul.mubr.f32.gmra.mrb[4].mxu0 %v267_v4 }
  0x3d   : > { %389 = vmatprep.mubr.f32.mxu0 %v271_v5 }
  0x40   : > { %390 = vmatmul.mubr.f32.gmra.mrb[6].mxu0 %v270_v6 }
  0x87   : > { %v280_v11 = vpop.permute.xlu0 %279  ;;  %v290_v23 = vpop.permute.xlu1 %289 }
  0x8b   : > { %v285_v18 = vpop.permute.xlu0 %284  ;;  %v295_v36 = vpop.permute.xlu1 %294 }
  0xf5   : > { %v732_v7 = vpop.f32.mrb[0].mxu1 }
  0xf6   : > { %v461_v8 = vpop.f32.mrb[1].mxu1 }
  0xf9   : > { %v735_v9 = vpop.f32.mrb[2].mxu1 }
  0xfa   : > { %v471_v10 = vpop.f32.mrb[3].mxu1 }
 0x107   : > { %v702_v12 = vpop.f32.mrb[0].mxu0 }
 0x108   : > { %v703_v13 = vpop.f32.mrb[1].mxu0 }
 0x109   : > { %v704_v14 = vadd.f32 %v703_v13, %v702_v12 }
 0x10b   : > { %v377_v15 = vadd.f32 %v704_v14, %v280_v11  ;;  %v705_v16 = vpop.f32.mrb[2].mxu0 }
 0x10c   : > { %v706_v17 = vpop.f32.mrb[3].mxu0 }
 0x10d   : > { %v707_v19 = vadd.f32 %v706_v17, %v705_v16  ;;  %v941_v20 = vadd.f32 %v461_v8, %v377_v15 }
 0x10f   : > { %v382_v21 = vadd.f32 %v707_v19, %v285_v18  ;;  %v708_v22 = vpop.f32.mrb[4].mxu0  ;;  %v497_v31 = vmul.f32 %v941_v20, %v941_v20  ;;  %v481_v35 = vsel %vm480_vm1, %v941_v20, 0.0 }
 0x110   : > { %v709_v24 = vpop.f32.mrb[5].mxu0 }
 0x111   : > { %v943_v25 = vadd.f32 %v732_v7, %v382_v21  ;;  %v710_v26 = vadd.f32 %v709_v24, %v708_v22  ;;  %v501_v43 = vsel %vm480_vm1, %v497_v31, 0.0 }
 0x113   : > { %v498_v27 = vmul.f32 %v943_v25, %v943_v25  ;;  %v711_v28 = vpop.f32.mrb[6].mxu0  ;;  %v387_v29 = vadd.f32 %v710_v26, %v290_v23  ;;  %v482_v34 = vsel %vm480_vm1, %v943_v25, 0.0 }
 0x114   : > { %v712_v30 = vpop.f32.mrb[7].mxu0  ;;  %v483_v41 = vadd.f32 %v482_v34, %v481_v35 }
 0x115   : > { %v713_v32 = vadd.f32 %v712_v30, %v711_v28  ;;  %v949_v33 = vadd.f32 %v471_v10, %v387_v29  ;;  %v502_v40 = vsel %vm480_vm1, %v498_v27, 0.0 }
 0x116   : > { %v503_v46 = vadd.f32 %v502_v40, %v501_v43 }
 0x117   : > { %v392_v37 = vadd.f32 %v713_v32, %v295_v36  ;;  %v499_v38 = vmul.f32 %v949_v33, %v949_v33  ;;  %v484_v39 = vsel %vm480_vm1, %v949_v33, 0.0 }
 0x118   : > { %v485_v45 = vadd.f32 %v484_v39, %v483_v41 }
 0x119   : > { %v960_v42 = vadd.f32 %v735_v9, %v392_v37  ;;  %v504_v44 = vsel %vm480_vm1, %v499_v38, 0.0 }
 0x11a   : > { %v505_v50 = vadd.f32 %v504_v44, %v503_v46 }
 0x11b   : > { %v486_v47 = vsel %vm480_vm1, %v960_v42, 0.0  ;;  %v500_v48 = vmul.f32 %v960_v42, %v960_v42 }
 0x11c   : > { %v487_v49 = vadd.f32 %v486_v47, %v485_v45 }
 0x11d   : > { %v506_v51 = vsel %vm480_vm1, %v500_v48, 0.0 }
 0x11e   : > { %488 = vadd.xlane.f32.xlu0 %v487_v49  ;;  %v507_v52 = vadd.f32 %v506_v51, %v505_v50 }
 0x120   : > { %508 = vadd.xlane.f32.xlu1 %v507_v52 }
 0x131   : > { %547 = vperm.xlu1 %794, %v537_v53  }
 0x134   : > { %542 = vperm.xlu0 %793, %v536_v54  }
 0x135   : > { %557 = vperm.xlu1 %794, %v539_v55  }
 0x138   : > { %552 = vperm.xlu0 %793, %v538_v56  }
 0x139   : > { %575 = vperm.xlu1 %794, %v565_v57  }
 0x13c   : > { %570 = vperm.xlu0 %793, %v564_v58  }
 0x13d   : > { %585 = vperm.xlu1 %794, %v567_v59  }
 0x140   : > { %580 = vperm.xlu0 %793, %v566_v60  }
 0x1ab   : > { %v489_v61 = vpop.xlane.xlu0 %488 }
 0x1ac   : > { %v490_v62 = vrot.slane %v489_v61, 4 }
 0x1ad   : > { %v509_v63 = vpop.xlane.xlu1 %508 }
 0x1ae   : > { %v491_v0 = vadd.f32 %v490_v62, %v489_v61  ;;  %v510_v1 = vrot.slane %v509_v63, 4 }
 0x1b0   : > { %v492_v2 = vrot.slane %v491_v0, 2  ;;  %v511_v3 = vadd.f32 %v510_v1, %v509_v63 }
 0x1b1   : > { %v548_v13 = vpop.permute.xlu1 %547 }
 0x1b2   : > { %v512_v4 = vrot.slane %v511_v3, 2  ;;  %v493_v5 = vadd.f32 %v492_v2, %v491_v0 }
 0x1b3   : > { %v543_v14 = vpop.permute.xlu0 %542 }
 0x1b4   : > { %v494_v6 = vrot.slane %v493_v5, 1  ;;  %v513_v7 = vadd.f32 %v512_v4, %v511_v3 }
 0x1b5   : > { %v558_v15 = vpop.permute.xlu1 %557 }
 0x1b6   : > { %v495_v8 = vadd.f32 %v494_v6, %v493_v5  ;;  %v514_v9 = vrot.slane %v513_v7, 1 }
 0x1b7   : > { %v553_v16 = vpop.permute.xlu0 %552 }
 0x1b8   : > { %777 = vpush %v495_v8  ;;  %v515_v10 = vadd.f32 %v514_v9, %v513_v7 }
 0x1b9   : > { %v576_v18 = vpop.permute.xlu1 %575 }
 0x1ba   : > { %779 = vpush %v515_v10 }
 0x1bb   : > { %v571_v19 = vpop.permute.xlu0 %570 }
 0x1bd   : > { %v586_v36 = vpop.permute.xlu1 %585 }
 0x1bf   : > { %v581_v37 = vpop.permute.xlu0 %580 }
 0x1e9   : > { %s778_s26 = spop %777 }
 0x1ea   : > { %s517_s27 = smul.f32 0.001953125, %s778_s26 }
 0x1eb   : > { %s780_s28 = spop %779 }
 0x1ec   : > { %s519_s29 = smul.f32 %s517_s27, %s517_s27  ;;  %v522_v17 = vstv %s517_s27 }
 0x1ed   : > { %s518_s30 = smul.f32 0.001953125, %s780_s28  ;;  %v523_v21 = vsub.f32 %v941_v20, %v522_v17  ;;  %v524_v22 = vsub.f32 %v943_v25, %v522_v17  ;;  %v525_v23 = vsub.f32 %v949_v33, %v522_v17  ;;  %v526_v24 = vsub.f32 %v960_v42, %v522_v17 }
 0x1ef   : > { %s520_s6 = ssub.f32 %s518_s30, %s519_s29 }
 0x1f1   : > { %s521_s8 = smax.f32 %s806_s7, %s520_s6 }
 0x1f2   : > { %s527_s9 = sadd.f32 1e-05, %s521_s8 }
 0x1f4   : > { %v528_v11 = vstv %s527_s9 }
 0x1f5   : > { %795 = vrsqrt.f32 %v528_v11 }
 0x1ff   : > { %v796_v12 = vpop.eup %795 }
 0x200   : > { %781 = vpush %v796_v12 }
 0x231   : > { %s782_s10 = spop %781 }
 0x232   : > { %v531_v26 = vstv %s782_s10 }
 0x233   : > { %v532_v27 = vmul.f32 %v531_v26, %v523_v21  ;;  %v533_v28 = vmul.f32 %v531_v26, %v524_v22  ;;  %v534_v29 = vmul.f32 %v531_v26, %v525_v23  ;;  %v535_v30 = vmul.f32 %v531_v26, %v526_v24 }
 0x235   : > { %v560_v31 = vmul.f32 %v543_v14, %v532_v27  ;;  %v561_v32 = vmul.f32 %v548_v13, %v533_v28  ;;  %v562_v34 = vmul.f32 %v553_v16, %v534_v29  ;;  %v563_v35 = vmul.f32 %v558_v15, %v535_v30 }
 0x237   : > { %v588_v20 = vadd.f32 %v571_v19, %v560_v31  ;;  %v589_v38 = vadd.f32 %v576_v18, %v561_v32  ;;  %v590_v25 = vadd.f32 %v581_v37, %v562_v34  ;;  %v591_v39 = vadd.f32 %v586_v36, %v563_v35 }
 0x239   : > { %v592_v33 = vmax.f32 %v588_v20, 0.0  ;;  %v593_v40 = vmax.f32 %v589_v38, 0.0  ;;  %v594_v41 = vmax.f32 %v590_v25, 0.0  ;;  %v595_v42 = vmax.f32 %v591_v39, 0.0 }
 0x23b   : > { %596 = vst.msk [vmem:[%s224_s14] sm:$0xff] %vm480_vm1, %v592_v33  ;;  %597 = vst.msk [vmem:[%s224_s14 + $0x8] sm:$0xff] %vm480_vm1, %v593_v40 }
 0x23c   : > { %598 = vst.msk [vmem:[%s224_s14 + $0x10] sm:$0xff] %vm480_vm1, %v594_v41  ;;  %599 = vst.msk [vmem:[%s224_s14 + $0x18] sm:$0xff] %vm480_vm1, %v595_v42 }
 0x23d PF: > { %s15_s18 = sadd.s32 1, %s803_s18  }
 0x23e   : > { %p12_p4 = scmp.ge.s32.totalorder %s15_s18, 4  }
 0x240   :  { %14 = sbr.rel (!%p12_p4) target bundleno = 1 (0x1), region = 70 }

// kernel: posterior_unet_forward.12
= control target key start
LH: loop header
LB: loop body
LE: loop exit
PB: predicated region body
PF: predicated region fallthrough
CT: control target
= control target key end

     0   :  { %s1059_s18 = smov 0   ;;  %s1342_s0 = inlined_call_operand.vmem [shape: f32[2,288,4], index: 0, kind: input, shape index: {}]   ;;  %s1343_s1 = inlined_call_operand.vmem [shape: f32[64,288], index: 1, kind: input, shape index: {}]   ;;  %s1344_s2 = inlined_call_operand.vmem [shape: f32[64,1], index: 2, kind: input, shape index: {}]   ;;  %s1345_s3 = inlined_call_operand.vmem [shape: f32[64,1], index: 3, kind: input, shape index: {}]   ;;  %s1346_s4 = inlined_call_operand.vmem [shape: f32[64,1], index: 4, kind: input, shape index: {}]   ;;  %s1347_s5 = inlined_call_operand.vmem [shape: f32[2,64,4], index: 5, kind: output, shape index: {}]  }
   0x1 LB: > { %s835_s19 = sadd.s32 4294967295, %s1025_s18   ;;  %p839_p0 = scmp.ge.s32.totalorder %s1025_s18, 1  ;;  %s1025_s18 = sphi %s1059_s18, %s15_s18  }
   0x2   : > { %p187_p1 = scmp.lt.s32.totalorder %s1025_s18, 3 }
   0x4   : > { %p188_p2 = pnand %p839_p0, %p187_p1 }
   0x5   : > { %p215_p3 = scmp.lt.s32.totalorder (!%p188_p2), %s835_s19, 1  ;;  %v262_v0 = vld [vmem:[%s1343_s1 + $0x8] sm:$0xff] (!%p188_p2)  ;;  %v280_v1 = vld [vmem:[%s1343_s1 + $0x98] sm:$0xff] (!%p188_p2)  ;;  %v1027_v2 = vmov (!%p188_p2), 0   ;;  %v285_v32 = vld [vmem:[%s1344_s2] sm:$0xff] (!%p188_p2)  ;;  %vm333_vm0 = vcmask (!%p188_p2), 261120  }
   0x6   : > { %191 = sbr.rel (%p188_p2) target bundleno = 587 (0x24b), region = 40  ;;  %422 = vmatprep.mubr.f32.mxu0 (!%p188_p2), %v262_v0  ;;  %452 = vmatprep.mubr.f32.mxu1 (!%p188_p2), %v280_v1  ;;  %v287_v33 = vld [vmem:[%s1344_s2 + $0x10] sm:$0xff] (!%p188_p2)  ;;  %v286_v36 = vld [vmem:[%s1344_s2 + $0x8] sm:$0xff] (!%p188_p2)  ;;  %v288_v37 = vld [vmem:[%s1344_s2 + $0x18] sm:$0xff] (!%p188_p2)  ;;  %vm568_vm1 = vcmask (!%p188_p2), 31744   ;;  %s1028_s9 = smov (!%p188_p2), 0.0  }
   0x7   : > { %1015 = vset.pattern.permute.xlu0 (!%p188_p2), %v1027_v2  ;;  %1016 = vset.pattern.permute.xlu1 (!%p188_p2), %v1027_v2  ;;  %v289_v44 = vld [vmem:[%s1344_s2 + $0x20] sm:$0xff] (!%p188_p2)  ;;  %v290_v45 = vld [vmem:[%s1344_s2 + $0x28] sm:$0xff] (!%p188_p2)  ;;  %v291_v52 = vld [vmem:[%s1344_s2 + $0x30] sm:$0xff] (!%p188_p2) }
   0x8   : > { %295 = vperm.xlu0 (!%p188_p2), %1015, %v285_v32   ;;  %305 = vperm.xlu1 (!%p188_p2), %1016, %v287_v33   ;;  %v292_v53 = vld [vmem:[%s1344_s2 + $0x38] sm:$0xff] (!%p188_p2)  ;;  %v261_v0 = vld [vmem:[%s1343_s1] sm:$0xff] (!%p188_p2)  ;;  %v279_v1 = vld [vmem:[%s1343_s1 + $0x90] sm:$0xff] (!%p188_p2) }
   0x9   : > { %v265_v2 = vld [vmem:[%s1343_s1 + $0x20] sm:$0xff] (!%p188_p2) }
   0xc   : > { %300 = vperm.xlu0 (!%p188_p2), %1015, %v286_v36   ;;  %310 = vperm.xlu1 (!%p188_p2), %1016, %v288_v37  }
   0xd   : > { %s1349_s19 = smov (!%p215_p3, %s835_s19), 1 }
   0xe   : > { %s998_s24 = smul.u32 288, %s1349_s19  ;;  %s853_s13 = sshll.u32 %s1349_s19, 6 }
   0xf   : > { %s224_s16 = scalar_lea.vmem %s1347_s5, %s853_s13 }
  0x10   : > { %s1079_s27 = scalar_lea.vmem %s1342_s0, %s998_s24  ;;  %315 = vperm.xlu0 %1015, %v289_v44   ;;  %320 = vperm.xlu1 %1016, %v290_v45  }
  0x11   : > { %v241_v3 = vld [vmem:[%s1079_s27 + $0x80] sm:$0xff]  ;;  %v242_v4 = vld [vmem:[%s1079_s27 + $0x88] sm:$0xff]  ;;  %v243_v8 = vld [vmem:[%s1079_s27 + $0x90] sm:$0xff] }
  0x12   : > { %v225_v5 = vld [vmem:[%s1079_s27] sm:$0xff]  ;;  %v942_v6 = vpack.c.bf16 %v242_v4, %v241_v3  ;;  %v226_v7 = vld [vmem:[%s1079_s27 + $0x8] sm:$0xff]  ;;  %v244_v9 = vld [vmem:[%s1079_s27 + $0x98] sm:$0xff] }
  0x13   : > { %v944_v10 = vpack.c.bf16 %v226_v7, %v225_v5  ;;  %v946_v11 = vpack.c.bf16 %v244_v9, %v243_v8  ;;  %v227_v12 = vld [vmem:[%s1079_s27 + $0x10] sm:$0xff]  ;;  %v228_v13 = vld [vmem:[%s1079_s27 + $0x18] sm:$0xff]  ;;  %v245_v14 = vld [vmem:[%s1079_s27 + $0xa0] sm:$0xff] }
  0x14   : > { %943 = vmatprep.subr.bf16.mxu0 %v942_v6  ;;  %982 = vmatprep.subr.bf16.mxu1 %v942_v6  ;;  %v246_v15 = vld [vmem:[%s1079_s27 + $0xa8] sm:$0xff]  ;;  %v948_v16 = vpack.c.bf16 %v228_v13, %v227_v12  ;;  %v229_v18 = vld [vmem:[%s1079_s27 + $0x20] sm:$0xff]  ;;  %v247_v20 = vld [vmem:[%s1079_s27 + $0xb0] sm:$0xff] }
  0x15   : > { %945 = vmatpush3.bf16.msra.mxu0 %v944_v10  ;;  %990 = vmatpush3.bf16.msra.mxu1 %v944_v10  ;;  %v950_v17 = vpack.c.bf16 %v246_v15, %v245_v14  ;;  %v230_v19 = vld [vmem:[%s1079_s27 + $0x28] sm:$0xff]  ;;  %v248_v21 = vld [vmem:[%s1079_s27 + $0xb8] sm:$0xff]  ;;  %v231_v24 = vld [vmem:[%s1079_s27 + $0x30] sm:$0xff] }
  0x16   : > { %947 = vmatprep.subr.bf16.mxu0 %v946_v11  ;;  %983 = vmatprep.subr.bf16.mxu1 %v946_v11  ;;  %v952_v22 = vpack.c.bf16 %v230_v19, %v229_v18  ;;  %v954_v23 = vpack.c.bf16 %v248_v21, %v247_v20  ;;  %v232_v25 = vld [vmem:[%s1079_s27 + $0x38] sm:$0xff]  ;;  %v249_v26 = vld [vmem:[%s1079_s27 + $0xc0] sm:$0xff]  ;;  %v250_v27 = vld [vmem:[%s1079_s27 + $0xc8] sm:$0xff] }
  0x17   : > { %v956_v28 = vpack.c.bf16 %v232_v25, %v231_v24  ;;  %v233_v29 = vld [vmem:[%s1079_s27 + $0x40] sm:$0xff]  ;;  %v958_v30 = vpack.c.bf16 %v250_v27, %v249_v26  ;;  %v234_v31 = vld [vmem:[%s1079_s27 + $0x48] sm:$0xff]  ;;  %v251_v34 = vld [vmem:[%s1079_s27 + $0xd0] sm:$0xff]  ;;  %325 = vperm.xlu0 %1015, %v291_v52   ;;  %330 = vperm.xlu1 %1016, %v292_v53  }
  0x18   : > { %v252_v35 = vld [vmem:[%s1079_s27 + $0xd8] sm:$0xff]  ;;  %v960_v38 = vpack.c.bf16 %v234_v31, %v233_v29  ;;  %v235_v40 = vld [vmem:[%s1079_s27 + $0x50] sm:$0xff]  ;;  %v253_v42 = vld [vmem:[%s1079_s27 + $0xe0] sm:$0xff] }
  0x19   : > { %949 = vmatpush3.bf16.msra.mxu0 %v948_v16  ;;  %991 = vmatpush3.bf16.msra.mxu1 %v948_v16  ;;  %v962_v39 = vpack.c.bf16 %v252_v35, %v251_v34  ;;  %v236_v41 = vld [vmem:[%s1079_s27 + $0x58] sm:$0xff]  ;;  %v254_v43 = vld [vmem:[%s1079_s27 + $0xe8] sm:$0xff]  ;;  %v237_v48 = vld [vmem:[%s1079_s27 + $0x60] sm:$0xff] }
  0x1a   : > { %951 = vmatprep.subr.bf16.mxu0 %v950_v17  ;;  %984 = vmatprep.subr.bf16.mxu1 %v950_v17  ;;  %v964_v46 = vpack.c.bf16 %v236_v41, %v235_v40  ;;  %v966_v47 = vpack.c.bf16 %v254_v43, %v253_v42  ;;  %v238_v49 = vld [vmem:[%s1079_s27 + $0x68] sm:$0xff]  ;;  %v255_v50 = vld [vmem:[%s1079_s27 + $0xf0] sm:$0xff]  ;;  %v256_v51 = vld [vmem:[%s1079_s27 + $0xf8] sm:$0xff] }
  0x1b   : > { %v968_v54 = vpack.c.bf16 %v238_v49, %v237_v48  ;;  %v970_v55 = vpack.c.bf16 %v256_v51, %v255_v50  ;;  %v239_v56 = vld [vmem:[%s1079_s27 + $0x70] sm:$0xff]  ;;  %v240_v57 = vld [vmem:[%s1079_s27 + $0x78] sm:$0xff]  ;;  %v257_v58 = vld [vmem:[%s1079_s27 + $0x100] sm:$0xff] }
  0x1c   : > { %v258_v59 = vld [vmem:[%s1079_s27 + $0x108] sm:$0xff]  ;;  %v972_v60 = vpack.c.bf16 %v240_v57, %v239_v56  ;;  %v259_v62 = vld [vmem:[%s1079_s27 + $0x110] sm:$0xff]  ;;  %v260_v63 = vld [vmem:[%s1079_s27 + $0x118] sm:$0xff] }
  0x1d   : > { %953 = vmatpush3.bf16.msra.mxu0 %v952_v22  ;;  %992 = vmatpush3.bf16.msra.mxu1 %v952_v22  ;;  %v974_v61 = vpack.c.bf16 %v258_v59, %v257_v58  ;;  %v978_v3 = vpack.c.bf16 %v260_v63, %v259_v62  ;;  %v283_v4 = vld [vmem:[%s1343_s1 + $0xb0] sm:$0xff]  ;;  %v264_v5 = vld [vmem:[%s1343_s1 + $0x18] sm:$0xff]  ;;  %v282_v6 = vld [vmem:[%s1343_s1 + $0xa8] sm:$0xff] }
  0x1e   : > { %955 = vmatprep.subr.bf16.mxu0 %v954_v23  ;;  %985 = vmatprep.subr.bf16.mxu1 %v954_v23  ;;  %v268_v7 = vld [vmem:[%s1343_s1 + $0x38] sm:$0xff]  ;;  %v263_v8 = vld [vmem:[%s1343_s1 + $0x10] sm:$0xff]  ;;  %v266_v10 = vld [vmem:[%s1343_s1 + $0x28] sm:$0xff] }
  0x1f   : > { %v267_v9 = vld [vmem:[%s1343_s1 + $0x30] sm:$0xff]  ;;  %v269_v12 = vld [vmem:[%s1343_s1 + $0x40] sm:$0xff]  ;;  %v270_v13 = vld [vmem:[%s1343_s1 + $0x48] sm:$0xff] }
  0x20   : > { %v271_v11 = vld [vmem:[%s1343_s1 + $0x50] sm:$0xff]  ;;  %v272_v14 = vld [vmem:[%s1343_s1 + $0x58] sm:$0xff]  ;;  %v274_v15 = vld [vmem:[%s1343_s1 + $0x68] sm:$0xff] }
  0x21   : > { %957 = vmatpush3.bf16.msra.mxu0 %v956_v28  ;;  %993 = vmatpush3.bf16.msra.mxu1 %v956_v28  ;;  %v275_v16 = vld [vmem:[%s1343_s1 + $0x70] sm:$0xff]  ;;  %v273_v17 = vld [vmem:[%s1343_s1 + $0x60] sm:$0xff]  ;;  %v278_v18 = vld [vmem:[%s1343_s1 + $0x88] sm:$0xff] }
  0x22   : > { %959 = vmatprep.subr.bf16.mxu0 %v958_v30  ;;  %986 = vmatprep.subr.bf16.mxu1 %v958_v30  ;;  %v277_v19 = vld [vmem:[%s1343_s1 + $0x80] sm:$0xff]  ;;  %v276_v21 = vld [vmem:[%s1343_s1 + $0x78] sm:$0xff] }
  0x23   : > { %v281_v20 = vld [vmem:[%s1343_s1 + $0xa0] sm:$0xff]  ;;  %v284_v22 = vld [vmem:[%s1343_s1 + $0xb8] sm:$0xff] }
  0x25   : > { %961 = vmatpush3.bf16.msra.mxu0 %v960_v38  ;;  %994 = vmatpush3.bf16.msra.mxu1 %v960_v38 }
  0x26   : > { %963 = vmatprep.subr.bf16.mxu0 %v962_v39  ;;  %987 = vmatprep.subr.bf16.mxu1 %v962_v39 }
  0x29   : > { %965 = vmatpush3.bf16.msra.mxu0 %v964_v46  ;;  %995 = vmatpush3.bf16.msra.mxu1 %v964_v46 }
  0x2a   : > { %967 = vmatprep.subr.bf16.mxu0 %v966_v47  ;;  %988 = vmatprep.subr.bf16.mxu1 %v966_v47 }
  0x2d   : > { %969 = vmatpush3.bf16.msra.mxu0 %v968_v54  ;;  %996 = vmatpush3.bf16.msra.mxu1 %v968_v54 }
  0x2e   : > { %971 = vmatprep.subr.bf16.mxu0 %v970_v55  ;;  %989 = vmatprep.subr.bf16.mxu1 %v970_v55 }
  0x31   : > { %973 = vmatpush3.bf16.msra.mxu0 %v972_v60  ;;  %997 = vmatpush3.bf16.msra.mxu1 %v972_v60 }
  0x32   : > { %975 = vmatprep.subr.bf16.mxu1 %v974_v61 }
  0x34   : > { %423 = vmatmul.mubr.f32.vlgmr.msra.gmra.mrb[0].mxu0 %v261_v0  ;;  %453 = vmatmul.mubr.f32.vlgmr.msra.gmra.mrb[0].mxu1 %v279_v1 }
  0x35   : > { %977 = vmatpush3.bf16.msra.mxu1 %v974_v61  ;;  %427 = vmatprep.mubr.f32.mxu0 %v265_v2 }
  0x36   : > { %457 = vmatprep.mubr.f32.mxu1 %v283_v4  ;;  %979 = vmatprep.subr.bf16.mxu1 %v978_v3 }
  0x38   : > { %428 = vmatmul.mubr.f32.gmra.mrb[2].mxu0 %v264_v5  ;;  %458 = vmatmul.mubr.f32.gmra.mrb[2].mxu1 %v282_v6 }
  0x39   : > { %981 = vmatpush3.bf16.msra.mxu1 %v978_v3  ;;  %432 = vmatprep.mubr.f32.mxu0 %v268_v7 }
  0x3a   : > { %930 = vmatprep.mubr.msk.f32.mxu1 %vm333_vm0, %v263_v8 }
  0x3c   : > { %433 = vmatmul.mubr.f32.gmra.mrb[4].mxu0 %v267_v9  ;;  %931 = vmatmul.mubr.msk.f32.vlgmr.msra.gmra.mrb[4].mxu1 %vm333_vm0, %v266_v10 }
  0x3d   : > { %437 = vmatprep.mubr.f32.mxu0 %v271_v11  ;;  %933 = vmatprep.mubr.msk.f32.mxu1 %vm333_vm0, %v269_v12 }
  0x40   : > { %438 = vmatmul.mubr.f32.gmra.mrb[6].mxu0 %v270_v13  ;;  %934 = vmatmul.mubr.msk.f32.gmra.mrb[6].mxu1 %vm333_vm0, %v272_v14 }
  0x41   : > { %442 = vmatprep.mubr.f32.mxu0 %v274_v15  ;;  %936 = vmatprep.mubr.msk.f32.mxu1 %vm333_vm0, %v275_v16 }
  0x44   : > { %443 = vmatmul.mubr.f32.gmra.mrb[8].mxu0 %v273_v17  ;;  %937 = vmatmul.mubr.msk.f32.gmra.mrb[8].mxu1 %vm333_vm0, %v278_v18 }
  0x45   : > { %447 = vmatprep.mubr.f32.mxu0 %v277_v19  ;;  %939 = vmatprep.mubr.msk.f32.mxu1 %vm333_vm0, %v281_v20 }
  0x48   : > { %448 = vmatmul.mubr.f32.gmra.mrb[10].mxu0 %v276_v21  ;;  %940 = vmatmul.mubr.msk.f32.gmra.mrb[10].mxu1 %vm333_vm0, %v284_v22 }
  0x87   : > { %v296_v23 = vpop.permute.xlu0 %295  ;;  %v306_v24 = vpop.permute.xlu1 %305 }
  0x8b   : > { %v301_v25 = vpop.permute.xlu0 %300  ;;  %v311_v26 = vpop.permute.xlu1 %310 }
  0x8f   : > { %v316_v39 = vpop.permute.xlu0 %315  ;;  %v321_v40 = vpop.permute.xlu1 %320 }
  0x96   : > { %v326_v56 = vpop.permute.xlu0 %325  ;;  %v331_v58 = vpop.permute.xlu1 %330 }
 0x107   : > { %v886_v27 = vpop.f32.mrb[0].mxu0  ;;  %v904_v28 = vpop.f32.mrb[0].mxu1 }
 0x108   : > { %v887_v29 = vpop.f32.mrb[1].mxu0  ;;  %v905_v30 = vpop.f32.mrb[1].mxu1 }
 0x109   : > { %v888_v31 = vadd.f32 %v887_v29, %v886_v27  ;;  %v906_v32 = vadd.f32 %v905_v30, %v904_v28 }
 0x10b   : > { %v889_v33 = vpop.f32.mrb[2].mxu0  ;;  %v907_v34 = vpop.f32.mrb[2].mxu1  ;;  %v425_v44 = vadd.f32 %v888_v31, %v296_v23  ;;  %v455_v7 = vadd.f32 %v906_v32, %v326_v56  ;;  %v652_v56 = vld [vmem:[%s1345_s3] sm:$0xff] }
 0x10c   : > { %v890_v35 = vpop.f32.mrb[3].mxu0  ;;  %v908_v36 = vpop.f32.mrb[3].mxu1 }
 0x10d   : > { %v891_v37 = vadd.f32 %v890_v35, %v889_v33  ;;  %v909_v38 = vadd.f32 %v908_v36, %v907_v34 }
 0x10f   : > { %v892_v41 = vpop.f32.mrb[4].mxu0  ;;  %v430_v42 = vadd.f32 %v891_v37, %v301_v25  ;;  %v932_v43 = vpop.f32.mrb[4].mxu1  ;;  %v460_v9 = vadd.f32 %v909_v38, %v331_v58  ;;  %v654_v58 = vld [vmem:[%s1345_s3 + $0x10] sm:$0xff] }
 0x110   : > { %v893_v45 = vpop.f32.mrb[5].mxu0  ;;  %v529_v46 = vpop.f32.mrb[5].mxu1 }
 0x111   : > { %v1215_v47 = vadd.f32 %v932_v43, %v430_v42  ;;  %v894_v48 = vadd.f32 %v893_v45, %v892_v41  ;;  %v1217_v49 = vadd.f32 %v529_v46, %v425_v44 }
 0x113   : > { %v895_v50 = vpop.f32.mrb[6].mxu0  ;;  %v935_v51 = vpop.f32.mrb[6].mxu1  ;;  %v435_v53 = vadd.f32 %v894_v48, %v306_v24  ;;  %v594_v57 = vmul.f32 %v1215_v47, %v1215_v47  ;;  %v593_v60 = vmul.f32 %v1217_v49, %v1217_v49  ;;  %v570_v3 = vsel %vm568_vm1, %v1215_v47, 0.0 }
 0x114   : > { %v896_v52 = vpop.f32.mrb[7].mxu0  ;;  %v539_v54 = vpop.f32.mrb[7].mxu1  ;;  %v569_v4 = vsel %vm568_vm1, %v1217_v49, 0.0 }
 0x115   : > { %v897_v55 = vadd.f32 %v896_v52, %v895_v50  ;;  %v1221_v59 = vadd.f32 %v539_v54, %v435_v53  ;;  %v602_v8 = vsel %vm568_vm1, %v594_v57, 0.0  ;;  %v601_v10 = vsel %vm568_vm1, %v593_v60, 0.0  ;;  %v655_v57 = vld [vmem:[%s1345_s3 + $0x18] sm:$0xff]  ;;  %v657_v60 = vld [vmem:[%s1345_s3 + $0x28] sm:$0xff] }
 0x116   : > { %v571_v16 = vadd.f32 %v570_v3, %v569_v4  ;;  %v603_v25 = vadd.f32 %v602_v8, %v601_v10  ;;  %v710_v3 = vld [vmem:[%s1346_s4 + $0x10] sm:$0xff]  ;;  %v713_v4 = vld [vmem:[%s1346_s4 + $0x28] sm:$0xff] }
 0x117   : > { %v440_v61 = vadd.f32 %v897_v55, %v311_v26  ;;  %v898_v62 = vpop.f32.mrb[8].mxu0  ;;  %v938_v63 = vpop.f32.mrb[8].mxu1  ;;  %v595_v0 = vmul.f32 %v1221_v59, %v1221_v59  ;;  %v572_v12 = vsel %vm568_vm1, %v1221_v59, 0.0  ;;  %v653_v55 = vld [vmem:[%s1345_s3 + $0x8] sm:$0xff]  ;;  %v714_v8 = vld [vmem:[%s1346_s4 + $0x30] sm:$0xff] }
 0x118   : > { %v899_v1 = vpop.f32.mrb[9].mxu0  ;;  %v549_v2 = vpop.f32.mrb[9].mxu1  ;;  %v573_v26 = vadd.f32 %v572_v12, %v571_v16 }
 0x119   : > { %v1231_v5 = vadd.f32 %v935_v51, %v440_v61  ;;  %v900_v6 = vadd.f32 %v899_v1, %v898_v62  ;;  %v604_v17 = vsel %vm568_vm1, %v595_v0, 0.0  ;;  %v656_v61 = vld [vmem:[%s1345_s3 + $0x20] sm:$0xff]  ;;  %v659_v62 = vld [vmem:[%s1345_s3 + $0x38] sm:$0xff]  ;;  %v709_v0 = vld [vmem:[%s1346_s4 + $0x8] sm:$0xff] }
 0x11a   : > { %v605_v31 = vadd.f32 %v604_v17, %v603_v25  ;;  %v708_v1 = vld [vmem:[%s1346_s4] sm:$0xff] }
 0x11b   : > { %v596_v11 = vmul.f32 %v1231_v5, %v1231_v5  ;;  %v445_v13 = vadd.f32 %v900_v6, %v316_v39  ;;  %v901_v14 = vpop.f32.mrb[10].mxu0  ;;  %v941_v15 = vpop.f32.mrb[10].mxu1  ;;  %v574_v22 = vsel %vm568_vm1, %v1231_v5, 0.0  ;;  %v712_v6 = vld [vmem:[%s1346_s4 + $0x20] sm:$0xff] }
 0x11c   : > { %v1240_v18 = vadd.f32 %v941_v15, %v460_v9  ;;  %v902_v19 = vpop.f32.mrb[11].mxu0  ;;  %v559_v20 = vpop.f32.mrb[11].mxu1  ;;  %v575_v32 = vadd.f32 %v574_v22, %v573_v26 }
 0x11d   : > { %v1242_v21 = vadd.f32 %v549_v2, %v445_v13  ;;  %v903_v23 = vadd.f32 %v902_v19, %v901_v14  ;;  %v1246_v24 = vadd.f32 %v559_v20, %v455_v7  ;;  %v606_v30 = vsel %vm568_vm1, %v596_v11, 0.0  ;;  %v711_v2 = vld [vmem:[%s1346_s4 + $0x18] sm:$0xff] }
 0x11e   : > { %v607_v36 = vadd.f32 %v606_v30, %v605_v31  ;;  %v600_v43 = vmul.f32 %v1240_v18, %v1240_v18  ;;  %v582_v48 = vsel %vm568_vm1, %v1240_v18, 0.0  ;;  %v715_v7 = vld [vmem:[%s1346_s4 + $0x38] sm:$0xff] }
 0x11f   : > { %v576_v27 = vsel %vm568_vm1, %v1242_v21, 0.0  ;;  %v597_v28 = vmul.f32 %v1242_v21, %v1242_v21  ;;  %v450_v29 = vadd.f32 %v903_v23, %v321_v40  ;;  %v599_v37 = vmul.f32 %v1246_v24, %v1246_v24 }
 0x120   : > { %v577_v35 = vadd.f32 %v576_v27, %v575_v32  ;;  %v580_v42 = vsel %vm568_vm1, %v1246_v24, 0.0  ;;  %v614_v53 = vsel %vm568_vm1, %v600_v43, 0.0 }
 0x121   : > { %v608_v33 = vsel %vm568_vm1, %v597_v28, 0.0  ;;  %v1254_v34 = vadd.f32 %v938_v63, %v450_v29  ;;  %v612_v50 = vsel %vm568_vm1, %v599_v37, 0.0  ;;  %v658_v63 = vld [vmem:[%s1345_s3 + $0x30] sm:$0xff] }
 0x122   : > { %v609_v41 = vadd.f32 %v608_v33, %v607_v36 }
 0x123   : > { %v578_v38 = vsel %vm568_vm1, %v1254_v34, 0.0  ;;  %v598_v39 = vmul.f32 %v1254_v34, %v1254_v34 }
 0x124   : > { %v579_v40 = vadd.f32 %v578_v38, %v577_v35 }
 0x125   : > { %v610_v44 = vsel %vm568_vm1, %v598_v39, 0.0 }
 0x126   : > { %v581_v45 = vadd.f32 %v580_v42, %v579_v40  ;;  %v611_v46 = vadd.f32 %v610_v44, %v609_v41 }
 0x128   : > { %v583_v51 = vadd.f32 %v582_v48, %v581_v45  ;;  %v613_v52 = vadd.f32 %v612_v50, %v611_v46 }
 0x12a   : > { %584 = vadd.xlane.f32.xlu0 %v583_v51  ;;  %v615_v54 = vadd.f32 %v614_v53, %v613_v52 }
 0x12c   : > { %616 = vadd.xlane.f32.xlu1 %v615_v54 }
 0x13d   : > { %667 = vperm.xlu1 %1016, %v653_v55  }
 0x140   : > { %662 = vperm.xlu0 %1015, %v652_v56  }
 0x141   : > { %677 = vperm.xlu1 %1016, %v655_v57  }
 0x144   : > { %672 = vperm.xlu0 %1015, %v654_v58  }
 0x145   : > { %687 = vperm.xlu1 %1016, %v657_v60  }
 0x148   : > { %682 = vperm.xlu0 %1015, %v656_v61  }
 0x149   : > { %697 = vperm.xlu1 %1016, %v659_v62  }
 0x14c   : > { %692 = vperm.xlu0 %1015, %v658_v63  }
 0x14d   : > { %723 = vperm.xlu1 %1016, %v709_v0  }
 0x150   : > { %718 = vperm.xlu0 %1015, %v708_v1  }
 0x151   : > { %733 = vperm.xlu1 %1016, %v711_v2  }
 0x154   : > { %728 = vperm.xlu0 %1015, %v710_v3  }
 0x155   : > { %743 = vperm.xlu1 %1016, %v713_v4  }
 0x158   : > { %738 = vperm.xlu0 %1015, %v712_v6  }
 0x159   : > { %753 = vperm.xlu1 %1016, %v715_v7  }
 0x15c   : > { %748 = vperm.xlu0 %1015, %v714_v8  }
 0x1b7   : > { %v585_v9 = vpop.xlane.xlu0 %584 }
 0x1b8   : > { %v586_v10 = vrot.slane %v585_v9, 4 }
 0x1b9   : > { %v617_v11 = vpop.xlane.xlu1 %616 }
 0x1ba   : > { %v587_v12 = vadd.f32 %v586_v10, %v585_v9  ;;  %v618_v13 = vrot.slane %v617_v11, 4 }
 0x1bc   : > { %v588_v14 = vrot.slane %v587_v12, 2  ;;  %v619_v15 = vadd.f32 %v618_v13, %v617_v11 }
 0x1bd   : > { %v668_v28 = vpop.permute.xlu1 %667 }
 0x1be   : > { %v620_v16 = vrot.slane %v619_v15, 2  ;;  %v589_v17 = vadd.f32 %v588_v14, %v587_v12 }
 0x1bf   : > { %v663_v29 = vpop.permute.xlu0 %662 }
 0x1c0   : > { %v590_v19 = vrot.slane %v589_v17, 1  ;;  %v621_v20 = vadd.f32 %v620_v16, %v619_v15 }
 0x1c1   : > { %v678_v30 = vpop.permute.xlu1 %677 }
 0x1c2   : > { %v591_v22 = vadd.f32 %v590_v19, %v589_v17  ;;  %v622_v23 = vrot.slane %v621_v20, 1 }
 0x1c3   : > { %v673_v31 = vpop.permute.xlu0 %672 }
 0x1c4   : > { %999 = vpush %v591_v22  ;;  %v623_v25 = vadd.f32 %v622_v23, %v621_v20 }
 0x1c5   : > { %v688_v32 = vpop.permute.xlu1 %687 }
 0x1c6   : > { %1001 = vpush %v623_v25 }
 0x1c7   : > { %v683_v33 = vpop.permute.xlu0 %682 }
 0x1c9   : > { %v698_v35 = vpop.permute.xlu1 %697 }
 0x1cb   : > { %v693_v36 = vpop.permute.xlu0 %692 }
 0x1cd   : > { %v724_v37 = vpop.permute.xlu1 %723 }
 0x1cf   : > { %v719_v38 = vpop.permute.xlu0 %718 }
 0x1d1   : > { %v734_v39 = vpop.permute.xlu1 %733 }
 0x1d3   : > { %v729_v40 = vpop.permute.xlu0 %728 }
 0x1d5   : > { %v744_v43 = vpop.permute.xlu1 %743 }
 0x1d7   : > { %v739_v44 = vpop.permute.xlu0 %738 }
 0x1d9   : > { %v754_v1 = vpop.permute.xlu1 %753 }
 0x1f5   : > { %s1000_s29 = spop %999 }
 0x1f6   : > { %s625_s27 = smul.f32 0.00390625, %s1000_s29 }
 0x1f7   : > { %s1002_s30 = spop %1001 }
 0x1f8   : > { %s627_s6 = smul.f32 %s625_s27, %s625_s27  ;;  %v630_v41 = vstv %s625_s27 }
 0x1f9   : > { %s626_s7 = smul.f32 0.00390625, %s1002_s30  ;;  %v631_v42 = vsub.f32 %v1217_v49, %v630_v41  ;;  %v632_v45 = vsub.f32 %v1215_v47, %v630_v41  ;;  %v633_v46 = vsub.f32 %v1221_v59, %v630_v41  ;;  %v634_v48 = vsub.f32 %v1231_v5, %v630_v41 }
 0x1fa   : > { %v635_v50 = vsub.f32 %v1242_v21, %v630_v41  ;;  %v636_v51 = vsub.f32 %v1254_v34, %v630_v41  ;;  %v637_v52 = vsub.f32 %v1246_v24, %v630_v41  ;;  %v638_v53 = vsub.f32 %v1240_v18, %v630_v41  ;;  %v749_v18 = vpop.permute.xlu0 %748 }
 0x1fb   : > { %s628_s8 = ssub.f32 %s626_s7, %s627_s6 }
 0x1fd   : > { %s629_s10 = smax.f32 %s1028_s9, %s628_s8 }
 0x1fe   : > { %s639_s11 = sadd.f32 1e-05, %s629_s10 }
 0x200   : > { %v640_v26 = vstv %s639_s11 }
 0x201   : > { %1017 = vrsqrt.f32 %v640_v26 }
 0x20b   : > { %v1018_v27 = vpop.eup %1017 }
 0x20c   : > { %1003 = vpush %v1018_v27 }
 0x23d   : > { %s1004_s12 = spop %1003 }
 0x23e   : > { %v643_v54 = vstv %s1004_s12 }
 0x23f   : > { %v644_v49 = vmul.f32 %v643_v54, %v631_v42  ;;  %v645_v55 = vmul.f32 %v643_v54, %v632_v45  ;;  %v646_v56 = vmul.f32 %v643_v54, %v633_v46  ;;  %v647_v57 = vmul.f32 %v643_v54, %v634_v48 }
 0x240   : > { %v648_v47 = vmul.f32 %v643_v54, %v635_v50  ;;  %v649_v58 = vmul.f32 %v643_v54, %v636_v51  ;;  %v650_v59 = vmul.f32 %v643_v54, %v637_v52  ;;  %v651_v60 = vmul.f32 %v643_v54, %v638_v53 }
 0x241   : > { %v700_v5 = vmul.f32 %v663_v29, %v644_v49  ;;  %v701_v61 = vmul.f32 %v668_v28, %v645_v55  ;;  %v702_v21 = vmul.f32 %v673_v31, %v646_v56  ;;  %v703_v62 = vmul.f32 %v678_v30, %v647_v57 }
 0x242   : > { %v704_v63 = vmul.f32 %v683_v33, %v648_v47  ;;  %v705_v34 = vmul.f32 %v688_v32, %v649_v58  ;;  %v706_v0 = vmul.f32 %v693_v36, %v650_v59  ;;  %v707_v24 = vmul.f32 %v698_v35, %v651_v60 }
 0x243   : > { %v756_v2 = vadd.f32 %v719_v38, %v700_v5  ;;  %v757_v3 = vadd.f32 %v724_v37, %v701_v61  ;;  %v758_v4 = vadd.f32 %v729_v40, %v702_v21  ;;  %v759_v6 = vadd.f32 %v734_v39, %v703_v62 }
 0x244   : > { %v760_v7 = vadd.f32 %v739_v44, %v704_v63  ;;  %v761_v8 = vadd.f32 %v744_v43, %v705_v34  ;;  %v762_v9 = vadd.f32 %v749_v18, %v706_v0  ;;  %v763_v10 = vadd.f32 %v754_v1, %v707_v24 }
 0x245   : > { %v764_v11 = vmax.f32 %v756_v2, 0.0  ;;  %v765_v12 = vmax.f32 %v757_v3, 0.0  ;;  %v766_v13 = vmax.f32 %v758_v4, 0.0  ;;  %v767_v14 = vmax.f32 %v759_v6, 0.0 }
 0x246   : > { %v768_v15 = vmax.f32 %v760_v7, 0.0  ;;  %v769_v16 = vmax.f32 %v761_v8, 0.0  ;;  %v770_v17 = vmax.f32 %v762_v9, 0.0  ;;  %v771_v19 = vmax.f32 %v763_v10, 0.0 }
 0x247   : > { %772 = vst.msk [vmem:[%s224_s16] sm:$0xff] %vm568_vm1, %v764_v11  ;;  %773 = vst.msk [vmem:[%s224_s16 + $0x8] sm:$0xff] %vm568_vm1, %v765_v12 }
 0x248   : > { %774 = vst.msk [vmem:[%s224_s16 + $0x10] sm:$0xff] %vm568_vm1, %v766_v13  ;;  %775 = vst.msk [vmem:[%s224_s16 + $0x18] sm:$0xff] %vm568_vm1, %v767_v14 }
 0x249   : > { %776 = vst.msk [vmem:[%s224_s16 + $0x20] sm:$0xff] %vm568_vm1, %v768_v15  ;;  %777 = vst.msk [vmem:[%s224_s16 + $0x28] sm:$0xff] %vm568_vm1, %v769_v16 }
 0x24a   : > { %778 = vst.msk [vmem:[%s224_s16 + $0x30] sm:$0xff] %vm568_vm1, %v770_v17  ;;  %779 = vst.msk [vmem:[%s224_s16 + $0x38] sm:$0xff] %vm568_vm1, %v771_v19 }
 0x24b PF: > { %s15_s18 = sadd.s32 1, %s1025_s18  }
 0x24c   : > { %p12_p4 = scmp.ge.s32.totalorder %s15_s18, 4  }
 0x24e   :  { %14 = sbr.rel (!%p12_p4) target bundleno = 1 (0x1), region = 70 }

// kernel: posterior_unet_forward.13
= control target key start
LH: loop header
LB: loop body
LE: loop exit
PB: predicated region body
PF: predicated region fallthrough
CT: control target
= control target key end

     0   :  { %s1192_s18 = smov 0   ;;  %s1562_s0 = inlined_call_operand.vmem [shape: f32[2,576,1], index: 0, kind: input, shape index: {}]   ;;  %s1563_s1 = inlined_call_operand.vmem [shape: f32[64,576], index: 1, kind: input, shape index: {}]   ;;  %s1564_s2 = inlined_call_operand.vmem [shape: f32[64,1], index: 2, kind: input, shape index: {}]   ;;  %s1565_s3 = inlined_call_operand.vmem [shape: f32[64,1], index: 3, kind: input, shape index: {}]   ;;  %s1566_s4 = inlined_call_operand.vmem [shape: f32[64,1], index: 4, kind: input, shape index: {}]   ;;  %s1567_s5 = inlined_call_operand.vmem [shape: f32[2,64,1], index: 5, kind: output, shape index: {}]  }
   0x1 LB: > { %s872_s19 = sadd.s32 4294967295, %s1159_s18   ;;  %p876_p0 = scmp.ge.s32.totalorder %s1159_s18, 1  ;;  %s1159_s18 = sphi %s1192_s18, %s15_s18  }
   0x2   : > { %p187_p1 = scmp.lt.s32.totalorder %s1159_s18, 3 }
   0x4   : > { %p188_p2 = pnand %p876_p0, %p187_p1 }
   0x5   : > { %p215_p3 = scmp.lt.s32.totalorder (!%p188_p2), %s872_s19, 1  ;;  %v298_v0 = vld [vmem:[%s1563_s1 + $0x8] sm:$0xff] (!%p188_p2)  ;;  %v300_v1 = vld [vmem:[%s1563_s1 + $0x18] sm:$0xff] (!%p188_p2)  ;;  %vm345_vm0 = vcmask (!%p188_p2), 523264   ;;  %vm685_vm1 = vcmask (!%p188_p2), 7168   ;;  %s1161_s9 = smov (!%p188_p2), 0.0  }
   0x6   : > { %191 = sbr.rel (%p188_p2) target bundleno = 607 (0x25f), region = 40  ;;  %434 = vmatprep.mubr.f32.mxu0 (!%p188_p2), %v298_v0  ;;  %539 = vmatprep.mubr.f32.mxu1 (!%p188_p2), %v300_v1 }
   0xd   : > { %s1569_s19 = smov (!%p215_p3, %s872_s19), 1 }
   0xe   : > { %s1135_s24 = smul.u32 576, %s1569_s19  ;;  %s890_s16 = sshll.u32 %s1569_s19, 6 }
   0xf   : > { %s224_s26 = scalar_lea.vmem %s1567_s5, %s890_s16 }
  0x10   : > { %s1212_s27 = scalar_lea.vmem %s1562_s0, %s1135_s24 }
  0x11   : > { %v241_v2 = vld [vmem:[%s1212_s27 + $0x80] sm:$0xff]  ;;  %v242_v3 = vld [vmem:[%s1212_s27 + $0x88] sm:$0xff]  ;;  %v243_v13 = vld [vmem:[%s1212_s27 + $0x90] sm:$0xff] }
  0x12   : > { %v273_v4 = vld [vmem:[%s1212_s27 + $0x180] sm:$0xff]  ;;  %v1047_v5 = vpack.c.bf16 %v242_v3, %v241_v2  ;;  %v274_v6 = vld [vmem:[%s1212_s27 + $0x188] sm:$0xff]  ;;  %v244_v15 = vld [vmem:[%s1212_s27 + $0x98] sm:$0xff] }
  0x13   : > { %v225_v7 = vld [vmem:[%s1212_s27] sm:$0xff]  ;;  %v226_v8 = vld [vmem:[%s1212_s27 + $0x8] sm:$0xff]  ;;  %v1079_v9 = vpack.c.bf16 %v274_v6, %v273_v4  ;;  %v275_v16 = vld [vmem:[%s1212_s27 + $0x190] sm:$0xff]  ;;  %v1051_v18 = vpack.c.bf16 %v244_v15, %v243_v13 }
  0x14   : > { %v1049_v10 = vpack.c.bf16 %v226_v8, %v225_v7  ;;  %v257_v11 = vld [vmem:[%s1212_s27 + $0x100] sm:$0xff]  ;;  %v258_v12 = vld [vmem:[%s1212_s27 + $0x108] sm:$0xff]  ;;  %1048 = vmatprep.subr.bf16.mxu0 %v1047_v5  ;;  %v276_v17 = vld [vmem:[%s1212_s27 + $0x198] sm:$0xff] }
  0x15   : > { %v1081_v14 = vpack.c.bf16 %v258_v12, %v257_v11  ;;  %1080 = vmatprep.subr.bf16.mxu1 %v1079_v9  ;;  %v1083_v19 = vpack.c.bf16 %v276_v17, %v275_v16  ;;  %v227_v20 = vld [vmem:[%s1212_s27 + $0x10] sm:$0xff]  ;;  %v228_v21 = vld [vmem:[%s1212_s27 + $0x18] sm:$0xff]  ;;  %v245_v25 = vld [vmem:[%s1212_s27 + $0xa0] sm:$0xff] }
  0x16   : > { %1050 = vmatpush3.bf16.msra.mxu0 %v1049_v10  ;;  %v259_v22 = vld [vmem:[%s1212_s27 + $0x110] sm:$0xff]  ;;  %v1053_v23 = vpack.c.bf16 %v228_v21, %v227_v20  ;;  %v260_v24 = vld [vmem:[%s1212_s27 + $0x118] sm:$0xff]  ;;  %v246_v26 = vld [vmem:[%s1212_s27 + $0xa8] sm:$0xff] }
  0x17   : > { %1082 = vmatpush3.bf16.msra.mxu1 %v1081_v14  ;;  %1052 = vmatprep.subr.bf16.mxu0 %v1051_v18  ;;  %v1085_v27 = vpack.c.bf16 %v260_v24, %v259_v22  ;;  %v1055_v28 = vpack.c.bf16 %v246_v26, %v245_v25  ;;  %v277_v29 = vld [vmem:[%s1212_s27 + $0x1a0] sm:$0xff]  ;;  %v278_v30 = vld [vmem:[%s1212_s27 + $0x1a8] sm:$0xff]  ;;  %v247_v37 = vld [vmem:[%s1212_s27 + $0xb0] sm:$0xff] }
  0x18   : > { %1084 = vmatprep.subr.bf16.mxu1 %v1083_v19  ;;  %v229_v31 = vld [vmem:[%s1212_s27 + $0x20] sm:$0xff]  ;;  %v1087_v32 = vpack.c.bf16 %v278_v30, %v277_v29  ;;  %v230_v33 = vld [vmem:[%s1212_s27 + $0x28] sm:$0xff]  ;;  %v248_v38 = vld [vmem:[%s1212_s27 + $0xb8] sm:$0xff] }
  0x19   : > { %v261_v34 = vld [vmem:[%s1212_s27 + $0x120] sm:$0xff]  ;;  %v262_v35 = vld [vmem:[%s1212_s27 + $0x128] sm:$0xff]  ;;  %v1057_v36 = vpack.c.bf16 %v230_v33, %v229_v31  ;;  %v279_v39 = vld [vmem:[%s1212_s27 + $0x1b0] sm:$0xff]  ;;  %v1059_v41 = vpack.c.bf16 %v248_v38, %v247_v37 }
  0x1a   : > { %1054 = vmatpush3.bf16.msra.mxu0 %v1053_v23  ;;  %v1089_v40 = vpack.c.bf16 %v262_v35, %v261_v34  ;;  %v280_v42 = vld [vmem:[%s1212_s27 + $0x1b8] sm:$0xff]  ;;  %v231_v43 = vld [vmem:[%s1212_s27 + $0x30] sm:$0xff]  ;;  %v249_v48 = vld [vmem:[%s1212_s27 + $0xc0] sm:$0xff] }
  0x1b   : > { %1086 = vmatpush3.bf16.msra.mxu1 %v1085_v27  ;;  %1056 = vmatprep.subr.bf16.mxu0 %v1055_v28  ;;  %v232_v44 = vld [vmem:[%s1212_s27 + $0x38] sm:$0xff]  ;;  %v1091_v45 = vpack.c.bf16 %v280_v42, %v279_v39  ;;  %v263_v46 = vld [vmem:[%s1212_s27 + $0x130] sm:$0xff]  ;;  %v250_v49 = vld [vmem:[%s1212_s27 + $0xc8] sm:$0xff] }
  0x1c   : > { %1088 = vmatprep.subr.bf16.mxu1 %v1087_v32  ;;  %v264_v47 = vld [vmem:[%s1212_s27 + $0x138] sm:$0xff]  ;;  %v281_v50 = vld [vmem:[%s1212_s27 + $0x1c0] sm:$0xff]  ;;  %v282_v51 = vld [vmem:[%s1212_s27 + $0x1c8] sm:$0xff]  ;;  %v1061_v52 = vpack.c.bf16 %v232_v44, %v231_v43  ;;  %v1063_v54 = vpack.c.bf16 %v250_v49, %v249_v48 }
  0x1d   : > { %v1093_v53 = vpack.c.bf16 %v264_v47, %v263_v46  ;;  %v233_v55 = vld [vmem:[%s1212_s27 + $0x40] sm:$0xff]  ;;  %v234_v56 = vld [vmem:[%s1212_s27 + $0x48] sm:$0xff]  ;;  %v1095_v58 = vpack.c.bf16 %v282_v51, %v281_v50  ;;  %v251_v60 = vld [vmem:[%s1212_s27 + $0xd0] sm:$0xff] }
  0x1e   : > { %1058 = vmatpush3.bf16.msra.mxu0 %v1057_v36  ;;  %v265_v57 = vld [vmem:[%s1212_s27 + $0x140] sm:$0xff]  ;;  %v266_v59 = vld [vmem:[%s1212_s27 + $0x148] sm:$0xff]  ;;  %v252_v61 = vld [vmem:[%s1212_s27 + $0xd8] sm:$0xff]  ;;  %v1065_v0 = vpack.c.bf16 %v234_v56, %v233_v55 }
  0x1f   : > { %1090 = vmatpush3.bf16.msra.mxu1 %v1089_v40  ;;  %1060 = vmatprep.subr.bf16.mxu0 %v1059_v41  ;;  %v283_v62 = vld [vmem:[%s1212_s27 + $0x1d0] sm:$0xff]  ;;  %v284_v63 = vld [vmem:[%s1212_s27 + $0x1d8] sm:$0xff]  ;;  %v1097_v1 = vpack.c.bf16 %v266_v59, %v265_v57  ;;  %v1067_v2 = vpack.c.bf16 %v252_v61, %v251_v60  ;;  %v253_v8 = vld [vmem:[%s1212_s27 + $0xe0] sm:$0xff] }
  0x20   : > { %1092 = vmatprep.subr.bf16.mxu1 %v1091_v45  ;;  %v235_v3 = vld [vmem:[%s1212_s27 + $0x50] sm:$0xff]  ;;  %v236_v4 = vld [vmem:[%s1212_s27 + $0x58] sm:$0xff]  ;;  %v1099_v6 = vpack.c.bf16 %v284_v63, %v283_v62  ;;  %v254_v9 = vld [vmem:[%s1212_s27 + $0xe8] sm:$0xff] }
  0x21   : > { %v267_v5 = vld [vmem:[%s1212_s27 + $0x150] sm:$0xff]  ;;  %v268_v7 = vld [vmem:[%s1212_s27 + $0x158] sm:$0xff]  ;;  %v285_v10 = vld [vmem:[%s1212_s27 + $0x1e0] sm:$0xff]  ;;  %v1069_v12 = vpack.c.bf16 %v236_v4, %v235_v3  ;;  %v1071_v14 = vpack.c.bf16 %v254_v9, %v253_v8 }
  0x22   : > { %1062 = vmatpush3.bf16.msra.mxu0 %v1061_v52  ;;  %v286_v11 = vld [vmem:[%s1212_s27 + $0x1e8] sm:$0xff]  ;;  %v1101_v13 = vpack.c.bf16 %v268_v7, %v267_v5  ;;  %v237_v15 = vld [vmem:[%s1212_s27 + $0x60] sm:$0xff]  ;;  %v255_v20 = vld [vmem:[%s1212_s27 + $0xf0] sm:$0xff] }
  0x23   : > { %1094 = vmatpush3.bf16.msra.mxu1 %v1093_v53  ;;  %1064 = vmatprep.subr.bf16.mxu0 %v1063_v54  ;;  %v238_v16 = vld [vmem:[%s1212_s27 + $0x68] sm:$0xff]  ;;  %v269_v17 = vld [vmem:[%s1212_s27 + $0x160] sm:$0xff]  ;;  %v1103_v18 = vpack.c.bf16 %v286_v11, %v285_v10  ;;  %v256_v21 = vld [vmem:[%s1212_s27 + $0xf8] sm:$0xff] }
  0x24   : > { %1096 = vmatprep.subr.bf16.mxu1 %v1095_v58  ;;  %v270_v19 = vld [vmem:[%s1212_s27 + $0x168] sm:$0xff]  ;;  %v287_v22 = vld [vmem:[%s1212_s27 + $0x1f0] sm:$0xff]  ;;  %v288_v23 = vld [vmem:[%s1212_s27 + $0x1f8] sm:$0xff]  ;;  %v1073_v24 = vpack.c.bf16 %v238_v16, %v237_v15  ;;  %v1075_v26 = vpack.c.bf16 %v256_v21, %v255_v20 }
  0x25   : > { %v1105_v25 = vpack.c.bf16 %v270_v19, %v269_v17  ;;  %v239_v27 = vld [vmem:[%s1212_s27 + $0x70] sm:$0xff]  ;;  %v240_v28 = vld [vmem:[%s1212_s27 + $0x78] sm:$0xff]  ;;  %v1107_v30 = vpack.c.bf16 %v288_v23, %v287_v22  ;;  %v289_v32 = vld [vmem:[%s1212_s27 + $0x200] sm:$0xff] }
  0x26   : > { %1066 = vmatpush3.bf16.msra.mxu0 %v1065_v0  ;;  %v271_v29 = vld [vmem:[%s1212_s27 + $0x170] sm:$0xff]  ;;  %v272_v31 = vld [vmem:[%s1212_s27 + $0x178] sm:$0xff]  ;;  %v290_v33 = vld [vmem:[%s1212_s27 + $0x208] sm:$0xff]  ;;  %v1077_v34 = vpack.c.bf16 %v240_v28, %v239_v27 }
  0x27   : > { %1098 = vmatpush3.bf16.msra.mxu1 %v1097_v1  ;;  %1068 = vmatprep.subr.bf16.mxu0 %v1067_v2  ;;  %v1109_v35 = vpack.c.bf16 %v272_v31, %v271_v29  ;;  %v1111_v36 = vpack.c.bf16 %v290_v33, %v289_v32  ;;  %v291_v37 = vld [vmem:[%s1212_s27 + $0x210] sm:$0xff]  ;;  %v292_v38 = vld [vmem:[%s1212_s27 + $0x218] sm:$0xff]  ;;  %v297_v39 = vld [vmem:[%s1563_s1] sm:$0xff] }
  0x28   : > { %1100 = vmatprep.subr.bf16.mxu1 %v1099_v6  ;;  %v299_v40 = vld [vmem:[%s1563_s1 + $0x10] sm:$0xff]  ;;  %v305_v42 = vld [vmem:[%s1563_s1 + $0x40] sm:$0xff]  ;;  %v1115_v43 = vpack.c.bf16 %v292_v38, %v291_v37  ;;  %v294_v45 = vld [vmem:[%s1212_s27 + $0x228] sm:$0xff] }
  0x29   : > { %v303_v41 = vld [vmem:[%s1563_s1 + $0x30] sm:$0xff]  ;;  %v293_v44 = vld [vmem:[%s1212_s27 + $0x220] sm:$0xff]  ;;  %v302_v46 = vld [vmem:[%s1563_s1 + $0x28] sm:$0xff] }
  0x2a   : > { %1070 = vmatpush3.bf16.msra.mxu0 %v1069_v12  ;;  %v304_v47 = vld [vmem:[%s1563_s1 + $0x38] sm:$0xff]  ;;  %v310_v49 = vld [vmem:[%s1563_s1 + $0x68] sm:$0xff]  ;;  %v1119_v50 = vpack.c.bf16 %v294_v45, %v293_v44  ;;  %v295_v51 = vld [vmem:[%s1212_s27 + $0x230] sm:$0xff] }
  0x2b   : > { %1102 = vmatpush3.bf16.msra.mxu1 %v1101_v13  ;;  %1072 = vmatprep.subr.bf16.mxu0 %v1071_v14  ;;  %v308_v48 = vld [vmem:[%s1563_s1 + $0x58] sm:$0xff]  ;;  %v307_v53 = vld [vmem:[%s1563_s1 + $0x50] sm:$0xff]  ;;  %v309_v54 = vld [vmem:[%s1563_s1 + $0x60] sm:$0xff] }
  0x2c   : > { %1104 = vmatprep.subr.bf16.mxu1 %v1103_v18  ;;  %v296_v52 = vld [vmem:[%s1212_s27 + $0x238] sm:$0xff]  ;;  %v313_v55 = vld [vmem:[%s1563_s1 + $0x80] sm:$0xff]  ;;  %v315_v56 = vld [vmem:[%s1563_s1 + $0x90] sm:$0xff] }
  0x2d   : > { %v1123_v57 = vpack.c.bf16 %v296_v52, %v295_v51  ;;  %v312_v58 = vld [vmem:[%s1563_s1 + $0x78] sm:$0xff]  ;;  %v314_v59 = vld [vmem:[%s1563_s1 + $0x88] sm:$0xff]  ;;  %v317_v62 = vld [vmem:[%s1563_s1 + $0xa0] sm:$0xff] }
  0x2e   : > { %1074 = vmatpush3.bf16.msra.mxu0 %v1073_v24  ;;  %v318_v60 = vld [vmem:[%s1563_s1 + $0xa8] sm:$0xff]  ;;  %v320_v61 = vld [vmem:[%s1563_s1 + $0xb8] sm:$0xff]  ;;  %v319_v63 = vld [vmem:[%s1563_s1 + $0xb0] sm:$0xff] }
  0x2f   : > { %1106 = vmatpush3.bf16.msra.mxu1 %v1105_v25  ;;  %1076 = vmatprep.subr.bf16.mxu0 %v1075_v26  ;;  %v323_v0 = vld [vmem:[%s1563_s1 + $0xd0] sm:$0xff]  ;;  %v325_v1 = vld [vmem:[%s1563_s1 + $0xe0] sm:$0xff]  ;;  %v322_v2 = vld [vmem:[%s1563_s1 + $0xc8] sm:$0xff] }
  0x30   : > { %1108 = vmatprep.subr.bf16.mxu1 %v1107_v30  ;;  %v324_v3 = vld [vmem:[%s1563_s1 + $0xd8] sm:$0xff]  ;;  %v330_v5 = vld [vmem:[%s1563_s1 + $0x108] sm:$0xff]  ;;  %v327_v6 = vld [vmem:[%s1563_s1 + $0xf0] sm:$0xff] }
  0x31   : > { %v328_v4 = vld [vmem:[%s1563_s1 + $0xf8] sm:$0xff]  ;;  %v329_v7 = vld [vmem:[%s1563_s1 + $0x100] sm:$0xff]  ;;  %v335_v9 = vld [vmem:[%s1563_s1 + $0x130] sm:$0xff] }
  0x32   : > { %1078 = vmatpush3.bf16.msra.mxu0 %v1077_v34  ;;  %v333_v8 = vld [vmem:[%s1563_s1 + $0x120] sm:$0xff]  ;;  %v332_v10 = vld [vmem:[%s1563_s1 + $0x118] sm:$0xff]  ;;  %v334_v11 = vld [vmem:[%s1563_s1 + $0x128] sm:$0xff] }
  0x33   : > { %1110 = vmatpush3.bf16.msra.mxu1 %v1109_v35  ;;  %1112 = vmatprep.subr.bf16.mxu0 %v1111_v36  ;;  %v301_v12 = vld [vmem:[%s1563_s1 + $0x20] sm:$0xff]  ;;  %v306_v14 = vld [vmem:[%s1563_s1 + $0x48] sm:$0xff]  ;;  %v311_v16 = vld [vmem:[%s1563_s1 + $0x70] sm:$0xff] }
  0x34   : > { %1127 = vmatprep.subr.bf16.mxu1 %v1111_v36  ;;  %v321_v13 = vld [vmem:[%s1563_s1 + $0xc0] sm:$0xff]  ;;  %v326_v15 = vld [vmem:[%s1563_s1 + $0xe8] sm:$0xff]  ;;  %v331_v17 = vld [vmem:[%s1563_s1 + $0x110] sm:$0xff] }
  0x35   : > { %435 = vmatmul.mubr.f32.vlgmr.msra.gmra.mrb[0].mxu0 %v297_v39  ;;  %v316_v18 = vld [vmem:[%s1563_s1 + $0x98] sm:$0xff]  ;;  %v337_v21 = vld [vmem:[%s1564_s2] sm:$0xff]  ;;  %v338_v29 = vld [vmem:[%s1564_s2 + $0x8] sm:$0xff] }
  0x36   : > { %540 = vmatmul.mubr.f32.vlgmr.msra.gmra.mrb[0].mxu1 %v299_v40  ;;  %1114 = vmatpush3.bf16.msra.mxu0 %v1111_v36  ;;  %v336_v19 = vld [vmem:[%s1563_s1 + $0x138] sm:$0xff]  ;;  %v339_v38 = vld [vmem:[%s1564_s2 + $0x10] sm:$0xff] }
  0x37   : > { %439 = vmatprep.mubr.f32.mxu0 %v303_v41  ;;  %544 = vmatprep.mubr.f32.mxu1 %v305_v42 }
  0x38   : > { %1116 = vmatprep.subr.bf16.mxu0 %v1115_v43  ;;  %1131 = vmatpush3.bf16.msra.mxu1 %v1111_v36 }
  0x39   : > { %440 = vmatmul.mubr.f32.gmra.mrb[2].mxu0 %v302_v46  ;;  %1128 = vmatprep.subr.bf16.mxu1 %v1115_v43 }
  0x3a   : > { %545 = vmatmul.mubr.f32.gmra.mrb[2].mxu1 %v304_v47  ;;  %444 = vmatprep.mubr.f32.mxu0 %v308_v48  ;;  %v340_v47 = vld [vmem:[%s1564_s2 + $0x18] sm:$0xff] }
  0x3b   : > { %549 = vmatprep.mubr.f32.mxu1 %v310_v49  ;;  %1118 = vmatpush3.bf16.msra.mxu0 %v1115_v43 }
  0x3c   : > { %1120 = vmatprep.subr.bf16.mxu0 %v1119_v50  ;;  %1132 = vmatpush3.bf16.msra.mxu1 %v1115_v43 }
  0x3d   : > { %445 = vmatmul.mubr.f32.gmra.mrb[4].mxu0 %v307_v53  ;;  %1129 = vmatprep.subr.bf16.mxu1 %v1119_v50 }
  0x3e   : > { %550 = vmatmul.mubr.f32.gmra.mrb[4].mxu1 %v309_v54  ;;  %449 = vmatprep.mubr.f32.mxu0 %v313_v55 }
  0x3f   : > { %554 = vmatprep.mubr.f32.mxu1 %v315_v56  ;;  %1122 = vmatpush3.bf16.msra.mxu0 %v1119_v50  ;;  %v341_v56 = vld [vmem:[%s1564_s2 + $0x20] sm:$0xff] }
  0x40   : > { %1124 = vmatprep.subr.bf16.mxu0 %v1123_v57  ;;  %1133 = vmatpush3.bf16.msra.mxu1 %v1119_v50 }
  0x41   : > { %450 = vmatmul.mubr.f32.gmra.mrb[6].mxu0 %v312_v58  ;;  %1130 = vmatprep.subr.bf16.mxu1 %v1123_v57 }
  0x42   : > { %555 = vmatmul.mubr.f32.gmra.mrb[6].mxu1 %v314_v59  ;;  %454 = vmatprep.mubr.f32.mxu0 %v318_v60 }
  0x43   : > { %559 = vmatprep.mubr.f32.mxu1 %v320_v61  ;;  %1126 = vmatpush3.bf16.msra.mxu0 %v1123_v57 }
  0x44   : > { %1134 = vmatpush3.bf16.msra.mxu1 %v1123_v57 }
  0x45   : > { %455 = vmatmul.mubr.f32.gmra.mrb[8].mxu0 %v317_v62 }
  0x46   : > { %560 = vmatmul.mubr.f32.gmra.mrb[8].mxu1 %v319_v63  ;;  %459 = vmatprep.mubr.f32.mxu0 %v323_v0 }
  0x47   : > { %564 = vmatprep.mubr.f32.mxu1 %v325_v1  ;;  %v342_v1 = vld [vmem:[%s1564_s2 + $0x28] sm:$0xff] }
  0x49   : > { %460 = vmatmul.mubr.f32.gmra.mrb[10].mxu0 %v322_v2 }
  0x4a   : > { %565 = vmatmul.mubr.f32.gmra.mrb[10].mxu1 %v324_v3  ;;  %464 = vmatprep.mubr.f32.mxu0 %v328_v4 }
  0x4b   : > { %569 = vmatprep.mubr.f32.mxu1 %v330_v5 }
  0x4d   : > { %465 = vmatmul.mubr.f32.gmra.mrb[12].mxu0 %v327_v6 }
  0x4e   : > { %570 = vmatmul.mubr.f32.gmra.mrb[12].mxu1 %v329_v7  ;;  %469 = vmatprep.mubr.f32.mxu0 %v333_v8 }
  0x4f   : > { %574 = vmatprep.mubr.f32.mxu1 %v335_v9 }
  0x51   : > { %470 = vmatmul.mubr.f32.gmra.mrb[14].mxu0 %v332_v10  ;;  %v343_v10 = vld [vmem:[%s1564_s2 + $0x30] sm:$0xff] }
  0x52   : > { %575 = vmatmul.mubr.f32.gmra.mrb[14].mxu1 %v334_v11  ;;  %1035 = vmatprep.mubr.msk.f32.mxu0 %vm345_vm0, %v301_v12 }
  0x53   : > { %1041 = vmatprep.mubr.msk.f32.mxu1 %vm345_vm0, %v321_v13 }
  0x55   : > { %1036 = vmatmul.mubr.msk.f32.vlgmr.msra.gmra.mrb[16].mxu0 %vm345_vm0, %v306_v14 }
  0x56   : > { %1042 = vmatmul.mubr.msk.f32.vlgmr.msra.gmra.mrb[16].mxu1 %vm345_vm0, %v326_v15  ;;  %1038 = vmatprep.mubr.msk.f32.mxu0 %vm345_vm0, %v311_v16 }
  0x57   : > { %1044 = vmatprep.mubr.msk.f32.mxu1 %vm345_vm0, %v331_v17 }
  0x59   : > { %1039 = vmatmul.mubr.msk.f32.gmra.mrb[18].mxu0 %vm345_vm0, %v316_v18 }
  0x5a   : > { %1045 = vmatmul.mubr.msk.f32.gmra.mrb[18].mxu1 %vm345_vm0, %v336_v19  ;;  %v344_v19 = vld [vmem:[%s1564_s2 + $0x38] sm:$0xff] }
 0x108   : > { %v923_v20 = vpop.f32.mrb[0].mxu0 }
 0x109   : > { %v924_v22 = vpop.f32.mrb[1].mxu0  ;;  %v979_v23 = vpop.f32.mrb[0].mxu1 }
 0x10a   : > { %v925_v24 = vadd.f32 %v924_v22, %v923_v20  ;;  %v980_v25 = vpop.f32.mrb[1].mxu1 }
 0x10b   : > { %v981_v26 = vadd.f32 %v980_v25, %v979_v23 }
 0x10c   : > { %v437_v27 = vadd.f32 %v925_v24, %v337_v21  ;;  %v926_v28 = vpop.f32.mrb[2].mxu0 }
 0x10d   : > { %v927_v30 = vpop.f32.mrb[3].mxu0  ;;  %v982_v31 = vpop.f32.mrb[2].mxu1 }
 0x10e   : > { %v928_v32 = vadd.f32 %v927_v30, %v926_v28  ;;  %v983_v33 = vpop.f32.mrb[3].mxu1  ;;  %v1414_v34 = vadd.f32 %v981_v26, %v437_v27 }
 0x10f   : > { %v984_v35 = vadd.f32 %v983_v33, %v982_v31 }
 0x110   : > { %v442_v36 = vadd.f32 %v928_v32, %v338_v29  ;;  %v929_v37 = vpop.f32.mrb[4].mxu0 }
 0x111   : > { %v930_v39 = vpop.f32.mrb[5].mxu0  ;;  %v985_v40 = vpop.f32.mrb[4].mxu1 }
 0x112   : > { %v931_v41 = vadd.f32 %v930_v39, %v929_v37  ;;  %v986_v42 = vpop.f32.mrb[5].mxu1  ;;  %v547_v43 = vadd.f32 %v984_v35, %v442_v36 }
 0x113   : > { %v987_v44 = vadd.f32 %v986_v42, %v985_v40 }
 0x114   : > { %v447_v45 = vadd.f32 %v931_v41, %v339_v38  ;;  %v932_v46 = vpop.f32.mrb[6].mxu0 }
 0x115   : > { %v933_v48 = vpop.f32.mrb[7].mxu0  ;;  %v988_v49 = vpop.f32.mrb[6].mxu1 }
 0x116   : > { %v934_v50 = vadd.f32 %v933_v48, %v932_v46  ;;  %v989_v51 = vpop.f32.mrb[7].mxu1  ;;  %v552_v52 = vadd.f32 %v987_v44, %v447_v45 }
 0x117   : > { %v990_v53 = vadd.f32 %v989_v51, %v988_v49 }
 0x118   : > { %v452_v54 = vadd.f32 %v934_v50, %v340_v47  ;;  %v935_v55 = vpop.f32.mrb[8].mxu0 }
 0x119   : > { %v936_v57 = vpop.f32.mrb[9].mxu0  ;;  %v991_v58 = vpop.f32.mrb[8].mxu1 }
 0x11a   : > { %v937_v59 = vadd.f32 %v936_v57, %v935_v55  ;;  %v992_v60 = vpop.f32.mrb[9].mxu1  ;;  %v557_v61 = vadd.f32 %v990_v53, %v452_v54 }
 0x11b   : > { %v993_v62 = vadd.f32 %v992_v60, %v991_v58 }
 0x11c   : > { %v457_v63 = vadd.f32 %v937_v59, %v341_v56  ;;  %v938_v0 = vpop.f32.mrb[10].mxu0 }
 0x11d   : > { %v939_v2 = vpop.f32.mrb[11].mxu0  ;;  %v994_v3 = vpop.f32.mrb[10].mxu1 }
 0x11e   : > { %v940_v4 = vadd.f32 %v939_v2, %v938_v0  ;;  %v995_v5 = vpop.f32.mrb[11].mxu1  ;;  %v562_v6 = vadd.f32 %v993_v62, %v457_v63 }
 0x11f   : > { %v996_v7 = vadd.f32 %v995_v5, %v994_v3 }
 0x120   : > { %v462_v8 = vadd.f32 %v940_v4, %v342_v1  ;;  %v941_v9 = vpop.f32.mrb[12].mxu0 }
 0x121   : > { %v942_v11 = vpop.f32.mrb[13].mxu0  ;;  %v997_v12 = vpop.f32.mrb[12].mxu1 }
 0x122   : > { %v943_v13 = vadd.f32 %v942_v11, %v941_v9  ;;  %v998_v14 = vpop.f32.mrb[13].mxu1  ;;  %v567_v15 = vadd.f32 %v996_v7, %v462_v8 }
 0x123   : > { %v999_v16 = vadd.f32 %v998_v14, %v997_v12 }
 0x124   : > { %v467_v17 = vadd.f32 %v943_v13, %v343_v10  ;;  %v944_v18 = vpop.f32.mrb[14].mxu0 }
 0x125   : > { %v945_v20 = vpop.f32.mrb[15].mxu0  ;;  %v1000_v21 = vpop.f32.mrb[14].mxu1 }
 0x126   : > { %v946_v22 = vadd.f32 %v945_v20, %v944_v18  ;;  %v1001_v23 = vpop.f32.mrb[15].mxu1  ;;  %v572_v24 = vadd.f32 %v999_v16, %v467_v17 }
 0x127   : > { %v1002_v25 = vadd.f32 %v1001_v23, %v1000_v21 }
 0x128   : > { %v472_v26 = vadd.f32 %v946_v22, %v344_v19  ;;  %v1037_v27 = vpop.f32.mrb[16].mxu0 }
 0x129   : > { %v1434_v28 = vadd.f32 %v1037_v27, %v547_v43  ;;  %v1043_v29 = vpop.f32.mrb[16].mxu1  ;;  %v646_v30 = vpop.f32.mrb[17].mxu0 }
 0x12a   : > { %v1436_v31 = vadd.f32 %v1043_v29, %v567_v15  ;;  %v1439_v32 = vadd.f32 %v646_v30, %v1414_v34  ;;  %v666_v33 = vpop.f32.mrb[17].mxu1  ;;  %v577_v35 = vadd.f32 %v1002_v25, %v472_v26 }
 0x12b   : > { %v711_v36 = vmul.f32 %v1434_v28, %v1434_v28  ;;  %v1443_v37 = vadd.f32 %v666_v33, %v562_v6  ;;  %v687_v38 = vsel %vm685_vm1, %v1434_v28, 0.0 }
 0x12c   : > { %v686_v39 = vsel %vm685_vm1, %v1439_v32, 0.0  ;;  %v710_v40 = vmul.f32 %v1439_v32, %v1439_v32  ;;  %v1040_v41 = vpop.f32.mrb[18].mxu0  ;;  %v695_v4 = vsel %vm685_vm1, %v1436_v31, 0.0 }
 0x12d   : > { %v719_v34 = vsel %vm685_vm1, %v711_v36, 0.0  ;;  %v1046_v42 = vpop.f32.mrb[18].mxu1  ;;  %v656_v43 = vpop.f32.mrb[19].mxu0  ;;  %v1453_v45 = vadd.f32 %v1040_v41, %v557_v61  ;;  %v688_v49 = vadd.f32 %v687_v38, %v686_v39  ;;  %v714_v57 = vmul.f32 %v1443_v37, %v1443_v37  ;;  %v769_v41 = vld [vmem:[%s1565_s3] sm:$0xff] }
 0x12e   : > { %v718_v44 = vsel %vm685_vm1, %v710_v40, 0.0  ;;  %v1455_v46 = vadd.f32 %v1046_v42, %v577_v35  ;;  %v1457_v47 = vadd.f32 %v656_v43, %v552_v52  ;;  %v676_v48 = vpop.f32.mrb[19].mxu1  ;;  %v715_v61 = vmul.f32 %v1436_v31, %v1436_v31 }
 0x12f   : > { %v1459_v50 = vadd.f32 %v676_v48, %v572_v24  ;;  %v713_v51 = vmul.f32 %v1453_v45, %v1453_v45  ;;  %v720_v55 = vadd.f32 %v719_v34, %v718_v44  ;;  %v691_v52 = vsel %vm685_vm1, %v1453_v45, 0.0  ;;  %v770_v48 = vld [vmem:[%s1565_s3 + $0x8] sm:$0xff] }
 0x130   : > { %v689_v53 = vsel %vm685_vm1, %v1457_v47, 0.0  ;;  %v712_v54 = vmul.f32 %v1457_v47, %v1457_v47  ;;  %v693_v62 = vsel %vm685_vm1, %v1443_v37, 0.0  ;;  %v725_v2 = vsel %vm685_vm1, %v714_v57, 0.0  ;;  %v785_v57 = vld [vmem:[%s1566_s4] sm:$0xff] }
 0x131   : > { %v690_v56 = vadd.f32 %v689_v53, %v688_v49  ;;  %v723_v63 = vsel %vm685_vm1, %v713_v51, 0.0  ;;  %v716_v3 = vmul.f32 %v1459_v50, %v1459_v50  ;;  %v697_v7 = vsel %vm685_vm1, %v1459_v50, 0.0  ;;  %v772_v49 = vld [vmem:[%s1565_s3 + $0x18] sm:$0xff]  ;;  %v773_v51 = vld [vmem:[%s1565_s3 + $0x20] sm:$0xff]  ;;  %v774_v53 = vld [vmem:[%s1565_s3 + $0x28] sm:$0xff] }
 0x132   : > { %v721_v58 = vsel %vm685_vm1, %v712_v54, 0.0  ;;  %v727_v8 = vsel %vm685_vm1, %v715_v61, 0.0  ;;  %v699_v11 = vsel %vm685_vm1, %v1455_v46, 0.0  ;;  %v717_v12 = vmul.f32 %v1455_v46, %v1455_v46  ;;  %v775_v54 = vld [vmem:[%s1565_s3 + $0x30] sm:$0xff] }
 0x133   : > { %v722_v59 = vadd.f32 %v721_v58, %v720_v55  ;;  %v692_v60 = vadd.f32 %v691_v52, %v690_v56  ;;  %v729_v13 = vsel %vm685_vm1, %v716_v3, 0.0  ;;  %v786_v52 = vld [vmem:[%s1566_s4 + $0x8] sm:$0xff] }
 0x134   : > { %v731_v16 = vsel %vm685_vm1, %v717_v12, 0.0 }
 0x135   : > { %v694_v0 = vadd.f32 %v693_v62, %v692_v60  ;;  %v724_v1 = vadd.f32 %v723_v63, %v722_v59  ;;  %v787_v62 = vld [vmem:[%s1566_s4 + $0x10] sm:$0xff]  ;;  %v788_v63 = vld [vmem:[%s1566_s4 + $0x18] sm:$0xff] }
 0x137   : > { %v696_v5 = vadd.f32 %v695_v4, %v694_v0  ;;  %v726_v6 = vadd.f32 %v725_v2, %v724_v1  ;;  %v789_v0 = vld [vmem:[%s1566_s4 + $0x20] sm:$0xff] }
 0x139   : > { %v698_v9 = vadd.f32 %v697_v7, %v696_v5  ;;  %v728_v10 = vadd.f32 %v727_v8, %v726_v6  ;;  %v790_v5 = vld [vmem:[%s1566_s4 + $0x28] sm:$0xff]  ;;  %v791_v6 = vld [vmem:[%s1566_s4 + $0x30] sm:$0xff]  ;;  %v792_v7 = vld [vmem:[%s1566_s4 + $0x38] sm:$0xff] }
 0x13b   : > { %v700_v14 = vadd.f32 %v699_v11, %v698_v9  ;;  %v730_v15 = vadd.f32 %v729_v13, %v728_v10 }
 0x13d   : > { %701 = vadd.xlane.f32.xlu0 %v700_v14  ;;  %v732_v17 = vadd.f32 %v731_v16, %v730_v15 }
 0x141   : > { %733 = vadd.xlane.f32.xlu0 %v732_v17 }
 0x1ca   : > { %v702_v18 = vpop.xlane.xlu0 %701 }
 0x1cb   : > { %v703_v19 = vrot.slane %v702_v18, 4 }
 0x1cd   : > { %v704_v20 = vadd.f32 %v703_v19, %v702_v18 }
 0x1ce   : > { %v734_v21 = vpop.xlane.xlu0 %733 }
 0x1cf   : > { %v705_v22 = vrot.slane %v704_v20, 2  ;;  %v735_v23 = vrot.slane %v734_v21, 4 }
 0x1d1   : > { %v736_v24 = vadd.f32 %v735_v23, %v734_v21  ;;  %v706_v25 = vadd.f32 %v705_v22, %v704_v20 }
 0x1d3   : > { %v737_v26 = vrot.slane %v736_v24, 2  ;;  %v707_v27 = vrot.slane %v706_v25, 1 }
 0x1d5   : > { %v738_v29 = vadd.f32 %v737_v26, %v736_v24  ;;  %v708_v30 = vadd.f32 %v707_v27, %v706_v25 }
 0x1d7   : > { %1136 = vpush %v708_v30  ;;  %v739_v33 = vrot.slane %v738_v29, 1 }
 0x1d9   : > { %v740_v35 = vadd.f32 %v739_v33, %v738_v29 }
 0x1db   : > { %1138 = vpush %v740_v35 }
 0x208   : > { %s1137_s29 = spop %1136 }
 0x209   : > { %s742_s27 = smul.f32 0.015625, %s1137_s29 }
 0x20b   : > { %s744_s30 = smul.f32 %s742_s27, %s742_s27  ;;  %v747_v39 = vstv %s742_s27 }
 0x20c   : > { %s1139_s6 = spop %1138  ;;  %v748_v40 = vsub.f32 %v1439_v32, %v747_v39  ;;  %v749_v34 = vsub.f32 %v1434_v28, %v747_v39  ;;  %v750_v42 = vsub.f32 %v1457_v47, %v747_v39  ;;  %v751_v43 = vsub.f32 %v1453_v45, %v747_v39  ;;  %v771_v32 = vld [vmem:[%s1565_s3 + $0x10] sm:$0xff] }
 0x20d   : > { %s743_s7 = smul.f32 0.015625, %s1139_s6  ;;  %v752_v44 = vsub.f32 %v1443_v37, %v747_v39  ;;  %v753_v28 = vsub.f32 %v1436_v31, %v747_v39  ;;  %v754_v47 = vsub.f32 %v1459_v50, %v747_v39  ;;  %v755_v45 = vsub.f32 %v1455_v46, %v747_v39  ;;  %v776_v46 = vld [vmem:[%s1565_s3 + $0x38] sm:$0xff] }
 0x20f   : > { %s745_s8 = ssub.f32 %s743_s7, %s744_s30 }
 0x211   : > { %s746_s10 = smax.f32 %s1161_s9, %s745_s8 }
 0x212   : > { %s756_s11 = sadd.f32 1e-05, %s746_s10 }
 0x214   : > { %v757_v36 = vstv %s756_s11 }
 0x215   : > { %1151 = vrsqrt.f32 %v757_v36 }
 0x21f   : > { %v1152_v38 = vpop.eup %1151 }
 0x220   : > { %1140 = vpush %v1152_v38 }
 0x251   : > { %s1141_s14 = spop %1140 }
 0x252   : > { %v760_v37 = vstv %s1141_s14 }
 0x253   : > { %v761_v55 = vmul.f32 %v760_v37, %v748_v40  ;;  %v762_v31 = vmul.f32 %v760_v37, %v749_v34  ;;  %v763_v56 = vmul.f32 %v760_v37, %v750_v42  ;;  %v764_v50 = vmul.f32 %v760_v37, %v751_v43 }
 0x254   : > { %v765_v58 = vmul.f32 %v760_v37, %v752_v44  ;;  %v766_v59 = vmul.f32 %v760_v37, %v753_v28  ;;  %v767_v60 = vmul.f32 %v760_v37, %v754_v47  ;;  %v768_v61 = vmul.f32 %v760_v37, %v755_v45 }
 0x255   : > { %v777_v1 = vmul.f32 %v769_v41, %v761_v55  ;;  %v778_v2 = vmul.f32 %v770_v48, %v762_v31  ;;  %v779_v3 = vmul.f32 %v771_v32, %v763_v56  ;;  %v780_v4 = vmul.f32 %v772_v49, %v764_v50 }
 0x256   : > { %v781_v8 = vmul.f32 %v773_v51, %v765_v58  ;;  %v782_v9 = vmul.f32 %v774_v53, %v766_v59  ;;  %v783_v10 = vmul.f32 %v775_v54, %v767_v60  ;;  %v784_v11 = vmul.f32 %v776_v46, %v768_v61 }
 0x257   : > { %v793_v12 = vadd.f32 %v785_v57, %v777_v1  ;;  %v794_v13 = vadd.f32 %v786_v52, %v778_v2  ;;  %v795_v14 = vadd.f32 %v787_v62, %v779_v3  ;;  %v796_v15 = vadd.f32 %v788_v63, %v780_v4 }
 0x258   : > { %v797_v16 = vadd.f32 %v789_v0, %v781_v8  ;;  %v798_v17 = vadd.f32 %v790_v5, %v782_v9  ;;  %v799_v18 = vadd.f32 %v791_v6, %v783_v10  ;;  %v800_v19 = vadd.f32 %v792_v7, %v784_v11 }
 0x259   : > { %v801_v20 = vmax.f32 %v793_v12, 0.0  ;;  %v802_v21 = vmax.f32 %v794_v13, 0.0  ;;  %v803_v22 = vmax.f32 %v795_v14, 0.0  ;;  %v804_v23 = vmax.f32 %v796_v15, 0.0 }
 0x25a   : > { %v805_v24 = vmax.f32 %v797_v16, 0.0  ;;  %v806_v25 = vmax.f32 %v798_v17, 0.0  ;;  %v807_v26 = vmax.f32 %v799_v18, 0.0  ;;  %v808_v27 = vmax.f32 %v800_v19, 0.0 }
 0x25b   : > { %809 = vst.msk [vmem:[%s224_s26] sm:$0xff] %vm685_vm1, %v801_v20  ;;  %810 = vst.msk [vmem:[%s224_s26 + $0x8] sm:$0xff] %vm685_vm1, %v802_v21 }
 0x25c   : > { %811 = vst.msk [vmem:[%s224_s26 + $0x10] sm:$0xff] %vm685_vm1, %v803_v22  ;;  %812 = vst.msk [vmem:[%s224_s26 + $0x18] sm:$0xff] %vm685_vm1, %v804_v23 }
 0x25d   : > { %813 = vst.msk [vmem:[%s224_s26 + $0x20] sm:$0xff] %vm685_vm1, %v805_v24  ;;  %814 = vst.msk [vmem:[%s224_s26 + $0x28] sm:$0xff] %vm685_vm1, %v806_v25 }
 0x25e   : > { %815 = vst.msk [vmem:[%s224_s26 + $0x30] sm:$0xff] %vm685_vm1, %v807_v26  ;;  %816 = vst.msk [vmem:[%s224_s26 + $0x38] sm:$0xff] %vm685_vm1, %v808_v27 }
 0x25f PF: > { %s15_s18 = sadd.s32 1, %s1159_s18  }
 0x260   : > { %p12_p4 = scmp.ge.s32.totalorder %s15_s18, 4  }
 0x262   :  { %14 = sbr.rel (!%p12_p4) target bundleno = 1 (0x1), region = 70 }

// kernel: posterior_unet_forward.14
= control target key start
LH: loop header
LB: loop body
LE: loop exit
PB: predicated region body
PF: predicated region fallthrough
CT: control target
= control target key end

     0   :  { %s1511_s18 = smov 0   ;;  %s1858_s0 = inlined_call_operand.vmem [shape: f32[2,1152,4], index: 0, kind: input, shape index: {}]   ;;  %s1859_s1 = inlined_call_operand.vmem [shape: f32[32,1152], index: 1, kind: input, shape index: {}]   ;;  %s1860_s2 = inlined_call_operand.vmem [shape: f32[32,1], index: 2, kind: input, shape index: {}]   ;;  %s1861_s3 = inlined_call_operand.vmem [shape: f32[32,1], index: 3, kind: input, shape index: {}]   ;;  %s1862_s4 = inlined_call_operand.vmem [shape: f32[32,1], index: 4, kind: input, shape index: {}]   ;;  %s1863_s5 = inlined_call_operand.vmem [shape: f32[2,32,4], index: 5, kind: output, shape index: {}]  }
   0x1 LB: > { %s1029_s19 = sadd.s32 4294967295, %s1477_s18   ;;  %p1033_p0 = scmp.ge.s32.totalorder %s1477_s18, 1  ;;  %s1477_s18 = sphi %s1511_s18, %s15_s18  }
   0x2   : > { %p187_p1 = scmp.lt.s32.totalorder %s1477_s18, 3 }
   0x4   : > { %p188_p2 = pnand %p1033_p0, %p187_p1 }
   0x5   : > { %p215_p3 = scmp.lt.s32.totalorder (!%p188_p2), %s1029_s19, 1  ;;  %v370_v0 = vld [vmem:[%s1859_s1 + $0x8] sm:$0xff] (!%p188_p2)  ;;  %v372_v1 = vld [vmem:[%s1859_s1 + $0x18] sm:$0xff] (!%p188_p2)  ;;  %v1479_v2 = vmov (!%p188_p2), 0   ;;  %vm854_vm0 = vcmask (!%p188_p2), 31744   ;;  %s1480_s12 = smov (!%p188_p2), 0.0  }
   0x6   : > { %191 = sbr.rel (%p188_p2) target bundleno = 626 (0x272), region = 40  ;;  %493 = vmatprep.mubr.f32.mxu0 (!%p188_p2), %v370_v0  ;;  %578 = vmatprep.mubr.f32.mxu1 (!%p188_p2), %v372_v1 }
   0x7   : > { %1467 = vset.pattern.permute.xlu0 (!%p188_p2), %v1479_v2  ;;  %1468 = vset.pattern.permute.xlu1 (!%p188_p2), %v1479_v2 }
   0xd   : > { %s1865_s19 = smov (!%p215_p3, %s1029_s19), 1 }
   0xe   : > { %s1450_s24 = smul.u32 1152, %s1865_s19  ;;  %s1039_s15 = sshll.u32 %s1865_s19, 5 }
   0xf   : > { %s224_s20 = scalar_lea.vmem %s1863_s5, %s1039_s15 }
  0x10   : > { %s1531_s27 = scalar_lea.vmem %s1858_s0, %s1450_s24 }
  0x11   : > { %v241_v3 = vld [vmem:[%s1531_s27 + $0x80] sm:$0xff]  ;;  %v242_v4 = vld [vmem:[%s1531_s27 + $0x88] sm:$0xff]  ;;  %v243_v14 = vld [vmem:[%s1531_s27 + $0x90] sm:$0xff] }
  0x12   : > { %v273_v5 = vld [vmem:[%s1531_s27 + $0x180] sm:$0xff]  ;;  %v1274_v6 = vpack.c.bf16 %v242_v4, %v241_v3  ;;  %v274_v7 = vld [vmem:[%s1531_s27 + $0x188] sm:$0xff]  ;;  %v244_v16 = vld [vmem:[%s1531_s27 + $0x98] sm:$0xff] }
  0x13   : > { %v225_v8 = vld [vmem:[%s1531_s27] sm:$0xff]  ;;  %v226_v9 = vld [vmem:[%s1531_s27 + $0x8] sm:$0xff]  ;;  %v1306_v10 = vpack.c.bf16 %v274_v7, %v273_v5  ;;  %v275_v17 = vld [vmem:[%s1531_s27 + $0x190] sm:$0xff]  ;;  %v1278_v19 = vpack.c.bf16 %v244_v16, %v243_v14 }
  0x14   : > { %v1276_v11 = vpack.c.bf16 %v226_v9, %v225_v8  ;;  %v257_v12 = vld [vmem:[%s1531_s27 + $0x100] sm:$0xff]  ;;  %v258_v13 = vld [vmem:[%s1531_s27 + $0x108] sm:$0xff]  ;;  %1275 = vmatprep.subr.bf16.mxu0 %v1274_v6  ;;  %v276_v18 = vld [vmem:[%s1531_s27 + $0x198] sm:$0xff] }
  0x15   : > { %v1308_v15 = vpack.c.bf16 %v258_v13, %v257_v12  ;;  %1307 = vmatprep.subr.bf16.mxu1 %v1306_v10  ;;  %v1310_v20 = vpack.c.bf16 %v276_v18, %v275_v17  ;;  %v227_v21 = vld [vmem:[%s1531_s27 + $0x10] sm:$0xff]  ;;  %v228_v22 = vld [vmem:[%s1531_s27 + $0x18] sm:$0xff]  ;;  %v245_v26 = vld [vmem:[%s1531_s27 + $0xa0] sm:$0xff] }
  0x16   : > { %1277 = vmatpush3.bf16.msra.mxu0 %v1276_v11  ;;  %v259_v23 = vld [vmem:[%s1531_s27 + $0x110] sm:$0xff]  ;;  %v1280_v24 = vpack.c.bf16 %v228_v22, %v227_v21  ;;  %v260_v25 = vld [vmem:[%s1531_s27 + $0x118] sm:$0xff]  ;;  %v246_v27 = vld [vmem:[%s1531_s27 + $0xa8] sm:$0xff] }
  0x17   : > { %1309 = vmatpush3.bf16.msra.mxu1 %v1308_v15  ;;  %1279 = vmatprep.subr.bf16.mxu0 %v1278_v19  ;;  %v1312_v28 = vpack.c.bf16 %v260_v25, %v259_v23  ;;  %v1282_v29 = vpack.c.bf16 %v246_v27, %v245_v26  ;;  %v277_v30 = vld [vmem:[%s1531_s27 + $0x1a0] sm:$0xff]  ;;  %v278_v31 = vld [vmem:[%s1531_s27 + $0x1a8] sm:$0xff]  ;;  %v247_v38 = vld [vmem:[%s1531_s27 + $0xb0] sm:$0xff] }
  0x18   : > { %1311 = vmatprep.subr.bf16.mxu1 %v1310_v20  ;;  %v229_v32 = vld [vmem:[%s1531_s27 + $0x20] sm:$0xff]  ;;  %v1314_v33 = vpack.c.bf16 %v278_v31, %v277_v30  ;;  %v230_v34 = vld [vmem:[%s1531_s27 + $0x28] sm:$0xff]  ;;  %v248_v39 = vld [vmem:[%s1531_s27 + $0xb8] sm:$0xff] }
  0x19   : > { %v261_v35 = vld [vmem:[%s1531_s27 + $0x120] sm:$0xff]  ;;  %v262_v36 = vld [vmem:[%s1531_s27 + $0x128] sm:$0xff]  ;;  %v1284_v37 = vpack.c.bf16 %v230_v34, %v229_v32  ;;  %v279_v40 = vld [vmem:[%s1531_s27 + $0x1b0] sm:$0xff]  ;;  %v1286_v42 = vpack.c.bf16 %v248_v39, %v247_v38 }
  0x1a   : > { %1281 = vmatpush3.bf16.msra.mxu0 %v1280_v24  ;;  %v1316_v41 = vpack.c.bf16 %v262_v36, %v261_v35  ;;  %v280_v43 = vld [vmem:[%s1531_s27 + $0x1b8] sm:$0xff]  ;;  %v231_v44 = vld [vmem:[%s1531_s27 + $0x30] sm:$0xff]  ;;  %v249_v49 = vld [vmem:[%s1531_s27 + $0xc0] sm:$0xff] }
  0x1b   : > { %1313 = vmatpush3.bf16.msra.mxu1 %v1312_v28  ;;  %1283 = vmatprep.subr.bf16.mxu0 %v1282_v29  ;;  %v232_v45 = vld [vmem:[%s1531_s27 + $0x38] sm:$0xff]  ;;  %v1318_v46 = vpack.c.bf16 %v280_v43, %v279_v40  ;;  %v263_v47 = vld [vmem:[%s1531_s27 + $0x130] sm:$0xff]  ;;  %v250_v50 = vld [vmem:[%s1531_s27 + $0xc8] sm:$0xff] }
  0x1c   : > { %1315 = vmatprep.subr.bf16.mxu1 %v1314_v33  ;;  %v264_v48 = vld [vmem:[%s1531_s27 + $0x138] sm:$0xff]  ;;  %v281_v51 = vld [vmem:[%s1531_s27 + $0x1c0] sm:$0xff]  ;;  %v282_v52 = vld [vmem:[%s1531_s27 + $0x1c8] sm:$0xff]  ;;  %v1288_v53 = vpack.c.bf16 %v232_v45, %v231_v44  ;;  %v1290_v55 = vpack.c.bf16 %v250_v50, %v249_v49 }
  0x1d   : > { %v1320_v54 = vpack.c.bf16 %v264_v48, %v263_v47  ;;  %v233_v56 = vld [vmem:[%s1531_s27 + $0x40] sm:$0xff]  ;;  %v234_v57 = vld [vmem:[%s1531_s27 + $0x48] sm:$0xff]  ;;  %v1322_v59 = vpack.c.bf16 %v282_v52, %v281_v51  ;;  %v251_v61 = vld [vmem:[%s1531_s27 + $0xd0] sm:$0xff] }
  0x1e   : > { %1285 = vmatpush3.bf16.msra.mxu0 %v1284_v37  ;;  %v265_v58 = vld [vmem:[%s1531_s27 + $0x140] sm:$0xff]  ;;  %v266_v60 = vld [vmem:[%s1531_s27 + $0x148] sm:$0xff]  ;;  %v252_v62 = vld [vmem:[%s1531_s27 + $0xd8] sm:$0xff]  ;;  %v1292_v1 = vpack.c.bf16 %v234_v57, %v233_v56 }
  0x1f   : > { %1317 = vmatpush3.bf16.msra.mxu1 %v1316_v41  ;;  %1287 = vmatprep.subr.bf16.mxu0 %v1286_v42  ;;  %v283_v63 = vld [vmem:[%s1531_s27 + $0x1d0] sm:$0xff]  ;;  %v284_v0 = vld [vmem:[%s1531_s27 + $0x1d8] sm:$0xff]  ;;  %v1324_v2 = vpack.c.bf16 %v266_v60, %v265_v58  ;;  %v1294_v3 = vpack.c.bf16 %v252_v62, %v251_v61  ;;  %v253_v9 = vld [vmem:[%s1531_s27 + $0xe0] sm:$0xff] }
  0x20   : > { %1319 = vmatprep.subr.bf16.mxu1 %v1318_v46  ;;  %v235_v4 = vld [vmem:[%s1531_s27 + $0x50] sm:$0xff]  ;;  %v236_v5 = vld [vmem:[%s1531_s27 + $0x58] sm:$0xff]  ;;  %v1326_v7 = vpack.c.bf16 %v284_v0, %v283_v63  ;;  %v254_v10 = vld [vmem:[%s1531_s27 + $0xe8] sm:$0xff] }
  0x21   : > { %v267_v6 = vld [vmem:[%s1531_s27 + $0x150] sm:$0xff]  ;;  %v268_v8 = vld [vmem:[%s1531_s27 + $0x158] sm:$0xff]  ;;  %v285_v11 = vld [vmem:[%s1531_s27 + $0x1e0] sm:$0xff]  ;;  %v1296_v13 = vpack.c.bf16 %v236_v5, %v235_v4  ;;  %v1298_v15 = vpack.c.bf16 %v254_v10, %v253_v9 }
  0x22   : > { %1289 = vmatpush3.bf16.msra.mxu0 %v1288_v53  ;;  %v286_v12 = vld [vmem:[%s1531_s27 + $0x1e8] sm:$0xff]  ;;  %v1328_v14 = vpack.c.bf16 %v268_v8, %v267_v6  ;;  %v237_v16 = vld [vmem:[%s1531_s27 + $0x60] sm:$0xff]  ;;  %v255_v21 = vld [vmem:[%s1531_s27 + $0xf0] sm:$0xff] }
  0x23   : > { %1321 = vmatpush3.bf16.msra.mxu1 %v1320_v54  ;;  %1291 = vmatprep.subr.bf16.mxu0 %v1290_v55  ;;  %v238_v17 = vld [vmem:[%s1531_s27 + $0x68] sm:$0xff]  ;;  %v269_v18 = vld [vmem:[%s1531_s27 + $0x160] sm:$0xff]  ;;  %v1330_v19 = vpack.c.bf16 %v286_v12, %v285_v11  ;;  %v256_v22 = vld [vmem:[%s1531_s27 + $0xf8] sm:$0xff] }
  0x24   : > { %1323 = vmatprep.subr.bf16.mxu1 %v1322_v59  ;;  %v270_v20 = vld [vmem:[%s1531_s27 + $0x168] sm:$0xff]  ;;  %v287_v23 = vld [vmem:[%s1531_s27 + $0x1f0] sm:$0xff]  ;;  %v288_v24 = vld [vmem:[%s1531_s27 + $0x1f8] sm:$0xff]  ;;  %v1300_v25 = vpack.c.bf16 %v238_v17, %v237_v16  ;;  %v1302_v27 = vpack.c.bf16 %v256_v22, %v255_v21 }
  0x25   : > { %v1332_v26 = vpack.c.bf16 %v270_v20, %v269_v18  ;;  %v239_v28 = vld [vmem:[%s1531_s27 + $0x70] sm:$0xff]  ;;  %v240_v29 = vld [vmem:[%s1531_s27 + $0x78] sm:$0xff]  ;;  %v1334_v31 = vpack.c.bf16 %v288_v24, %v287_v23  ;;  %v305_v33 = vld [vmem:[%s1531_s27 + $0x280] sm:$0xff] }
  0x26   : > { %1293 = vmatpush3.bf16.msra.mxu0 %v1292_v1  ;;  %v271_v30 = vld [vmem:[%s1531_s27 + $0x170] sm:$0xff]  ;;  %v272_v32 = vld [vmem:[%s1531_s27 + $0x178] sm:$0xff]  ;;  %v306_v34 = vld [vmem:[%s1531_s27 + $0x288] sm:$0xff]  ;;  %v1304_v37 = vpack.c.bf16 %v240_v29, %v239_v28 }
  0x27   : > { %1325 = vmatpush3.bf16.msra.mxu1 %v1324_v2  ;;  %1295 = vmatprep.subr.bf16.mxu0 %v1294_v3  ;;  %v337_v35 = vld [vmem:[%s1531_s27 + $0x380] sm:$0xff]  ;;  %v338_v36 = vld [vmem:[%s1531_s27 + $0x388] sm:$0xff]  ;;  %v1336_v38 = vpack.c.bf16 %v272_v32, %v271_v30  ;;  %v1338_v39 = vpack.c.bf16 %v306_v34, %v305_v33  ;;  %v307_v45 = vld [vmem:[%s1531_s27 + $0x290] sm:$0xff] }
  0x28   : > { %1327 = vmatprep.subr.bf16.mxu1 %v1326_v7  ;;  %v289_v40 = vld [vmem:[%s1531_s27 + $0x200] sm:$0xff]  ;;  %v290_v41 = vld [vmem:[%s1531_s27 + $0x208] sm:$0xff]  ;;  %v1370_v43 = vpack.c.bf16 %v338_v36, %v337_v35  ;;  %v308_v46 = vld [vmem:[%s1531_s27 + $0x298] sm:$0xff] }
  0x29   : > { %v321_v42 = vld [vmem:[%s1531_s27 + $0x300] sm:$0xff]  ;;  %v322_v44 = vld [vmem:[%s1531_s27 + $0x308] sm:$0xff]  ;;  %v339_v47 = vld [vmem:[%s1531_s27 + $0x390] sm:$0xff]  ;;  %v1340_v51 = vpack.c.bf16 %v290_v41, %v289_v40  ;;  %v1342_v53 = vpack.c.bf16 %v308_v46, %v307_v45 }
  0x2a   : > { %1297 = vmatpush3.bf16.msra.mxu0 %v1296_v13  ;;  %v340_v48 = vld [vmem:[%s1531_s27 + $0x398] sm:$0xff]  ;;  %v369_v49 = vld [vmem:[%s1859_s1] sm:$0xff]  ;;  %v371_v50 = vld [vmem:[%s1859_s1 + $0x10] sm:$0xff]  ;;  %v1372_v52 = vpack.c.bf16 %v322_v44, %v321_v42 }
  0x2b   : > { %1329 = vmatpush3.bf16.msra.mxu1 %v1328_v14  ;;  %1299 = vmatprep.subr.bf16.mxu0 %v1298_v15  ;;  %v291_v54 = vld [vmem:[%s1531_s27 + $0x210] sm:$0xff]  ;;  %v292_v55 = vld [vmem:[%s1531_s27 + $0x218] sm:$0xff]  ;;  %v1374_v57 = vpack.c.bf16 %v340_v48, %v339_v47  ;;  %v309_v59 = vld [vmem:[%s1531_s27 + $0x2a0] sm:$0xff] }
  0x2c   : > { %1331 = vmatprep.subr.bf16.mxu1 %v1330_v19  ;;  %v323_v56 = vld [vmem:[%s1531_s27 + $0x310] sm:$0xff]  ;;  %v324_v58 = vld [vmem:[%s1531_s27 + $0x318] sm:$0xff]  ;;  %v310_v60 = vld [vmem:[%s1531_s27 + $0x2a8] sm:$0xff]  ;;  %v1344_v0 = vpack.c.bf16 %v292_v55, %v291_v54 }
  0x2d   : > { %v341_v61 = vld [vmem:[%s1531_s27 + $0x3a0] sm:$0xff]  ;;  %v342_v62 = vld [vmem:[%s1531_s27 + $0x3a8] sm:$0xff]  ;;  %v379_v63 = vld [vmem:[%s1859_s1 + $0x50] sm:$0xff]  ;;  %v1376_v4 = vpack.c.bf16 %v324_v58, %v323_v56  ;;  %v1346_v5 = vpack.c.bf16 %v310_v60, %v309_v59 }
  0x2e   : > { %1301 = vmatpush3.bf16.msra.mxu0 %v1300_v25  ;;  %v378_v1 = vld [vmem:[%s1859_s1 + $0x48] sm:$0xff]  ;;  %v381_v2 = vld [vmem:[%s1859_s1 + $0x60] sm:$0xff]  ;;  %v380_v3 = vld [vmem:[%s1859_s1 + $0x58] sm:$0xff]  ;;  %v1378_v9 = vpack.c.bf16 %v342_v62, %v341_v61 }
  0x2f   : > { %1333 = vmatpush3.bf16.msra.mxu1 %v1332_v26  ;;  %1303 = vmatprep.subr.bf16.mxu0 %v1302_v27  ;;  %v293_v6 = vld [vmem:[%s1531_s27 + $0x220] sm:$0xff]  ;;  %v294_v7 = vld [vmem:[%s1531_s27 + $0x228] sm:$0xff]  ;;  %v311_v11 = vld [vmem:[%s1531_s27 + $0x2b0] sm:$0xff] }
  0x30   : > { %1335 = vmatprep.subr.bf16.mxu1 %v1334_v31  ;;  %v325_v8 = vld [vmem:[%s1531_s27 + $0x320] sm:$0xff]  ;;  %v326_v10 = vld [vmem:[%s1531_s27 + $0x328] sm:$0xff]  ;;  %v312_v12 = vld [vmem:[%s1531_s27 + $0x2b8] sm:$0xff]  ;;  %v1348_v16 = vpack.c.bf16 %v294_v7, %v293_v6 }
  0x31   : > { %v343_v13 = vld [vmem:[%s1531_s27 + $0x3b0] sm:$0xff]  ;;  %v344_v14 = vld [vmem:[%s1531_s27 + $0x3b8] sm:$0xff]  ;;  %v390_v18 = vld [vmem:[%s1859_s1 + $0xa8] sm:$0xff]  ;;  %v1380_v20 = vpack.c.bf16 %v326_v10, %v325_v8  ;;  %v1350_v21 = vpack.c.bf16 %v312_v12, %v311_v11 }
  0x32   : > { %1305 = vmatpush3.bf16.msra.mxu0 %v1304_v37  ;;  %v388_v15 = vld [vmem:[%s1859_s1 + $0x98] sm:$0xff]  ;;  %v387_v17 = vld [vmem:[%s1859_s1 + $0x90] sm:$0xff]  ;;  %v389_v19 = vld [vmem:[%s1859_s1 + $0xa0] sm:$0xff]  ;;  %v1382_v25 = vpack.c.bf16 %v344_v14, %v343_v13 }
  0x33   : > { %1337 = vmatpush3.bf16.msra.mxu1 %v1336_v38  ;;  %1339 = vmatprep.subr.bf16.mxu0 %v1338_v39  ;;  %v295_v22 = vld [vmem:[%s1531_s27 + $0x230] sm:$0xff]  ;;  %v296_v23 = vld [vmem:[%s1531_s27 + $0x238] sm:$0xff]  ;;  %v313_v27 = vld [vmem:[%s1531_s27 + $0x2c0] sm:$0xff] }
  0x34   : > { %1371 = vmatprep.subr.bf16.mxu1 %v1370_v43  ;;  %v327_v24 = vld [vmem:[%s1531_s27 + $0x330] sm:$0xff]  ;;  %v328_v26 = vld [vmem:[%s1531_s27 + $0x338] sm:$0xff]  ;;  %v314_v28 = vld [vmem:[%s1531_s27 + $0x2c8] sm:$0xff]  ;;  %v1352_v32 = vpack.c.bf16 %v296_v23, %v295_v22 }
  0x35   : > { %494 = vmatmul.mubr.f32.vlgmr.msra.gmra.mrb[0].mxu0 %v369_v49  ;;  %v345_v29 = vld [vmem:[%s1531_s27 + $0x3c0] sm:$0xff]  ;;  %v346_v30 = vld [vmem:[%s1531_s27 + $0x3c8] sm:$0xff]  ;;  %v396_v33 = vld [vmem:[%s1859_s1 + $0xd8] sm:$0xff]  ;;  %v1384_v36 = vpack.c.bf16 %v328_v26, %v327_v24  ;;  %v1354_v37 = vpack.c.bf16 %v314_v28, %v313_v27 }
  0x36   : > { %579 = vmatmul.mubr.f32.vlgmr.msra.gmra.mrb[0].mxu1 %v371_v50  ;;  %1341 = vmatpush3.bf16.msra.mxu0 %v1340_v51  ;;  %v397_v31 = vld [vmem:[%s1859_s1 + $0xe0] sm:$0xff]  ;;  %v399_v34 = vld [vmem:[%s1859_s1 + $0xf0] sm:$0xff]  ;;  %v398_v35 = vld [vmem:[%s1859_s1 + $0xe8] sm:$0xff]  ;;  %v1386_v41 = vpack.c.bf16 %v346_v30, %v345_v29 }
  0x37   : > { %1373 = vmatpush3.bf16.msra.mxu1 %v1372_v52  ;;  %1343 = vmatprep.subr.bf16.mxu0 %v1342_v53  ;;  %v297_v38 = vld [vmem:[%s1531_s27 + $0x240] sm:$0xff]  ;;  %v298_v39 = vld [vmem:[%s1531_s27 + $0x248] sm:$0xff]  ;;  %v315_v43 = vld [vmem:[%s1531_s27 + $0x2d0] sm:$0xff] }
  0x38   : > { %1375 = vmatprep.subr.bf16.mxu1 %v1374_v57  ;;  %498 = vmatprep.mubr.f32.mxu0 %v379_v63  ;;  %v329_v40 = vld [vmem:[%s1531_s27 + $0x340] sm:$0xff]  ;;  %v330_v42 = vld [vmem:[%s1531_s27 + $0x348] sm:$0xff]  ;;  %v316_v44 = vld [vmem:[%s1531_s27 + $0x2d8] sm:$0xff]  ;;  %v1356_v48 = vpack.c.bf16 %v298_v39, %v297_v38 }
  0x39   : > { %499 = vmatmul.mubr.f32.gmra.mrb[2].mxu0 %v378_v1  ;;  %583 = vmatprep.mubr.f32.mxu1 %v381_v2  ;;  %v347_v45 = vld [vmem:[%s1531_s27 + $0x3d0] sm:$0xff]  ;;  %v348_v46 = vld [vmem:[%s1531_s27 + $0x3d8] sm:$0xff]  ;;  %v374_v47 = vld [vmem:[%s1859_s1 + $0x28] sm:$0xff]  ;;  %v1388_v50 = vpack.c.bf16 %v330_v42, %v329_v40  ;;  %v1358_v51 = vpack.c.bf16 %v316_v44, %v315_v43 }
  0x3a   : > { %1345 = vmatpush3.bf16.msra.mxu0 %v1344_v0  ;;  %584 = vmatmul.mubr.f32.gmra.mrb[2].mxu1 %v380_v3  ;;  %v376_v49 = vld [vmem:[%s1859_s1 + $0x38] sm:$0xff]  ;;  %v299_v52 = vld [vmem:[%s1531_s27 + $0x250] sm:$0xff]  ;;  %v1390_v55 = vpack.c.bf16 %v348_v46, %v347_v45  ;;  %v317_v57 = vld [vmem:[%s1531_s27 + $0x2e0] sm:$0xff] }
  0x3b   : > { %1377 = vmatpush3.bf16.msra.mxu1 %v1376_v4  ;;  %1347 = vmatprep.subr.bf16.mxu0 %v1346_v5  ;;  %v300_v53 = vld [vmem:[%s1531_s27 + $0x258] sm:$0xff]  ;;  %v331_v54 = vld [vmem:[%s1531_s27 + $0x350] sm:$0xff]  ;;  %v318_v58 = vld [vmem:[%s1531_s27 + $0x2e8] sm:$0xff] }
  0x3c   : > { %1379 = vmatprep.subr.bf16.mxu1 %v1378_v9  ;;  %503 = vmatprep.mubr.f32.mxu0 %v388_v15  ;;  %v332_v56 = vld [vmem:[%s1531_s27 + $0x358] sm:$0xff]  ;;  %v349_v59 = vld [vmem:[%s1531_s27 + $0x3e0] sm:$0xff]  ;;  %v350_v60 = vld [vmem:[%s1531_s27 + $0x3e8] sm:$0xff]  ;;  %v1360_v61 = vpack.c.bf16 %v300_v53, %v299_v52  ;;  %v1362_v1 = vpack.c.bf16 %v318_v58, %v317_v57 }
  0x3d   : > { %504 = vmatmul.mubr.f32.gmra.mrb[4].mxu0 %v387_v17  ;;  %588 = vmatprep.mubr.f32.mxu1 %v390_v18  ;;  %v301_v62 = vld [vmem:[%s1531_s27 + $0x260] sm:$0xff]  ;;  %v302_v63 = vld [vmem:[%s1531_s27 + $0x268] sm:$0xff]  ;;  %v1392_v0 = vpack.c.bf16 %v332_v56, %v331_v54  ;;  %v407_v4 = vld [vmem:[%s1860_s2 + $0x10] sm:$0xff]  ;;  %v1394_v5 = vpack.c.bf16 %v350_v60, %v349_v59 }
  0x3e   : > { %1349 = vmatpush3.bf16.msra.mxu0 %v1348_v16  ;;  %589 = vmatmul.mubr.f32.gmra.mrb[4].mxu1 %v389_v19  ;;  %v333_v2 = vld [vmem:[%s1531_s27 + $0x360] sm:$0xff]  ;;  %v334_v6 = vld [vmem:[%s1531_s27 + $0x368] sm:$0xff]  ;;  %v319_v7 = vld [vmem:[%s1531_s27 + $0x2f0] sm:$0xff]  ;;  %v1364_v12 = vpack.c.bf16 %v302_v63, %v301_v62 }
  0x3f   : > { %1381 = vmatpush3.bf16.msra.mxu1 %v1380_v20  ;;  %1351 = vmatprep.subr.bf16.mxu0 %v1350_v21  ;;  %v405_v3 = vld [vmem:[%s1860_s2] sm:$0xff]  ;;  %v320_v8 = vld [vmem:[%s1531_s27 + $0x2f8] sm:$0xff]  ;;  %v351_v9 = vld [vmem:[%s1531_s27 + $0x3f0] sm:$0xff]  ;;  %v1396_v14 = vpack.c.bf16 %v334_v6, %v333_v2 }
  0x40   : > { %1383 = vmatprep.subr.bf16.mxu1 %v1382_v25  ;;  %508 = vmatprep.mubr.f32.mxu0 %v397_v31  ;;  %v352_v10 = vld [vmem:[%s1531_s27 + $0x3f8] sm:$0xff]  ;;  %v406_v11 = vld [vmem:[%s1860_s2 + $0x8] sm:$0xff]  ;;  %v1366_v15 = vpack.c.bf16 %v320_v8, %v319_v7  ;;  %v303_v16 = vld [vmem:[%s1531_s27 + $0x270] sm:$0xff] }
  0x41   : > { %509 = vmatmul.mubr.f32.gmra.mrb[6].mxu0 %v396_v33  ;;  %593 = vmatprep.mubr.f32.mxu1 %v399_v34  ;;  %v408_v13 = vld [vmem:[%s1860_s2 + $0x18] sm:$0xff]  ;;  %v335_v18 = vld [vmem:[%s1531_s27 + $0x370] sm:$0xff]  ;;  %v1398_v19 = vpack.c.bf16 %v352_v10, %v351_v9  ;;  %v353_v21 = vld [vmem:[%s1531_s27 + $0x400] sm:$0xff] }
  0x42   : > { %1353 = vmatpush3.bf16.msra.mxu0 %v1352_v32  ;;  %594 = vmatmul.mubr.f32.gmra.mrb[6].mxu1 %v398_v35  ;;  %v304_v17 = vld [vmem:[%s1531_s27 + $0x278] sm:$0xff]  ;;  %v354_v22 = vld [vmem:[%s1531_s27 + $0x408] sm:$0xff]  ;;  %v355_v26 = vld [vmem:[%s1531_s27 + $0x410] sm:$0xff] }
  0x43   : > { %1385 = vmatpush3.bf16.msra.mxu1 %v1384_v36  ;;  %1355 = vmatprep.subr.bf16.mxu0 %v1354_v37  ;;  %v336_v20 = vld [vmem:[%s1531_s27 + $0x378] sm:$0xff]  ;;  %v1368_v23 = vpack.c.bf16 %v304_v17, %v303_v16  ;;  %v1402_v25 = vpack.c.bf16 %v354_v22, %v353_v21  ;;  %v373_v28 = vld [vmem:[%s1859_s1 + $0x20] sm:$0xff]  ;;  %v375_v29 = vld [vmem:[%s1859_s1 + $0x30] sm:$0xff] }
  0x44   : > { %1387 = vmatprep.subr.bf16.mxu1 %v1386_v41  ;;  %663 = vmatprep.mubr.f32.mxu0 %v374_v47  ;;  %v1400_v24 = vpack.c.bf16 %v336_v20, %v335_v18  ;;  %v356_v27 = vld [vmem:[%s1531_s27 + $0x418] sm:$0xff]  ;;  %v383_v30 = vld [vmem:[%s1859_s1 + $0x70] sm:$0xff]  ;;  %v357_v32 = vld [vmem:[%s1531_s27 + $0x420] sm:$0xff] }
  0x45   : > { %748 = vmatprep.mubr.f32.mxu1 %v376_v49  ;;  %411 = vperm.xlu0 %1467, %v405_v3   ;;  %v1406_v31 = vpack.c.bf16 %v356_v27, %v355_v26  ;;  %v358_v33 = vld [vmem:[%s1531_s27 + $0x428] sm:$0xff]  ;;  %v385_v35 = vld [vmem:[%s1859_s1 + $0x80] sm:$0xff]  ;;  %v384_v36 = vld [vmem:[%s1859_s1 + $0x78] sm:$0xff] }
  0x46   : > { %1357 = vmatpush3.bf16.msra.mxu0 %v1356_v48  ;;  %421 = vperm.xlu1 %1468, %v407_v4   ;;  %v382_v34 = vld [vmem:[%s1859_s1 + $0x68] sm:$0xff]  ;;  %v392_v37 = vld [vmem:[%s1859_s1 + $0xb8] sm:$0xff]  ;;  %v1410_v38 = vpack.c.bf16 %v358_v33, %v357_v32  ;;  %v359_v39 = vld [vmem:[%s1531_s27 + $0x430] sm:$0xff] }
  0x47   : > { %1389 = vmatpush3.bf16.msra.mxu1 %v1388_v50  ;;  %1359 = vmatprep.subr.bf16.mxu0 %v1358_v51  ;;  %v360_v40 = vld [vmem:[%s1531_s27 + $0x438] sm:$0xff]  ;;  %v391_v41 = vld [vmem:[%s1859_s1 + $0xb0] sm:$0xff]  ;;  %v394_v42 = vld [vmem:[%s1859_s1 + $0xc8] sm:$0xff] }
  0x48   : > { %1391 = vmatprep.subr.bf16.mxu1 %v1390_v55  ;;  %v393_v43 = vld [vmem:[%s1859_s1 + $0xc0] sm:$0xff]  ;;  %v1414_v45 = vpack.c.bf16 %v360_v40, %v359_v39  ;;  %v362_v47 = vld [vmem:[%s1531_s27 + $0x448] sm:$0xff]  ;;  %v400_v48 = vld [vmem:[%s1859_s1 + $0xf8] sm:$0xff] }
  0x49   : > { %416 = vperm.xlu0 %1467, %v406_v11   ;;  %v401_v44 = vld [vmem:[%s1859_s1 + $0x100] sm:$0xff]  ;;  %v403_v49 = vld [vmem:[%s1859_s1 + $0x110] sm:$0xff]  ;;  %v402_v50 = vld [vmem:[%s1859_s1 + $0x108] sm:$0xff] }
  0x4a   : > { %1361 = vmatpush3.bf16.msra.mxu0 %v1360_v61  ;;  %426 = vperm.xlu1 %1468, %v408_v13   ;;  %v361_v46 = vld [vmem:[%s1531_s27 + $0x440] sm:$0xff]  ;;  %v363_v52 = vld [vmem:[%s1531_s27 + $0x450] sm:$0xff]  ;;  %v364_v53 = vld [vmem:[%s1531_s27 + $0x458] sm:$0xff] }
  0x4b   : > { %1393 = vmatpush3.bf16.msra.mxu1 %v1392_v0  ;;  %1363 = vmatprep.subr.bf16.mxu0 %v1362_v1  ;;  %v1418_v51 = vpack.c.bf16 %v362_v47, %v361_v46  ;;  %v377_v54 = vld [vmem:[%s1859_s1 + $0x40] sm:$0xff]  ;;  %v395_v55 = vld [vmem:[%s1859_s1 + $0xd0] sm:$0xff]  ;;  %v1422_v56 = vpack.c.bf16 %v364_v53, %v363_v52  ;;  %v366_v58 = vld [vmem:[%s1531_s27 + $0x468] sm:$0xff] }
  0x4c   : > { %1395 = vmatprep.subr.bf16.mxu1 %v1394_v5  ;;  %v365_v57 = vld [vmem:[%s1531_s27 + $0x460] sm:$0xff]  ;;  %v367_v60 = vld [vmem:[%s1531_s27 + $0x470] sm:$0xff]  ;;  %v368_v61 = vld [vmem:[%s1531_s27 + $0x478] sm:$0xff] }
  0x4d   : > { %v1426_v59 = vpack.c.bf16 %v366_v58, %v365_v57  ;;  %v1430_v62 = vpack.c.bf16 %v368_v61, %v367_v60  ;;  %v386_v63 = vld [vmem:[%s1859_s1 + $0x88] sm:$0xff]  ;;  %v404_v0 = vld [vmem:[%s1859_s1 + $0x118] sm:$0xff] }
  0x4e   : > { %1365 = vmatpush3.bf16.msra.mxu0 %v1364_v12 }
  0x4f   : > { %1397 = vmatpush3.bf16.msra.mxu1 %v1396_v14  ;;  %1367 = vmatprep.subr.bf16.mxu0 %v1366_v15 }
  0x50   : > { %1399 = vmatprep.subr.bf16.mxu1 %v1398_v19 }
  0x52   : > { %1369 = vmatpush3.bf16.msra.mxu0 %v1368_v23 }
  0x53   : > { %1401 = vmatpush3.bf16.msra.mxu1 %v1400_v24  ;;  %1403 = vmatprep.subr.bf16.mxu0 %v1402_v25 }
  0x54   : > { %1434 = vmatprep.subr.bf16.mxu1 %v1402_v25 }
  0x55   : > { %664 = vmatmul.mubr.f32.vlgmr.msra.gmra.mrb[8].mxu0 %v373_v28 }
  0x56   : > { %749 = vmatmul.mubr.f32.vlgmr.msra.gmra.mrb[8].mxu1 %v375_v29  ;;  %1405 = vmatpush3.bf16.msra.mxu0 %v1402_v25 }
  0x57   : > { %1442 = vmatpush3.bf16.msra.mxu1 %v1402_v25  ;;  %668 = vmatprep.mubr.f32.mxu0 %v383_v30 }
  0x58   : > { %1407 = vmatprep.subr.bf16.mxu0 %v1406_v31  ;;  %1435 = vmatprep.subr.bf16.mxu1 %v1406_v31 }
  0x59   : > { %669 = vmatmul.mubr.f32.gmra.mrb[10].mxu0 %v382_v34  ;;  %753 = vmatprep.mubr.f32.mxu1 %v385_v35 }
  0x5a   : > { %1409 = vmatpush3.bf16.msra.mxu0 %v1406_v31  ;;  %754 = vmatmul.mubr.f32.gmra.mrb[10].mxu1 %v384_v36 }
  0x5b   : > { %1443 = vmatpush3.bf16.msra.mxu1 %v1406_v31  ;;  %673 = vmatprep.mubr.f32.mxu0 %v392_v37 }
  0x5c   : > { %1411 = vmatprep.subr.bf16.mxu0 %v1410_v38  ;;  %1436 = vmatprep.subr.bf16.mxu1 %v1410_v38 }
  0x5d   : > { %674 = vmatmul.mubr.f32.gmra.mrb[12].mxu0 %v391_v41  ;;  %758 = vmatprep.mubr.f32.mxu1 %v394_v42 }
  0x5e   : > { %1413 = vmatpush3.bf16.msra.mxu0 %v1410_v38  ;;  %759 = vmatmul.mubr.f32.gmra.mrb[12].mxu1 %v393_v43 }
  0x5f   : > { %1444 = vmatpush3.bf16.msra.mxu1 %v1410_v38  ;;  %678 = vmatprep.mubr.f32.mxu0 %v401_v44 }
  0x60   : > { %1415 = vmatprep.subr.bf16.mxu0 %v1414_v45  ;;  %1437 = vmatprep.subr.bf16.mxu1 %v1414_v45 }
  0x61   : > { %679 = vmatmul.mubr.f32.gmra.mrb[14].mxu0 %v400_v48  ;;  %763 = vmatprep.mubr.f32.mxu1 %v403_v49 }
  0x62   : > { %1417 = vmatpush3.bf16.msra.mxu0 %v1414_v45  ;;  %764 = vmatmul.mubr.f32.gmra.mrb[14].mxu1 %v402_v50 }
  0x63   : > { %1445 = vmatpush3.bf16.msra.mxu1 %v1414_v45  ;;  %1419 = vmatprep.subr.bf16.mxu0 %v1418_v51 }
  0x64   : > { %1438 = vmatprep.subr.bf16.mxu1 %v1418_v51  ;;  %1268 = vmatprep.mubr.f32.mxu0 %v377_v54 }
  0x65   : > { %1271 = vmatprep.mubr.f32.mxu1 %v395_v55 }
  0x66   : > { %1421 = vmatpush3.bf16.msra.mxu0 %v1418_v51 }
  0x67   : > { %1446 = vmatpush3.bf16.msra.mxu1 %v1418_v51  ;;  %1423 = vmatprep.subr.bf16.mxu0 %v1422_v56 }
  0x68   : > { %1439 = vmatprep.subr.bf16.mxu1 %v1422_v56 }
  0x6a   : > { %1425 = vmatpush3.bf16.msra.mxu0 %v1422_v56 }
  0x6b   : > { %1447 = vmatpush3.bf16.msra.mxu1 %v1422_v56  ;;  %1427 = vmatprep.subr.bf16.mxu0 %v1426_v59 }
  0x6c   : > { %1440 = vmatprep.subr.bf16.mxu1 %v1426_v59 }
  0x6e   : > { %1429 = vmatpush3.bf16.msra.mxu0 %v1426_v59 }
  0x6f   : > { %1448 = vmatpush3.bf16.msra.mxu1 %v1426_v59  ;;  %1431 = vmatprep.subr.bf16.mxu0 %v1430_v62 }
  0x70   : > { %1441 = vmatprep.subr.bf16.mxu1 %v1430_v62 }
  0x72   : > { %1433 = vmatpush3.bf16.msra.mxu0 %v1430_v62 }
  0x73   : > { %1449 = vmatpush3.bf16.msra.mxu1 %v1430_v62 }
  0x75   : > { %1269 = vmatmul.mubr.f32.vlgmr.msra.gmra.mrb[16].mxu0 %v386_v63 }
  0x76   : > { %1272 = vmatmul.mubr.f32.vlgmr.msra.gmra.mrb[16].mxu1 %v404_v0 }
  0xc4   : > { %v412_v2 = vpop.permute.xlu0 %411 }
  0xc5   : > { %v422_v16 = vpop.permute.xlu1 %421 }
  0xc8   : > { %v417_v10 = vpop.permute.xlu0 %416 }
  0xc9   : > { %v427_v28 = vpop.permute.xlu1 %426 }
 0x108   : > { %v1072_v1 = vpop.f32.mrb[0].mxu0 }
 0x109   : > { %v1073_v3 = vpop.f32.mrb[1].mxu0  ;;  %v1116_v4 = vpop.f32.mrb[0].mxu1 }
 0x10a   : > { %v1074_v5 = vadd.f32 %v1073_v3, %v1072_v1  ;;  %v1117_v6 = vpop.f32.mrb[1].mxu1 }
 0x10b   : > { %v1118_v7 = vadd.f32 %v1117_v6, %v1116_v4 }
 0x10c   : > { %v496_v8 = vadd.f32 %v1074_v5, %v412_v2  ;;  %v1075_v9 = vpop.f32.mrb[2].mxu0 }
 0x10d   : > { %v1076_v11 = vpop.f32.mrb[3].mxu0  ;;  %v1119_v12 = vpop.f32.mrb[2].mxu1 }
 0x10e   : > { %v581_v13 = vadd.f32 %v1118_v7, %v496_v8  ;;  %v1077_v14 = vadd.f32 %v1076_v11, %v1075_v9  ;;  %v1120_v15 = vpop.f32.mrb[3].mxu1 }
 0x10f   : > { %v1121_v17 = vadd.f32 %v1120_v15, %v1119_v12 }
 0x110   : > { %v501_v18 = vadd.f32 %v1077_v14, %v417_v10  ;;  %v1078_v19 = vpop.f32.mrb[4].mxu0 }
 0x111   : > { %v1079_v20 = vpop.f32.mrb[5].mxu0  ;;  %v1122_v21 = vpop.f32.mrb[4].mxu1 }
 0x112   : > { %v586_v22 = vadd.f32 %v1121_v17, %v501_v18  ;;  %v1080_v23 = vadd.f32 %v1079_v20, %v1078_v19  ;;  %v1123_v24 = vpop.f32.mrb[5].mxu1 }
 0x113   : > { %v1124_v25 = vadd.f32 %v1123_v24, %v1122_v21 }
 0x114   : > { %v506_v26 = vadd.f32 %v1080_v23, %v422_v16  ;;  %v1081_v27 = vpop.f32.mrb[6].mxu0 }
 0x115   : > { %v1082_v29 = vpop.f32.mrb[7].mxu0  ;;  %v1125_v30 = vpop.f32.mrb[6].mxu1 }
 0x116   : > { %v591_v31 = vadd.f32 %v1124_v25, %v506_v26  ;;  %v1083_v32 = vadd.f32 %v1082_v29, %v1081_v27  ;;  %v1126_v33 = vpop.f32.mrb[7].mxu1 }
 0x117   : > { %v1127_v34 = vadd.f32 %v1126_v33, %v1125_v30  ;;  %v913_v33 = vld [vmem:[%s1861_s3 + $0x18] sm:$0xff] }
 0x118   : > { %v511_v35 = vadd.f32 %v1083_v32, %v427_v28  ;;  %v910_v32 = vld [vmem:[%s1861_s3] sm:$0xff] }
 0x11a   : > { %v596_v36 = vadd.f32 %v1127_v34, %v511_v35  ;;  %v912_v34 = vld [vmem:[%s1861_s3 + $0x10] sm:$0xff]  ;;  %v939_v35 = vld [vmem:[%s1862_s4 + $0x8] sm:$0xff] }
 0x128   : > { %v1160_v37 = vpop.f32.mrb[8].mxu0 }
 0x129   : > { %v1161_v38 = vpop.f32.mrb[9].mxu0  ;;  %v1204_v39 = vpop.f32.mrb[8].mxu1 }
 0x12a   : > { %v1162_v40 = vadd.f32 %v1161_v38, %v1160_v37  ;;  %v1205_v41 = vpop.f32.mrb[9].mxu1  ;;  %v941_v37 = vld [vmem:[%s1862_s4 + $0x18] sm:$0xff]  ;;  %v940_v38 = vld [vmem:[%s1862_s4 + $0x10] sm:$0xff] }
 0x12b   : > { %v1206_v42 = vadd.f32 %v1205_v41, %v1204_v39 }
 0x12c   : > { %v666_v43 = vadd.f32 %v1162_v40, %v581_v13  ;;  %v1163_v44 = vpop.f32.mrb[10].mxu0 }
 0x12d   : > { %v1164_v45 = vpop.f32.mrb[11].mxu0  ;;  %v1207_v46 = vpop.f32.mrb[10].mxu1 }
 0x12e   : > { %v1165_v47 = vadd.f32 %v1164_v45, %v1163_v44  ;;  %v1208_v48 = vpop.f32.mrb[11].mxu1  ;;  %v751_v49 = vadd.f32 %v1206_v42, %v666_v43 }
 0x12f   : > { %v1209_v50 = vadd.f32 %v1208_v48, %v1207_v46 }
 0x130   : > { %v671_v51 = vadd.f32 %v1165_v47, %v586_v22  ;;  %v1166_v52 = vpop.f32.mrb[12].mxu0 }
 0x131   : > { %v1167_v53 = vpop.f32.mrb[13].mxu0  ;;  %v1210_v54 = vpop.f32.mrb[12].mxu1 }
 0x132   : > { %v1168_v55 = vadd.f32 %v1167_v53, %v1166_v52  ;;  %v1211_v56 = vpop.f32.mrb[13].mxu1  ;;  %v756_v57 = vadd.f32 %v1209_v50, %v671_v51 }
 0x133   : > { %v1212_v58 = vadd.f32 %v1211_v56, %v1210_v54 }
 0x134   : > { %v676_v59 = vadd.f32 %v1168_v55, %v591_v31  ;;  %v1169_v60 = vpop.f32.mrb[14].mxu0  ;;  %v911_v31 = vld [vmem:[%s1861_s3 + $0x8] sm:$0xff] }
 0x135   : > { %v1170_v61 = vpop.f32.mrb[15].mxu0  ;;  %v1213_v62 = vpop.f32.mrb[14].mxu1 }
 0x136   : > { %v1171_v63 = vadd.f32 %v1170_v61, %v1169_v60  ;;  %v1214_v0 = vpop.f32.mrb[15].mxu1  ;;  %v761_v1 = vadd.f32 %v1212_v58, %v676_v59 }
 0x137   : > { %v1215_v2 = vadd.f32 %v1214_v0, %v1213_v62 }
 0x138   : > { %v681_v3 = vadd.f32 %v1171_v63, %v596_v36  ;;  %v938_v36 = vld [vmem:[%s1862_s4] sm:$0xff] }
 0x13a   : > { %v766_v4 = vadd.f32 %v1215_v2, %v681_v3 }
 0x148   : > { %v1270_v5 = vpop.f32.mrb[16].mxu0 }
 0x149   : > { %v1791_v6 = vadd.f32 %v1270_v5, %v756_v57  ;;  %v1273_v7 = vpop.f32.mrb[16].mxu1  ;;  %v835_v8 = vpop.f32.mrb[17].mxu0 }
 0x14a   : > { %v1793_v9 = vadd.f32 %v1273_v7, %v766_v4  ;;  %v1795_v10 = vadd.f32 %v835_v8, %v751_v49  ;;  %v845_v11 = vpop.f32.mrb[17].mxu1 }
 0x14b   : > { %v856_v12 = vsel %vm854_vm0, %v1791_v6, 0.0  ;;  %v872_v13 = vmul.f32 %v1791_v6, %v1791_v6  ;;  %v1801_v14 = vadd.f32 %v845_v11, %v761_v1 }
 0x14c   : > { %v855_v15 = vsel %vm854_vm0, %v1795_v10, 0.0  ;;  %v871_v16 = vmul.f32 %v1795_v10, %v1795_v10  ;;  %v874_v21 = vmul.f32 %v1793_v9, %v1793_v9  ;;  %v860_v25 = vsel %vm854_vm0, %v1793_v9, 0.0 }
 0x14d   : > { %v873_v17 = vmul.f32 %v1801_v14, %v1801_v14  ;;  %v857_v18 = vadd.f32 %v856_v12, %v855_v15  ;;  %v876_v19 = vsel %vm854_vm0, %v872_v13, 0.0  ;;  %v858_v20 = vsel %vm854_vm0, %v1801_v14, 0.0 }
 0x14e   : > { %v875_v22 = vsel %vm854_vm0, %v871_v16, 0.0  ;;  %v880_v29 = vsel %vm854_vm0, %v874_v21, 0.0 }
 0x14f   : > { %v859_v23 = vadd.f32 %v858_v20, %v857_v18  ;;  %v877_v24 = vadd.f32 %v876_v19, %v875_v22  ;;  %v878_v26 = vsel %vm854_vm0, %v873_v17, 0.0 }
 0x151   : > { %v861_v27 = vadd.f32 %v860_v25, %v859_v23  ;;  %v879_v28 = vadd.f32 %v878_v26, %v877_v24 }
 0x153   : > { %862 = vadd.xlane.f32.xlu0 %v861_v27  ;;  %v881_v30 = vadd.f32 %v880_v29, %v879_v28 }
 0x155   : > { %882 = vadd.xlane.f32.xlu1 %v881_v30 }
 0x166   : > { %921 = vperm.xlu1 %1468, %v911_v31  }
 0x169   : > { %916 = vperm.xlu0 %1467, %v910_v32  }
 0x16a   : > { %931 = vperm.xlu1 %1468, %v913_v33  }
 0x16d   : > { %926 = vperm.xlu0 %1467, %v912_v34  }
 0x16e   : > { %949 = vperm.xlu1 %1468, %v939_v35  }
 0x171   : > { %944 = vperm.xlu0 %1467, %v938_v36  }
 0x172   : > { %959 = vperm.xlu1 %1468, %v941_v37  }
 0x175   : > { %954 = vperm.xlu0 %1467, %v940_v38  }
 0x1e0   : > { %v863_v39 = vpop.xlane.xlu0 %862 }
 0x1e1   : > { %v864_v40 = vrot.slane %v863_v39, 4 }
 0x1e2   : > { %v883_v41 = vpop.xlane.xlu1 %882 }
 0x1e3   : > { %v865_v42 = vadd.f32 %v864_v40, %v863_v39  ;;  %v884_v43 = vrot.slane %v883_v41, 4 }
 0x1e5   : > { %v866_v44 = vrot.slane %v865_v42, 2  ;;  %v885_v45 = vadd.f32 %v884_v43, %v883_v41 }
 0x1e6   : > { %v922_v55 = vpop.permute.xlu1 %921 }
 0x1e7   : > { %v886_v46 = vrot.slane %v885_v45, 2  ;;  %v867_v47 = vadd.f32 %v866_v44, %v865_v42 }
 0x1e8   : > { %v917_v56 = vpop.permute.xlu0 %916 }
 0x1e9   : > { %v868_v48 = vrot.slane %v867_v47, 1  ;;  %v887_v49 = vadd.f32 %v886_v46, %v885_v45 }
 0x1ea   : > { %v932_v57 = vpop.permute.xlu1 %931 }
 0x1eb   : > { %v869_v50 = vadd.f32 %v868_v48, %v867_v47  ;;  %v888_v51 = vrot.slane %v887_v49, 1 }
 0x1ec   : > { %v927_v58 = vpop.permute.xlu0 %926 }
 0x1ed   : > { %1451 = vpush %v869_v50  ;;  %v889_v52 = vadd.f32 %v888_v51, %v887_v49 }
 0x1ee   : > { %v950_v60 = vpop.permute.xlu1 %949 }
 0x1ef   : > { %1453 = vpush %v889_v52 }
 0x1f0   : > { %v945_v61 = vpop.permute.xlu0 %944 }
 0x1f2   : > { %v960_v15 = vpop.permute.xlu1 %959 }
 0x1f4   : > { %v955_v16 = vpop.permute.xlu0 %954 }
 0x21e   : > { %s1452_s6 = spop %1451 }
 0x21f   : > { %s891_s7 = smul.f32 0.0078125, %s1452_s6 }
 0x220   : > { %s1454_s8 = spop %1453 }
 0x221   : > { %s893_s9 = smul.f32 %s891_s7, %s891_s7  ;;  %v896_v59 = vstv %s891_s7 }
 0x222   : > { %s892_s10 = smul.f32 0.0078125, %s1454_s8  ;;  %v897_v62 = vsub.f32 %v1795_v10, %v896_v59  ;;  %v898_v63 = vsub.f32 %v1791_v6, %v896_v59  ;;  %v899_v0 = vsub.f32 %v1801_v14, %v896_v59  ;;  %v900_v1 = vsub.f32 %v1793_v9, %v896_v59 }
 0x224   : > { %s894_s11 = ssub.f32 %s892_s10, %s893_s9 }
 0x226   : > { %s895_s27 = smax.f32 %s1480_s12, %s894_s11 }
 0x227   : > { %s901_s13 = sadd.f32 1e-05, %s895_s27 }
 0x229   : > { %v902_v53 = vstv %s901_s13 }
 0x22a   : > { %1469 = vrsqrt.f32 %v902_v53 }
 0x234   : > { %v1470_v54 = vpop.eup %1469 }
 0x235   : > { %1455 = vpush %v1470_v54 }
 0x266   : > { %s1456_s14 = spop %1455 }
 0x267   : > { %v905_v2 = vstv %s1456_s14 }
 0x268   : > { %v906_v3 = vmul.f32 %v905_v2, %v897_v62  ;;  %v907_v4 = vmul.f32 %v905_v2, %v898_v63  ;;  %v908_v5 = vmul.f32 %v905_v2, %v899_v0  ;;  %v909_v7 = vmul.f32 %v905_v2, %v900_v1 }
 0x26a   : > { %v934_v8 = vmul.f32 %v917_v56, %v906_v3  ;;  %v935_v11 = vmul.f32 %v922_v55, %v907_v4  ;;  %v936_v12 = vmul.f32 %v927_v58, %v908_v5  ;;  %v937_v13 = vmul.f32 %v932_v57, %v909_v7 }
 0x26c   : > { %v962_v10 = vadd.f32 %v945_v61, %v934_v8  ;;  %v963_v17 = vadd.f32 %v950_v60, %v935_v11  ;;  %v964_v6 = vadd.f32 %v955_v16, %v936_v12  ;;  %v965_v18 = vadd.f32 %v960_v15, %v937_v13 }
 0x26e   : > { %v966_v9 = vmax.f32 %v962_v10, 0.0  ;;  %v967_v14 = vmax.f32 %v963_v17, 0.0  ;;  %v968_v19 = vmax.f32 %v964_v6, 0.0  ;;  %v969_v20 = vmax.f32 %v965_v18, 0.0 }
 0x270   : > { %970 = vst.msk [vmem:[%s224_s20] sm:$0xff] %vm854_vm0, %v966_v9  ;;  %971 = vst.msk [vmem:[%s224_s20 + $0x8] sm:$0xff] %vm854_vm0, %v967_v14 }
 0x271   : > { %972 = vst.msk [vmem:[%s224_s20 + $0x10] sm:$0xff] %vm854_vm0, %v968_v19  ;;  %973 = vst.msk [vmem:[%s224_s20 + $0x18] sm:$0xff] %vm854_vm0, %v969_v20 }
 0x272 PF: > { %s15_s18 = sadd.s32 1, %s1477_s18  }
 0x273   : > { %p12_p4 = scmp.ge.s32.totalorder %s15_s18, 4  }
 0x275   :  { %14 = sbr.rel (!%p12_p4) target bundleno = 1 (0x1), region = 70 }

// kernel: posterior_unet_forward.15
= control target key start
LH: loop header
LB: loop body
LE: loop exit
PB: predicated region body
PF: predicated region fallthrough
CT: control target
= control target key end

     0   :  { %s1070_s18 = smov 0   ;;  %s1297_s0 = inlined_call_operand.vmem [shape: f32[2,576,16], index: 0, kind: input, shape index: {}]   ;;  %s1298_s1 = inlined_call_operand.vmem [shape: f32[32,576], index: 1, kind: input, shape index: {}]   ;;  %s1299_s2 = inlined_call_operand.vmem [shape: f32[32,1], index: 2, kind: input, shape index: {}]   ;;  %s1300_s3 = inlined_call_operand.vmem [shape: f32[32,1], index: 3, kind: input, shape index: {}]   ;;  %s1301_s4 = inlined_call_operand.vmem [shape: f32[32,1], index: 4, kind: input, shape index: {}]   ;;  %s1302_s5 = inlined_call_operand.vmem [shape: f32[2,32,16], index: 5, kind: output, shape index: {}]  }
   0x1 LB: > { %s784_s19 = sadd.s32 4294967295, %s1036_s18   ;;  %p788_p0 = scmp.ge.s32.totalorder %s1036_s18, 1  ;;  %s1036_s18 = sphi %s1070_s18, %s15_s18  }
   0x2   : > { %p187_p1 = scmp.lt.s32.totalorder %s1036_s18, 3 }
   0x4   : > { %p188_p2 = pnand %p788_p0, %p187_p1 }
   0x5   : > { %p215_p3 = scmp.lt.s32.totalorder (!%p188_p2), %s784_s19, 1  ;;  %v298_v0 = vld [vmem:[%s1298_s1 + $0x8] sm:$0xff] (!%p188_p2)  ;;  %v300_v1 = vld [vmem:[%s1298_s1 + $0x18] sm:$0xff] (!%p188_p2)  ;;  %v1038_v2 = vmov (!%p188_p2), 0   ;;  %v317_v3 = vld [vmem:[%s1299_s2] sm:$0xff] (!%p188_p2)  ;;  %vm341_vm0 = vcmask (!%p188_p2), 523264  }
   0x6   : > { %191 = sbr.rel (%p188_p2) target bundleno = 578 (0x242), region = 40  ;;  %418 = vmatprep.mubr.f32.mxu0 (!%p188_p2), %v298_v0  ;;  %503 = vmatprep.mubr.f32.mxu1 (!%p188_p2), %v300_v1  ;;  %vm609_vm1 = vcmask (!%p188_p2), 130048   ;;  %s1039_s25 = smov (!%p188_p2), 0.0  }
   0x7   : > { %1026 = vset.pattern.permute.xlu0 (!%p188_p2), %v1038_v2  ;;  %1027 = vset.pattern.permute.xlu1 (!%p188_p2), %v1038_v2 }
   0x8   : > { %323 = vperm.xlu0 (!%p188_p2), %1026, %v317_v3  }
   0xd   : > { %s1304_s19 = smov (!%p215_p3, %s784_s19), 1 }
   0xe   : > { %s1009_s24 = smul.u32 576, %s1304_s19  ;;  %s798_s30 = sshll.u32 %s1304_s19, 5 }
   0xf   : > { %s224_s8 = scalar_lea.vmem %s1302_s5, %s798_s30 }
  0x10   : > { %s1090_s27 = scalar_lea.vmem %s1297_s0, %s1009_s24 }
  0x11   : > { %v241_v4 = vld [vmem:[%s1090_s27 + $0x80] sm:$0xff]  ;;  %v242_v5 = vld [vmem:[%s1090_s27 + $0x88] sm:$0xff]  ;;  %v243_v15 = vld [vmem:[%s1090_s27 + $0x90] sm:$0xff] }
  0x12   : > { %v273_v6 = vld [vmem:[%s1090_s27 + $0x180] sm:$0xff]  ;;  %v921_v7 = vpack.c.bf16 %v242_v5, %v241_v4  ;;  %v274_v8 = vld [vmem:[%s1090_s27 + $0x188] sm:$0xff]  ;;  %v244_v17 = vld [vmem:[%s1090_s27 + $0x98] sm:$0xff] }
  0x13   : > { %v225_v9 = vld [vmem:[%s1090_s27] sm:$0xff]  ;;  %v226_v10 = vld [vmem:[%s1090_s27 + $0x8] sm:$0xff]  ;;  %v953_v11 = vpack.c.bf16 %v274_v8, %v273_v6  ;;  %v275_v18 = vld [vmem:[%s1090_s27 + $0x190] sm:$0xff]  ;;  %v925_v20 = vpack.c.bf16 %v244_v17, %v243_v15 }
  0x14   : > { %v923_v12 = vpack.c.bf16 %v226_v10, %v225_v9  ;;  %v257_v13 = vld [vmem:[%s1090_s27 + $0x100] sm:$0xff]  ;;  %v258_v14 = vld [vmem:[%s1090_s27 + $0x108] sm:$0xff]  ;;  %922 = vmatprep.subr.bf16.mxu0 %v921_v7  ;;  %v276_v19 = vld [vmem:[%s1090_s27 + $0x198] sm:$0xff] }
  0x15   : > { %v955_v16 = vpack.c.bf16 %v258_v14, %v257_v13  ;;  %954 = vmatprep.subr.bf16.mxu1 %v953_v11  ;;  %v957_v21 = vpack.c.bf16 %v276_v19, %v275_v18  ;;  %v227_v22 = vld [vmem:[%s1090_s27 + $0x10] sm:$0xff]  ;;  %v228_v23 = vld [vmem:[%s1090_s27 + $0x18] sm:$0xff]  ;;  %v245_v27 = vld [vmem:[%s1090_s27 + $0xa0] sm:$0xff] }
  0x16   : > { %924 = vmatpush3.bf16.msra.mxu0 %v923_v12  ;;  %v259_v24 = vld [vmem:[%s1090_s27 + $0x110] sm:$0xff]  ;;  %v927_v25 = vpack.c.bf16 %v228_v23, %v227_v22  ;;  %v260_v26 = vld [vmem:[%s1090_s27 + $0x118] sm:$0xff]  ;;  %v246_v28 = vld [vmem:[%s1090_s27 + $0xa8] sm:$0xff] }
  0x17   : > { %956 = vmatpush3.bf16.msra.mxu1 %v955_v16  ;;  %926 = vmatprep.subr.bf16.mxu0 %v925_v20  ;;  %v959_v29 = vpack.c.bf16 %v260_v26, %v259_v24  ;;  %v929_v30 = vpack.c.bf16 %v246_v28, %v245_v27  ;;  %v277_v31 = vld [vmem:[%s1090_s27 + $0x1a0] sm:$0xff]  ;;  %v278_v32 = vld [vmem:[%s1090_s27 + $0x1a8] sm:$0xff]  ;;  %v247_v39 = vld [vmem:[%s1090_s27 + $0xb0] sm:$0xff] }
  0x18   : > { %958 = vmatprep.subr.bf16.mxu1 %v957_v21  ;;  %v229_v33 = vld [vmem:[%s1090_s27 + $0x20] sm:$0xff]  ;;  %v961_v34 = vpack.c.bf16 %v278_v32, %v277_v31  ;;  %v230_v35 = vld [vmem:[%s1090_s27 + $0x28] sm:$0xff]  ;;  %v248_v40 = vld [vmem:[%s1090_s27 + $0xb8] sm:$0xff] }
  0x19   : > { %v261_v36 = vld [vmem:[%s1090_s27 + $0x120] sm:$0xff]  ;;  %v262_v37 = vld [vmem:[%s1090_s27 + $0x128] sm:$0xff]  ;;  %v931_v38 = vpack.c.bf16 %v230_v35, %v229_v33  ;;  %v279_v41 = vld [vmem:[%s1090_s27 + $0x1b0] sm:$0xff]  ;;  %v933_v43 = vpack.c.bf16 %v248_v40, %v247_v39 }
  0x1a   : > { %928 = vmatpush3.bf16.msra.mxu0 %v927_v25  ;;  %v963_v42 = vpack.c.bf16 %v262_v37, %v261_v36  ;;  %v280_v44 = vld [vmem:[%s1090_s27 + $0x1b8] sm:$0xff]  ;;  %v231_v45 = vld [vmem:[%s1090_s27 + $0x30] sm:$0xff]  ;;  %v249_v50 = vld [vmem:[%s1090_s27 + $0xc0] sm:$0xff] }
  0x1b   : > { %960 = vmatpush3.bf16.msra.mxu1 %v959_v29  ;;  %930 = vmatprep.subr.bf16.mxu0 %v929_v30  ;;  %v232_v46 = vld [vmem:[%s1090_s27 + $0x38] sm:$0xff]  ;;  %v965_v47 = vpack.c.bf16 %v280_v44, %v279_v41  ;;  %v263_v48 = vld [vmem:[%s1090_s27 + $0x130] sm:$0xff]  ;;  %v250_v51 = vld [vmem:[%s1090_s27 + $0xc8] sm:$0xff] }
  0x1c   : > { %962 = vmatprep.subr.bf16.mxu1 %v961_v34  ;;  %v264_v49 = vld [vmem:[%s1090_s27 + $0x138] sm:$0xff]  ;;  %v281_v52 = vld [vmem:[%s1090_s27 + $0x1c0] sm:$0xff]  ;;  %v282_v53 = vld [vmem:[%s1090_s27 + $0x1c8] sm:$0xff]  ;;  %v935_v54 = vpack.c.bf16 %v232_v46, %v231_v45  ;;  %v937_v56 = vpack.c.bf16 %v250_v51, %v249_v50 }
  0x1d   : > { %v967_v55 = vpack.c.bf16 %v264_v49, %v263_v48  ;;  %v233_v57 = vld [vmem:[%s1090_s27 + $0x40] sm:$0xff]  ;;  %v234_v58 = vld [vmem:[%s1090_s27 + $0x48] sm:$0xff]  ;;  %v969_v60 = vpack.c.bf16 %v282_v53, %v281_v52  ;;  %v251_v62 = vld [vmem:[%s1090_s27 + $0xd0] sm:$0xff] }
  0x1e   : > { %932 = vmatpush3.bf16.msra.mxu0 %v931_v38  ;;  %v265_v59 = vld [vmem:[%s1090_s27 + $0x140] sm:$0xff]  ;;  %v266_v61 = vld [vmem:[%s1090_s27 + $0x148] sm:$0xff]  ;;  %v252_v63 = vld [vmem:[%s1090_s27 + $0xd8] sm:$0xff]  ;;  %v939_v2 = vpack.c.bf16 %v234_v58, %v233_v57 }
  0x1f   : > { %964 = vmatpush3.bf16.msra.mxu1 %v963_v42  ;;  %934 = vmatprep.subr.bf16.mxu0 %v933_v43  ;;  %v283_v0 = vld [vmem:[%s1090_s27 + $0x1d0] sm:$0xff]  ;;  %v284_v1 = vld [vmem:[%s1090_s27 + $0x1d8] sm:$0xff]  ;;  %v971_v3 = vpack.c.bf16 %v266_v61, %v265_v59  ;;  %v941_v4 = vpack.c.bf16 %v252_v63, %v251_v62  ;;  %v253_v10 = vld [vmem:[%s1090_s27 + $0xe0] sm:$0xff] }
  0x20   : > { %966 = vmatprep.subr.bf16.mxu1 %v965_v47  ;;  %v235_v5 = vld [vmem:[%s1090_s27 + $0x50] sm:$0xff]  ;;  %v236_v6 = vld [vmem:[%s1090_s27 + $0x58] sm:$0xff]  ;;  %v973_v8 = vpack.c.bf16 %v284_v1, %v283_v0  ;;  %v254_v11 = vld [vmem:[%s1090_s27 + $0xe8] sm:$0xff] }
  0x21   : > { %v267_v7 = vld [vmem:[%s1090_s27 + $0x150] sm:$0xff]  ;;  %v268_v9 = vld [vmem:[%s1090_s27 + $0x158] sm:$0xff]  ;;  %v285_v12 = vld [vmem:[%s1090_s27 + $0x1e0] sm:$0xff]  ;;  %v943_v14 = vpack.c.bf16 %v236_v6, %v235_v5  ;;  %v945_v16 = vpack.c.bf16 %v254_v11, %v253_v10 }
  0x22   : > { %936 = vmatpush3.bf16.msra.mxu0 %v935_v54  ;;  %v286_v13 = vld [vmem:[%s1090_s27 + $0x1e8] sm:$0xff]  ;;  %v975_v15 = vpack.c.bf16 %v268_v9, %v267_v7  ;;  %v237_v17 = vld [vmem:[%s1090_s27 + $0x60] sm:$0xff]  ;;  %v255_v22 = vld [vmem:[%s1090_s27 + $0xf0] sm:$0xff] }
  0x23   : > { %968 = vmatpush3.bf16.msra.mxu1 %v967_v55  ;;  %938 = vmatprep.subr.bf16.mxu0 %v937_v56  ;;  %v238_v18 = vld [vmem:[%s1090_s27 + $0x68] sm:$0xff]  ;;  %v269_v19 = vld [vmem:[%s1090_s27 + $0x160] sm:$0xff]  ;;  %v977_v20 = vpack.c.bf16 %v286_v13, %v285_v12  ;;  %v256_v23 = vld [vmem:[%s1090_s27 + $0xf8] sm:$0xff] }
  0x24   : > { %970 = vmatprep.subr.bf16.mxu1 %v969_v60  ;;  %v270_v21 = vld [vmem:[%s1090_s27 + $0x168] sm:$0xff]  ;;  %v287_v24 = vld [vmem:[%s1090_s27 + $0x1f0] sm:$0xff]  ;;  %v288_v25 = vld [vmem:[%s1090_s27 + $0x1f8] sm:$0xff]  ;;  %v947_v26 = vpack.c.bf16 %v238_v18, %v237_v17  ;;  %v949_v30 = vpack.c.bf16 %v256_v23, %v255_v22 }
  0x25   : > { %v318_v27 = vld [vmem:[%s1299_s2 + $0x8] sm:$0xff]  ;;  %v319_v28 = vld [vmem:[%s1299_s2 + $0x10] sm:$0xff]  ;;  %v979_v29 = vpack.c.bf16 %v270_v21, %v269_v19  ;;  %v240_v32 = vld [vmem:[%s1090_s27 + $0x78] sm:$0xff]  ;;  %v981_v34 = vpack.c.bf16 %v288_v25, %v287_v24 }
  0x26   : > { %940 = vmatpush3.bf16.msra.mxu0 %v939_v2  ;;  %v239_v31 = vld [vmem:[%s1090_s27 + $0x70] sm:$0xff]  ;;  %v272_v35 = vld [vmem:[%s1090_s27 + $0x178] sm:$0xff]  ;;  %v289_v36 = vld [vmem:[%s1090_s27 + $0x200] sm:$0xff]  ;;  %328 = vperm.xlu0 %1026, %v318_v27  }
  0x27   : > { %972 = vmatpush3.bf16.msra.mxu1 %v971_v3  ;;  %942 = vmatprep.subr.bf16.mxu0 %v941_v4  ;;  %v271_v33 = vld [vmem:[%s1090_s27 + $0x170] sm:$0xff]  ;;  %v290_v37 = vld [vmem:[%s1090_s27 + $0x208] sm:$0xff]  ;;  %v951_v38 = vpack.c.bf16 %v240_v32, %v239_v31  ;;  %v320_v39 = vld [vmem:[%s1299_s2 + $0x18] sm:$0xff] }
  0x28   : > { %974 = vmatprep.subr.bf16.mxu1 %v973_v8  ;;  %333 = vperm.xlu1 %1027, %v319_v28   ;;  %v983_v40 = vpack.c.bf16 %v272_v35, %v271_v33  ;;  %v985_v41 = vpack.c.bf16 %v290_v37, %v289_v36  ;;  %v291_v42 = vld [vmem:[%s1090_s27 + $0x210] sm:$0xff]  ;;  %v292_v43 = vld [vmem:[%s1090_s27 + $0x218] sm:$0xff]  ;;  %v297_v44 = vld [vmem:[%s1298_s1] sm:$0xff] }
  0x29   : > { %v299_v45 = vld [vmem:[%s1298_s1 + $0x10] sm:$0xff]  ;;  %v989_v47 = vpack.c.bf16 %v292_v43, %v291_v42  ;;  %v305_v48 = vld [vmem:[%s1298_s1 + $0x40] sm:$0xff]  ;;  %v294_v50 = vld [vmem:[%s1090_s27 + $0x228] sm:$0xff] }
  0x2a   : > { %944 = vmatpush3.bf16.msra.mxu0 %v943_v14  ;;  %v303_v46 = vld [vmem:[%s1298_s1 + $0x30] sm:$0xff]  ;;  %v293_v49 = vld [vmem:[%s1090_s27 + $0x220] sm:$0xff]  ;;  %v302_v51 = vld [vmem:[%s1298_s1 + $0x28] sm:$0xff] }
  0x2b   : > { %976 = vmatpush3.bf16.msra.mxu1 %v975_v15  ;;  %946 = vmatprep.subr.bf16.mxu0 %v945_v16  ;;  %v304_v52 = vld [vmem:[%s1298_s1 + $0x38] sm:$0xff]  ;;  %v993_v54 = vpack.c.bf16 %v294_v50, %v293_v49  ;;  %v310_v55 = vld [vmem:[%s1298_s1 + $0x68] sm:$0xff]  ;;  %v295_v56 = vld [vmem:[%s1090_s27 + $0x230] sm:$0xff] }
  0x2c   : > { %978 = vmatprep.subr.bf16.mxu1 %v977_v20  ;;  %338 = vperm.xlu1 %1027, %v320_v39   ;;  %v308_v53 = vld [vmem:[%s1298_s1 + $0x58] sm:$0xff]  ;;  %v307_v58 = vld [vmem:[%s1298_s1 + $0x50] sm:$0xff]  ;;  %v309_v59 = vld [vmem:[%s1298_s1 + $0x60] sm:$0xff] }
  0x2d   : > { %v296_v57 = vld [vmem:[%s1090_s27 + $0x238] sm:$0xff]  ;;  %v313_v60 = vld [vmem:[%s1298_s1 + $0x80] sm:$0xff]  ;;  %v315_v62 = vld [vmem:[%s1298_s1 + $0x90] sm:$0xff] }
  0x2e   : > { %948 = vmatpush3.bf16.msra.mxu0 %v947_v26  ;;  %v997_v61 = vpack.c.bf16 %v296_v57, %v295_v56  ;;  %v312_v63 = vld [vmem:[%s1298_s1 + $0x78] sm:$0xff]  ;;  %v314_v0 = vld [vmem:[%s1298_s1 + $0x88] sm:$0xff]  ;;  %v301_v1 = vld [vmem:[%s1298_s1 + $0x20] sm:$0xff] }
  0x2f   : > { %980 = vmatpush3.bf16.msra.mxu1 %v979_v29  ;;  %950 = vmatprep.subr.bf16.mxu0 %v949_v30  ;;  %v311_v2 = vld [vmem:[%s1298_s1 + $0x70] sm:$0xff]  ;;  %v306_v3 = vld [vmem:[%s1298_s1 + $0x48] sm:$0xff]  ;;  %v316_v4 = vld [vmem:[%s1298_s1 + $0x98] sm:$0xff] }
  0x30   : > { %982 = vmatprep.subr.bf16.mxu1 %v981_v34 }
  0x32   : > { %952 = vmatpush3.bf16.msra.mxu0 %v951_v38 }
  0x33   : > { %984 = vmatpush3.bf16.msra.mxu1 %v983_v40  ;;  %986 = vmatprep.subr.bf16.mxu0 %v985_v41 }
  0x34   : > { %1001 = vmatprep.subr.bf16.mxu1 %v985_v41 }
  0x35   : > { %419 = vmatmul.mubr.f32.vlgmr.msra.gmra.mrb[0].mxu0 %v297_v44 }
  0x36   : > { %504 = vmatmul.mubr.f32.vlgmr.msra.gmra.mrb[0].mxu1 %v299_v45  ;;  %988 = vmatpush3.bf16.msra.mxu0 %v985_v41 }
  0x37   : > { %1005 = vmatpush3.bf16.msra.mxu1 %v985_v41  ;;  %423 = vmatprep.mubr.f32.mxu0 %v303_v46 }
  0x38   : > { %508 = vmatprep.mubr.f32.mxu1 %v305_v48  ;;  %990 = vmatprep.subr.bf16.mxu0 %v989_v47 }
  0x39   : > { %424 = vmatmul.mubr.f32.gmra.mrb[2].mxu0 %v302_v51  ;;  %1002 = vmatprep.subr.bf16.mxu1 %v989_v47 }
  0x3a   : > { %509 = vmatmul.mubr.f32.gmra.mrb[2].mxu1 %v304_v52  ;;  %992 = vmatpush3.bf16.msra.mxu0 %v989_v47 }
  0x3b   : > { %1006 = vmatpush3.bf16.msra.mxu1 %v989_v47  ;;  %428 = vmatprep.mubr.f32.mxu0 %v308_v53 }
  0x3c   : > { %513 = vmatprep.mubr.f32.mxu1 %v310_v55  ;;  %994 = vmatprep.subr.bf16.mxu0 %v993_v54 }
  0x3d   : > { %429 = vmatmul.mubr.f32.gmra.mrb[4].mxu0 %v307_v58  ;;  %1003 = vmatprep.subr.bf16.mxu1 %v993_v54 }
  0x3e   : > { %514 = vmatmul.mubr.f32.gmra.mrb[4].mxu1 %v309_v59  ;;  %996 = vmatpush3.bf16.msra.mxu0 %v993_v54 }
  0x3f   : > { %1007 = vmatpush3.bf16.msra.mxu1 %v993_v54  ;;  %433 = vmatprep.mubr.f32.mxu0 %v313_v60 }
  0x40   : > { %518 = vmatprep.mubr.f32.mxu1 %v315_v62  ;;  %998 = vmatprep.subr.bf16.mxu0 %v997_v61 }
  0x41   : > { %434 = vmatmul.mubr.f32.gmra.mrb[6].mxu0 %v312_v63  ;;  %1004 = vmatprep.subr.bf16.mxu1 %v997_v61 }
  0x42   : > { %519 = vmatmul.mubr.f32.gmra.mrb[6].mxu1 %v314_v0  ;;  %1000 = vmatpush3.bf16.msra.mxu0 %v997_v61 }
  0x43   : > { %1008 = vmatpush3.bf16.msra.mxu1 %v997_v61  ;;  %915 = vmatprep.mubr.msk.f32.mxu0 %vm341_vm0, %v301_v1 }
  0x44   : > { %918 = vmatprep.mubr.msk.f32.mxu1 %vm341_vm0, %v311_v2 }
  0x45   : > { %916 = vmatmul.mubr.msk.f32.vlgmr.msra.gmra.mrb[8].mxu0 %vm341_vm0, %v306_v3  ;;  %v666_v3 = vld [vmem:[%s1300_s3 + $0x8] sm:$0xff] }
  0x46   : > { %919 = vmatmul.mubr.msk.f32.vlgmr.msra.gmra.mrb[8].mxu1 %vm341_vm0, %v316_v4  ;;  %v665_v4 = vld [vmem:[%s1300_s3] sm:$0xff] }
  0x87   : > { %v324_v5 = vpop.permute.xlu0 %323 }
  0xa5   : > { %v329_v14 = vpop.permute.xlu0 %328 }
  0xa7   : > { %v334_v23 = vpop.permute.xlu1 %333 }
  0xab   : > { %v339_v37 = vpop.permute.xlu1 %338 }
 0x108   : > { %v831_v6 = vpop.f32.mrb[0].mxu0 }
 0x109   : > { %v832_v7 = vpop.f32.mrb[1].mxu0  ;;  %v875_v8 = vpop.f32.mrb[0].mxu1 }
 0x10a   : > { %v833_v9 = vadd.f32 %v832_v7, %v831_v6  ;;  %v876_v10 = vpop.f32.mrb[1].mxu1  ;;  %v667_v6 = vld [vmem:[%s1300_s3 + $0x10] sm:$0xff]  ;;  %v694_v7 = vld [vmem:[%s1301_s4 + $0x8] sm:$0xff] }
 0x10b   : > { %v877_v11 = vadd.f32 %v876_v10, %v875_v8  ;;  %v693_v8 = vld [vmem:[%s1301_s4] sm:$0xff]  ;;  %v695_v10 = vld [vmem:[%s1301_s4 + $0x10] sm:$0xff] }
 0x10c   : > { %v421_v12 = vadd.f32 %v833_v9, %v324_v5  ;;  %v834_v13 = vpop.f32.mrb[2].mxu0  ;;  %v668_v5 = vld [vmem:[%s1300_s3 + $0x18] sm:$0xff] }
 0x10d   : > { %v835_v15 = vpop.f32.mrb[3].mxu0  ;;  %v878_v16 = vpop.f32.mrb[2].mxu1  ;;  %v696_v9 = vld [vmem:[%s1301_s4 + $0x18] sm:$0xff] }
 0x10e   : > { %v836_v17 = vadd.f32 %v835_v15, %v834_v13  ;;  %v879_v18 = vpop.f32.mrb[3].mxu1  ;;  %v506_v19 = vadd.f32 %v877_v11, %v421_v12 }
 0x10f   : > { %v880_v20 = vadd.f32 %v879_v18, %v878_v16 }
 0x110   : > { %v426_v21 = vadd.f32 %v836_v17, %v329_v14  ;;  %v837_v22 = vpop.f32.mrb[4].mxu0 }
 0x111   : > { %v838_v24 = vpop.f32.mrb[5].mxu0  ;;  %v881_v25 = vpop.f32.mrb[4].mxu1 }
 0x112   : > { %v839_v26 = vadd.f32 %v838_v24, %v837_v22  ;;  %v882_v27 = vpop.f32.mrb[5].mxu1  ;;  %v511_v28 = vadd.f32 %v880_v20, %v426_v21 }
 0x113   : > { %v883_v29 = vadd.f32 %v882_v27, %v881_v25 }
 0x114   : > { %v431_v30 = vadd.f32 %v839_v26, %v334_v23  ;;  %v840_v31 = vpop.f32.mrb[6].mxu0 }
 0x115   : > { %v841_v32 = vpop.f32.mrb[7].mxu0  ;;  %v884_v33 = vpop.f32.mrb[6].mxu1 }
 0x116   : > { %v842_v34 = vadd.f32 %v841_v32, %v840_v31  ;;  %v885_v35 = vpop.f32.mrb[7].mxu1  ;;  %v516_v36 = vadd.f32 %v883_v29, %v431_v30 }
 0x117   : > { %v886_v38 = vadd.f32 %v885_v35, %v884_v33 }
 0x118   : > { %v436_v39 = vadd.f32 %v842_v34, %v339_v37  ;;  %v917_v40 = vpop.f32.mrb[8].mxu0 }
 0x119   : > { %v1230_v41 = vadd.f32 %v917_v40, %v511_v28  ;;  %v920_v42 = vpop.f32.mrb[8].mxu1  ;;  %v590_v43 = vpop.f32.mrb[9].mxu0 }
 0x11a   : > { %v521_v44 = vadd.f32 %v886_v38, %v436_v39  ;;  %v1232_v45 = vadd.f32 %v590_v43, %v506_v19  ;;  %v600_v46 = vpop.f32.mrb[9].mxu1 }
 0x11b   : > { %v611_v47 = vsel %vm609_vm1, %v1230_v41, 0.0  ;;  %v627_v48 = vmul.f32 %v1230_v41, %v1230_v41  ;;  %v1238_v49 = vadd.f32 %v600_v46, %v516_v36 }
 0x11c   : > { %v1240_v50 = vadd.f32 %v920_v42, %v521_v44  ;;  %v610_v51 = vsel %vm609_vm1, %v1232_v45, 0.0  ;;  %v626_v52 = vmul.f32 %v1232_v45, %v1232_v45 }
 0x11d   : > { %v628_v53 = vmul.f32 %v1238_v49, %v1238_v49  ;;  %v612_v54 = vadd.f32 %v611_v47, %v610_v51  ;;  %v631_v55 = vsel %vm609_vm1, %v627_v48, 0.0  ;;  %v613_v56 = vsel %vm609_vm1, %v1238_v49, 0.0 }
 0x11e   : > { %v629_v57 = vmul.f32 %v1240_v50, %v1240_v50  ;;  %v630_v58 = vsel %vm609_vm1, %v626_v52, 0.0  ;;  %v615_v61 = vsel %vm609_vm1, %v1240_v50, 0.0 }
 0x11f   : > { %v614_v59 = vadd.f32 %v613_v56, %v612_v54  ;;  %v632_v60 = vadd.f32 %v631_v55, %v630_v58  ;;  %v633_v62 = vsel %vm609_vm1, %v628_v53, 0.0 }
 0x120   : > { %v635_v1 = vsel %vm609_vm1, %v629_v57, 0.0 }
 0x121   : > { %v616_v63 = vadd.f32 %v615_v61, %v614_v59  ;;  %v634_v0 = vadd.f32 %v633_v62, %v632_v60 }
 0x123   : > { %617 = vadd.xlane.f32.xlu0 %v616_v63  ;;  %v636_v2 = vadd.f32 %v635_v1, %v634_v0 }
 0x125   : > { %637 = vadd.xlane.f32.xlu1 %v636_v2 }
 0x136   : > { %676 = vperm.xlu1 %1027, %v666_v3  }
 0x139   : > { %671 = vperm.xlu0 %1026, %v665_v4  }
 0x13a   : > { %686 = vperm.xlu1 %1027, %v668_v5  }
 0x13d   : > { %681 = vperm.xlu0 %1026, %v667_v6  }
 0x13e   : > { %704 = vperm.xlu1 %1027, %v694_v7  }
 0x141   : > { %699 = vperm.xlu0 %1026, %v693_v8  }
 0x142   : > { %714 = vperm.xlu1 %1027, %v696_v9  }
 0x145   : > { %709 = vperm.xlu0 %1026, %v695_v10  }
 0x1b0   : > { %v618_v11 = vpop.xlane.xlu0 %617 }
 0x1b1   : > { %v619_v12 = vrot.slane %v618_v11, 4 }
 0x1b2   : > { %v638_v13 = vpop.xlane.xlu1 %637 }
 0x1b3   : > { %v620_v14 = vadd.f32 %v619_v12, %v618_v11  ;;  %v639_v15 = vrot.slane %v638_v13, 4 }
 0x1b5   : > { %v621_v16 = vrot.slane %v620_v14, 2  ;;  %v640_v17 = vadd.f32 %v639_v15, %v638_v13 }
 0x1b6   : > { %v677_v27 = vpop.permute.xlu1 %676 }
 0x1b7   : > { %v641_v18 = vrot.slane %v640_v17, 2  ;;  %v622_v19 = vadd.f32 %v621_v16, %v620_v14 }
 0x1b8   : > { %v672_v28 = vpop.permute.xlu0 %671 }
 0x1b9   : > { %v623_v20 = vrot.slane %v622_v19, 1  ;;  %v642_v21 = vadd.f32 %v641_v18, %v640_v17 }
 0x1ba   : > { %v687_v29 = vpop.permute.xlu1 %686 }
 0x1bb   : > { %v624_v22 = vadd.f32 %v623_v20, %v622_v19  ;;  %v643_v23 = vrot.slane %v642_v21, 1 }
 0x1bc   : > { %v682_v30 = vpop.permute.xlu0 %681 }
 0x1bd   : > { %1010 = vpush %v624_v22  ;;  %v644_v24 = vadd.f32 %v643_v23, %v642_v21 }
 0x1be   : > { %v705_v32 = vpop.permute.xlu1 %704 }
 0x1bf   : > { %1012 = vpush %v644_v24 }
 0x1c0   : > { %v700_v33 = vpop.permute.xlu0 %699 }
 0x1c2   : > { %v715_v51 = vpop.permute.xlu1 %714 }
 0x1c4   : > { %v710_v52 = vpop.permute.xlu0 %709 }
 0x1ee   : > { %s1011_s17 = spop %1010 }
 0x1ef   : > { %s646_s20 = smul.f32 0.001953125, %s1011_s17 }
 0x1f0   : > { %s1013_s21 = spop %1012 }
 0x1f1   : > { %s648_s22 = smul.f32 %s646_s20, %s646_s20  ;;  %v651_v31 = vstv %s646_s20 }
 0x1f2   : > { %s647_s23 = smul.f32 0.001953125, %s1013_s21  ;;  %v652_v34 = vsub.f32 %v1232_v45, %v651_v31  ;;  %v653_v35 = vsub.f32 %v1230_v41, %v651_v31  ;;  %v654_v36 = vsub.f32 %v1238_v49, %v651_v31  ;;  %v655_v37 = vsub.f32 %v1240_v50, %v651_v31 }
 0x1f4   : > { %s649_s24 = ssub.f32 %s647_s23, %s648_s22 }
 0x1f6   : > { %s650_s26 = smax.f32 %s1039_s25, %s649_s24 }
 0x1f7   : > { %s656_s28 = sadd.f32 1e-05, %s650_s26 }
 0x1f9   : > { %v657_v25 = vstv %s656_s28 }
 0x1fa   : > { %1028 = vrsqrt.f32 %v657_v25 }
 0x204   : > { %v1029_v26 = vpop.eup %1028 }
 0x205   : > { %1014 = vpush %v1029_v26 }
 0x236   : > { %s1015_s29 = spop %1014 }
 0x237   : > { %v660_v38 = vstv %s1015_s29 }
 0x238   : > { %v661_v39 = vmul.f32 %v660_v38, %v652_v34  ;;  %v662_v40 = vmul.f32 %v660_v38, %v653_v35  ;;  %v663_v42 = vmul.f32 %v660_v38, %v654_v36  ;;  %v664_v43 = vmul.f32 %v660_v38, %v655_v37 }
 0x23a   : > { %v689_v44 = vmul.f32 %v672_v28, %v661_v39  ;;  %v690_v46 = vmul.f32 %v677_v27, %v662_v40  ;;  %v691_v47 = vmul.f32 %v682_v30, %v663_v42  ;;  %v692_v48 = vmul.f32 %v687_v29, %v664_v43 }
 0x23c   : > { %v717_v45 = vadd.f32 %v700_v33, %v689_v44  ;;  %v718_v53 = vadd.f32 %v705_v32, %v690_v46  ;;  %v719_v41 = vadd.f32 %v710_v52, %v691_v47  ;;  %v720_v54 = vadd.f32 %v715_v51, %v692_v48 }
 0x23e   : > { %v721_v49 = vmax.f32 %v717_v45, 0.0  ;;  %v722_v50 = vmax.f32 %v718_v53, 0.0  ;;  %v723_v55 = vmax.f32 %v719_v41, 0.0  ;;  %v724_v56 = vmax.f32 %v720_v54, 0.0 }
 0x240   : > { %725 = vst.msk [vmem:[%s224_s8] sm:$0xff] %vm609_vm1, %v721_v49  ;;  %726 = vst.msk [vmem:[%s224_s8 + $0x8] sm:$0xff] %vm609_vm1, %v722_v50 }
 0x241   : > { %727 = vst.msk [vmem:[%s224_s8 + $0x10] sm:$0xff] %vm609_vm1, %v723_v55  ;;  %728 = vst.msk [vmem:[%s224_s8 + $0x18] sm:$0xff] %vm609_vm1, %v724_v56 }
 0x242 PF: > { %s15_s18 = sadd.s32 1, %s1036_s18  }
 0x243   : > { %p12_p4 = scmp.ge.s32.totalorder %s15_s18, 4  }
 0x245   :  { %14 = sbr.rel (!%p12_p4) target bundleno = 1 (0x1), region = 70 }

// kernel: posterior_unet_forward.16
= control target key start
LH: loop header
LB: loop body
LE: loop exit
PB: predicated region body
PF: predicated region fallthrough
CT: control target
= control target key end

     0   :  { %s1069_s18 = smov 0   ;;  %s1300_s0 = inlined_call_operand.vmem [shape: f32[2,576,64], index: 0, kind: input, shape index: {}]   ;;  %s1301_s1 = inlined_call_operand.vmem [shape: f32[32,576], index: 1, kind: input, shape index: {}]   ;;  %s1302_s2 = inlined_call_operand.vmem [shape: f32[32,1], index: 2, kind: input, shape index: {}]   ;;  %s1303_s3 = inlined_call_operand.vmem [shape: f32[32,1], index: 3, kind: input, shape index: {}]   ;;  %s1304_s4 = inlined_call_operand.vmem [shape: f32[32,1], index: 4, kind: input, shape index: {}]   ;;  %s1305_s5 = inlined_call_operand.vmem [shape: f32[2,32,64], index: 5, kind: output, shape index: {}]  }
   0x1 LB: > { %s783_s19 = sadd.s32 4294967295, %s1035_s18   ;;  %p787_p0 = scmp.ge.s32.totalorder %s1035_s18, 1  ;;  %s1035_s18 = sphi %s1069_s18, %s15_s18  }
   0x2   : > { %p187_p1 = scmp.lt.s32.totalorder %s1035_s18, 3 }
   0x4   : > { %p188_p2 = pnand %p787_p0, %p187_p1 }
   0x5   : > { %p215_p3 = scmp.lt.s32.totalorder (!%p188_p2), %s783_s19, 1  ;;  %v298_v0 = vld [vmem:[%s1301_s1 + $0x8] sm:$0xff] (!%p188_p2)  ;;  %v300_v1 = vld [vmem:[%s1301_s1 + $0x18] sm:$0xff] (!%p188_p2)  ;;  %v1037_v2 = vmov (!%p188_p2), 0   ;;  %v317_v3 = vld [vmem:[%s1302_s2] sm:$0xff] (!%p188_p2)  ;;  %vm341_vm0 = vcmask (!%p188_p2), 523264  }
   0x6   : > { %191 = sbr.rel (%p188_p2) target bundleno = 578 (0x242), region = 40  ;;  %418 = vmatprep.mubr.f32.mxu0 (!%p188_p2), %v298_v0  ;;  %503 = vmatprep.mubr.f32.mxu1 (!%p188_p2), %v300_v1  ;;  %s1038_s25 = smov (!%p188_p2), 0.0  }
   0x7   : > { %1025 = vset.pattern.permute.xlu0 (!%p188_p2), %v1037_v2  ;;  %1026 = vset.pattern.permute.xlu1 (!%p188_p2), %v1037_v2 }
   0x8   : > { %323 = vperm.xlu0 (!%p188_p2), %1025, %v317_v3  }
   0xd   : > { %s1307_s19 = smov (!%p215_p3, %s783_s19), 1 }
   0xe   : > { %s1008_s24 = smul.u32 576, %s1307_s19  ;;  %s797_s30 = sshll.u32 %s1307_s19, 5 }
   0xf   : > { %s224_s8 = scalar_lea.vmem %s1305_s5, %s797_s30 }
  0x10   : > { %s1089_s27 = scalar_lea.vmem %s1300_s0, %s1008_s24 }
  0x11   : > { %v241_v4 = vld [vmem:[%s1089_s27 + $0x80] sm:$0xff]  ;;  %v242_v5 = vld [vmem:[%s1089_s27 + $0x88] sm:$0xff]  ;;  %v243_v15 = vld [vmem:[%s1089_s27 + $0x90] sm:$0xff] }
  0x12   : > { %v273_v6 = vld [vmem:[%s1089_s27 + $0x180] sm:$0xff]  ;;  %v920_v7 = vpack.c.bf16 %v242_v5, %v241_v4  ;;  %v274_v8 = vld [vmem:[%s1089_s27 + $0x188] sm:$0xff]  ;;  %v244_v17 = vld [vmem:[%s1089_s27 + $0x98] sm:$0xff] }
  0x13   : > { %v225_v9 = vld [vmem:[%s1089_s27] sm:$0xff]  ;;  %v226_v10 = vld [vmem:[%s1089_s27 + $0x8] sm:$0xff]  ;;  %v952_v11 = vpack.c.bf16 %v274_v8, %v273_v6  ;;  %v275_v18 = vld [vmem:[%s1089_s27 + $0x190] sm:$0xff]  ;;  %v924_v20 = vpack.c.bf16 %v244_v17, %v243_v15 }
  0x14   : > { %v922_v12 = vpack.c.bf16 %v226_v10, %v225_v9  ;;  %v257_v13 = vld [vmem:[%s1089_s27 + $0x100] sm:$0xff]  ;;  %v258_v14 = vld [vmem:[%s1089_s27 + $0x108] sm:$0xff]  ;;  %921 = vmatprep.subr.bf16.mxu0 %v920_v7  ;;  %v276_v19 = vld [vmem:[%s1089_s27 + $0x198] sm:$0xff] }
  0x15   : > { %v954_v16 = vpack.c.bf16 %v258_v14, %v257_v13  ;;  %953 = vmatprep.subr.bf16.mxu1 %v952_v11  ;;  %v956_v21 = vpack.c.bf16 %v276_v19, %v275_v18  ;;  %v227_v22 = vld [vmem:[%s1089_s27 + $0x10] sm:$0xff]  ;;  %v228_v23 = vld [vmem:[%s1089_s27 + $0x18] sm:$0xff]  ;;  %v245_v27 = vld [vmem:[%s1089_s27 + $0xa0] sm:$0xff] }
  0x16   : > { %923 = vmatpush3.bf16.msra.mxu0 %v922_v12  ;;  %v259_v24 = vld [vmem:[%s1089_s27 + $0x110] sm:$0xff]  ;;  %v926_v25 = vpack.c.bf16 %v228_v23, %v227_v22  ;;  %v260_v26 = vld [vmem:[%s1089_s27 + $0x118] sm:$0xff]  ;;  %v246_v28 = vld [vmem:[%s1089_s27 + $0xa8] sm:$0xff] }
  0x17   : > { %955 = vmatpush3.bf16.msra.mxu1 %v954_v16  ;;  %925 = vmatprep.subr.bf16.mxu0 %v924_v20  ;;  %v958_v29 = vpack.c.bf16 %v260_v26, %v259_v24  ;;  %v928_v30 = vpack.c.bf16 %v246_v28, %v245_v27  ;;  %v277_v31 = vld [vmem:[%s1089_s27 + $0x1a0] sm:$0xff]  ;;  %v278_v32 = vld [vmem:[%s1089_s27 + $0x1a8] sm:$0xff]  ;;  %v247_v39 = vld [vmem:[%s1089_s27 + $0xb0] sm:$0xff] }
  0x18   : > { %957 = vmatprep.subr.bf16.mxu1 %v956_v21  ;;  %v229_v33 = vld [vmem:[%s1089_s27 + $0x20] sm:$0xff]  ;;  %v960_v34 = vpack.c.bf16 %v278_v32, %v277_v31  ;;  %v230_v35 = vld [vmem:[%s1089_s27 + $0x28] sm:$0xff]  ;;  %v248_v40 = vld [vmem:[%s1089_s27 + $0xb8] sm:$0xff] }
  0x19   : > { %v261_v36 = vld [vmem:[%s1089_s27 + $0x120] sm:$0xff]  ;;  %v262_v37 = vld [vmem:[%s1089_s27 + $0x128] sm:$0xff]  ;;  %v930_v38 = vpack.c.bf16 %v230_v35, %v229_v33  ;;  %v279_v41 = vld [vmem:[%s1089_s27 + $0x1b0] sm:$0xff]  ;;  %v932_v43 = vpack.c.bf16 %v248_v40, %v247_v39 }
  0x1a   : > { %927 = vmatpush3.bf16.msra.mxu0 %v926_v25  ;;  %v962_v42 = vpack.c.bf16 %v262_v37, %v261_v36  ;;  %v280_v44 = vld [vmem:[%s1089_s27 + $0x1b8] sm:$0xff]  ;;  %v231_v45 = vld [vmem:[%s1089_s27 + $0x30] sm:$0xff]  ;;  %v249_v50 = vld [vmem:[%s1089_s27 + $0xc0] sm:$0xff] }
  0x1b   : > { %959 = vmatpush3.bf16.msra.mxu1 %v958_v29  ;;  %929 = vmatprep.subr.bf16.mxu0 %v928_v30  ;;  %v232_v46 = vld [vmem:[%s1089_s27 + $0x38] sm:$0xff]  ;;  %v964_v47 = vpack.c.bf16 %v280_v44, %v279_v41  ;;  %v263_v48 = vld [vmem:[%s1089_s27 + $0x130] sm:$0xff]  ;;  %v250_v51 = vld [vmem:[%s1089_s27 + $0xc8] sm:$0xff] }
  0x1c   : > { %961 = vmatprep.subr.bf16.mxu1 %v960_v34  ;;  %v264_v49 = vld [vmem:[%s1089_s27 + $0x138] sm:$0xff]  ;;  %v281_v52 = vld [vmem:[%s1089_s27 + $0x1c0] sm:$0xff]  ;;  %v282_v53 = vld [vmem:[%s1089_s27 + $0x1c8] sm:$0xff]  ;;  %v934_v54 = vpack.c.bf16 %v232_v46, %v231_v45  ;;  %v936_v56 = vpack.c.bf16 %v250_v51, %v249_v50 }
  0x1d   : > { %v966_v55 = vpack.c.bf16 %v264_v49, %v263_v48  ;;  %v233_v57 = vld [vmem:[%s1089_s27 + $0x40] sm:$0xff]  ;;  %v234_v58 = vld [vmem:[%s1089_s27 + $0x48] sm:$0xff]  ;;  %v968_v60 = vpack.c.bf16 %v282_v53, %v281_v52  ;;  %v251_v62 = vld [vmem:[%s1089_s27 + $0xd0] sm:$0xff] }
  0x1e   : > { %931 = vmatpush3.bf16.msra.mxu0 %v930_v38  ;;  %v265_v59 = vld [vmem:[%s1089_s27 + $0x140] sm:$0xff]  ;;  %v266_v61 = vld [vmem:[%s1089_s27 + $0x148] sm:$0xff]  ;;  %v252_v63 = vld [vmem:[%s1089_s27 + $0xd8] sm:$0xff]  ;;  %v938_v2 = vpack.c.bf16 %v234_v58, %v233_v57 }
  0x1f   : > { %963 = vmatpush3.bf16.msra.mxu1 %v962_v42  ;;  %933 = vmatprep.subr.bf16.mxu0 %v932_v43  ;;  %v283_v0 = vld [vmem:[%s1089_s27 + $0x1d0] sm:$0xff]  ;;  %v284_v1 = vld [vmem:[%s1089_s27 + $0x1d8] sm:$0xff]  ;;  %v970_v3 = vpack.c.bf16 %v266_v61, %v265_v59  ;;  %v940_v4 = vpack.c.bf16 %v252_v63, %v251_v62  ;;  %v253_v10 = vld [vmem:[%s1089_s27 + $0xe0] sm:$0xff] }
  0x20   : > { %965 = vmatprep.subr.bf16.mxu1 %v964_v47  ;;  %v235_v5 = vld [vmem:[%s1089_s27 + $0x50] sm:$0xff]  ;;  %v236_v6 = vld [vmem:[%s1089_s27 + $0x58] sm:$0xff]  ;;  %v972_v8 = vpack.c.bf16 %v284_v1, %v283_v0  ;;  %v254_v11 = vld [vmem:[%s1089_s27 + $0xe8] sm:$0xff] }
  0x21   : > { %v267_v7 = vld [vmem:[%s1089_s27 + $0x150] sm:$0xff]  ;;  %v268_v9 = vld [vmem:[%s1089_s27 + $0x158] sm:$0xff]  ;;  %v285_v12 = vld [vmem:[%s1089_s27 + $0x1e0] sm:$0xff]  ;;  %v942_v14 = vpack.c.bf16 %v236_v6, %v235_v5  ;;  %v944_v16 = vpack.c.bf16 %v254_v11, %v253_v10 }
  0x22   : > { %935 = vmatpush3.bf16.msra.mxu0 %v934_v54  ;;  %v286_v13 = vld [vmem:[%s1089_s27 + $0x1e8] sm:$0xff]  ;;  %v974_v15 = vpack.c.bf16 %v268_v9, %v267_v7  ;;  %v237_v17 = vld [vmem:[%s1089_s27 + $0x60] sm:$0xff]  ;;  %v255_v22 = vld [vmem:[%s1089_s27 + $0xf0] sm:$0xff] }
  0x23   : > { %967 = vmatpush3.bf16.msra.mxu1 %v966_v55  ;;  %937 = vmatprep.subr.bf16.mxu0 %v936_v56  ;;  %v238_v18 = vld [vmem:[%s1089_s27 + $0x68] sm:$0xff]  ;;  %v269_v19 = vld [vmem:[%s1089_s27 + $0x160] sm:$0xff]  ;;  %v976_v20 = vpack.c.bf16 %v286_v13, %v285_v12  ;;  %v256_v23 = vld [vmem:[%s1089_s27 + $0xf8] sm:$0xff] }
  0x24   : > { %969 = vmatprep.subr.bf16.mxu1 %v968_v60  ;;  %v270_v21 = vld [vmem:[%s1089_s27 + $0x168] sm:$0xff]  ;;  %v287_v24 = vld [vmem:[%s1089_s27 + $0x1f0] sm:$0xff]  ;;  %v288_v25 = vld [vmem:[%s1089_s27 + $0x1f8] sm:$0xff]  ;;  %v946_v26 = vpack.c.bf16 %v238_v18, %v237_v17  ;;  %v948_v30 = vpack.c.bf16 %v256_v23, %v255_v22 }
  0x25   : > { %v318_v27 = vld [vmem:[%s1302_s2 + $0x8] sm:$0xff]  ;;  %v319_v28 = vld [vmem:[%s1302_s2 + $0x10] sm:$0xff]  ;;  %v978_v29 = vpack.c.bf16 %v270_v21, %v269_v19  ;;  %v240_v32 = vld [vmem:[%s1089_s27 + $0x78] sm:$0xff]  ;;  %v980_v34 = vpack.c.bf16 %v288_v25, %v287_v24 }
  0x26   : > { %939 = vmatpush3.bf16.msra.mxu0 %v938_v2  ;;  %v239_v31 = vld [vmem:[%s1089_s27 + $0x70] sm:$0xff]  ;;  %v272_v35 = vld [vmem:[%s1089_s27 + $0x178] sm:$0xff]  ;;  %v289_v36 = vld [vmem:[%s1089_s27 + $0x200] sm:$0xff]  ;;  %328 = vperm.xlu0 %1025, %v318_v27  }
  0x27   : > { %971 = vmatpush3.bf16.msra.mxu1 %v970_v3  ;;  %941 = vmatprep.subr.bf16.mxu0 %v940_v4  ;;  %v271_v33 = vld [vmem:[%s1089_s27 + $0x170] sm:$0xff]  ;;  %v290_v37 = vld [vmem:[%s1089_s27 + $0x208] sm:$0xff]  ;;  %v950_v38 = vpack.c.bf16 %v240_v32, %v239_v31  ;;  %v320_v39 = vld [vmem:[%s1302_s2 + $0x18] sm:$0xff] }
  0x28   : > { %973 = vmatprep.subr.bf16.mxu1 %v972_v8  ;;  %333 = vperm.xlu1 %1026, %v319_v28   ;;  %v982_v40 = vpack.c.bf16 %v272_v35, %v271_v33  ;;  %v984_v41 = vpack.c.bf16 %v290_v37, %v289_v36  ;;  %v291_v42 = vld [vmem:[%s1089_s27 + $0x210] sm:$0xff]  ;;  %v292_v43 = vld [vmem:[%s1089_s27 + $0x218] sm:$0xff]  ;;  %v297_v44 = vld [vmem:[%s1301_s1] sm:$0xff] }
  0x29   : > { %v299_v45 = vld [vmem:[%s1301_s1 + $0x10] sm:$0xff]  ;;  %v988_v47 = vpack.c.bf16 %v292_v43, %v291_v42  ;;  %v305_v48 = vld [vmem:[%s1301_s1 + $0x40] sm:$0xff]  ;;  %v294_v50 = vld [vmem:[%s1089_s27 + $0x228] sm:$0xff] }
  0x2a   : > { %943 = vmatpush3.bf16.msra.mxu0 %v942_v14  ;;  %v303_v46 = vld [vmem:[%s1301_s1 + $0x30] sm:$0xff]  ;;  %v293_v49 = vld [vmem:[%s1089_s27 + $0x220] sm:$0xff]  ;;  %v302_v51 = vld [vmem:[%s1301_s1 + $0x28] sm:$0xff] }
  0x2b   : > { %975 = vmatpush3.bf16.msra.mxu1 %v974_v15  ;;  %945 = vmatprep.subr.bf16.mxu0 %v944_v16  ;;  %v304_v52 = vld [vmem:[%s1301_s1 + $0x38] sm:$0xff]  ;;  %v992_v54 = vpack.c.bf16 %v294_v50, %v293_v49  ;;  %v310_v55 = vld [vmem:[%s1301_s1 + $0x68] sm:$0xff]  ;;  %v295_v56 = vld [vmem:[%s1089_s27 + $0x230] sm:$0xff] }
  0x2c   : > { %977 = vmatprep.subr.bf16.mxu1 %v976_v20  ;;  %338 = vperm.xlu1 %1026, %v320_v39   ;;  %v308_v53 = vld [vmem:[%s1301_s1 + $0x58] sm:$0xff]  ;;  %v307_v58 = vld [vmem:[%s1301_s1 + $0x50] sm:$0xff]  ;;  %v309_v59 = vld [vmem:[%s1301_s1 + $0x60] sm:$0xff] }
  0x2d   : > { %v296_v57 = vld [vmem:[%s1089_s27 + $0x238] sm:$0xff]  ;;  %v313_v60 = vld [vmem:[%s1301_s1 + $0x80] sm:$0xff]  ;;  %v315_v62 = vld [vmem:[%s1301_s1 + $0x90] sm:$0xff] }
  0x2e   : > { %947 = vmatpush3.bf16.msra.mxu0 %v946_v26  ;;  %v996_v61 = vpack.c.bf16 %v296_v57, %v295_v56  ;;  %v312_v63 = vld [vmem:[%s1301_s1 + $0x78] sm:$0xff]  ;;  %v314_v0 = vld [vmem:[%s1301_s1 + $0x88] sm:$0xff]  ;;  %v301_v1 = vld [vmem:[%s1301_s1 + $0x20] sm:$0xff] }
  0x2f   : > { %979 = vmatpush3.bf16.msra.mxu1 %v978_v29  ;;  %949 = vmatprep.subr.bf16.mxu0 %v948_v30  ;;  %v311_v2 = vld [vmem:[%s1301_s1 + $0x70] sm:$0xff]  ;;  %v306_v3 = vld [vmem:[%s1301_s1 + $0x48] sm:$0xff]  ;;  %v316_v4 = vld [vmem:[%s1301_s1 + $0x98] sm:$0xff] }
  0x30   : > { %981 = vmatprep.subr.bf16.mxu1 %v980_v34 }
  0x32   : > { %951 = vmatpush3.bf16.msra.mxu0 %v950_v38 }
  0x33   : > { %983 = vmatpush3.bf16.msra.mxu1 %v982_v40  ;;  %985 = vmatprep.subr.bf16.mxu0 %v984_v41 }
  0x34   : > { %1000 = vmatprep.subr.bf16.mxu1 %v984_v41 }
  0x35   : > { %419 = vmatmul.mubr.f32.vlgmr.msra.gmra.mrb[0].mxu0 %v297_v44 }
  0x36   : > { %504 = vmatmul.mubr.f32.vlgmr.msra.gmra.mrb[0].mxu1 %v299_v45  ;;  %987 = vmatpush3.bf16.msra.mxu0 %v984_v41 }
  0x37   : > { %1004 = vmatpush3.bf16.msra.mxu1 %v984_v41  ;;  %423 = vmatprep.mubr.f32.mxu0 %v303_v46 }
  0x38   : > { %508 = vmatprep.mubr.f32.mxu1 %v305_v48  ;;  %989 = vmatprep.subr.bf16.mxu0 %v988_v47 }
  0x39   : > { %424 = vmatmul.mubr.f32.gmra.mrb[2].mxu0 %v302_v51  ;;  %1001 = vmatprep.subr.bf16.mxu1 %v988_v47 }
  0x3a   : > { %509 = vmatmul.mubr.f32.gmra.mrb[2].mxu1 %v304_v52  ;;  %991 = vmatpush3.bf16.msra.mxu0 %v988_v47 }
  0x3b   : > { %1005 = vmatpush3.bf16.msra.mxu1 %v988_v47  ;;  %428 = vmatprep.mubr.f32.mxu0 %v308_v53 }
  0x3c   : > { %513 = vmatprep.mubr.f32.mxu1 %v310_v55  ;;  %993 = vmatprep.subr.bf16.mxu0 %v992_v54 }
  0x3d   : > { %429 = vmatmul.mubr.f32.gmra.mrb[4].mxu0 %v307_v58  ;;  %1002 = vmatprep.subr.bf16.mxu1 %v992_v54 }
  0x3e   : > { %514 = vmatmul.mubr.f32.gmra.mrb[4].mxu1 %v309_v59  ;;  %995 = vmatpush3.bf16.msra.mxu0 %v992_v54 }
  0x3f   : > { %1006 = vmatpush3.bf16.msra.mxu1 %v992_v54  ;;  %433 = vmatprep.mubr.f32.mxu0 %v313_v60 }
  0x40   : > { %518 = vmatprep.mubr.f32.mxu1 %v315_v62  ;;  %997 = vmatprep.subr.bf16.mxu0 %v996_v61 }
  0x41   : > { %434 = vmatmul.mubr.f32.gmra.mrb[6].mxu0 %v312_v63  ;;  %1003 = vmatprep.subr.bf16.mxu1 %v996_v61 }
  0x42   : > { %519 = vmatmul.mubr.f32.gmra.mrb[6].mxu1 %v314_v0  ;;  %999 = vmatpush3.bf16.msra.mxu0 %v996_v61 }
  0x43   : > { %1007 = vmatpush3.bf16.msra.mxu1 %v996_v61  ;;  %914 = vmatprep.mubr.msk.f32.mxu0 %vm341_vm0, %v301_v1 }
  0x44   : > { %917 = vmatprep.mubr.msk.f32.mxu1 %vm341_vm0, %v311_v2 }
  0x45   : > { %915 = vmatmul.mubr.msk.f32.vlgmr.msra.gmra.mrb[8].mxu0 %vm341_vm0, %v306_v3  ;;  %v665_v3 = vld [vmem:[%s1303_s3 + $0x8] sm:$0xff] }
  0x46   : > { %918 = vmatmul.mubr.msk.f32.vlgmr.msra.gmra.mrb[8].mxu1 %vm341_vm0, %v316_v4  ;;  %v664_v4 = vld [vmem:[%s1303_s3] sm:$0xff] }
  0x87   : > { %v324_v5 = vpop.permute.xlu0 %323 }
  0xa5   : > { %v329_v14 = vpop.permute.xlu0 %328 }
  0xa7   : > { %v334_v23 = vpop.permute.xlu1 %333 }
  0xab   : > { %v339_v37 = vpop.permute.xlu1 %338 }
 0x108   : > { %v830_v6 = vpop.f32.mrb[0].mxu0 }
 0x109   : > { %v831_v7 = vpop.f32.mrb[1].mxu0  ;;  %v874_v8 = vpop.f32.mrb[0].mxu1 }
 0x10a   : > { %v832_v9 = vadd.f32 %v831_v7, %v830_v6  ;;  %v875_v10 = vpop.f32.mrb[1].mxu1  ;;  %v666_v6 = vld [vmem:[%s1303_s3 + $0x10] sm:$0xff]  ;;  %v693_v7 = vld [vmem:[%s1304_s4 + $0x8] sm:$0xff] }
 0x10b   : > { %v876_v11 = vadd.f32 %v875_v10, %v874_v8  ;;  %v692_v8 = vld [vmem:[%s1304_s4] sm:$0xff]  ;;  %v694_v10 = vld [vmem:[%s1304_s4 + $0x10] sm:$0xff] }
 0x10c   : > { %v421_v12 = vadd.f32 %v832_v9, %v324_v5  ;;  %v833_v13 = vpop.f32.mrb[2].mxu0  ;;  %v667_v5 = vld [vmem:[%s1303_s3 + $0x18] sm:$0xff] }
 0x10d   : > { %v834_v15 = vpop.f32.mrb[3].mxu0  ;;  %v877_v16 = vpop.f32.mrb[2].mxu1  ;;  %v695_v9 = vld [vmem:[%s1304_s4 + $0x18] sm:$0xff] }
 0x10e   : > { %v835_v17 = vadd.f32 %v834_v15, %v833_v13  ;;  %v878_v18 = vpop.f32.mrb[3].mxu1  ;;  %v506_v19 = vadd.f32 %v876_v11, %v421_v12 }
 0x10f   : > { %v879_v20 = vadd.f32 %v878_v18, %v877_v16 }
 0x110   : > { %v426_v21 = vadd.f32 %v835_v17, %v329_v14  ;;  %v836_v22 = vpop.f32.mrb[4].mxu0 }
 0x111   : > { %v837_v24 = vpop.f32.mrb[5].mxu0  ;;  %v880_v25 = vpop.f32.mrb[4].mxu1 }
 0x112   : > { %v838_v26 = vadd.f32 %v837_v24, %v836_v22  ;;  %v881_v27 = vpop.f32.mrb[5].mxu1  ;;  %v511_v28 = vadd.f32 %v879_v20, %v426_v21 }
 0x113   : > { %v882_v29 = vadd.f32 %v881_v27, %v880_v25 }
 0x114   : > { %v431_v30 = vadd.f32 %v838_v26, %v334_v23  ;;  %v839_v31 = vpop.f32.mrb[6].mxu0 }
 0x115   : > { %v840_v32 = vpop.f32.mrb[7].mxu0  ;;  %v883_v33 = vpop.f32.mrb[6].mxu1 }
 0x116   : > { %v841_v34 = vadd.f32 %v840_v32, %v839_v31  ;;  %v884_v35 = vpop.f32.mrb[7].mxu1  ;;  %v516_v36 = vadd.f32 %v882_v29, %v431_v30 }
 0x117   : > { %v885_v38 = vadd.f32 %v884_v35, %v883_v33 }
 0x118   : > { %v436_v39 = vadd.f32 %v841_v34, %v339_v37  ;;  %v916_v40 = vpop.f32.mrb[8].mxu0 }
 0x119   : > { %v1233_v41 = vadd.f32 %v916_v40, %v511_v28  ;;  %v919_v42 = vpop.f32.mrb[8].mxu1  ;;  %v590_v43 = vpop.f32.mrb[9].mxu0 }
 0x11a   : > { %v521_v44 = vadd.f32 %v885_v38, %v436_v39  ;;  %v1235_v45 = vadd.f32 %v590_v43, %v506_v19  ;;  %v600_v46 = vpop.f32.mrb[9].mxu1 }
 0x11b   : > { %v610_v47 = vsel %vm341_vm0, %v1233_v41, 0.0  ;;  %v626_v48 = vmul.f32 %v1233_v41, %v1233_v41  ;;  %v1241_v49 = vadd.f32 %v600_v46, %v516_v36 }
 0x11c   : > { %v1243_v50 = vadd.f32 %v919_v42, %v521_v44  ;;  %v609_v51 = vsel %vm341_vm0, %v1235_v45, 0.0  ;;  %v625_v52 = vmul.f32 %v1235_v45, %v1235_v45 }
 0x11d   : > { %v627_v53 = vmul.f32 %v1241_v49, %v1241_v49  ;;  %v611_v54 = vadd.f32 %v610_v47, %v609_v51  ;;  %v630_v55 = vsel %vm341_vm0, %v626_v48, 0.0  ;;  %v612_v56 = vsel %vm341_vm0, %v1241_v49, 0.0 }
 0x11e   : > { %v628_v57 = vmul.f32 %v1243_v50, %v1243_v50  ;;  %v629_v58 = vsel %vm341_vm0, %v625_v52, 0.0  ;;  %v614_v61 = vsel %vm341_vm0, %v1243_v50, 0.0 }
 0x11f   : > { %v613_v59 = vadd.f32 %v612_v56, %v611_v54  ;;  %v631_v60 = vadd.f32 %v630_v55, %v629_v58  ;;  %v632_v62 = vsel %vm341_vm0, %v627_v53, 0.0 }
 0x120   : > { %v634_v1 = vsel %vm341_vm0, %v628_v57, 0.0 }
 0x121   : > { %v615_v63 = vadd.f32 %v614_v61, %v613_v59  ;;  %v633_v0 = vadd.f32 %v632_v62, %v631_v60 }
 0x123   : > { %616 = vadd.xlane.f32.xlu0 %v615_v63  ;;  %v635_v2 = vadd.f32 %v634_v1, %v633_v0 }
 0x125   : > { %636 = vadd.xlane.f32.xlu1 %v635_v2 }
 0x136   : > { %675 = vperm.xlu1 %1026, %v665_v3  }
 0x139   : > { %670 = vperm.xlu0 %1025, %v664_v4  }
 0x13a   : > { %685 = vperm.xlu1 %1026, %v667_v5  }
 0x13d   : > { %680 = vperm.xlu0 %1025, %v666_v6  }
 0x13e   : > { %703 = vperm.xlu1 %1026, %v693_v7  }
 0x141   : > { %698 = vperm.xlu0 %1025, %v692_v8  }
 0x142   : > { %713 = vperm.xlu1 %1026, %v695_v9  }
 0x145   : > { %708 = vperm.xlu0 %1025, %v694_v10  }
 0x1b0   : > { %v617_v11 = vpop.xlane.xlu0 %616 }
 0x1b1   : > { %v618_v12 = vrot.slane %v617_v11, 4 }
 0x1b2   : > { %v637_v13 = vpop.xlane.xlu1 %636 }
 0x1b3   : > { %v619_v14 = vadd.f32 %v618_v12, %v617_v11  ;;  %v638_v15 = vrot.slane %v637_v13, 4 }
 0x1b5   : > { %v620_v16 = vrot.slane %v619_v14, 2  ;;  %v639_v17 = vadd.f32 %v638_v15, %v637_v13 }
 0x1b6   : > { %v676_v27 = vpop.permute.xlu1 %675 }
 0x1b7   : > { %v640_v18 = vrot.slane %v639_v17, 2  ;;  %v621_v19 = vadd.f32 %v620_v16, %v619_v14 }
 0x1b8   : > { %v671_v28 = vpop.permute.xlu0 %670 }
 0x1b9   : > { %v622_v20 = vrot.slane %v621_v19, 1  ;;  %v641_v21 = vadd.f32 %v640_v18, %v639_v17 }
 0x1ba   : > { %v686_v29 = vpop.permute.xlu1 %685 }
 0x1bb   : > { %v623_v22 = vadd.f32 %v622_v20, %v621_v19  ;;  %v642_v23 = vrot.slane %v641_v21, 1 }
 0x1bc   : > { %v681_v30 = vpop.permute.xlu0 %680 }
 0x1bd   : > { %1009 = vpush %v623_v22  ;;  %v643_v24 = vadd.f32 %v642_v23, %v641_v21 }
 0x1be   : > { %v704_v32 = vpop.permute.xlu1 %703 }
 0x1bf   : > { %1011 = vpush %v643_v24 }
 0x1c0   : > { %v699_v33 = vpop.permute.xlu0 %698 }
 0x1c2   : > { %v714_v51 = vpop.permute.xlu1 %713 }
 0x1c4   : > { %v709_v52 = vpop.permute.xlu0 %708 }
 0x1ee   : > { %s1010_s17 = spop %1009 }
 0x1ef   : > { %s645_s20 = smul.f32 0.00048828125, %s1010_s17 }
 0x1f0   : > { %s1012_s21 = spop %1011 }
 0x1f1   : > { %s647_s22 = smul.f32 %s645_s20, %s645_s20  ;;  %v650_v31 = vstv %s645_s20 }
 0x1f2   : > { %s646_s23 = smul.f32 0.00048828125, %s1012_s21  ;;  %v651_v34 = vsub.f32 %v1235_v45, %v650_v31  ;;  %v652_v35 = vsub.f32 %v1233_v41, %v650_v31  ;;  %v653_v36 = vsub.f32 %v1241_v49, %v650_v31  ;;  %v654_v37 = vsub.f32 %v1243_v50, %v650_v31 }
 0x1f4   : > { %s648_s24 = ssub.f32 %s646_s23, %s647_s22 }
 0x1f6   : > { %s649_s26 = smax.f32 %s1038_s25, %s648_s24 }
 0x1f7   : > { %s655_s28 = sadd.f32 1e-05, %s649_s26 }
 0x1f9   : > { %v656_v25 = vstv %s655_s28 }
 0x1fa   : > { %1027 = vrsqrt.f32 %v656_v25 }
 0x204   : > { %v1028_v26 = vpop.eup %1027 }
 0x205   : > { %1013 = vpush %v1028_v26 }
 0x236   : > { %s1014_s29 = spop %1013 }
 0x237   : > { %v659_v38 = vstv %s1014_s29 }
 0x238   : > { %v660_v39 = vmul.f32 %v659_v38, %v651_v34  ;;  %v661_v40 = vmul.f32 %v659_v38, %v652_v35  ;;  %v662_v42 = vmul.f32 %v659_v38, %v653_v36  ;;  %v663_v43 = vmul.f32 %v659_v38, %v654_v37 }
 0x23a   : > { %v688_v44 = vmul.f32 %v671_v28, %v660_v39  ;;  %v689_v46 = vmul.f32 %v676_v27, %v661_v40  ;;  %v690_v47 = vmul.f32 %v681_v30, %v662_v42  ;;  %v691_v48 = vmul.f32 %v686_v29, %v663_v43 }
 0x23c   : > { %v716_v45 = vadd.f32 %v699_v33, %v688_v44  ;;  %v717_v53 = vadd.f32 %v704_v32, %v689_v46  ;;  %v718_v41 = vadd.f32 %v709_v52, %v690_v47  ;;  %v719_v54 = vadd.f32 %v714_v51, %v691_v48 }
 0x23e   : > { %v720_v49 = vmax.f32 %v716_v45, 0.0  ;;  %v721_v50 = vmax.f32 %v717_v53, 0.0  ;;  %v722_v55 = vmax.f32 %v718_v41, 0.0  ;;  %v723_v56 = vmax.f32 %v719_v54, 0.0 }
 0x240   : > { %724 = vst.msk [vmem:[%s224_s8] sm:$0xff] %vm341_vm0, %v720_v49  ;;  %725 = vst.msk [vmem:[%s224_s8 + $0x8] sm:$0xff] %vm341_vm0, %v721_v50 }
 0x241   : > { %726 = vst.msk [vmem:[%s224_s8 + $0x10] sm:$0xff] %vm341_vm0, %v722_v55  ;;  %727 = vst.msk [vmem:[%s224_s8 + $0x18] sm:$0xff] %vm341_vm0, %v723_v56 }
 0x242 PF: > { %s15_s18 = sadd.s32 1, %s1035_s18  }
 0x243   : > { %p12_p4 = scmp.ge.s32.totalorder %s15_s18, 4  }
 0x245   :  { %14 = sbr.rel (!%p12_p4) target bundleno = 1 (0x1), region = 70 }

// kernel: posterior_unet_forward.17
= control target key start
LH: loop header
LB: loop body
LE: loop exit
PB: predicated region body
PF: predicated region fallthrough
CT: control target
= control target key end

     0   :  { %s1290_s24 = smov 0   ;;  %s1607_s0 = inlined_call_operand.vmem [shape: f32[2,576,256], index: 0, kind: input, shape index: {}]   ;;  %s1608_s1 = inlined_call_operand.vmem [shape: f32[32,576], index: 1, kind: input, shape index: {}]   ;;  %s1609_s2 = inlined_call_operand.vmem [shape: f32[32,1], index: 2, kind: input, shape index: {}]   ;;  %s1610_s3 = inlined_call_operand.vmem [shape: f32[32,1], index: 3, kind: input, shape index: {}]   ;;  %s1611_s4 = inlined_call_operand.vmem [shape: f32[32,1], index: 4, kind: input, shape index: {}]   ;;  %s1612_s5 = inlined_call_operand.vmem [shape: f32[8,32], index: 5, kind: input, shape index: {}]   ;;  %s1613_s6 = inlined_call_operand.vmem [shape: f32[8,1], index: 6, kind: input, shape index: {}]   ;;  %s1614_s7 = inlined_call_operand.vmem [shape: f32[2,8,256], index: 7, kind: output, shape index: {}]  }
   0x1 LB: > { %s1025_s25 = sadd.s32 4294967295, %s1245_s24   ;;  %p1029_p0 = scmp.ge.s32.totalorder %s1245_s24, 1  ;;  %s1245_s24 = sphi %s1290_s24, %s17_s24  }
   0x2   : > { %p237_p1 = scmp.lt.s32.totalorder %s1245_s24, 3 }
   0x4   : > { %p238_p2 = pnand %p1029_p0, %p237_p1 }
   0x5   : > { %p269_p3 = scmp.lt.s32.totalorder (!%p238_p2), %s1025_s25, 1  ;;  %v426_v0 = vld [vmem:[%s1608_s1 + $0x18] sm:$0xff] (!%p238_p2)  ;;  %v424_v1 = vld [vmem:[%s1608_s1 + $0x8] sm:$0xff] (!%p238_p2)  ;;  %v1247_v2 = vmov (!%p238_p2), 0   ;;  %v443_v3 = vld [vmem:[%s1609_s2] sm:$0xff] (!%p238_p2)  ;;  %vm467_vm0 = vcmask (!%p238_p2), 523264  }
   0x6   : > { %241 = sbr.rel (%p238_p2) target bundleno = 841 (0x349), region = 48  ;;  %633 = vmatprep.mubr.f32.mxu0 (!%p238_p2), %v426_v0  ;;  %544 = vmatprep.mubr.f32.mxu1 (!%p238_p2), %v424_v1  ;;  %s1249_s17 = smov (!%p238_p2), 0.0   ;;  %vm893_vm1 = vcmask (!%p238_p2), 261120  }
   0x7   : > { %1235 = vset.pattern.permute.xlu0 (!%p238_p2), %v1247_v2  ;;  %1236 = vset.pattern.permute.xlu1 (!%p238_p2), %v1247_v2 }
   0x8   : > { %449 = vperm.xlu0 (!%p238_p2), %1235, %v443_v3  }
   0xd   : > { %s1616_s25 = smov (!%p269_p3, %s1025_s25), 1 }
   0xe   : > { %s1217_s30 = smul.u32 1152, %s1616_s25  ;;  %s1040_s22 = sshll.u32 %s1616_s25, 4 }
   0xf   : > { %s278_s27 = scalar_lea.vmem %s1614_s7, %s1040_s22 }
  0x10   : > { %s1310_s10 = scalar_lea.vmem %s1607_s0, %s1217_s30 }
  0x11   : > { %v344_v4 = vld [vmem:[%s1310_s10 + $0x208] sm:$0xff]  ;;  %v346_v5 = vld [vmem:[%s1310_s10 + $0x218] sm:$0xff]  ;;  %v343_v6 = vld [vmem:[%s1310_s10 + $0x200] sm:$0xff] }
  0x12   : > { %v1105_v7 = vpack.c.bf16 %v346_v5, %v344_v4  ;;  %v345_v8 = vld [vmem:[%s1310_s10 + $0x210] sm:$0xff]  ;;  %v348_v9 = vld [vmem:[%s1310_s10 + $0x228] sm:$0xff]  ;;  %v350_v10 = vld [vmem:[%s1310_s10 + $0x238] sm:$0xff] }
  0x13   : > { %v1107_v11 = vpack.c.bf16 %v345_v8, %v343_v6  ;;  %v1109_v12 = vpack.c.bf16 %v350_v10, %v348_v9  ;;  %v347_v13 = vld [vmem:[%s1310_s10 + $0x220] sm:$0xff]  ;;  %v349_v14 = vld [vmem:[%s1310_s10 + $0x230] sm:$0xff]  ;;  %v352_v15 = vld [vmem:[%s1310_s10 + $0x248] sm:$0xff] }
  0x14   : > { %1106 = vmatprep.subr.bf16.mxu0 %v1105_v7  ;;  %v354_v16 = vld [vmem:[%s1310_s10 + $0x258] sm:$0xff]  ;;  %v280_v17 = vld [vmem:[%s1310_s10 + $0x8] sm:$0xff]  ;;  %v1111_v19 = vpack.c.bf16 %v349_v14, %v347_v13  ;;  %v351_v21 = vld [vmem:[%s1310_s10 + $0x240] sm:$0xff] }
  0x15   : > { %v282_v18 = vld [vmem:[%s1310_s10 + $0x18] sm:$0xff]  ;;  %1108 = vmatpush1.bf16.msra.mxu0 %v1107_v11  ;;  %v279_v22 = vld [vmem:[%s1310_s10] sm:$0xff]  ;;  %v1113_v23 = vpack.c.bf16 %v354_v16, %v352_v15  ;;  %v353_v24 = vld [vmem:[%s1310_s10 + $0x250] sm:$0xff] }
  0x16   : > { %v1041_v20 = vpack.c.bf16 %v282_v18, %v280_v17  ;;  %1110 = vmatprep.subr.bf16.mxu0 %v1109_v12  ;;  %v281_v25 = vld [vmem:[%s1310_s10 + $0x10] sm:$0xff]  ;;  %v356_v26 = vld [vmem:[%s1310_s10 + $0x268] sm:$0xff]  ;;  %v358_v28 = vld [vmem:[%s1310_s10 + $0x278] sm:$0xff]  ;;  %v1115_v34 = vpack.c.bf16 %v353_v24, %v351_v21 }
  0x17   : > { %v1043_v27 = vpack.c.bf16 %v281_v25, %v279_v22  ;;  %v284_v29 = vld [vmem:[%s1310_s10 + $0x28] sm:$0xff]  ;;  %v286_v30 = vld [vmem:[%s1310_s10 + $0x38] sm:$0xff]  ;;  %v283_v32 = vld [vmem:[%s1310_s10 + $0x20] sm:$0xff]  ;;  %v1117_v38 = vpack.c.bf16 %v358_v28, %v356_v26 }
  0x18   : > { %1042 = vmatprep.subr.bf16.mxu1 %v1041_v20  ;;  %v1045_v31 = vpack.c.bf16 %v286_v30, %v284_v29  ;;  %v285_v33 = vld [vmem:[%s1310_s10 + $0x30] sm:$0xff]  ;;  %v355_v35 = vld [vmem:[%s1310_s10 + $0x260] sm:$0xff]  ;;  %v288_v37 = vld [vmem:[%s1310_s10 + $0x48] sm:$0xff] }
  0x19   : > { %1112 = vmatpush1.bf16.msra.mxu0 %v1111_v19  ;;  %1044 = vmatpush1.bf16.msra.mxu1 %v1043_v27  ;;  %v1047_v36 = vpack.c.bf16 %v285_v33, %v283_v32  ;;  %v357_v39 = vld [vmem:[%s1310_s10 + $0x270] sm:$0xff]  ;;  %v360_v40 = vld [vmem:[%s1310_s10 + $0x288] sm:$0xff]  ;;  %v290_v41 = vld [vmem:[%s1310_s10 + $0x58] sm:$0xff] }
  0x1a   : > { %1114 = vmatprep.subr.bf16.mxu0 %v1113_v23  ;;  %1046 = vmatprep.subr.bf16.mxu1 %v1045_v31  ;;  %v362_v42 = vld [vmem:[%s1310_s10 + $0x298] sm:$0xff]  ;;  %v1049_v43 = vpack.c.bf16 %v290_v41, %v288_v37  ;;  %v287_v44 = vld [vmem:[%s1310_s10 + $0x40] sm:$0xff]  ;;  %v289_v45 = vld [vmem:[%s1310_s10 + $0x50] sm:$0xff]  ;;  %v1119_v48 = vpack.c.bf16 %v357_v39, %v355_v35 }
  0x1b   : > { %v292_v46 = vld [vmem:[%s1310_s10 + $0x68] sm:$0xff]  ;;  %v294_v47 = vld [vmem:[%s1310_s10 + $0x78] sm:$0xff]  ;;  %v359_v49 = vld [vmem:[%s1310_s10 + $0x280] sm:$0xff]  ;;  %v1051_v51 = vpack.c.bf16 %v289_v45, %v287_v44  ;;  %v1121_v52 = vpack.c.bf16 %v362_v42, %v360_v40 }
  0x1c   : > { %v361_v50 = vld [vmem:[%s1310_s10 + $0x290] sm:$0xff]  ;;  %v364_v53 = vld [vmem:[%s1310_s10 + $0x2a8] sm:$0xff]  ;;  %v1053_v54 = vpack.c.bf16 %v294_v47, %v292_v46  ;;  %v291_v55 = vld [vmem:[%s1310_s10 + $0x60] sm:$0xff] }
  0x1d   : > { %1116 = vmatpush1.bf16.msra.mxu0 %v1115_v34  ;;  %1048 = vmatpush1.bf16.msra.mxu1 %v1047_v36  ;;  %v293_v56 = vld [vmem:[%s1310_s10 + $0x70] sm:$0xff]  ;;  %v366_v57 = vld [vmem:[%s1310_s10 + $0x2b8] sm:$0xff]  ;;  %v296_v58 = vld [vmem:[%s1310_s10 + $0x88] sm:$0xff]  ;;  %v1123_v60 = vpack.c.bf16 %v361_v50, %v359_v49 }
  0x1e   : > { %1118 = vmatprep.subr.bf16.mxu0 %v1117_v38  ;;  %1050 = vmatprep.subr.bf16.mxu1 %v1049_v43  ;;  %v298_v59 = vld [vmem:[%s1310_s10 + $0x98] sm:$0xff]  ;;  %v363_v61 = vld [vmem:[%s1310_s10 + $0x2a0] sm:$0xff]  ;;  %v365_v62 = vld [vmem:[%s1310_s10 + $0x2b0] sm:$0xff]  ;;  %v1055_v63 = vpack.c.bf16 %v293_v56, %v291_v55  ;;  %v1125_v0 = vpack.c.bf16 %v366_v57, %v364_v53 }
  0x1f   : > { %v368_v1 = vld [vmem:[%s1310_s10 + $0x2c8] sm:$0xff]  ;;  %v1057_v2 = vpack.c.bf16 %v298_v59, %v296_v58  ;;  %v295_v3 = vld [vmem:[%s1310_s10 + $0x80] sm:$0xff]  ;;  %v297_v4 = vld [vmem:[%s1310_s10 + $0x90] sm:$0xff]  ;;  %v1127_v8 = vpack.c.bf16 %v365_v62, %v363_v61 }
  0x20   : > { %v370_v5 = vld [vmem:[%s1310_s10 + $0x2d8] sm:$0xff]  ;;  %v300_v6 = vld [vmem:[%s1310_s10 + $0xa8] sm:$0xff]  ;;  %v367_v9 = vld [vmem:[%s1310_s10 + $0x2c0] sm:$0xff]  ;;  %v1059_v11 = vpack.c.bf16 %v297_v4, %v295_v3 }
  0x21   : > { %1120 = vmatpush1.bf16.msra.mxu0 %v1119_v48  ;;  %1052 = vmatpush1.bf16.msra.mxu1 %v1051_v51  ;;  %v302_v7 = vld [vmem:[%s1310_s10 + $0xb8] sm:$0xff]  ;;  %v369_v10 = vld [vmem:[%s1310_s10 + $0x2d0] sm:$0xff]  ;;  %v1129_v12 = vpack.c.bf16 %v370_v5, %v368_v1  ;;  %v372_v13 = vld [vmem:[%s1310_s10 + $0x2e8] sm:$0xff] }
  0x22   : > { %1122 = vmatprep.subr.bf16.mxu0 %v1121_v52  ;;  %1054 = vmatprep.subr.bf16.mxu1 %v1053_v54  ;;  %v1061_v14 = vpack.c.bf16 %v302_v7, %v300_v6  ;;  %v299_v15 = vld [vmem:[%s1310_s10 + $0xa0] sm:$0xff]  ;;  %v301_v16 = vld [vmem:[%s1310_s10 + $0xb0] sm:$0xff]  ;;  %v374_v17 = vld [vmem:[%s1310_s10 + $0x2f8] sm:$0xff]  ;;  %v1131_v20 = vpack.c.bf16 %v369_v10, %v367_v9 }
  0x23   : > { %v304_v18 = vld [vmem:[%s1310_s10 + $0xc8] sm:$0xff]  ;;  %v306_v19 = vld [vmem:[%s1310_s10 + $0xd8] sm:$0xff]  ;;  %v371_v21 = vld [vmem:[%s1310_s10 + $0x2e0] sm:$0xff]  ;;  %v1063_v23 = vpack.c.bf16 %v301_v16, %v299_v15  ;;  %v1133_v24 = vpack.c.bf16 %v374_v17, %v372_v13 }
  0x24   : > { %v373_v22 = vld [vmem:[%s1310_s10 + $0x2f0] sm:$0xff]  ;;  %v376_v25 = vld [vmem:[%s1310_s10 + $0x308] sm:$0xff]  ;;  %v1065_v26 = vpack.c.bf16 %v306_v19, %v304_v18  ;;  %v303_v27 = vld [vmem:[%s1310_s10 + $0xc0] sm:$0xff] }
  0x25   : > { %1124 = vmatpush1.bf16.msra.mxu0 %v1123_v60  ;;  %1056 = vmatpush1.bf16.msra.mxu1 %v1055_v63  ;;  %v305_v28 = vld [vmem:[%s1310_s10 + $0xd0] sm:$0xff]  ;;  %v378_v29 = vld [vmem:[%s1310_s10 + $0x318] sm:$0xff]  ;;  %v308_v30 = vld [vmem:[%s1310_s10 + $0xe8] sm:$0xff]  ;;  %v1135_v32 = vpack.c.bf16 %v373_v22, %v371_v21 }
  0x26   : > { %1126 = vmatprep.subr.bf16.mxu0 %v1125_v0  ;;  %1058 = vmatprep.subr.bf16.mxu1 %v1057_v2  ;;  %v310_v31 = vld [vmem:[%s1310_s10 + $0xf8] sm:$0xff]  ;;  %v375_v33 = vld [vmem:[%s1310_s10 + $0x300] sm:$0xff]  ;;  %v377_v34 = vld [vmem:[%s1310_s10 + $0x310] sm:$0xff]  ;;  %v1067_v35 = vpack.c.bf16 %v305_v28, %v303_v27  ;;  %v1137_v36 = vpack.c.bf16 %v378_v29, %v376_v25 }
  0x27   : > { %v380_v37 = vld [vmem:[%s1310_s10 + $0x328] sm:$0xff]  ;;  %v1069_v38 = vpack.c.bf16 %v310_v31, %v308_v30  ;;  %v307_v39 = vld [vmem:[%s1310_s10 + $0xe0] sm:$0xff]  ;;  %v309_v40 = vld [vmem:[%s1310_s10 + $0xf0] sm:$0xff]  ;;  %v1139_v44 = vpack.c.bf16 %v377_v34, %v375_v33 }
  0x28   : > { %v382_v41 = vld [vmem:[%s1310_s10 + $0x338] sm:$0xff]  ;;  %v312_v42 = vld [vmem:[%s1310_s10 + $0x108] sm:$0xff]  ;;  %v379_v45 = vld [vmem:[%s1310_s10 + $0x320] sm:$0xff]  ;;  %v1071_v47 = vpack.c.bf16 %v309_v40, %v307_v39 }
  0x29   : > { %1128 = vmatpush1.bf16.msra.mxu0 %v1127_v8  ;;  %1060 = vmatpush1.bf16.msra.mxu1 %v1059_v11  ;;  %v314_v43 = vld [vmem:[%s1310_s10 + $0x118] sm:$0xff]  ;;  %v381_v46 = vld [vmem:[%s1310_s10 + $0x330] sm:$0xff]  ;;  %v1141_v48 = vpack.c.bf16 %v382_v41, %v380_v37  ;;  %v384_v49 = vld [vmem:[%s1310_s10 + $0x348] sm:$0xff] }
  0x2a   : > { %1130 = vmatprep.subr.bf16.mxu0 %v1129_v12  ;;  %1062 = vmatprep.subr.bf16.mxu1 %v1061_v14  ;;  %v1073_v50 = vpack.c.bf16 %v314_v43, %v312_v42  ;;  %v311_v51 = vld [vmem:[%s1310_s10 + $0x100] sm:$0xff]  ;;  %v313_v52 = vld [vmem:[%s1310_s10 + $0x110] sm:$0xff]  ;;  %v386_v53 = vld [vmem:[%s1310_s10 + $0x358] sm:$0xff]  ;;  %v1143_v56 = vpack.c.bf16 %v381_v46, %v379_v45 }
  0x2b   : > { %v316_v54 = vld [vmem:[%s1310_s10 + $0x128] sm:$0xff]  ;;  %v318_v55 = vld [vmem:[%s1310_s10 + $0x138] sm:$0xff]  ;;  %v383_v57 = vld [vmem:[%s1310_s10 + $0x340] sm:$0xff]  ;;  %v1075_v59 = vpack.c.bf16 %v313_v52, %v311_v51  ;;  %v1145_v60 = vpack.c.bf16 %v386_v53, %v384_v49 }
  0x2c   : > { %v385_v58 = vld [vmem:[%s1310_s10 + $0x350] sm:$0xff]  ;;  %v388_v61 = vld [vmem:[%s1310_s10 + $0x368] sm:$0xff]  ;;  %v1077_v62 = vpack.c.bf16 %v318_v55, %v316_v54  ;;  %v315_v63 = vld [vmem:[%s1310_s10 + $0x120] sm:$0xff] }
  0x2d   : > { %1132 = vmatpush1.bf16.msra.mxu0 %v1131_v20  ;;  %1064 = vmatpush1.bf16.msra.mxu1 %v1063_v23  ;;  %v317_v0 = vld [vmem:[%s1310_s10 + $0x130] sm:$0xff]  ;;  %v390_v1 = vld [vmem:[%s1310_s10 + $0x378] sm:$0xff]  ;;  %v320_v2 = vld [vmem:[%s1310_s10 + $0x148] sm:$0xff]  ;;  %v1147_v4 = vpack.c.bf16 %v385_v58, %v383_v57 }
  0x2e   : > { %1134 = vmatprep.subr.bf16.mxu0 %v1133_v24  ;;  %1066 = vmatprep.subr.bf16.mxu1 %v1065_v26  ;;  %v322_v3 = vld [vmem:[%s1310_s10 + $0x158] sm:$0xff]  ;;  %v387_v5 = vld [vmem:[%s1310_s10 + $0x360] sm:$0xff]  ;;  %v389_v6 = vld [vmem:[%s1310_s10 + $0x370] sm:$0xff]  ;;  %v1079_v7 = vpack.c.bf16 %v317_v0, %v315_v63  ;;  %v1149_v8 = vpack.c.bf16 %v390_v1, %v388_v61 }
  0x2f   : > { %v392_v9 = vld [vmem:[%s1310_s10 + $0x388] sm:$0xff]  ;;  %v1081_v10 = vpack.c.bf16 %v322_v3, %v320_v2  ;;  %v319_v11 = vld [vmem:[%s1310_s10 + $0x140] sm:$0xff]  ;;  %v321_v12 = vld [vmem:[%s1310_s10 + $0x150] sm:$0xff]  ;;  %v1151_v16 = vpack.c.bf16 %v389_v6, %v387_v5 }
  0x30   : > { %v394_v13 = vld [vmem:[%s1310_s10 + $0x398] sm:$0xff]  ;;  %v324_v14 = vld [vmem:[%s1310_s10 + $0x168] sm:$0xff]  ;;  %v391_v17 = vld [vmem:[%s1310_s10 + $0x380] sm:$0xff]  ;;  %v1083_v19 = vpack.c.bf16 %v321_v12, %v319_v11 }
  0x31   : > { %1136 = vmatpush1.bf16.msra.mxu0 %v1135_v32  ;;  %1068 = vmatpush1.bf16.msra.mxu1 %v1067_v35  ;;  %v326_v15 = vld [vmem:[%s1310_s10 + $0x178] sm:$0xff]  ;;  %v393_v18 = vld [vmem:[%s1310_s10 + $0x390] sm:$0xff]  ;;  %v1153_v20 = vpack.c.bf16 %v394_v13, %v392_v9  ;;  %v396_v21 = vld [vmem:[%s1310_s10 + $0x3a8] sm:$0xff] }
  0x32   : > { %1138 = vmatprep.subr.bf16.mxu0 %v1137_v36  ;;  %1070 = vmatprep.subr.bf16.mxu1 %v1069_v38  ;;  %v1085_v22 = vpack.c.bf16 %v326_v15, %v324_v14  ;;  %v323_v23 = vld [vmem:[%s1310_s10 + $0x160] sm:$0xff]  ;;  %v325_v24 = vld [vmem:[%s1310_s10 + $0x170] sm:$0xff]  ;;  %v398_v25 = vld [vmem:[%s1310_s10 + $0x3b8] sm:$0xff]  ;;  %v1155_v29 = vpack.c.bf16 %v393_v18, %v391_v17 }
  0x33   : > { %v328_v26 = vld [vmem:[%s1310_s10 + $0x188] sm:$0xff]  ;;  %v330_v27 = vld [vmem:[%s1310_s10 + $0x198] sm:$0xff]  ;;  %v395_v28 = vld [vmem:[%s1310_s10 + $0x3a0] sm:$0xff]  ;;  %v1087_v31 = vpack.c.bf16 %v325_v24, %v323_v23  ;;  %v1157_v34 = vpack.c.bf16 %v398_v25, %v396_v21 }
  0x34   : > { %v397_v30 = vld [vmem:[%s1310_s10 + $0x3b0] sm:$0xff]  ;;  %v444_v32 = vld [vmem:[%s1609_s2 + $0x8] sm:$0xff]  ;;  %v1089_v36 = vpack.c.bf16 %v330_v27, %v328_v26  ;;  %v327_v37 = vld [vmem:[%s1310_s10 + $0x180] sm:$0xff] }
  0x35   : > { %1140 = vmatpush1.bf16.msra.mxu0 %v1139_v44  ;;  %1072 = vmatpush1.bf16.msra.mxu1 %v1071_v47  ;;  %v445_v33 = vld [vmem:[%s1609_s2 + $0x10] sm:$0xff]  ;;  %v400_v35 = vld [vmem:[%s1310_s10 + $0x3c8] sm:$0xff]  ;;  %v402_v39 = vld [vmem:[%s1310_s10 + $0x3d8] sm:$0xff]  ;;  %v1159_v43 = vpack.c.bf16 %v397_v30, %v395_v28 }
  0x36   : > { %1142 = vmatprep.subr.bf16.mxu0 %v1141_v48  ;;  %1074 = vmatprep.subr.bf16.mxu1 %v1073_v50  ;;  %v329_v38 = vld [vmem:[%s1310_s10 + $0x190] sm:$0xff]  ;;  %v332_v40 = vld [vmem:[%s1310_s10 + $0x1a8] sm:$0xff]  ;;  %v334_v41 = vld [vmem:[%s1310_s10 + $0x1b8] sm:$0xff]  ;;  %v1161_v47 = vpack.c.bf16 %v402_v39, %v400_v35 }
  0x37   : > { %454 = vperm.xlu0 %1235, %v444_v32   ;;  %459 = vperm.xlu1 %1236, %v445_v33   ;;  %v446_v42 = vld [vmem:[%s1609_s2 + $0x18] sm:$0xff]  ;;  %v399_v44 = vld [vmem:[%s1310_s10 + $0x3c0] sm:$0xff]  ;;  %v401_v45 = vld [vmem:[%s1310_s10 + $0x3d0] sm:$0xff]  ;;  %v1091_v46 = vpack.c.bf16 %v329_v38, %v327_v37  ;;  %v1093_v49 = vpack.c.bf16 %v334_v41, %v332_v40 }
  0x38   : > { %v404_v48 = vld [vmem:[%s1310_s10 + $0x3e8] sm:$0xff]  ;;  %v331_v50 = vld [vmem:[%s1310_s10 + $0x1a0] sm:$0xff]  ;;  %v333_v51 = vld [vmem:[%s1310_s10 + $0x1b0] sm:$0xff]  ;;  %v1163_v55 = vpack.c.bf16 %v401_v45, %v399_v44  ;;  %v1248_v44 = vmov 0.0  }
  0x39   : > { %1144 = vmatpush1.bf16.msra.mxu0 %v1143_v56  ;;  %1076 = vmatpush1.bf16.msra.mxu1 %v1075_v59  ;;  %v406_v52 = vld [vmem:[%s1310_s10 + $0x3f8] sm:$0xff]  ;;  %v336_v53 = vld [vmem:[%s1310_s10 + $0x1c8] sm:$0xff]  ;;  %v403_v56 = vld [vmem:[%s1310_s10 + $0x3e0] sm:$0xff]  ;;  %v1095_v58 = vpack.c.bf16 %v333_v51, %v331_v50 }
  0x3a   : > { %1146 = vmatprep.subr.bf16.mxu0 %v1145_v60  ;;  %1078 = vmatprep.subr.bf16.mxu1 %v1077_v62  ;;  %v338_v54 = vld [vmem:[%s1310_s10 + $0x1d8] sm:$0xff]  ;;  %v405_v57 = vld [vmem:[%s1310_s10 + $0x3f0] sm:$0xff]  ;;  %v1165_v59 = vpack.c.bf16 %v406_v52, %v404_v48  ;;  %v408_v60 = vld [vmem:[%s1310_s10 + $0x408] sm:$0xff] }
  0x3b   : > { %464 = vperm.xlu1 %1236, %v446_v42   ;;  %v1097_v61 = vpack.c.bf16 %v338_v54, %v336_v53  ;;  %v335_v62 = vld [vmem:[%s1310_s10 + $0x1c0] sm:$0xff]  ;;  %v337_v63 = vld [vmem:[%s1310_s10 + $0x1d0] sm:$0xff]  ;;  %v410_v0 = vld [vmem:[%s1310_s10 + $0x418] sm:$0xff]  ;;  %v1167_v3 = vpack.c.bf16 %v405_v57, %v403_v56 }
  0x3c   : > { %v340_v1 = vld [vmem:[%s1310_s10 + $0x1e8] sm:$0xff]  ;;  %v342_v2 = vld [vmem:[%s1310_s10 + $0x1f8] sm:$0xff]  ;;  %v1169_v5 = vpack.c.bf16 %v410_v0, %v408_v60  ;;  %v407_v6 = vld [vmem:[%s1310_s10 + $0x400] sm:$0xff] }
  0x3d   : > { %1148 = vmatpush1.bf16.msra.mxu0 %v1147_v4  ;;  %1080 = vmatpush1.bf16.msra.mxu1 %v1079_v7  ;;  %v1099_v4 = vpack.c.bf16 %v337_v63, %v335_v62  ;;  %v409_v7 = vld [vmem:[%s1310_s10 + $0x410] sm:$0xff]  ;;  %v1101_v9 = vpack.c.bf16 %v342_v2, %v340_v1  ;;  %v339_v11 = vld [vmem:[%s1310_s10 + $0x1e0] sm:$0xff]  ;;  %v418_v21 = vld [vmem:[%s1310_s10 + $0x458] sm:$0xff] }
  0x3e   : > { %1150 = vmatprep.subr.bf16.mxu0 %v1149_v8  ;;  %1082 = vmatprep.subr.bf16.mxu1 %v1081_v10  ;;  %v412_v8 = vld [vmem:[%s1310_s10 + $0x428] sm:$0xff]  ;;  %v414_v10 = vld [vmem:[%s1310_s10 + $0x438] sm:$0xff]  ;;  %v341_v12 = vld [vmem:[%s1310_s10 + $0x1f0] sm:$0xff]  ;;  %v1171_v14 = vpack.c.bf16 %v409_v7, %v407_v6 }
  0x3f   : > { %v425_v13 = vld [vmem:[%s1608_s1 + $0x10] sm:$0xff]  ;;  %v431_v15 = vld [vmem:[%s1608_s1 + $0x40] sm:$0xff]  ;;  %v436_v24 = vld [vmem:[%s1608_s1 + $0x68] sm:$0xff] }
  0x40   : > { %v411_v17 = vld [vmem:[%s1310_s10 + $0x420] sm:$0xff]  ;;  %v413_v18 = vld [vmem:[%s1310_s10 + $0x430] sm:$0xff]  ;;  %v422_v30 = vld [vmem:[%s1310_s10 + $0x478] sm:$0xff] }
  0x41   : > { %1152 = vmatpush1.bf16.msra.mxu0 %v1151_v16  ;;  %1084 = vmatpush1.bf16.msra.mxu1 %v1083_v19  ;;  %v1173_v16 = vpack.c.bf16 %v414_v10, %v412_v8  ;;  %v1103_v19 = vpack.c.bf16 %v341_v12, %v339_v11  ;;  %v1175_v23 = vpack.c.bf16 %v413_v18, %v411_v17  ;;  %v415_v26 = vld [vmem:[%s1310_s10 + $0x440] sm:$0xff]  ;;  %v417_v27 = vld [vmem:[%s1310_s10 + $0x450] sm:$0xff]  ;;  %v428_v38 = vld [vmem:[%s1608_s1 + $0x28] sm:$0xff] }
  0x42   : > { %1154 = vmatprep.subr.bf16.mxu0 %v1153_v20  ;;  %1086 = vmatprep.subr.bf16.mxu1 %v1085_v22  ;;  %v416_v20 = vld [vmem:[%s1310_s10 + $0x448] sm:$0xff]  ;;  %v430_v22 = vld [vmem:[%s1608_s1 + $0x38] sm:$0xff]  ;;  %v423_v28 = vld [vmem:[%s1608_s1] sm:$0xff]  ;;  %v1179_v33 = vpack.c.bf16 %v417_v27, %v415_v26 }
  0x43   : > { %v1177_v25 = vpack.c.bf16 %v418_v21, %v416_v20  ;;  %v435_v32 = vld [vmem:[%s1608_s1 + $0x60] sm:$0xff]  ;;  %v421_v37 = vld [vmem:[%s1310_s10 + $0x470] sm:$0xff]  ;;  %v434_v39 = vld [vmem:[%s1608_s1 + $0x58] sm:$0xff] }
  0x44   : > { %v440_v40 = vld [vmem:[%s1608_s1 + $0x88] sm:$0xff]  ;;  %v433_v42 = vld [vmem:[%s1608_s1 + $0x50] sm:$0xff]  ;;  %v427_v45 = vld [vmem:[%s1608_s1 + $0x20] sm:$0xff] }
  0x45   : > { %1156 = vmatpush1.bf16.msra.mxu0 %v1155_v29  ;;  %1088 = vmatpush1.bf16.msra.mxu1 %v1087_v31  ;;  %v420_v29 = vld [vmem:[%s1310_s10 + $0x468] sm:$0xff]  ;;  %v429_v31 = vld [vmem:[%s1608_s1 + $0x30] sm:$0xff] }
  0x46   : > { %1158 = vmatprep.subr.bf16.mxu0 %v1157_v34  ;;  %1090 = vmatprep.subr.bf16.mxu1 %v1089_v36  ;;  %v441_v34 = vld [vmem:[%s1608_s1 + $0x90] sm:$0xff]  ;;  %v1181_v35 = vpack.c.bf16 %v422_v30, %v420_v29  ;;  %v419_v36 = vld [vmem:[%s1310_s10 + $0x460] sm:$0xff] }
  0x47   : > { %v1183_v41 = vpack.c.bf16 %v421_v37, %v419_v36  ;;  %v437_v48 = vld [vmem:[%s1608_s1 + $0x70] sm:$0xff] }
  0x49   : > { %1160 = vmatpush1.bf16.msra.mxu0 %v1159_v43  ;;  %1092 = vmatpush1.bf16.msra.mxu1 %v1091_v46  ;;  %v439_v43 = vld [vmem:[%s1608_s1 + $0x80] sm:$0xff]  ;;  %v438_v46 = vld [vmem:[%s1608_s1 + $0x78] sm:$0xff] }
  0x4a   : > { %1162 = vmatprep.subr.bf16.mxu0 %v1161_v47  ;;  %1094 = vmatprep.subr.bf16.mxu1 %v1093_v49  ;;  %v432_v47 = vld [vmem:[%s1608_s1 + $0x48] sm:$0xff]  ;;  %v442_v49 = vld [vmem:[%s1608_s1 + $0x98] sm:$0xff] }
  0x4d   : > { %1164 = vmatpush1.bf16.msra.mxu0 %v1163_v55  ;;  %1096 = vmatpush1.bf16.msra.mxu1 %v1095_v58 }
  0x4e   : > { %1166 = vmatprep.subr.bf16.mxu0 %v1165_v59  ;;  %1098 = vmatprep.subr.bf16.mxu1 %v1097_v61 }
  0x51   : > { %1168 = vmatpush1.bf16.msra.mxu0 %v1167_v3  ;;  %1100 = vmatpush1.bf16.msra.mxu1 %v1099_v4 }
  0x52   : > { %1170 = vmatprep.subr.bf16.mxu0 %v1169_v5  ;;  %1102 = vmatprep.subr.bf16.mxu1 %v1101_v9 }
  0x54   : > { %634 = vmatmul.mubr.f32.vlgmr.msra.gmra.mrb[0].mxu0 %v425_v13 }
  0x55   : > { %1172 = vmatpush1.bf16.msra.mxu0 %v1171_v14  ;;  %639 = vmatprep.mubr.f32.mxu0 %v431_v15 }
  0x56   : > { %1174 = vmatprep.subr.bf16.mxu0 %v1173_v16  ;;  %1104 = vmatpush1.bf16.msra.mxu1 %v1103_v19 }
  0x58   : > { %640 = vmatmul.mubr.f32.gmra.mrb[2].mxu0 %v430_v22 }
  0x59   : > { %1176 = vmatpush1.bf16.msra.mxu0 %v1175_v23  ;;  %645 = vmatprep.mubr.f32.mxu0 %v436_v24 }
  0x5a   : > { %1178 = vmatprep.subr.bf16.mxu0 %v1177_v25  ;;  %545 = vmatmul.mubr.f32.vlgmr.msra.gmra.mrb[0].mxu1 %v423_v28 }
  0x5b   : > { %550 = vmatprep.mubr.f32.mxu1 %v429_v31 }
  0x5c   : > { %646 = vmatmul.mubr.f32.gmra.mrb[4].mxu0 %v435_v32 }
  0x5d   : > { %1180 = vmatpush1.bf16.msra.mxu0 %v1179_v33  ;;  %651 = vmatprep.mubr.f32.mxu0 %v441_v34 }
  0x5e   : > { %1182 = vmatprep.subr.bf16.mxu0 %v1181_v35  ;;  %551 = vmatmul.mubr.f32.gmra.mrb[2].mxu1 %v428_v38 }
  0x5f   : > { %556 = vmatprep.mubr.f32.mxu1 %v434_v39 }
  0x60   : > { %652 = vmatmul.mubr.f32.gmra.mrb[6].mxu0 %v440_v40 }
  0x61   : > { %1184 = vmatpush1.bf16.msra.mxu0 %v1183_v41  ;;  %722 = vmatprep.mubr.f32.mxu0 %v1248_v44 }
  0x62   : > { %557 = vmatmul.mubr.f32.gmra.mrb[4].mxu1 %v433_v42 }
  0x63   : > { %562 = vmatprep.mubr.f32.mxu1 %v439_v43 }
  0x64   : > { %1033 = vmatmul.mubr.msk.f32.vlgmr.msra.gmra.mrb[0].mxu0 %vm467_vm0, %v427_v45  ;;  %v814_v45 = vld [vmem:[%s1610_s3] sm:$0xff] }
  0x65   : > { %728 = vmatprep.mubr.f32.mxu0 %v1248_v44 }
  0x66   : > { %563 = vmatmul.mubr.f32.gmra.mrb[6].mxu1 %v438_v46  ;;  %v847_v46 = vld [vmem:[%s1611_s4 + $0x8] sm:$0xff] }
  0x67   : > { %961 = vmatprep.mubr.f32.mxu1 %v1248_v44 }
  0x68   : > { %1034 = vmatmul.mubr.msk.f32.gmra.mrb[2].mxu0 %vm467_vm0, %v432_v47  ;;  %v846_v47 = vld [vmem:[%s1611_s4] sm:$0xff] }
  0x69   : > { %734 = vmatprep.mubr.f32.mxu0 %v1248_v44 }
  0x6c   : > { %1035 = vmatmul.mubr.msk.f32.gmra.mrb[4].mxu0 %vm467_vm0, %v437_v48  ;;  %v817_v48 = vld [vmem:[%s1610_s3 + $0x18] sm:$0xff] }
  0x6d   : > { %740 = vmatprep.mubr.f32.mxu0 %v1248_v44  ;;  %v815_v44 = vld [vmem:[%s1610_s3 + $0x8] sm:$0xff] }
  0x70   : > { %1036 = vmatmul.mubr.msk.f32.gmra.mrb[6].mxu0 %vm467_vm0, %v442_v49  ;;  %v816_v49 = vld [vmem:[%s1610_s3 + $0x10] sm:$0xff] }
  0x87   : > { %v450_v52 = vpop.permute.xlu0 %449 }
  0xb6   : > { %v455_v59 = vpop.permute.xlu0 %454  ;;  %v460_v0 = vpop.permute.xlu1 %459 }
  0xba   : > { %v465_v18 = vpop.permute.xlu1 %464 }
 0x12d   : > { %v546_v50 = vpop.f32.mrb[0].mxu1 }
 0x12e   : > { %v548_v51 = vpop.f32.mrb[1].mxu1  ;;  %v547_v55 = vadd.f32 %v546_v50, %v450_v52  ;;  %v849_v50 = vld [vmem:[%s1611_s4 + $0x18] sm:$0xff] }
 0x12f   : > { %v549_v56 = vadd.f32 %v548_v51, %v450_v52  ;;  %v848_v51 = vld [vmem:[%s1611_s4 + $0x10] sm:$0xff]  ;;  %v887_v52 = vld [vmem:[%s1613_s6] sm:$0xff] }
 0x131   : > { %v552_v53 = vpop.f32.mrb[2].mxu1 }
 0x132   : > { %v554_v54 = vpop.f32.mrb[3].mxu1  ;;  %v553_v2 = vadd.f32 %v552_v53, %v455_v59 }
 0x133   : > { %v555_v5 = vadd.f32 %v554_v54, %v455_v59 }
 0x135   : > { %v558_v57 = vpop.f32.mrb[4].mxu1 }
 0x136   : > { %v560_v58 = vpop.f32.mrb[5].mxu1  ;;  %v559_v9 = vadd.f32 %v558_v57, %v460_v0 }
 0x137   : > { %v724_v60 = vpop.f32.mrb[0].mxu0  ;;  %v561_v13 = vadd.f32 %v560_v58, %v460_v0 }
 0x138   : > { %v1522_v61 = vadd.f32 %v724_v60, %v547_v55  ;;  %v726_v62 = vpop.f32.mrb[1].mxu0 }
 0x139   : > { %v1524_v63 = vadd.f32 %v726_v62, %v549_v56  ;;  %v564_v1 = vpop.f32.mrb[6].mxu1 }
 0x13a   : > { %v763_v3 = vmul.f32 %v1522_v61, %v1522_v61  ;;  %v566_v4 = vpop.f32.mrb[7].mxu1  ;;  %v565_v26 = vadd.f32 %v564_v1, %v465_v18 }
 0x13b   : > { %v747_v6 = vadd.f32 %v1524_v63, %v1522_v61  ;;  %v764_v7 = vmul.f32 %v1524_v63, %v1524_v63  ;;  %v730_v8 = vpop.f32.mrb[2].mxu0  ;;  %v567_v29 = vadd.f32 %v566_v4, %v465_v18 }
 0x13c   : > { %v1532_v10 = vadd.f32 %v730_v8, %v553_v2  ;;  %v732_v11 = vpop.f32.mrb[3].mxu0 }
 0x13d   : > { %v771_v12 = vadd.f32 %v764_v7, %v763_v3  ;;  %v1534_v14 = vadd.f32 %v732_v11, %v555_v5 }
 0x13e   : > { %v748_v15 = vadd.f32 %v1532_v10, %v747_v6  ;;  %v765_v16 = vmul.f32 %v1532_v10, %v1532_v10 }
 0x13f   : > { %v766_v17 = vmul.f32 %v1534_v14, %v1534_v14  ;;  %v736_v19 = vpop.f32.mrb[4].mxu0 }
 0x140   : > { %v772_v20 = vadd.f32 %v771_v12, %v765_v16  ;;  %v749_v21 = vadd.f32 %v1534_v14, %v748_v15  ;;  %v1542_v22 = vadd.f32 %v736_v19, %v559_v9  ;;  %v738_v23 = vpop.f32.mrb[5].mxu0 }
 0x141   : > { %v1544_v24 = vadd.f32 %v738_v23, %v561_v13 }
 0x142   : > { %v773_v25 = vadd.f32 %v772_v20, %v766_v17  ;;  %v750_v27 = vadd.f32 %v1542_v22, %v749_v21  ;;  %v767_v28 = vmul.f32 %v1542_v22, %v1542_v22 }
 0x143   : > { %v768_v30 = vmul.f32 %v1544_v24, %v1544_v24  ;;  %v742_v31 = vpop.f32.mrb[6].mxu0 }
 0x144   : > { %v774_v32 = vadd.f32 %v773_v25, %v767_v28  ;;  %v751_v33 = vadd.f32 %v1544_v24, %v750_v27  ;;  %v1552_v34 = vadd.f32 %v742_v31, %v565_v26  ;;  %v744_v35 = vpop.f32.mrb[7].mxu0 }
 0x145   : > { %v1554_v36 = vadd.f32 %v744_v35, %v567_v29 }
 0x146   : > { %v769_v37 = vmul.f32 %v1552_v34, %v1552_v34  ;;  %v752_v38 = vadd.f32 %v1552_v34, %v751_v33  ;;  %v775_v39 = vadd.f32 %v774_v32, %v768_v30 }
 0x147   : > { %v770_v40 = vmul.f32 %v1554_v36, %v1554_v36 }
 0x148   : > { %v753_v41 = vadd.f32 %v1554_v36, %v752_v38  ;;  %v776_v42 = vadd.f32 %v775_v39, %v769_v37 }
 0x14a   : > { %754 = vadd.xlane.f32.xlu0 %v753_v41  ;;  %v777_v43 = vadd.f32 %v776_v42, %v770_v40 }
 0x14c   : > { %778 = vadd.xlane.f32.xlu1 %v777_v43 }
 0x15d   : > { %825 = vperm.xlu1 %1236, %v815_v44  }
 0x160   : > { %820 = vperm.xlu0 %1235, %v814_v45  }
 0x161   : > { %857 = vperm.xlu1 %1236, %v847_v46  }
 0x164   : > { %852 = vperm.xlu0 %1235, %v846_v47  }
 0x165   : > { %835 = vperm.xlu1 %1236, %v817_v48  }
 0x168   : > { %830 = vperm.xlu0 %1235, %v816_v49  }
 0x169   : > { %867 = vperm.xlu1 %1236, %v849_v50  }
 0x16c   : > { %862 = vperm.xlu0 %1235, %v848_v51  }
 0x170   : > { %890 = vperm.xlu0 %1235, %v887_v52  }
 0x1d7   : > { %v755_v53 = vpop.xlane.xlu0 %754 }
 0x1d8   : > { %v756_v54 = vrot.slane %v755_v53, 4 }
 0x1d9   : > { %v779_v55 = vpop.xlane.xlu1 %778 }
 0x1da   : > { %v757_v56 = vadd.f32 %v756_v54, %v755_v53  ;;  %v780_v57 = vrot.slane %v779_v55, 4 }
 0x1dc   : > { %v758_v58 = vrot.slane %v757_v56, 2  ;;  %v781_v59 = vadd.f32 %v780_v57, %v779_v55 }
 0x1dd   : > { %v826_v7 = vpop.permute.xlu1 %825 }
 0x1de   : > { %v782_v60 = vrot.slane %v781_v59, 2  ;;  %v759_v62 = vadd.f32 %v758_v58, %v757_v56 }
 0x1df   : > { %v821_v8 = vpop.permute.xlu0 %820 }
 0x1e0   : > { %v760_v0 = vrot.slane %v759_v62, 1  ;;  %v783_v1 = vadd.f32 %v782_v60, %v781_v59  ;;  %v886_v59 = vld [vmem:[%s1612_s5] sm:$0xff] }
 0x1e1   : > { %v858_v9 = vpop.permute.xlu1 %857 }
 0x1e2   : > { %v761_v2 = vadd.f32 %v760_v0, %v759_v62  ;;  %v784_v3 = vrot.slane %v783_v1, 1 }
 0x1e3   : > { %v853_v11 = vpop.permute.xlu0 %852 }
 0x1e4   : > { %1218 = vpush %v761_v2  ;;  %v785_v4 = vadd.f32 %v784_v3, %v783_v1 }
 0x1e5   : > { %v836_v15 = vpop.permute.xlu1 %835 }
 0x1e6   : > { %1220 = vpush %v785_v4 }
 0x1e7   : > { %v831_v16 = vpop.permute.xlu0 %830 }
 0x1e9   : > { %v868_v39 = vpop.permute.xlu1 %867 }
 0x215   : > { %s1219_s11 = spop %1218 }
 0x216   : > { %s787_s12 = smul.f32 0.00012207031, %s1219_s11 }
 0x217   : > { %s1221_s13 = spop %1220 }
 0x218   : > { %s789_s14 = smul.f32 %s787_s12, %s787_s12  ;;  %v792_v12 = vstv %s787_s12 }
 0x219   : > { %s788_s15 = smul.f32 0.00012207031, %s1221_s13  ;;  %v794_v13 = vsub.f32 %v1524_v63, %v792_v12  ;;  %v796_v17 = vsub.f32 %v1534_v14, %v792_v12  ;;  %v793_v18 = vsub.f32 %v1522_v61, %v792_v12  ;;  %v795_v19 = vsub.f32 %v1532_v10, %v792_v12 }
 0x21a   : > { %v798_v20 = vsub.f32 %v1544_v24, %v792_v12  ;;  %v800_v23 = vsub.f32 %v1554_v36, %v792_v12  ;;  %v797_v25 = vsub.f32 %v1542_v22, %v792_v12  ;;  %v799_v26 = vsub.f32 %v1552_v34, %v792_v12  ;;  %v863_v22 = vpop.permute.xlu0 %862 }
 0x21b   : > { %s790_s16 = ssub.f32 %s788_s15, %s789_s14 }
 0x21d   : > { %s791_s18 = smax.f32 %s1249_s17, %s790_s16 }
 0x21e   : > { %s801_s19 = sadd.f32 1e-05, %s791_s18  ;;  %v891_v60 = vpop.permute.xlu0 %890 }
 0x220   : > { %v802_v5 = vstv %s801_s19 }
 0x221   : > { %1237 = vrsqrt.f32 %v802_v5 }
 0x22b   : > { %v1238_v6 = vpop.eup %1237 }
 0x22c   : > { %1222 = vpush %v1238_v6 }
 0x25d   : > { %s1223_s20 = spop %1222 }
 0x25e   : > { %v805_v21 = vstv %s1223_s20 }
 0x25f   : > { %v807_v27 = vmul.f32 %v805_v21, %v794_v13  ;;  %v809_v63 = vmul.f32 %v805_v21, %v796_v17  ;;  %v806_v28 = vmul.f32 %v805_v21, %v793_v18  ;;  %v808_v29 = vmul.f32 %v805_v21, %v795_v19 }
 0x260   : > { %v811_v30 = vmul.f32 %v805_v21, %v798_v20  ;;  %v813_v31 = vmul.f32 %v805_v21, %v800_v23  ;;  %v810_v14 = vmul.f32 %v805_v21, %v797_v25  ;;  %v812_v32 = vmul.f32 %v805_v21, %v799_v26 }
 0x261   : > { %v839_v61 = vmul.f32 %v821_v8, %v807_v27  ;;  %v841_v33 = vmul.f32 %v826_v7, %v809_v63  ;;  %v838_v10 = vmul.f32 %v821_v8, %v806_v28  ;;  %v840_v35 = vmul.f32 %v826_v7, %v808_v29 }
 0x262   : > { %v843_v24 = vmul.f32 %v831_v16, %v811_v30  ;;  %v845_v37 = vmul.f32 %v836_v15, %v813_v31  ;;  %v842_v38 = vmul.f32 %v831_v16, %v810_v14  ;;  %v844_v36 = vmul.f32 %v836_v15, %v812_v32 }
 0x263   : > { %v871_v40 = vadd.f32 %v853_v11, %v839_v61  ;;  %v873_v34 = vadd.f32 %v858_v9, %v841_v33  ;;  %v870_v41 = vadd.f32 %v853_v11, %v838_v10  ;;  %v872_v42 = vadd.f32 %v858_v9, %v840_v35 }
 0x264   : > { %v875_v43 = vadd.f32 %v863_v22, %v843_v24  ;;  %v877_v44 = vadd.f32 %v868_v39, %v845_v37  ;;  %v874_v45 = vadd.f32 %v863_v22, %v842_v38  ;;  %v876_v46 = vadd.f32 %v868_v39, %v844_v36 }
 0x265   : > { %v879_v47 = vmax.f32 %v871_v40, 0.0  ;;  %v881_v48 = vmax.f32 %v873_v34, 0.0  ;;  %v878_v49 = vmax.f32 %v870_v41, 0.0  ;;  %v880_v50 = vmax.f32 %v872_v42, 0.0 }
 0x266   : > { %v883_v51 = vmax.f32 %v875_v43, 0.0  ;;  %v885_v52 = vmax.f32 %v877_v44, 0.0  ;;  %v882_v55 = vmax.f32 %v874_v45, 0.0  ;;  %v884_v56 = vmax.f32 %v876_v46, 0.0 }
 0x267   : > { %v1185_v53 = vpack.c.bf16 %v881_v48, %v879_v47  ;;  %v1187_v54 = vpack.c.bf16 %v880_v50, %v878_v49 }
 0x268   : > { %v1189_v57 = vpack.c.bf16 %v885_v52, %v883_v51  ;;  %v1191_v58 = vpack.c.bf16 %v884_v56, %v882_v55 }
 0x269   : > { %1186 = vmatprep.subr.bf16.mxu1 %v1185_v53 }
 0x26a   : > { %1188 = vmatpush1.bf16.msra.mxu1 %v1187_v54 }
 0x26b   : > { %1190 = vmatprep.subr.bf16.mxu1 %v1189_v57 }
 0x26e   : > { %1192 = vmatpush1.bf16.msra.mxu1 %v1191_v58 }
 0x271   : > { %1037 = vmatmul.mubr.msk.f32.vlgmr.msra.gmra.mrb[8].mxu1 %vm893_vm1, %v886_v59 }
 0x344   : > { %v963_v62 = vpop.f32.mrb[8].mxu1 }
 0x345   : > { %v964_v0 = vadd.f32 %v963_v62, %v891_v60  ;;  %v965_v1 = vpop.f32.mrb[9].mxu1 }
 0x346   : > { %v966_v2 = vadd.f32 %v965_v1, %v891_v60 }
 0x347   : > { %968 = vst [vmem:[%s278_s27] sm:$0xff] %v964_v0 }
 0x348   : > { %969 = vst [vmem:[%s278_s27 + $0x8] sm:$0xff] %v966_v2 }
 0x349 PF: > { %s17_s24 = sadd.s32 1, %s1245_s24  }
 0x34a   : > { %p14_p4 = scmp.ge.s32.totalorder %s17_s24, 4  }
 0x34c   :  { %16 = sbr.rel (!%p14_p4) target bundleno = 1 (0x1), region = 78 }

</bundles_post_ra>
